<compile_context>
chip_gen: v6e
topology: v6e:2x2x1
jax: 0.10.0
libtpu: 0.0.40
codegen_flags: <defaults>
</compile_context>

<pallas_src>
import functools

import jax
import jax.numpy as jnp
from jax.experimental import pallas as pl
from jax.experimental.pallas import tpu as pltpu

NEG_SLOPE = 0.2      # LeakyReLU(0.2)
BN_EPS = 1e-5        # nn.BatchNorm2d default eps
BN_GAIN = 0.02       # init_weights: BN weight ~ N(1.0, 0.02)

_KSIZE, _PAD = 4, 1
_TM_MAX = 256
_VMEM_LIMIT = 32 * 1024 * 1024   # v7x-safe scoped-VMEM budget


def _round_up(x, m):
    return ((x + m - 1) // m) * m


def _tiles_m(m):
    """Pad M for bf16 sublane packing; prefer >=2 M tiles (v7x megacore)."""
    m_pad = _round_up(m, 16)
    if m_pad > _TM_MAX:
        return _round_up(m, _TM_MAX), _TM_MAX
    if m_pad >= 32 and m_pad % 32 == 0:
        return m_pad, m_pad // 2          # two tiles -> both v7x TCs get work
    return m_pad, m_pad


# ---------------------------------------------------------------------------
# Pallas kernels (all single-K-step: full K_pad and N_pad per grid step)
# ---------------------------------------------------------------------------
def _conv_bias_act_kernel(a_ref, b_ref, bias_ref, o_ref, *, act):
    """o = [leaky_relu](a @ b + bias); fp32 math, cast at store."""
    y = jnp.dot(a_ref[...], b_ref[...], preferred_element_type=jnp.float32)
    y = y + bias_ref[...]
    if act:
        y = jnp.where(y >= 0.0, y, NEG_SLOPE * y)
    o_ref[...] = y.astype(o_ref.dtype)


def _conv_stats_kernel(a_ref, b_ref, o_ref, sum_ref, ssq_ref):
    """Conv (no bias, precedes BN): bf16 output + fp32 per-channel partial
    sum / sum-of-squares taken from the fp32 accumulator (exact BN stats)."""
    y = jnp.dot(a_ref[...], b_ref[...], preferred_element_type=jnp.float32)
    o_ref[...] = y.astype(o_ref.dtype)
    sum_ref[...] = jnp.sum(y, axis=0).reshape(sum_ref.shape)
    ssq_ref[...] = jnp.sum(y * y, axis=0).reshape(ssq_ref.shape)


def _affine_leaky_kernel(x_ref, scale_ref, shift_ref, o_ref):
    """BatchNorm folded into (scale, shift) + LeakyReLU(0.2); fp32 math."""
    y = x_ref[...].astype(jnp.float32) * scale_ref[...] + shift_ref[...]
    y = jnp.where(y >= 0.0, y, NEG_SLOPE * y)
    o_ref[...] = y.astype(o_ref.dtype)


def _head_conv_bce_kernel(a_ref, b_ref, bias_ref, o_ref, part_ref, *,
                          tm, n_valid, target):
    """Head conv (bias, no norm/act) with the BCEWithLogits reduction fused:
    emits fp32 logits plus a masked per-tile partial loss sum."""
    y = jnp.dot(a_ref[...], b_ref[...], preferred_element_type=jnp.float32)
    y = y + bias_ref[...]
    o_ref[...] = y
    rows = jax.lax.broadcasted_iota(jnp.int32, y.shape, 0) + pl.program_id(0) * tm
    cols = jax.lax.broadcasted_iota(jnp.int32, y.shape, 1)
    mask = (rows < n_valid) & (cols < 1)
    loss = jnp.maximum(y, 0.0) - y * target + jnp.log1p(jnp.exp(-jnp.abs(y)))
    loss = jnp.where(mask, loss, 0.0)
    part_ref[...] = jnp.broadcast_to(jnp.sum(loss).reshape(1, 1, 1),
                                     part_ref.shape)


# ---------------------------------------------------------------------------
# pallas_call wrappers
# ---------------------------------------------------------------------------
def _common_params():
    return pltpu.CompilerParams(dimension_semantics=("parallel",),
                                vmem_limit_bytes=_VMEM_LIMIT)


def _conv_matmul(patches, w_mat, bias_row, *, tm, act, out_dtype):
    m_pad, k_pad = patches.shape
    _, n_pad = w_mat.shape
    flops = 2 * m_pad * k_pad * n_pad
    bytes_acc = (patches.size * 2 + w_mat.size * 2
                 + m_pad * n_pad * jnp.dtype(out_dtype).itemsize)
    return pl.pallas_call(
        functools.partial(_conv_bias_act_kernel, act=act),
        out_shape=jax.ShapeDtypeStruct((m_pad, n_pad), out_dtype),
        grid=(m_pad // tm,),
        in_specs=[
            pl.BlockSpec((tm, k_pad), lambda i: (i, 0)),
            pl.BlockSpec((k_pad, n_pad), lambda i: (0, 0)),   # VMEM-resident W
            pl.BlockSpec((1, n_pad), lambda i: (0, 0)),
        ],
        out_specs=pl.BlockSpec((tm, n_pad), lambda i: (i, 0)),
        compiler_params=_common_params(),
        cost_estimate=pl.CostEstimate(flops=flops, transcendentals=0,
                                      bytes_accessed=bytes_acc),
    )(patches, w_mat, bias_row)


def _conv_matmul_stats(patches, w_mat, *, tm):
    m_pad, k_pad = patches.shape
    _, n_pad = w_mat.shape
    n_m = m_pad // tm
    flops = 2 * m_pad * k_pad * n_pad
    bytes_acc = patches.size * 2 + w_mat.size * 2 + m_pad * n_pad * 2
    return pl.pallas_call(
        _conv_stats_kernel,
        out_shape=(
            jax.ShapeDtypeStruct((m_pad, n_pad), jnp.bfloat16),
            jax.ShapeDtypeStruct((n_m, 1, n_pad), jnp.float32),
            jax.ShapeDtypeStruct((n_m, 1, n_pad), jnp.float32),
        ),
        grid=(n_m,),
        in_specs=[
            pl.BlockSpec((tm, k_pad), lambda i: (i, 0)),
            pl.BlockSpec((k_pad, n_pad), lambda i: (0, 0)),   # VMEM-resident W
        ],
        out_specs=(
            pl.BlockSpec((tm, n_pad), lambda i: (i, 0)),
            pl.BlockSpec((1, 1, n_pad), lambda i: (i, 0, 0)),
            pl.BlockSpec((1, 1, n_pad), lambda i: (i, 0, 0)),
        ),
        compiler_params=_common_params(),
        cost_estimate=pl.CostEstimate(flops=flops, transcendentals=0,
                                      bytes_accessed=bytes_acc),
    )(patches, w_mat)


def _affine_leaky(x2d, scale_row, shift_row, *, tm):
    m_pad, n_pad = x2d.shape
    return pl.pallas_call(
        _affine_leaky_kernel,
        out_shape=jax.ShapeDtypeStruct((m_pad, n_pad), jnp.bfloat16),
        grid=(m_pad // tm,),
        in_specs=[
            pl.BlockSpec((tm, n_pad), lambda i: (i, 0)),
            pl.BlockSpec((1, n_pad), lambda i: (0, 0)),
            pl.BlockSpec((1, n_pad), lambda i: (0, 0)),
        ],
        out_specs=pl.BlockSpec((tm, n_pad), lambda i: (i, 0)),
        compiler_params=_common_params(),
    )(x2d, scale_row, shift_row)


def _head_conv_bce(patches, w_mat, bias_row, *, tm, n_valid, target):
    m_pad, k_pad = patches.shape
    _, n_pad = w_mat.shape
    n_m = m_pad // tm
    kern = functools.partial(_head_conv_bce_kernel, tm=tm, n_valid=n_valid,
                             target=target)
    return pl.pallas_call(
        kern,
        out_shape=(
            jax.ShapeDtypeStruct((m_pad, n_pad), jnp.float32),
            jax.ShapeDtypeStruct((n_m, 1, n_pad), jnp.float32),
        ),
        grid=(n_m,),
        in_specs=[
            pl.BlockSpec((tm, k_pad), lambda i: (i, 0)),
            pl.BlockSpec((k_pad, n_pad), lambda i: (0, 0)),   # VMEM-resident W
            pl.BlockSpec((1, n_pad), lambda i: (0, 0)),
        ],
        out_specs=(
            pl.BlockSpec((tm, n_pad), lambda i: (i, 0)),
            pl.BlockSpec((1, 1, n_pad), lambda i: (i, 0, 0)),
        ),
        compiler_params=_common_params(),
    )(patches, w_mat, bias_row)


# ---------------------------------------------------------------------------
# PatchDiscriminator(input_c=3, num_filters=64, n_down=3)
# layer spec: (c_in, c_out, stride, has_norm, has_act, has_bias)
# ---------------------------------------------------------------------------
_LAYERS = [
    (3,   64,  2, False, True,  True),   # get_layers(3, 64, norm=False)
    (64,  128, 2, True,  True,  False),  # i=0
    (128, 256, 2, True,  True,  False),  # i=1
    (256, 512, 1, True,  True,  False),  # i=2  (s=1 on last down block)
    (512, 1,   1, False, False, True),   # head: norm=False, act=False
]


def _conv_plan(c_in, c_out):
    k_real = _KSIZE * _KSIZE * c_in
    k_pad = _round_up(k_real, 128)       # 128 alignment is sufficient (review)
    n_pad = _round_up(c_out, 128)
    return k_real, k_pad, n_pad


def init_discriminator_params(key):
    """Matches init_weights(net, 'kaiming'): conv W ~ kaiming_normal(fan_in)
    (std = sqrt(2 / (Cin*k*k))), conv b = 0, BN gamma ~ N(1, 0.02), beta = 0.
    Weights are pre-padded/reshaped once (K_pad x N_pad, bf16)."""
    params = []
    for (c_in, c_out, stride, norm, act, has_bias) in _LAYERS:
        key, kw, kg = jax.random.split(key, 3)
        k_real, k_pad, n_pad = _conv_plan(c_in, c_out)
        fan_in = c_in * _KSIZE * _KSIZE
        std = jnp.sqrt(2.0 / fan_in)
        w = std * jax.random.normal(kw, (_KSIZE, _KSIZE, c_in, c_out),
                                    jnp.float32)
        w_mat = jnp.zeros((k_pad, n_pad), jnp.float32)
        w_mat = w_mat.at[:k_real, :c_out].set(w.reshape(k_real, c_out))
        w_mat = w_mat.astype(jnp.bfloat16)
        b_row = jnp.zeros((1, n_pad), jnp.float32)      # conv bias init = 0
        gamma_row = beta_row = None
        if norm:
            gamma = 1.0 + BN_GAIN * jax.random.normal(kg, (c_out,), jnp.float32)
            gamma_row = jnp.zeros((1, n_pad), jnp.float32).at[0, :c_out].set(gamma)
            beta_row = jnp.zeros((1, n_pad), jnp.float32)
        params.append(dict(w_mat=w_mat, b_row=b_row,
                           gamma_row=gamma_row, beta_row=beta_row))
    return params


def _im2col(x, k, s, p):
    """x: (B, H, W, C) NHWC -> (B*Ho*Wo, k*k*C) patch matrix (fused under jit)."""
    x = jnp.pad(x, ((0, 0), (p, p), (p, p), (0, 0)))
    B, Hp, Wp, C = x.shape
    Ho = (Hp - k) // s + 1
    Wo = (Wp - k) // s + 1
    cols = []
    for i in range(k):
        for j in range(k):
            cols.append(x[:, i:i + s * Ho:s, j:j + s * Wo:s, :])  # (B,Ho,Wo,C)
    pt = jnp.stack(cols, axis=3)                                  # (B,Ho,Wo,kk,C)
    return pt.reshape(B * Ho * Wo, k * k * C), B, Ho, Wo


def patch_discriminator(params, x_nhwc, *, target_is_real=True):
    """Runs net_D on x and fuses GANLoss('vanilla') into the head conv.
    Returns (preds (B,Ho,Wo,1) fp32, scalar BCE loss)."""
    x = x_nhwc
    loss = None
    n_layers = len(_LAYERS)
    for idx, (p, spec) in enumerate(zip(params, _LAYERS)):
        c_in, c_out, stride, norm, act, has_bias = spec
        k_real, k_pad, n_pad = _conv_plan(c_in, c_out)

        pm, B, Ho, Wo = _im2col(x, _KSIZE, stride, _PAD)
        M = pm.shape[0]
        m_pad, tm = _tiles_m(M)
        patches = jnp.pad(pm, ((0, m_pad - M), (0, k_pad - k_real)))
        patches = patches.astype(jnp.bfloat16)          # bf16 MXU inputs

        is_head = (idx == n_layers - 1)
        if norm:
            # Conv (no bias) with fused per-channel stats, then BN + LeakyReLU.
            y2d, sums, ssqs = _conv_matmul_stats(patches, p["w_mat"], tm=tm)
            total = jnp.sum(sums, axis=(0, 1))            # (n_pad,)
            totsq = jnp.sum(ssqs, axis=(0, 1))
            mean = total / M                  # padded rows contribute exact 0
            var = jnp.maximum(totsq / M - mean * mean, 0.0)   # biased (train)
            inv_std = jax.lax.rsqrt(var + BN_EPS)
            scale = p["gamma_row"] * inv_std                  # (1, n_pad)
            shift = p["beta_row"] - p["gamma_row"] * mean * inv_std
            y2d = _affine_leaky(y2d, scale, shift, tm=tm)
        elif is_head:
            # Head conv (+bias) with the BCEWithLogits reduction fused in.
            y2d, parts = _head_conv_bce(
                patches, p["w_mat"], p["b_row"], tm=tm, n_valid=M,
                target=1.0 if target_is_real else 0.0)
            loss = jnp.sum(parts[:, 0, 0]) / M
        else:
            # Conv (+bias) with fused LeakyReLU; bf16 intermediate at HBM.
            y2d = _conv_matmul(patches, p["w_mat"], p["b_row"], tm=tm, act=act,
                               out_dtype=jnp.bfloat16)

        # Lazy slice of padded rows/channels (fused by XLA into the next
        # layer's im2col) instead of a separate padded-lane copy.
        x = y2d[:M, :c_out].reshape(B, Ho, Wo, c_out)

    return x.astype(jnp.float32), loss


@jax.jit
def forward_real(params, x_nhwc):
    """backward_D real branch: preds = net_D(real_image); GANcriterion(preds, True)."""
    preds, loss_real = patch_discriminator(params, x_nhwc, target_is_real=True)
    return preds, loss_real


# ---------------------------------------------------------------------------
# Main
# ---------------------------------------------------------------------------
if __name__ == "__main__":
    key = jax.random.PRNGKey(0)
    kL, kab, kp = jax.random.split(key, 3)

    B, H, W = 2, 32, 32                       # small shapes; 5 convs need H >= 32
    L = jax.random.normal(kL, (B, 1, H, W), jnp.float32)    # NCHW, like data['L']
    ab = jax.random.normal(kab, (B, 2, H, W), jnp.float32)  # NCHW, like data['ab']

    params = init_discriminator_params(kp)

    # real_image = cat([L, ab], dim=1); preds = net_D(real_image)
    real_image = jnp.concatenate([L, ab], axis=1)            # (B, 3, H, W) NCHW
    x_nhwc = jnp.transpose(real_image, (0, 2, 3, 1))         # NHWC for kernels

    preds, loss_D_real = forward_real(params, x_nhwc)        # (B,2,2,1), scalar

    jax.block_until_ready(preds)
    jax.block_until_ready(loss_D_real)
    print("KERNEL_OK")
</pallas_src>

<mosaic_0001>
module attributes {stable_mosaic.version = 11 : i64} {
  func.func @_conv_bias_act_kernel(%arg0: i32, %arg1: memref<256x128xbf16, #tpu.memory_space<vmem>>, %arg2: memref<128x128xbf16, #tpu.memory_space<vmem>>, %arg3: memref<1x128xf32, #tpu.memory_space<vmem>>, %arg4: memref<256x128xbf16, #tpu.memory_space<vmem>>) attributes {dimension_semantics = [#tpu.dimension_semantics<parallel>], iteration_bounds = array<i64: 2>, scalar_prefetch = 0 : i64, scratch_operands = 0 : i64, tpu.core_type = #tpu.core_type<tc>, window_params = [{transform_indices = @transform_0, window_bounds = array<i64: 256, 128>}, {pipeline_mode = #tpu.pipeline_mode<synchronous>, transform_indices = @transform_1, window_bounds = array<i64: 128, 128>}, {pipeline_mode = #tpu.pipeline_mode<synchronous>, transform_indices = @transform_2, window_bounds = array<i64: 1, 128>}, {transform_indices = @transform_3, window_bounds = array<i64: 256, 128>}]} {
    %c0 = arith.constant 0 : index
    %c0_0 = arith.constant 0 : index
    %0 = vector.load %arg1[%c0, %c0_0] : memref<256x128xbf16, #tpu.memory_space<vmem>>, vector<256x128xbf16>
    %c0_1 = arith.constant 0 : index
    %c0_2 = arith.constant 0 : index
    %1 = vector.load %arg2[%c0_1, %c0_2] : memref<128x128xbf16, #tpu.memory_space<vmem>>, vector<128x128xbf16>
    %cst = arith.constant dense<0.000000e+00> : vector<256x128xf32>
    %2 = tpu.matmul %0, %1, %cst {dimension_numbers = #tpu.dot_dimension_numbers<[1], [0], [0], [1], [0, 0, 1, 1], [], []>} : vector<256x128xbf16>, vector<128x128xbf16>, vector<256x128xf32> -> vector<256x128xf32>
    %c0_3 = arith.constant 0 : index
    %c0_4 = arith.constant 0 : index
    %3 = vector.load %arg3[%c0_3, %c0_4] : memref<1x128xf32, #tpu.memory_space<vmem>>, vector<1x128xf32>
    %4 = vector.broadcast %3 : vector<1x128xf32> to vector<256x128xf32>
    %5 = arith.addf %2, %4 : vector<256x128xf32>
    %cst_5 = arith.constant 0.000000e+00 : f32
    %6 = vector.broadcast %cst_5 : f32 to vector<256x128xf32>
    %7 = arith.cmpf oge, %5, %6 : vector<256x128xf32>
    %cst_6 = arith.constant 2.000000e-01 : f32
    %8 = vector.broadcast %cst_6 : f32 to vector<256x128xf32>
    %9 = arith.mulf %8, %5 : vector<256x128xf32>
    %10 = arith.select %7, %5, %9 : vector<256x128xi1>, vector<256x128xf32>
    %11 = arith.truncf %10 : vector<256x128xf32> to vector<256x128xbf16>
    %c0_7 = arith.constant 0 : index
    %c0_8 = arith.constant 0 : index
    %12 = vector.load %arg4[%c0_7, %c0_8] : memref<256x128xbf16, #tpu.memory_space<vmem>>, vector<256x128xbf16>
    tpu.vector_store %arg4[%c0_7, %c0_8], %11 {strides = array<i32>} : memref<256x128xbf16, #tpu.memory_space<vmem>>, vector<256x128xbf16>,
    return
  }
  func.func @transform_0(%arg0: i32) -> (i32, i32) {
    %c0_i32 = arith.constant 0 : i32
    %c0_i32_0 = arith.constant 0 : i32
    return %arg0, %c0_i32 : i32, i32
  }
  func.func @transform_1(%arg0: i32) -> (i32, i32) {
    %c0_i32 = arith.constant 0 : i32
    %c0_i32_0 = arith.constant 0 : i32
    %c0_i32_1 = arith.constant 0 : i32
    return %c0_i32, %c0_i32_0 : i32, i32
  }
  func.func @transform_2(%arg0: i32) -> (i32, i32) {
    %c0_i32 = arith.constant 0 : i32
    %c0_i32_0 = arith.constant 0 : i32
    %c0_i32_1 = arith.constant 0 : i32
    return %c0_i32, %c0_i32_0 : i32, i32
  }
  func.func @transform_3(%arg0: i32) -> (i32, i32) {
    %c0_i32 = arith.constant 0 : i32
    %c0_i32_0 = arith.constant 0 : i32
    return %arg0, %c0_i32 : i32, i32
  }
}

module attributes {stable_mosaic.version = 11 : i64} {
  func.func @_conv_stats_kernel(%arg0: i32, %arg1: memref<64x1024xbf16, #tpu.memory_space<vmem>>, %arg2: memref<1024x128xbf16, #tpu.memory_space<vmem>>, %arg3: memref<64x128xbf16, #tpu.memory_space<vmem>>, %arg4: memref<1x1x128xf32, #tpu.memory_space<vmem>>, %arg5: memref<1x1x128xf32, #tpu.memory_space<vmem>>) attributes {dimension_semantics = [#tpu.dimension_semantics<parallel>], iteration_bounds = array<i64: 2>, scalar_prefetch = 0 : i64, scratch_operands = 0 : i64, tpu.core_type = #tpu.core_type<tc>, window_params = [{transform_indices = @transform_0, window_bounds = array<i64: 64, 1024>}, {pipeline_mode = #tpu.pipeline_mode<synchronous>, transform_indices = @transform_1, window_bounds = array<i64: 1024, 128>}, {transform_indices = @transform_2, window_bounds = array<i64: 64, 128>}, {transform_indices = @transform_3, window_bounds = array<i64: 1, 1, 128>}, {transform_indices = @transform_4, window_bounds = array<i64: 1, 1, 128>}]} {
    %c0 = arith.constant 0 : index
    %c0_0 = arith.constant 0 : index
    %0 = vector.load %arg1[%c0, %c0_0] : memref<64x1024xbf16, #tpu.memory_space<vmem>>, vector<64x1024xbf16>
    %c0_1 = arith.constant 0 : index
    %c0_2 = arith.constant 0 : index
    %1 = vector.load %arg2[%c0_1, %c0_2] : memref<1024x128xbf16, #tpu.memory_space<vmem>>, vector<1024x128xbf16>
    %cst = arith.constant dense<0.000000e+00> : vector<64x128xf32>
    %2 = tpu.matmul %0, %1, %cst {dimension_numbers = #tpu.dot_dimension_numbers<[1], [0], [0], [1], [0, 0, 1, 1], [], []>} : vector<64x1024xbf16>, vector<1024x128xbf16>, vector<64x128xf32> -> vector<64x128xf32>
    %3 = arith.truncf %2 : vector<64x128xf32> to vector<64x128xbf16>
    %c0_3 = arith.constant 0 : index
    %c0_4 = arith.constant 0 : index
    %4 = vector.load %arg3[%c0_3, %c0_4] : memref<64x128xbf16, #tpu.memory_space<vmem>>, vector<64x128xbf16>
    tpu.vector_store %arg3[%c0_3, %c0_4], %3 {strides = array<i32>} : memref<64x128xbf16, #tpu.memory_space<vmem>>, vector<64x128xbf16>,
    %cst_5 = arith.constant dense<0.000000e+00> : vector<128xf32>
    %5 = vector.multi_reduction <add>, %2, %cst_5 [0] : vector<64x128xf32> to vector<128xf32>
    %6 = vector.shape_cast %5 : vector<128xf32> to vector<1x1x128xf32>
    %c0_6 = arith.constant 0 : index
    %c0_7 = arith.constant 0 : index
    %c0_8 = arith.constant 0 : index
    %7 = vector.load %arg4[%c0_6, %c0_7, %c0_8] : memref<1x1x128xf32, #tpu.memory_space<vmem>>, vector<1x1x128xf32>
    tpu.vector_store %arg4[%c0_6, %c0_7, %c0_8], %6 {strides = array<i32>} : memref<1x1x128xf32, #tpu.memory_space<vmem>>, vector<1x1x128xf32>,
    %8 = arith.mulf %2, %2 : vector<64x128xf32>
    %cst_9 = arith.constant dense<0.000000e+00> : vector<128xf32>
    %9 = vector.multi_reduction <add>, %8, %cst_9 [0] : vector<64x128xf32> to vector<128xf32>
    %10 = vector.shape_cast %9 : vector<128xf32> to vector<1x1x128xf32>
    %c0_10 = arith.constant 0 : index
    %c0_11 = arith.constant 0 : index
    %c0_12 = arith.constant 0 : index
    %11 = vector.load %arg5[%c0_10, %c0_11, %c0_12] : memref<1x1x128xf32, #tpu.memory_space<vmem>>, vector<1x1x128xf32>
    tpu.vector_store %arg5[%c0_10, %c0_11, %c0_12], %10 {strides = array<i32>} : memref<1x1x128xf32, #tpu.memory_space<vmem>>, vector<1x1x128xf32>,
    return
  }
  func.func @transform_0(%arg0: i32) -> (i32, i32) {
    %c0_i32 = arith.constant 0 : i32
    %c0_i32_0 = arith.constant 0 : i32
    return %arg0, %c0_i32 : i32, i32
  }
  func.func @transform_1(%arg0: i32) -> (i32, i32) {
    %c0_i32 = arith.constant 0 : i32
    %c0_i32_0 = arith.constant 0 : i32
    %c0_i32_1 = arith.constant 0 : i32
    return %c0_i32, %c0_i32_0 : i32, i32
  }
  func.func @transform_2(%arg0: i32) -> (i32, i32) {
    %c0_i32 = arith.constant 0 : i32
    %c0_i32_0 = arith.constant 0 : i32
    return %arg0, %c0_i32 : i32, i32
  }
  func.func @transform_3(%arg0: i32) -> (i32, i32, i32) {
    %c0_i32 = arith.constant 0 : i32
    %c0_i32_0 = arith.constant 0 : i32
    %c0_i32_1 = arith.constant 0 : i32
    return %arg0, %c0_i32, %c0_i32_0 : i32, i32, i32
  }
  func.func @transform_4(%arg0: i32) -> (i32, i32, i32) {
    %c0_i32 = arith.constant 0 : i32
    %c0_i32_0 = arith.constant 0 : i32
    %c0_i32_1 = arith.constant 0 : i32
    return %arg0, %c0_i32, %c0_i32_0 : i32, i32, i32
  }
}

module attributes {stable_mosaic.version = 11 : i64} {
  func.func @_affine_leaky_kernel(%arg0: i32, %arg1: memref<64x128xbf16, #tpu.memory_space<vmem>>, %arg2: memref<1x128xf32, #tpu.memory_space<vmem>>, %arg3: memref<1x128xf32, #tpu.memory_space<vmem>>, %arg4: memref<64x128xbf16, #tpu.memory_space<vmem>>) attributes {dimension_semantics = [#tpu.dimension_semantics<parallel>], iteration_bounds = array<i64: 2>, scalar_prefetch = 0 : i64, scratch_operands = 0 : i64, tpu.core_type = #tpu.core_type<tc>, window_params = [{transform_indices = @transform_0, window_bounds = array<i64: 64, 128>}, {pipeline_mode = #tpu.pipeline_mode<synchronous>, transform_indices = @transform_1, window_bounds = array<i64: 1, 128>}, {pipeline_mode = #tpu.pipeline_mode<synchronous>, transform_indices = @transform_2, window_bounds = array<i64: 1, 128>}, {transform_indices = @transform_3, window_bounds = array<i64: 64, 128>}]} {
    %c0 = arith.constant 0 : index
    %c0_0 = arith.constant 0 : index
    %0 = vector.load %arg1[%c0, %c0_0] : memref<64x128xbf16, #tpu.memory_space<vmem>>, vector<64x128xbf16>
    %1 = arith.extf %0 : vector<64x128xbf16> to vector<64x128xf32>
    %c0_1 = arith.constant 0 : index
    %c0_2 = arith.constant 0 : index
    %2 = vector.load %arg2[%c0_1, %c0_2] : memref<1x128xf32, #tpu.memory_space<vmem>>, vector<1x128xf32>
    %3 = vector.broadcast %2 : vector<1x128xf32> to vector<64x128xf32>
    %4 = arith.mulf %1, %3 : vector<64x128xf32>
    %c0_3 = arith.constant 0 : index
    %c0_4 = arith.constant 0 : index
    %5 = vector.load %arg3[%c0_3, %c0_4] : memref<1x128xf32, #tpu.memory_space<vmem>>, vector<1x128xf32>
    %6 = vector.broadcast %5 : vector<1x128xf32> to vector<64x128xf32>
    %7 = arith.addf %4, %6 : vector<64x128xf32>
    %cst = arith.constant 0.000000e+00 : f32
    %8 = vector.broadcast %cst : f32 to vector<64x128xf32>
    %9 = arith.cmpf oge, %7, %8 : vector<64x128xf32>
    %cst_5 = arith.constant 2.000000e-01 : f32
    %10 = vector.broadcast %cst_5 : f32 to vector<64x128xf32>
    %11 = arith.mulf %10, %7 : vector<64x128xf32>
    %12 = arith.select %9, %7, %11 : vector<64x128xi1>, vector<64x128xf32>
    %13 = arith.truncf %12 : vector<64x128xf32> to vector<64x128xbf16>
    %c0_6 = arith.constant 0 : index
    %c0_7 = arith.constant 0 : index
    %14 = vector.load %arg4[%c0_6, %c0_7] : memref<64x128xbf16, #tpu.memory_space<vmem>>, vector<64x128xbf16>
    tpu.vector_store %arg4[%c0_6, %c0_7], %13 {strides = array<i32>} : memref<64x128xbf16, #tpu.memory_space<vmem>>, vector<64x128xbf16>,
    return
  }
  func.func @transform_0(%arg0: i32) -> (i32, i32) {
    %c0_i32 = arith.constant 0 : i32
    %c0_i32_0 = arith.constant 0 : i32
    return %arg0, %c0_i32 : i32, i32
  }
  func.func @transform_1(%arg0: i32) -> (i32, i32) {
    %c0_i32 = arith.constant 0 : i32
    %c0_i32_0 = arith.constant 0 : i32
    %c0_i32_1 = arith.constant 0 : i32
    return %c0_i32, %c0_i32_0 : i32, i32
  }
  func.func @transform_2(%arg0: i32) -> (i32, i32) {
    %c0_i32 = arith.constant 0 : i32
    %c0_i32_0 = arith.constant 0 : i32
    %c0_i32_1 = arith.constant 0 : i32
    return %c0_i32, %c0_i32_0 : i32, i32
  }
  func.func @transform_3(%arg0: i32) -> (i32, i32) {
    %c0_i32 = arith.constant 0 : i32
    %c0_i32_0 = arith.constant 0 : i32
    return %arg0, %c0_i32 : i32, i32
  }
}

module attributes {stable_mosaic.version = 11 : i64} {
  func.func @_affine_leaky_kernel(%arg0: i32, %arg1: memref<16x256xbf16, #tpu.memory_space<vmem>>, %arg2: memref<1x256xf32, #tpu.memory_space<vmem>>, %arg3: memref<1x256xf32, #tpu.memory_space<vmem>>, %arg4: memref<16x256xbf16, #tpu.memory_space<vmem>>) attributes {dimension_semantics = [#tpu.dimension_semantics<parallel>], iteration_bounds = array<i64: 2>, scalar_prefetch = 0 : i64, scratch_operands = 0 : i64, tpu.core_type = #tpu.core_type<tc>, window_params = [{transform_indices = @transform_0, window_bounds = array<i64: 16, 256>}, {pipeline_mode = #tpu.pipeline_mode<synchronous>, transform_indices = @transform_1, window_bounds = array<i64: 1, 256>}, {pipeline_mode = #tpu.pipeline_mode<synchronous>, transform_indices = @transform_2, window_bounds = array<i64: 1, 256>}, {transform_indices = @transform_3, window_bounds = array<i64: 16, 256>}]} {
    %c0 = arith.constant 0 : index
    %c0_0 = arith.constant 0 : index
    %0 = vector.load %arg1[%c0, %c0_0] : memref<16x256xbf16, #tpu.memory_space<vmem>>, vector<16x256xbf16>
    %1 = arith.extf %0 : vector<16x256xbf16> to vector<16x256xf32>
    %c0_1 = arith.constant 0 : index
    %c0_2 = arith.constant 0 : index
    %2 = vector.load %arg2[%c0_1, %c0_2] : memref<1x256xf32, #tpu.memory_space<vmem>>, vector<1x256xf32>
    %3 = vector.broadcast %2 : vector<1x256xf32> to vector<16x256xf32>
    %4 = arith.mulf %1, %3 : vector<16x256xf32>
    %c0_3 = arith.constant 0 : index
    %c0_4 = arith.constant 0 : index
    %5 = vector.load %arg3[%c0_3, %c0_4] : memref<1x256xf32, #tpu.memory_space<vmem>>, vector<1x256xf32>
    %6 = vector.broadcast %5 : vector<1x256xf32> to vector<16x256xf32>
    %7 = arith.addf %4, %6 : vector<16x256xf32>
    %cst = arith.constant 0.000000e+00 : f32
    %8 = vector.broadcast %cst : f32 to vector<16x256xf32>
    %9 = arith.cmpf oge, %7, %8 : vector<16x256xf32>
    %cst_5 = arith.constant 2.000000e-01 : f32
    %10 = vector.broadcast %cst_5 : f32 to vector<16x256xf32>
    %11 = arith.mulf %10, %7 : vector<16x256xf32>
    %12 = arith.select %9, %7, %11 : vector<16x256xi1>, vector<16x256xf32>
    %13 = arith.truncf %12 : vector<16x256xf32> to vector<16x256xbf16>
    %c0_6 = arith.constant 0 : index
    %c0_7 = arith.constant 0 : index
    %14 = vector.load %arg4[%c0_6, %c0_7] : memref<16x256xbf16, #tpu.memory_space<vmem>>, vector<16x256xbf16>
    tpu.vector_store %arg4[%c0_6, %c0_7], %13 {strides = array<i32>} : memref<16x256xbf16, #tpu.memory_space<vmem>>, vector<16x256xbf16>,
    return
  }
  func.func @transform_0(%arg0: i32) -> (i32, i32) {
    %c0_i32 = arith.constant 0 : i32
    %c0_i32_0 = arith.constant 0 : i32
    return %arg0, %c0_i32 : i32, i32
  }
  func.func @transform_1(%arg0: i32) -> (i32, i32) {
    %c0_i32 = arith.constant 0 : i32
    %c0_i32_0 = arith.constant 0 : i32
    %c0_i32_1 = arith.constant 0 : i32
    return %c0_i32, %c0_i32_0 : i32, i32
  }
  func.func @transform_2(%arg0: i32) -> (i32, i32) {
    %c0_i32 = arith.constant 0 : i32
    %c0_i32_0 = arith.constant 0 : i32
    %c0_i32_1 = arith.constant 0 : i32
    return %c0_i32, %c0_i32_0 : i32, i32
  }
  func.func @transform_3(%arg0: i32) -> (i32, i32) {
    %c0_i32 = arith.constant 0 : i32
    %c0_i32_0 = arith.constant 0 : i32
    return %arg0, %c0_i32 : i32, i32
  }
}

module attributes {stable_mosaic.version = 11 : i64} {
  func.func @_conv_stats_kernel(%arg0: i32, %arg1: memref<16x2048xbf16, #tpu.memory_space<vmem>>, %arg2: memref<2048x256xbf16, #tpu.memory_space<vmem>>, %arg3: memref<16x256xbf16, #tpu.memory_space<vmem>>, %arg4: memref<1x1x256xf32, #tpu.memory_space<vmem>>, %arg5: memref<1x1x256xf32, #tpu.memory_space<vmem>>) attributes {dimension_semantics = [#tpu.dimension_semantics<parallel>], iteration_bounds = array<i64: 2>, scalar_prefetch = 0 : i64, scratch_operands = 0 : i64, tpu.core_type = #tpu.core_type<tc>, window_params = [{transform_indices = @transform_0, window_bounds = array<i64: 16, 2048>}, {pipeline_mode = #tpu.pipeline_mode<synchronous>, transform_indices = @transform_1, window_bounds = array<i64: 2048, 256>}, {transform_indices = @transform_2, window_bounds = array<i64: 16, 256>}, {transform_indices = @transform_3, window_bounds = array<i64: 1, 1, 256>}, {transform_indices = @transform_4, window_bounds = array<i64: 1, 1, 256>}]} {
    %c0 = arith.constant 0 : index
    %c0_0 = arith.constant 0 : index
    %0 = vector.load %arg1[%c0, %c0_0] : memref<16x2048xbf16, #tpu.memory_space<vmem>>, vector<16x2048xbf16>
    %c0_1 = arith.constant 0 : index
    %c0_2 = arith.constant 0 : index
    %1 = vector.load %arg2[%c0_1, %c0_2] : memref<2048x256xbf16, #tpu.memory_space<vmem>>, vector<2048x256xbf16>
    %cst = arith.constant dense<0.000000e+00> : vector<16x256xf32>
    %2 = tpu.matmul %0, %1, %cst {dimension_numbers = #tpu.dot_dimension_numbers<[1], [0], [0], [1], [0, 0, 1, 1], [], []>} : vector<16x2048xbf16>, vector<2048x256xbf16>, vector<16x256xf32> -> vector<16x256xf32>
    %3 = arith.truncf %2 : vector<16x256xf32> to vector<16x256xbf16>
    %c0_3 = arith.constant 0 : index
    %c0_4 = arith.constant 0 : index
    %4 = vector.load %arg3[%c0_3, %c0_4] : memref<16x256xbf16, #tpu.memory_space<vmem>>, vector<16x256xbf16>
    tpu.vector_store %arg3[%c0_3, %c0_4], %3 {strides = array<i32>} : memref<16x256xbf16, #tpu.memory_space<vmem>>, vector<16x256xbf16>,
    %cst_5 = arith.constant dense<0.000000e+00> : vector<256xf32>
    %5 = vector.multi_reduction <add>, %2, %cst_5 [0] : vector<16x256xf32> to vector<256xf32>
    %6 = vector.shape_cast %5 : vector<256xf32> to vector<1x1x256xf32>
    %c0_6 = arith.constant 0 : index
    %c0_7 = arith.constant 0 : index
    %c0_8 = arith.constant 0 : index
    %7 = vector.load %arg4[%c0_6, %c0_7, %c0_8] : memref<1x1x256xf32, #tpu.memory_space<vmem>>, vector<1x1x256xf32>
    tpu.vector_store %arg4[%c0_6, %c0_7, %c0_8], %6 {strides = array<i32>} : memref<1x1x256xf32, #tpu.memory_space<vmem>>, vector<1x1x256xf32>,
    %8 = arith.mulf %2, %2 : vector<16x256xf32>
    %cst_9 = arith.constant dense<0.000000e+00> : vector<256xf32>
    %9 = vector.multi_reduction <add>, %8, %cst_9 [0] : vector<16x256xf32> to vector<256xf32>
    %10 = vector.shape_cast %9 : vector<256xf32> to vector<1x1x256xf32>
    %c0_10 = arith.constant 0 : index
    %c0_11 = arith.constant 0 : index
    %c0_12 = arith.constant 0 : index
    %11 = vector.load %arg5[%c0_10, %c0_11, %c0_12] : memref<1x1x256xf32, #tpu.memory_space<vmem>>, vector<1x1x256xf32>
    tpu.vector_store %arg5[%c0_10, %c0_11, %c0_12], %10 {strides = array<i32>} : memref<1x1x256xf32, #tpu.memory_space<vmem>>, vector<1x1x256xf32>,
    return
  }
  func.func @transform_0(%arg0: i32) -> (i32, i32) {
    %c0_i32 = arith.constant 0 : i32
    %c0_i32_0 = arith.constant 0 : i32
    return %arg0, %c0_i32 : i32, i32
  }
  func.func @transform_1(%arg0: i32) -> (i32, i32) {
    %c0_i32 = arith.constant 0 : i32
    %c0_i32_0 = arith.constant 0 : i32
    %c0_i32_1 = arith.constant 0 : i32
    return %c0_i32, %c0_i32_0 : i32, i32
  }
  func.func @transform_2(%arg0: i32) -> (i32, i32) {
    %c0_i32 = arith.constant 0 : i32
    %c0_i32_0 = arith.constant 0 : i32
    return %arg0, %c0_i32 : i32, i32
  }
  func.func @transform_3(%arg0: i32) -> (i32, i32, i32) {
    %c0_i32 = arith.constant 0 : i32
    %c0_i32_0 = arith.constant 0 : i32
    %c0_i32_1 = arith.constant 0 : i32
    return %arg0, %c0_i32, %c0_i32_0 : i32, i32, i32
  }
  func.func @transform_4(%arg0: i32) -> (i32, i32, i32) {
    %c0_i32 = arith.constant 0 : i32
    %c0_i32_0 = arith.constant 0 : i32
    %c0_i32_1 = arith.constant 0 : i32
    return %arg0, %c0_i32, %c0_i32_0 : i32, i32, i32
  }
}

module attributes {stable_mosaic.version = 11 : i64} {
  func.func @_conv_stats_kernel(%arg0: i32, %arg1: memref<16x4096xbf16, #tpu.memory_space<vmem>>, %arg2: memref<4096x512xbf16, #tpu.memory_space<vmem>>, %arg3: memref<16x512xbf16, #tpu.memory_space<vmem>>, %arg4: memref<1x1x512xf32, #tpu.memory_space<vmem>>, %arg5: memref<1x1x512xf32, #tpu.memory_space<vmem>>) attributes {dimension_semantics = [#tpu.dimension_semantics<parallel>], iteration_bounds = array<i64: 2>, scalar_prefetch = 0 : i64, scratch_operands = 0 : i64, tpu.core_type = #tpu.core_type<tc>, window_params = [{transform_indices = @transform_0, window_bounds = array<i64: 16, 4096>}, {pipeline_mode = #tpu.pipeline_mode<synchronous>, transform_indices = @transform_1, window_bounds = array<i64: 4096, 512>}, {transform_indices = @transform_2, window_bounds = array<i64: 16, 512>}, {transform_indices = @transform_3, window_bounds = array<i64: 1, 1, 512>}, {transform_indices = @transform_4, window_bounds = array<i64: 1, 1, 512>}]} {
    %c0 = arith.constant 0 : index
    %c0_0 = arith.constant 0 : index
    %0 = vector.load %arg1[%c0, %c0_0] : memref<16x4096xbf16, #tpu.memory_space<vmem>>, vector<16x4096xbf16>
    %c0_1 = arith.constant 0 : index
    %c0_2 = arith.constant 0 : index
    %1 = vector.load %arg2[%c0_1, %c0_2] : memref<4096x512xbf16, #tpu.memory_space<vmem>>, vector<4096x512xbf16>
    %cst = arith.constant dense<0.000000e+00> : vector<16x512xf32>
    %2 = tpu.matmul %0, %1, %cst {dimension_numbers = #tpu.dot_dimension_numbers<[1], [0], [0], [1], [0, 0, 1, 1], [], []>} : vector<16x4096xbf16>, vector<4096x512xbf16>, vector<16x512xf32> -> vector<16x512xf32>
    %3 = arith.truncf %2 : vector<16x512xf32> to vector<16x512xbf16>
    %c0_3 = arith.constant 0 : index
    %c0_4 = arith.constant 0 : index
    %4 = vector.load %arg3[%c0_3, %c0_4] : memref<16x512xbf16, #tpu.memory_space<vmem>>, vector<16x512xbf16>
    tpu.vector_store %arg3[%c0_3, %c0_4], %3 {strides = array<i32>} : memref<16x512xbf16, #tpu.memory_space<vmem>>, vector<16x512xbf16>,
    %cst_5 = arith.constant dense<0.000000e+00> : vector<512xf32>
    %5 = vector.multi_reduction <add>, %2, %cst_5 [0] : vector<16x512xf32> to vector<512xf32>
    %6 = vector.shape_cast %5 : vector<512xf32> to vector<1x1x512xf32>
    %c0_6 = arith.constant 0 : index
    %c0_7 = arith.constant 0 : index
    %c0_8 = arith.constant 0 : index
    %7 = vector.load %arg4[%c0_6, %c0_7, %c0_8] : memref<1x1x512xf32, #tpu.memory_space<vmem>>, vector<1x1x512xf32>
    tpu.vector_store %arg4[%c0_6, %c0_7, %c0_8], %6 {strides = array<i32>} : memref<1x1x512xf32, #tpu.memory_space<vmem>>, vector<1x1x512xf32>,
    %8 = arith.mulf %2, %2 : vector<16x512xf32>
    %cst_9 = arith.constant dense<0.000000e+00> : vector<512xf32>
    %9 = vector.multi_reduction <add>, %8, %cst_9 [0] : vector<16x512xf32> to vector<512xf32>
    %10 = vector.shape_cast %9 : vector<512xf32> to vector<1x1x512xf32>
    %c0_10 = arith.constant 0 : index
    %c0_11 = arith.constant 0 : index
    %c0_12 = arith.constant 0 : index
    %11 = vector.load %arg5[%c0_10, %c0_11, %c0_12] : memref<1x1x512xf32, #tpu.memory_space<vmem>>, vector<1x1x512xf32>
    tpu.vector_store %arg5[%c0_10, %c0_11, %c0_12], %10 {strides = array<i32>} : memref<1x1x512xf32, #tpu.memory_space<vmem>>, vector<1x1x512xf32>,
    return
  }
  func.func @transform_0(%arg0: i32) -> (i32, i32) {
    %c0_i32 = arith.constant 0 : i32
    %c0_i32_0 = arith.constant 0 : i32
    return %arg0, %c0_i32 : i32, i32
  }
  func.func @transform_1(%arg0: i32) -> (i32, i32) {
    %c0_i32 = arith.constant 0 : i32
    %c0_i32_0 = arith.constant 0 : i32
    %c0_i32_1 = arith.constant 0 : i32
    return %c0_i32, %c0_i32_0 : i32, i32
  }
  func.func @transform_2(%arg0: i32) -> (i32, i32) {
    %c0_i32 = arith.constant 0 : i32
    %c0_i32_0 = arith.constant 0 : i32
    return %arg0, %c0_i32 : i32, i32
  }
  func.func @transform_3(%arg0: i32) -> (i32, i32, i32) {
    %c0_i32 = arith.constant 0 : i32
    %c0_i32_0 = arith.constant 0 : i32
    %c0_i32_1 = arith.constant 0 : i32
    return %arg0, %c0_i32, %c0_i32_0 : i32, i32, i32
  }
  func.func @transform_4(%arg0: i32) -> (i32, i32, i32) {
    %c0_i32 = arith.constant 0 : i32
    %c0_i32_0 = arith.constant 0 : i32
    %c0_i32_1 = arith.constant 0 : i32
    return %arg0, %c0_i32, %c0_i32_0 : i32, i32, i32
  }
}

module attributes {stable_mosaic.version = 11 : i64} {
  func.func @_affine_leaky_kernel(%arg0: i32, %arg1: memref<16x512xbf16, #tpu.memory_space<vmem>>, %arg2: memref<1x512xf32, #tpu.memory_space<vmem>>, %arg3: memref<1x512xf32, #tpu.memory_space<vmem>>, %arg4: memref<16x512xbf16, #tpu.memory_space<vmem>>) attributes {dimension_semantics = [#tpu.dimension_semantics<parallel>], iteration_bounds = array<i64: 2>, scalar_prefetch = 0 : i64, scratch_operands = 0 : i64, tpu.core_type = #tpu.core_type<tc>, window_params = [{transform_indices = @transform_0, window_bounds = array<i64: 16, 512>}, {pipeline_mode = #tpu.pipeline_mode<synchronous>, transform_indices = @transform_1, window_bounds = array<i64: 1, 512>}, {pipeline_mode = #tpu.pipeline_mode<synchronous>, transform_indices = @transform_2, window_bounds = array<i64: 1, 512>}, {transform_indices = @transform_3, window_bounds = array<i64: 16, 512>}]} {
    %c0 = arith.constant 0 : index
    %c0_0 = arith.constant 0 : index
    %0 = vector.load %arg1[%c0, %c0_0] : memref<16x512xbf16, #tpu.memory_space<vmem>>, vector<16x512xbf16>
    %1 = arith.extf %0 : vector<16x512xbf16> to vector<16x512xf32>
    %c0_1 = arith.constant 0 : index
    %c0_2 = arith.constant 0 : index
    %2 = vector.load %arg2[%c0_1, %c0_2] : memref<1x512xf32, #tpu.memory_space<vmem>>, vector<1x512xf32>
    %3 = vector.broadcast %2 : vector<1x512xf32> to vector<16x512xf32>
    %4 = arith.mulf %1, %3 : vector<16x512xf32>
    %c0_3 = arith.constant 0 : index
    %c0_4 = arith.constant 0 : index
    %5 = vector.load %arg3[%c0_3, %c0_4] : memref<1x512xf32, #tpu.memory_space<vmem>>, vector<1x512xf32>
    %6 = vector.broadcast %5 : vector<1x512xf32> to vector<16x512xf32>
    %7 = arith.addf %4, %6 : vector<16x512xf32>
    %cst = arith.constant 0.000000e+00 : f32
    %8 = vector.broadcast %cst : f32 to vector<16x512xf32>
    %9 = arith.cmpf oge, %7, %8 : vector<16x512xf32>
    %cst_5 = arith.constant 2.000000e-01 : f32
    %10 = vector.broadcast %cst_5 : f32 to vector<16x512xf32>
    %11 = arith.mulf %10, %7 : vector<16x512xf32>
    %12 = arith.select %9, %7, %11 : vector<16x512xi1>, vector<16x512xf32>
    %13 = arith.truncf %12 : vector<16x512xf32> to vector<16x512xbf16>
    %c0_6 = arith.constant 0 : index
    %c0_7 = arith.constant 0 : index
    %14 = vector.load %arg4[%c0_6, %c0_7] : memref<16x512xbf16, #tpu.memory_space<vmem>>, vector<16x512xbf16>
    tpu.vector_store %arg4[%c0_6, %c0_7], %13 {strides = array<i32>} : memref<16x512xbf16, #tpu.memory_space<vmem>>, vector<16x512xbf16>,
    return
  }
  func.func @transform_0(%arg0: i32) -> (i32, i32) {
    %c0_i32 = arith.constant 0 : i32
    %c0_i32_0 = arith.constant 0 : i32
    return %arg0, %c0_i32 : i32, i32
  }
  func.func @transform_1(%arg0: i32) -> (i32, i32) {
    %c0_i32 = arith.constant 0 : i32
    %c0_i32_0 = arith.constant 0 : i32
    %c0_i32_1 = arith.constant 0 : i32
    return %c0_i32, %c0_i32_0 : i32, i32
  }
  func.func @transform_2(%arg0: i32) -> (i32, i32) {
    %c0_i32 = arith.constant 0 : i32
    %c0_i32_0 = arith.constant 0 : i32
    %c0_i32_1 = arith.constant 0 : i32
    return %c0_i32, %c0_i32_0 : i32, i32
  }
  func.func @transform_3(%arg0: i32) -> (i32, i32) {
    %c0_i32 = arith.constant 0 : i32
    %c0_i32_0 = arith.constant 0 : i32
    return %arg0, %c0_i32 : i32, i32
  }
}

module attributes {stable_mosaic.version = 11 : i64} {
  func.func @_head_conv_bce_kernel(%arg0: i32, %arg1: memref<16x8192xbf16, #tpu.memory_space<vmem>>, %arg2: memref<8192x128xbf16, #tpu.memory_space<vmem>>, %arg3: memref<1x128xf32, #tpu.memory_space<vmem>>, %arg4: memref<16x128xf32, #tpu.memory_space<vmem>>, %arg5: memref<1x1x128xf32, #tpu.memory_space<vmem>>) attributes {dimension_semantics = [#tpu.dimension_semantics<parallel>], iteration_bounds = array<i64: 1>, scalar_prefetch = 0 : i64, scratch_operands = 0 : i64, tpu.core_type = #tpu.core_type<tc>, window_params = [{transform_indices = @transform_0, window_bounds = array<i64: 16, 8192>}, {pipeline_mode = #tpu.pipeline_mode<synchronous>, transform_indices = @transform_1, window_bounds = array<i64: 8192, 128>}, {pipeline_mode = #tpu.pipeline_mode<synchronous>, transform_indices = @transform_2, window_bounds = array<i64: 1, 128>}, {transform_indices = @transform_3, window_bounds = array<i64: 16, 128>}, {transform_indices = @transform_4, window_bounds = array<i64: 1, 1, 128>}]} {
    %c0 = arith.constant 0 : index
    %c0_0 = arith.constant 0 : index
    %0 = vector.load %arg1[%c0, %c0_0] : memref<16x8192xbf16, #tpu.memory_space<vmem>>, vector<16x8192xbf16>
    %c0_1 = arith.constant 0 : index
    %c0_2 = arith.constant 0 : index
    %1 = vector.load %arg2[%c0_1, %c0_2] : memref<8192x128xbf16, #tpu.memory_space<vmem>>, vector<8192x128xbf16>
    %cst = arith.constant dense<0.000000e+00> : vector<16x128xf32>
    %2 = tpu.matmul %0, %1, %cst {dimension_numbers = #tpu.dot_dimension_numbers<[1], [0], [0], [1], [0, 0, 1, 1], [], []>} : vector<16x8192xbf16>, vector<8192x128xbf16>, vector<16x128xf32> -> vector<16x128xf32>
    %c0_3 = arith.constant 0 : index
    %c0_4 = arith.constant 0 : index
    %3 = vector.load %arg3[%c0_3, %c0_4] : memref<1x128xf32, #tpu.memory_space<vmem>>, vector<1x128xf32>
    %4 = vector.broadcast %3 : vector<1x128xf32> to vector<16x128xf32>
    %5 = arith.addf %2, %4 : vector<16x128xf32>
    %c0_5 = arith.constant 0 : index
    %c0_6 = arith.constant 0 : index
    %6 = vector.load %arg4[%c0_5, %c0_6] : memref<16x128xf32, #tpu.memory_space<vmem>>, vector<16x128xf32>
    tpu.vector_store %arg4[%c0_5, %c0_6], %5 {strides = array<i32>} : memref<16x128xf32, #tpu.memory_space<vmem>>, vector<16x128xf32>,
    %7 = tpu.iota {dimensions = array<i32: 0>} : vector<16x128xi32>
    %c16_i32 = arith.constant 16 : i32
    %8 = arith.muli %arg0, %c16_i32 : i32
    %9 = vector.broadcast %8 : i32 to vector<16x128xi32>
    %10 = arith.addi %7, %9 : vector<16x128xi32>
    %11 = tpu.iota {dimensions = array<i32: 1>} : vector<16x128xi32>
    %c8_i32 = arith.constant 8 : i32
    %12 = vector.broadcast %c8_i32 : i32 to vector<16x128xi32>
    %13 = arith.cmpi slt, %10, %12 : vector<16x128xi32>
    %c1_i32 = arith.constant 1 : i32
    %14 = vector.broadcast %c1_i32 : i32 to vector<16x128xi32>
    %15 = arith.cmpi slt, %11, %14 : vector<16x128xi32>
    %16 = arith.andi %13, %15 : vector<16x128xi1>
    %cst_7 = arith.constant 0.000000e+00 : f32
    %17 = vector.broadcast %cst_7 : f32 to vector<16x128xf32>
    %18 = arith.maximumf %5, %17 : vector<16x128xf32>
    %cst_8 = arith.constant 1.000000e+00 : f32
    %19 = vector.broadcast %cst_8 : f32 to vector<16x128xf32>
    %20 = arith.mulf %5, %19 : vector<16x128xf32>
    %21 = arith.subf %18, %20 : vector<16x128xf32>
    %22 = math.absf %5 : vector<16x128xf32>
    %cst_9 = arith.constant 0.000000e+00 : f32
    %23 = vector.broadcast %cst_9 : f32 to vector<16x128xf32>
    %24 = arith.subf %23, %22 : vector<16x128xf32>
    %25 = math.exp %24 : vector<16x128xf32>
    %26 = math.log1p %25 : vector<16x128xf32>
    %27 = arith.addf %21, %26 : vector<16x128xf32>
    %cst_10 = arith.constant 0.000000e+00 : f32
    %28 = vector.broadcast %cst_10 : f32 to vector<16x128xf32>
    %29 = arith.select %16, %27, %28 : vector<16x128xi1>, vector<16x128xf32>
    %30 = vector.shape_cast %29 : vector<16x128xf32> to vector<1x16x128xf32>
    %cst_11 = arith.constant dense<0.000000e+00> : vector<1xf32>
    %31 = vector.multi_reduction <add>, %30, %cst_11 [1, 2] : vector<1x16x128xf32> to vector<1xf32>
    %32 = vector.shape_cast %31 : vector<1xf32> to vector<1x1x1xf32>
    %33 = vector.extract %32[0, 0, 0] : f32 from vector<1x1x1xf32>
    %34 = vector.broadcast %33 : f32 to vector<1x1x1xf32>
    %35 = vector.shape_cast %34 : vector<1x1x1xf32> to vector<1x1x1xf32>
    %36 = vector.broadcast %35 : vector<1x1x1xf32> to vector<1x1x128xf32>
    %c0_12 = arith.constant 0 : index
    %c0_13 = arith.constant 0 : index
    %c0_14 = arith.constant 0 : index
    %37 = vector.load %arg5[%c0_12, %c0_13, %c0_14] : memref<1x1x128xf32, #tpu.memory_space<vmem>>, vector<1x1x128xf32>
    tpu.vector_store %arg5[%c0_12, %c0_13, %c0_14], %36 {strides = array<i32>} : memref<1x1x128xf32, #tpu.memory_space<vmem>>, vector<1x1x128xf32>,
    return
  }
  func.func @transform_0(%arg0: i32) -> (i32, i32) {
    %c0_i32 = arith.constant 0 : i32
    %c0_i32_0 = arith.constant 0 : i32
    return %arg0, %c0_i32 : i32, i32
  }
  func.func @transform_1(%arg0: i32) -> (i32, i32) {
    %c0_i32 = arith.constant 0 : i32
    %c0_i32_0 = arith.constant 0 : i32
    %c0_i32_1 = arith.constant 0 : i32
    return %c0_i32, %c0_i32_0 : i32, i32
  }
  func.func @transform_2(%arg0: i32) -> (i32, i32) {
    %c0_i32 = arith.constant 0 : i32
    %c0_i32_0 = arith.constant 0 : i32
    %c0_i32_1 = arith.constant 0 : i32
    return %c0_i32, %c0_i32_0 : i32, i32
  }
  func.func @transform_3(%arg0: i32) -> (i32, i32) {
    %c0_i32 = arith.constant 0 : i32
    %c0_i32_0 = arith.constant 0 : i32
    return %arg0, %c0_i32 : i32, i32
  }
  func.func @transform_4(%arg0: i32) -> (i32, i32, i32) {
    %c0_i32 = arith.constant 0 : i32
    %c0_i32_0 = arith.constant 0 : i32
    %c0_i32_1 = arith.constant 0 : i32
    return %arg0, %c0_i32, %c0_i32_0 : i32, i32, i32
  }
}

</mosaic_0001>

<bundles_post_ra>
// kernel: forward_real.8
= control target key start
LH: loop header
LB: loop body
LE: loop exit
PB: predicated region body
PF: predicated region fallthrough
CT: control target
= control target key end

     0   :  { %8 = vsyncpa [#allocation3], 0  ;;  %s1477_s0 = inlined_call_operand.vmem [shape: bf16[512,128], index: 0, kind: input, shape index: {}]   ;;  %s1478_s1 = inlined_call_operand.hbm [shape: bf16[128,128], index: 1, kind: input, shape index: {}]   ;;  %s1479_s2 = inlined_call_operand.hbm [shape: f32[1,128], index: 2, kind: input, shape index: {}]   ;;  %s1480_s3 = inlined_call_operand.vmem [shape: bf16[512,128], index: 3, kind: output, shape index: {}]  }
   0x1   :  { %9 = vsyncpa [#allocation5], 0  ;;  %s1331_s12 = smov 0  }
   0x2 LB: > { %s897_s13 = sadd.s32 4294967295, %s1305_s12   ;;  %p899_p0 = scmp.ge.s32.totalorder %s1305_s12, 1  ;;  %s1305_s12 = sphi %s1331_s12, %s15_s12  }
   0x3   : > { %p114_p1 = scmp.lt.s32.totalorder %s1305_s12, 3  ;;  %s1307_s14 = smov [#allocation2]  }
   0x4   : > { %s126_s15 = sshll.u32 %s1307_s14, 4  ;;  %p1345_p3 = scmp.eq.s32.totalorder %s897_s13, 0  ;;  %s127_s15 = int_to_ptr.vmem [resolvable:$true] %s126_s15 }
   0x5   : > { %p1339_p2 = pnand %p899_p0, %p114_p1  ;;  %s1308_s18 = smov [#allocation4]  }
   0x6   : > { %s140_s19 = sshll.u32 %s1308_s18, 4  ;;  %s1250_s21 = scalar_lea.vmem %s127_s15, 1024  ;;  %s141_s19 = int_to_ptr.vmem [resolvable:$true] %s140_s19 }
   0x7   : > { %p1192_p4 = pneg %p1339_p2  ;;  %p1251_p7 = scmp.ne.s32.totalorder %s127_s15, %s1250_s21 }
   0x8   : > { %p1258_p10 = scmp.lt.s32.totalorder %s127_s15, %s127_s15  ;;  %p1259_p11 = scmp.lt.s32.totalorder %s1250_s21, %s1250_s21 }
   0x9   : > { %p1353_p5 = pnand %p1345_p3, %p1192_p4 }
   0xa   : > { %p1260_p12 = por %p1259_p11, %p1258_p10 }
   0xb   : > { %p1241_p6 = pneg %p1353_p5 }
   0xd   : > { %p1253_p8 = pnand %p1251_p7, %p1241_p6 }
   0xf   : > { %p1254_p9 = pneg %p1253_p8 }
  0x11   : > { %p1261_p13 = pnand %p1260_p12, %p1254_p9 }
  0x13   : > { %1264 = shalt.err (!%p1261_p13)
}
  0x14   : > { %s1309_s22 = smov 64   ;;  %s1310_s23 = smov 4  }
  0x15   : > { %1195 = dma.hbm_to_vmem [thread:$0]  (!%p1353_p5), %s1478_s1, 1024, %s127_s15, [#allocation3], %s1309_s22, %s1309_s22, %s1310_s23  }
  0x16   : > { %s1276_s26 = scalar_lea.vmem %s141_s19, 16  ;;  %s1283_s27 = scalar_lea.vmem %s141_s19, 32 }
  0x17   : > { %p1277_p0 = scmp.ne.s32.totalorder %s141_s19, %s1276_s26  ;;  %p1284_p7 = scmp.lt.s32.totalorder %s141_s19, %s141_s19 }
  0x18   : > { %p1285_p8 = scmp.lt.s32.totalorder %s1283_s27, %s1276_s26 }
  0x19   : > { %p1279_p1 = pnand %p1277_p0, %p1241_p6 }
  0x1a   : > { %p1286_p9 = por %p1285_p8, %p1284_p7 }
  0x1b   : > { %p1280_p4 = pneg %p1279_p1 }
  0x1d   : > { %p1287_p10 = pnand %p1286_p9, %p1280_p4 }
  0x1f   : > { %1290 = shalt.err (!%p1287_p10)
}
  0x20   : > { %1198 = dma.hbm_to_vmem [thread:$0]  (!%p1353_p5), %s1479_s2, 16, %s141_s19, [#allocation5]  }
  0x21   : > { %162 = sbr.rel (%p1339_p2) target bundleno = 309 (0x135), region = 32 }
  0x26   : > { %1296 = dma.done.wait (%p1345_p3), [#allocation3], 1024  }
  0x27   : > { %1298 = vsyncadd (%p1345_p3), [#allocation3], 4294966272 }
  0x28   : > { %1300 = dma.done.wait (%p1345_p3), [#allocation5], 16  }
  0x29   : > { %1302 = vsyncadd (%p1345_p3), [#allocation5], 4294967280  ;;  %s906_s30 = sshll.u32 %s897_s13, 5  ;;  %v1215_v0 = vld [vmem:[#allocation2 + $0x38] sm:$0xff]   ;;  %v1216_v1 = vld [vmem:[#allocation2 + $0x30] sm:$0xff]  }
  0x2a   : > { %p191_p6 = scmp.lt.s32.totalorder %s906_s30, 63  ;;  %1120 = vmatprep.subr.bf16.mxu0 %v1215_v0  ;;  %1168 = vmatprep.subr.bf16.mxu1 %v1215_v0  ;;  %v1217_v2 = vld [vmem:[#allocation2 + $0x28] sm:$0xff]   ;;  %v1218_v3 = vld [vmem:[#allocation2 + $0x20] sm:$0xff]   ;;  %v1219_v6 = vld [vmem:[#allocation2 + $0x18] sm:$0xff]  }
  0x2b   : > { %1121 = vmatpush3.bf16.msra.mxu0 %v1215_v0  ;;  %1176 = vmatpush3.bf16.msra.mxu1 %v1215_v0  ;;  %v1220_v7 = vld [vmem:[#allocation2 + $0x10] sm:$0xff]   ;;  %v1221_v8 = vld [vmem:[#allocation2 + $0x8] sm:$0xff]   ;;  %v1222_v9 = vld [vmem:[#allocation2] sm:$0xff]  }
  0x2c   : > { %s1485_s30 = smov (!%p191_p6, %s906_s30), 63  ;;  %1122 = vmatprep.subr.bf16.mxu0 %v1216_v1  ;;  %1169 = vmatprep.subr.bf16.mxu1 %v1216_v1  ;;  %v1413_v24 = vld [vmem:[#allocation4] ss:$0 sm:$0xff] }
  0x2d   : > { %s907_s4 = sshll.u32 %s1485_s30, 2 }
  0x2e   : > { %s1395_s7 = scalar_lea.vmem %s1477_s0, %s907_s4  ;;  %s1428_s10 = scalar_lea.vmem %s1480_s3, %s907_s4 }
  0x2f   : > { %1123 = vmatpush3.bf16.msra.mxu0 %v1216_v1  ;;  %1177 = vmatpush3.bf16.msra.mxu1 %v1216_v1  ;;  %v1223_v4 = vld [vmem:[%s1395_s7] sm:$0xff]   ;;  %v1225_v10 = vld [vmem:[%s1395_s7 + $0x8] sm:$0xff]   ;;  %v1227_v12 = vld [vmem:[%s1395_s7 + $0x10] sm:$0xff]  }
  0x30   : > { %1124 = vmatprep.subr.bf16.mxu0 %v1217_v2  ;;  %1170 = vmatprep.subr.bf16.mxu1 %v1217_v2  ;;  %v1224_v5 = vld [vmem:[%s1395_s7 + $0x40] sm:$0xff]   ;;  %v1226_v11 = vld [vmem:[%s1395_s7 + $0x48] sm:$0xff]   ;;  %v1228_v13 = vld [vmem:[%s1395_s7 + $0x50] sm:$0xff]  }
  0x31   : > { %1136 = vmatprep.mubr.bf16.mxu0 %v1223_v4  ;;  %1152 = vmatprep.mubr.bf16.mxu1 %v1224_v5  ;;  %v1229_v14 = vld [vmem:[%s1395_s7 + $0x18] sm:$0xff]   ;;  %v1231_v16 = vld [vmem:[%s1395_s7 + $0x20] sm:$0xff]   ;;  %v1233_v18 = vld [vmem:[%s1395_s7 + $0x28] sm:$0xff]  }
  0x32   : > { %v1230_v15 = vld [vmem:[%s1395_s7 + $0x58] sm:$0xff]   ;;  %v1232_v17 = vld [vmem:[%s1395_s7 + $0x60] sm:$0xff]   ;;  %v1234_v19 = vld [vmem:[%s1395_s7 + $0x68] sm:$0xff]  }
  0x33   : > { %1125 = vmatpush3.bf16.msra.mxu0 %v1217_v2  ;;  %1178 = vmatpush3.bf16.msra.mxu1 %v1217_v2  ;;  %v1235_v20 = vld [vmem:[%s1395_s7 + $0x30] sm:$0xff]   ;;  %v1237_v22 = vld [vmem:[%s1395_s7 + $0x38] sm:$0xff]  }
  0x34   : > { %1126 = vmatprep.subr.bf16.mxu0 %v1218_v3  ;;  %1171 = vmatprep.subr.bf16.mxu1 %v1218_v3  ;;  %v1236_v21 = vld [vmem:[%s1395_s7 + $0x70] sm:$0xff]   ;;  %v1238_v23 = vld [vmem:[%s1395_s7 + $0x78] sm:$0xff]  }
  0x37   : > { %1127 = vmatpush3.bf16.msra.mxu0 %v1218_v3  ;;  %1179 = vmatpush3.bf16.msra.mxu1 %v1218_v3 }
  0x38   : > { %1128 = vmatprep.subr.bf16.mxu0 %v1219_v6  ;;  %1172 = vmatprep.subr.bf16.mxu1 %v1219_v6 }
  0x3b   : > { %1129 = vmatpush3.bf16.msra.mxu0 %v1219_v6  ;;  %1180 = vmatpush3.bf16.msra.mxu1 %v1219_v6 }
  0x3c   : > { %1130 = vmatprep.subr.bf16.mxu0 %v1220_v7  ;;  %1173 = vmatprep.subr.bf16.mxu1 %v1220_v7 }
  0x3f   : > { %1131 = vmatpush3.bf16.msra.mxu0 %v1220_v7  ;;  %1181 = vmatpush3.bf16.msra.mxu1 %v1220_v7 }
  0x40   : > { %1132 = vmatprep.subr.bf16.mxu0 %v1221_v8  ;;  %1174 = vmatprep.subr.bf16.mxu1 %v1221_v8 }
  0x43   : > { %1133 = vmatpush3.bf16.msra.mxu0 %v1221_v8  ;;  %1182 = vmatpush3.bf16.msra.mxu1 %v1221_v8 }
  0x44   : > { %1134 = vmatprep.subr.bf16.mxu0 %v1222_v9  ;;  %1175 = vmatprep.subr.bf16.mxu1 %v1222_v9 }
  0x47   : > { %1135 = vmatpush3.bf16.msra.mxu0 %v1222_v9  ;;  %1183 = vmatpush3.bf16.msra.mxu1 %v1222_v9 }
  0x4a   : > { %1137 = vmatmul.mubr.bf16.vlgmr.msra.gmra.mxu0 %v1225_v10  ;;  %1153 = vmatmul.mubr.bf16.vlgmr.msra.gmra.mxu1 %v1226_v11 }
  0x4b   : > { %1140 = vmatprep.mubr.bf16.mxu0 %v1227_v12  ;;  %1156 = vmatprep.mubr.bf16.mxu1 %v1228_v13 }
  0x52   : > { %1141 = vmatmul.mubr.bf16.gmra.mxu0 %v1229_v14  ;;  %1157 = vmatmul.mubr.bf16.gmra.mxu1 %v1230_v15 }
  0x53   : > { %1144 = vmatprep.mubr.bf16.mxu0 %v1231_v16  ;;  %1160 = vmatprep.mubr.bf16.mxu1 %v1232_v17 }
  0x5a   : > { %1145 = vmatmul.mubr.bf16.gmra.mxu0 %v1233_v18  ;;  %1161 = vmatmul.mubr.bf16.gmra.mxu1 %v1234_v19 }
  0x5b   : > { %1148 = vmatprep.mubr.bf16.mxu0 %v1235_v20  ;;  %1164 = vmatprep.mubr.bf16.mxu1 %v1236_v21 }
  0x62   : > { %1149 = vmatmul.mubr.bf16.gmra.mxu0 %v1237_v22  ;;  %1165 = vmatmul.mubr.bf16.gmra.mxu1 %v1238_v23 }
 0x10a   : > { %v1138_v25 = vpop.f32.mrf.mxu0  ;;  %v1154_v26 = vpop.f32.mrf.mxu1 }
 0x10b   : > { %v445_v27 = vadd.f32 %v1138_v25, %v1413_v24  ;;  %v509_v28 = vadd.f32 %v1154_v26, %v1413_v24 }
 0x10c   : > { %v436_v29 = vpop.f32.mrf.mxu0  ;;  %v500_v30 = vpop.f32.mrf.mxu1 }
 0x10d   : > { %vm565_vm0 = vcmp.ge.f32.partialorder %v445_v27, 0.0  ;;  %v597_v31 = vmul.f32 0.2, %v445_v27  ;;  %vm581_vm1 = vcmp.ge.f32.partialorder %v509_v28, 0.0  ;;  %v613_v32 = vmul.f32 0.2, %v509_v28 }
 0x10e   : > { %v437_v33 = vadd.f32 %v1413_v24, %v436_v29  ;;  %v501_v34 = vadd.f32 %v1413_v24, %v500_v30  ;;  %v1139_v35 = vpop.f32.mrf.mxu0  ;;  %v1155_v36 = vpop.f32.mrf.mxu1 }
 0x10f   : > { %v629_v37 = vsel %vm565_vm0, %v445_v27, %v597_v31  ;;  %v448_v38 = vadd.f32 %v1139_v35, %v1413_v24  ;;  %v512_v39 = vadd.f32 %v1155_v36, %v1413_v24  ;;  %v645_v40 = vsel %vm581_vm1, %v509_v28, %v613_v32 }
 0x110   : > { %vm563_vm2 = vcmp.ge.f32.partialorder %v437_v33, 0.0  ;;  %v595_v41 = vmul.f32 0.2, %v437_v33  ;;  %vm579_vm3 = vcmp.ge.f32.partialorder %v501_v34, 0.0  ;;  %v439_v42 = vpop.f32.mrf.mxu0  ;;  %v503_v43 = vpop.f32.mrf.mxu1  ;;  %v611_v47 = vmul.f32 0.2, %v501_v34 }
 0x111   : > { %vm566_vm4 = vcmp.ge.f32.partialorder %v448_v38, 0.0  ;;  %v598_v44 = vmul.f32 0.2, %v448_v38  ;;  %vm582_vm5 = vcmp.ge.f32.partialorder %v512_v39, 0.0  ;;  %v614_v45 = vmul.f32 0.2, %v512_v39 }
 0x112   : > { %v627_v46 = vsel %vm563_vm2, %v437_v33, %v595_v41  ;;  %v440_v48 = vadd.f32 %v1413_v24, %v439_v42  ;;  %v504_v49 = vadd.f32 %v1413_v24, %v503_v43  ;;  %v1142_v50 = vpop.f32.mrf.mxu0  ;;  %v1158_v51 = vpop.f32.mrf.mxu1  ;;  %v643_v63 = vsel %vm579_vm3, %v501_v34, %v611_v47 }
 0x113   : > { %v630_v52 = vsel %vm566_vm4, %v448_v38, %v598_v44  ;;  %v646_v53 = vsel %vm582_vm5, %v512_v39, %v614_v45  ;;  %v461_v54 = vadd.f32 %v1142_v50, %v1413_v24  ;;  %v525_v55 = vadd.f32 %v1158_v51, %v1413_v24 }
 0x114   : > { %v1009_v56 = vpack.c.bf16 %v630_v52, %v629_v37  ;;  %v1049_v57 = vpack.c.bf16 %v646_v53, %v645_v40  ;;  %vm564_vm6 = vcmp.ge.f32.partialorder %v440_v48, 0.0  ;;  %v596_v58 = vmul.f32 0.2, %v440_v48  ;;  %v452_v59 = vpop.f32.mrf.mxu0  ;;  %v516_v60 = vpop.f32.mrf.mxu1 }
 0x115   : > { %vm580_vm7 = vcmp.ge.f32.partialorder %v504_v49, 0.0  ;;  %v612_v61 = vmul.f32 0.2, %v504_v49  ;;  %vm569_vm8 = vcmp.ge.f32.partialorder %v461_v54, 0.0  ;;  %v601_v62 = vmul.f32 0.2, %v461_v54 }
 0x116   : > { %1081 = vst [vmem:[%s1428_s10 + $0x8] sm:$0xff] %v1009_v56   ;;  %1089 = vst [vmem:[%s1428_s10 + $0x48] sm:$0xff] %v1049_v57   ;;  %v628_v0 = vsel %vm564_vm6, %v440_v48, %v596_v58  ;;  %v617_v1 = vmul.f32 0.2, %v525_v55  ;;  %v453_v2 = vadd.f32 %v1413_v24, %v452_v59  ;;  %v1143_v3 = vpop.f32.mrf.mxu0  ;;  %v1159_v4 = vpop.f32.mrf.mxu1  ;;  %vm585_vm9 = vcmp.ge.f32.partialorder %v525_v55, 0.0 }
 0x117   : > { %v1004_v5 = vpack.c.bf16 %v628_v0, %v627_v46  ;;  %v644_v6 = vsel %vm580_vm7, %v504_v49, %v612_v61  ;;  %v517_v7 = vadd.f32 %v1413_v24, %v516_v60  ;;  %v633_v9 = vsel %vm569_vm8, %v461_v54, %v601_v62 }
 0x118   : > { %v1044_v8 = vpack.c.bf16 %v644_v6, %v643_v63  ;;  %vm567_vm10 = vcmp.ge.f32.partialorder %v453_v2, 0.0  ;;  %v599_v10 = vmul.f32 0.2, %v453_v2  ;;  %v455_v11 = vpop.f32.mrf.mxu0  ;;  %v519_v12 = vpop.f32.mrf.mxu1  ;;  %v464_v14 = vadd.f32 %v1143_v3, %v1413_v24 }
 0x119   : > { %1005 = vst [vmem:[%s1428_s10] sm:$0xff] %v1004_v5   ;;  %vm583_vm11 = vcmp.ge.f32.partialorder %v517_v7, 0.0  ;;  %v615_v13 = vmul.f32 0.2, %v517_v7  ;;  %v528_v15 = vadd.f32 %v1159_v4, %v1413_v24  ;;  %v649_v16 = vsel %vm585_vm9, %v525_v55, %v617_v1 }
 0x11a   : > { %1088 = vst [vmem:[%s1428_s10 + $0x40] sm:$0xff] %v1044_v8   ;;  %v631_v17 = vsel %vm567_vm10, %v453_v2, %v599_v10  ;;  %v456_v18 = vadd.f32 %v1413_v24, %v455_v11  ;;  %v520_v19 = vadd.f32 %v1413_v24, %v519_v12  ;;  %v1146_v20 = vpop.f32.mrf.mxu0  ;;  %v1162_v21 = vpop.f32.mrf.mxu1  ;;  %vm570_vm12 = vcmp.ge.f32.partialorder %v464_v14, 0.0 }
 0x11b   : > { %v647_v22 = vsel %vm583_vm11, %v517_v7, %v615_v13  ;;  %v602_v23 = vmul.f32 0.2, %v464_v14  ;;  %vm586_vm13 = vcmp.ge.f32.partialorder %v528_v15, 0.0  ;;  %v618_v25 = vmul.f32 0.2, %v528_v15 }
 0x11c   : > { %vm568_vm14 = vcmp.ge.f32.partialorder %v456_v18, 0.0  ;;  %v600_v26 = vmul.f32 0.2, %v456_v18  ;;  %vm584_vm15 = vcmp.ge.f32.partialorder %v520_v19, 0.0  ;;  %v468_v27 = vpop.f32.mrf.mxu0  ;;  %v532_v28 = vpop.f32.mrf.mxu1  ;;  %v616_v30 = vmul.f32 0.2, %v520_v19 }
 0x11d   : > { %v634_v29 = vsel %vm570_vm12, %v464_v14, %v602_v23  ;;  %v477_v31 = vadd.f32 %v1146_v20, %v1413_v24  ;;  %v541_v32 = vadd.f32 %v1162_v21, %v1413_v24  ;;  %v650_v34 = vsel %vm586_vm13, %v528_v15, %v618_v25 }
 0x11e   : > { %v1019_v33 = vpack.c.bf16 %v634_v29, %v633_v9  ;;  %v632_v35 = vsel %vm568_vm14, %v456_v18, %v600_v26  ;;  %v469_v36 = vadd.f32 %v1413_v24, %v468_v27  ;;  %v1147_v37 = vpop.f32.mrf.mxu0  ;;  %v1163_v38 = vpop.f32.mrf.mxu1  ;;  %v1059_v39 = vpack.c.bf16 %v650_v34, %v649_v16 }
 0x11f   : > { %v1014_v40 = vpack.c.bf16 %v632_v35, %v631_v17  ;;  %v648_v41 = vsel %vm584_vm15, %v520_v19, %v616_v30  ;;  %vm573_vm0 = vcmp.ge.f32.partialorder %v477_v31, 0.0  ;;  %v605_v43 = vmul.f32 0.2, %v477_v31 }
 0x120   : > { %1083 = vst [vmem:[%s1428_s10 + $0x18] sm:$0xff] %v1019_v33   ;;  %v1054_v42 = vpack.c.bf16 %v648_v41, %v647_v22  ;;  %vm589_vm1 = vcmp.ge.f32.partialorder %v541_v32, 0.0  ;;  %v621_v44 = vmul.f32 0.2, %v541_v32  ;;  %v471_v45 = vpop.f32.mrf.mxu0  ;;  %v535_v46 = vpop.f32.mrf.mxu1  ;;  %1091 = vst [vmem:[%s1428_s10 + $0x58] sm:$0xff] %v1059_v39   ;;  %vm571_vm2 = vcmp.ge.f32.partialorder %v469_v36, 0.0 }
 0x121   : > { %1082 = vst [vmem:[%s1428_s10 + $0x10] sm:$0xff] %v1014_v40   ;;  %v603_v47 = vmul.f32 0.2, %v469_v36  ;;  %v533_v48 = vadd.f32 %v1413_v24, %v532_v28  ;;  %v480_v49 = vadd.f32 %v1147_v37, %v1413_v24  ;;  %v637_v50 = vsel %vm573_vm0, %v477_v31, %v605_v43 }
 0x122   : > { %1090 = vst [vmem:[%s1428_s10 + $0x50] sm:$0xff] %v1054_v42   ;;  %v544_v51 = vadd.f32 %v1163_v38, %v1413_v24  ;;  %v472_v52 = vadd.f32 %v1413_v24, %v471_v45  ;;  %v1150_v53 = vpop.f32.mrf.mxu0  ;;  %v1166_v54 = vpop.f32.mrf.mxu1  ;;  %v653_v55 = vsel %vm589_vm1, %v541_v32, %v621_v44  ;;  %v536_v63 = vadd.f32 %v1413_v24, %v535_v46 }
 0x123   : > { %v635_v56 = vsel %vm571_vm2, %v469_v36, %v603_v47  ;;  %vm587_vm3 = vcmp.ge.f32.partialorder %v533_v48, 0.0  ;;  %vm574_vm4 = vcmp.ge.f32.partialorder %v480_v49, 0.0  ;;  %v606_v57 = vmul.f32 0.2, %v480_v49 }
 0x124   : > { %vm590_vm5 = vcmp.ge.f32.partialorder %v544_v51, 0.0  ;;  %v622_v58 = vmul.f32 0.2, %v544_v51  ;;  %vm572_vm6 = vcmp.ge.f32.partialorder %v472_v52, 0.0  ;;  %v484_v59 = vpop.f32.mrf.mxu0  ;;  %v548_v60 = vpop.f32.mrf.mxu1  ;;  %v619_v61 = vmul.f32 0.2, %v533_v48 }
 0x125   : > { %v604_v62 = vmul.f32 0.2, %v472_v52  ;;  %v493_v0 = vadd.f32 %v1150_v53, %v1413_v24  ;;  %v638_v1 = vsel %vm574_vm4, %v480_v49, %v606_v57  ;;  %v557_v3 = vadd.f32 %v1166_v54, %v1413_v24 }
 0x126   : > { %v654_v2 = vsel %vm590_vm5, %v544_v51, %v622_v58  ;;  %v485_v4 = vadd.f32 %v1413_v24, %v484_v59  ;;  %v1151_v5 = vpop.f32.mrf.mxu0  ;;  %v1167_v6 = vpop.f32.mrf.mxu1  ;;  %v1029_v7 = vpack.c.bf16 %v638_v1, %v637_v50  ;;  %vm588_vm7 = vcmp.ge.f32.partialorder %v536_v63, 0.0 }
 0x127   : > { %v1069_v8 = vpack.c.bf16 %v654_v2, %v653_v55  ;;  %v636_v9 = vsel %vm572_vm6, %v472_v52, %v604_v62  ;;  %v620_v11 = vmul.f32 0.2, %v536_v63  ;;  %v609_v12 = vmul.f32 0.2, %v493_v0 }
 0x128   : > { %v1024_v10 = vpack.c.bf16 %v636_v9, %v635_v56  ;;  %v651_v13 = vsel %vm587_vm3, %v533_v48, %v619_v61  ;;  %1085 = vst [vmem:[%s1428_s10 + $0x28] sm:$0xff] %v1029_v7   ;;  %vm577_vm8 = vcmp.ge.f32.partialorder %v493_v0, 0.0  ;;  %v625_v15 = vmul.f32 0.2, %v557_v3  ;;  %v487_v18 = vpop.f32.mrf.mxu0  ;;  %v551_v19 = vpop.f32.mrf.mxu1 }
 0x129   : > { %1093 = vst [vmem:[%s1428_s10 + $0x68] sm:$0xff] %v1069_v8   ;;  %v652_v14 = vsel %vm588_vm7, %v536_v63, %v620_v11  ;;  %v549_v16 = vadd.f32 %v1413_v24, %v548_v60  ;;  %v496_v17 = vadd.f32 %v1151_v5, %v1413_v24  ;;  %vm593_vm9 = vcmp.ge.f32.partialorder %v557_v3, 0.0 }
 0x12a   : > { %1084 = vst [vmem:[%s1428_s10 + $0x20] sm:$0xff] %v1024_v10   ;;  %v1064_v20 = vpack.c.bf16 %v652_v14, %v651_v13  ;;  %vm575_vm10 = vcmp.ge.f32.partialorder %v485_v4, 0.0  ;;  %v560_v21 = vadd.f32 %v1167_v6, %v1413_v24  ;;  %v641_v22 = vsel %vm577_vm8, %v493_v0, %v609_v12 }
 0x12b   : > { %v607_v23 = vmul.f32 0.2, %v485_v4  ;;  %vm578_vm11 = vcmp.ge.f32.partialorder %v496_v17, 0.0  ;;  %v610_v25 = vmul.f32 0.2, %v496_v17  ;;  %v488_v27 = vadd.f32 %v1413_v24, %v487_v18 }
 0x12c   : > { %1092 = vst [vmem:[%s1428_s10 + $0x60] sm:$0xff] %v1064_v20   ;;  %vm594_vm12 = vcmp.ge.f32.partialorder %v560_v21, 0.0  ;;  %v626_v26 = vmul.f32 0.2, %v560_v21  ;;  %v552_v28 = vadd.f32 %v1413_v24, %v551_v19  ;;  %v657_v29 = vsel %vm593_vm9, %v557_v3, %v625_v15 }
 0x12d   : > { %vm591_vm13 = vcmp.ge.f32.partialorder %v549_v16, 0.0  ;;  %v623_v30 = vmul.f32 0.2, %v549_v16  ;;  %v642_v31 = vsel %vm578_vm11, %v496_v17, %v610_v25  ;;  %vm576_vm14 = vcmp.ge.f32.partialorder %v488_v27, 0.0 }
 0x12e   : > { %v1039_v32 = vpack.c.bf16 %v642_v31, %v641_v22  ;;  %v658_v33 = vsel %vm594_vm12, %v560_v21, %v626_v26  ;;  %v608_v34 = vmul.f32 0.2, %v488_v27  ;;  %vm592_vm15 = vcmp.ge.f32.partialorder %v552_v28, 0.0 }
 0x12f   : > { %v1079_v35 = vpack.c.bf16 %v658_v33, %v657_v29  ;;  %v624_v36 = vmul.f32 0.2, %v552_v28  ;;  %v639_v37 = vsel %vm575_vm10, %v485_v4, %v607_v23  ;;  %v655_v39 = vsel %vm591_vm13, %v549_v16, %v623_v30 }
 0x130   : > { %1087 = vst [vmem:[%s1428_s10 + $0x38] sm:$0xff] %v1039_v32   ;;  %v640_v38 = vsel %vm576_vm14, %v488_v27, %v608_v34 }
 0x131   : > { %1095 = vst [vmem:[%s1428_s10 + $0x78] sm:$0xff] %v1079_v35   ;;  %v1034_v24 = vpack.c.bf16 %v640_v38, %v639_v37  ;;  %v656_v40 = vsel %vm592_vm15, %v552_v28, %v624_v36 }
 0x132   : > { %v1074_v41 = vpack.c.bf16 %v656_v40, %v655_v39 }
 0x133   : > { %1086 = vst [vmem:[%s1428_s10 + $0x30] sm:$0xff] %v1034_v24  }
 0x134   : > { %1094 = vst [vmem:[%s1428_s10 + $0x70] sm:$0xff] %v1074_v41  }
 0x135 PF: > { %s15_s12 = sadd.s32 1, %s1305_s12  }
 0x136   : > { %p12_p2 = scmp.ge.s32.totalorder %s15_s12, 4  }
 0x138   :  { %14 = sbr.rel (!%p12_p2) target bundleno = 2 (0x2), region = 71 }
 0x13d   :  { %841 = vsyncpa [#allocation3], 1 }
 0x13e   :  { %843 = vsyncpa [#allocation3 + $0x1], 1 }
 0x13f   :  { %844 = vsyncpa [#allocation5], 1 }

// kernel: forward_real.9
= control target key start
LH: loop header
LB: loop body
LE: loop exit
PB: predicated region body
PF: predicated region fallthrough
CT: control target
= control target key end

     0   :  { %s1781_s15 = smov 0   ;;  %s2075_s0 = inlined_call_operand.vmem [shape: bf16[128,1024], index: 0, kind: input, shape index: {}]   ;;  %s2076_s1 = inlined_call_operand.vmem [shape: bf16[1024,128], index: 1, kind: input, shape index: {}]   ;;  %s2077_s2 = inlined_call_operand.vmem [shape: bf16[128,128], index: 2, kind: output, shape index: {0}]   ;;  %s2078_s3 = inlined_call_operand.vmem [shape: f32[2,1,128], index: 3, kind: output, shape index: {1}]   ;;  %s2079_s4 = inlined_call_operand.vmem [shape: f32[2,1,128], index: 4, kind: output, shape index: {2}]  }
   0x1 LB: > { %s1787_s16 = sadd.s32 4294967295, %s1754_s15   ;;  %p1372_p0 = scmp.ge.s32.totalorder %s1754_s15, 1  ;;  %s1754_s15 = sphi %s1781_s15, %s15_s15  }
   0x2   : > { %p169_p1 = scmp.lt.s32.totalorder %s1754_s15, 3 }
   0x4   : > { %p170_p2 = pnand %p1372_p0, %p169_p1 }
   0x5   : > { %s1373_s25 = sshll.u32 (!%p170_p2), %s1787_s16, 3  ;;  %p215_p4 = scmp.lt.s32.totalorder (!%p170_p2), %s1787_s16, 1 }
   0x6   : > { %173 = sbr.rel (%p170_p2) target bundleno = 323 (0x143), region = 28  ;;  %p203_p3 = scmp.lt.s32.totalorder (!%p170_p2), %s1373_s25, 15 }
   0xb   : > { %v1684_v0 = vld [vmem:[%s2076_s1 + $0x78] sm:$0xff]   ;;  %v1688_v4 = vld [vmem:[%s2076_s1 + $0x70] sm:$0xff]   ;;  %v1692_v8 = vld [vmem:[%s2076_s1 + $0x68] sm:$0xff]   ;;  %s2081_s25 = smov (!%p203_p3, %s1373_s25), 15  ;;  %s2083_s16 = smov (!%p215_p4, %s1787_s16), 1 }
   0xc   : > { %v1685_v1 = vld [vmem:[%s2076_s1 + $0xf8] sm:$0xff]   ;;  %1516 = vmatprep.subr.bf16.mxu0 %v1684_v0  ;;  %v1689_v5 = vld [vmem:[%s2076_s1 + $0xf0] sm:$0xff]   ;;  %v1693_v9 = vld [vmem:[%s2076_s1 + $0xe8] sm:$0xff]   ;;  %s1484_s24 = sshll.u32 %s2081_s25, 5  ;;  %s217_s17 = scalar_lea.vmem %s2078_s3, %s2083_s16 }
   0xd   : > { %v1686_v2 = vld [vmem:[%s2076_s1 + $0x38] sm:$0xff]   ;;  %1556 = vmatprep.subr.bf16.mxu1 %v1685_v1  ;;  %v1690_v6 = vld [vmem:[%s2076_s1 + $0x30] sm:$0xff]   ;;  %v1694_v10 = vld [vmem:[%s2076_s1 + $0x28] sm:$0xff]   ;;  %s1888_s8 = scalar_lea.vmem %s2075_s0, %s1484_s24  ;;  %s220_s20 = scalar_lea.vmem %s2079_s4, %s2083_s16 }
   0xe   : > { %v1687_v3 = vld [vmem:[%s2076_s1 + $0xb8] sm:$0xff]   ;;  %1517 = vmatpush3.bf16.msra.mxu0 %v1686_v2  ;;  %v1691_v7 = vld [vmem:[%s2076_s1 + $0xb0] sm:$0xff]   ;;  %v1695_v11 = vld [vmem:[%s2076_s1 + $0xa8] sm:$0xff]  }
   0xf   : > { %1557 = vmatpush3.bf16.msra.mxu1 %v1687_v3  ;;  %1518 = vmatprep.subr.bf16.mxu0 %v1688_v4  ;;  %v1696_v12 = vld [vmem:[%s2076_s1 + $0x60] sm:$0xff]   ;;  %v1700_v16 = vld [vmem:[%s2076_s1 + $0x58] sm:$0xff]   ;;  %v1704_v20 = vld [vmem:[%s2076_s1 + $0x50] sm:$0xff]  }
  0x10   : > { %1558 = vmatprep.subr.bf16.mxu1 %v1689_v5  ;;  %v1697_v13 = vld [vmem:[%s2076_s1 + $0xe0] sm:$0xff]   ;;  %v1701_v17 = vld [vmem:[%s2076_s1 + $0xd8] sm:$0xff]   ;;  %v1705_v21 = vld [vmem:[%s2076_s1 + $0xd0] sm:$0xff]  }
  0x11   : > { %v1698_v14 = vld [vmem:[%s2076_s1 + $0x20] sm:$0xff]   ;;  %v1702_v18 = vld [vmem:[%s2076_s1 + $0x18] sm:$0xff]   ;;  %v1706_v22 = vld [vmem:[%s2076_s1 + $0x10] sm:$0xff]  }
  0x12   : > { %1519 = vmatpush3.bf16.msra.mxu0 %v1690_v6  ;;  %v1699_v15 = vld [vmem:[%s2076_s1 + $0xa0] sm:$0xff]   ;;  %v1703_v19 = vld [vmem:[%s2076_s1 + $0x98] sm:$0xff]   ;;  %v1707_v23 = vld [vmem:[%s2076_s1 + $0x90] sm:$0xff]  }
  0x13   : > { %1559 = vmatpush3.bf16.msra.mxu1 %v1691_v7  ;;  %1520 = vmatprep.subr.bf16.mxu0 %v1692_v8  ;;  %v1708_v24 = vld [vmem:[%s2076_s1 + $0x48] sm:$0xff]   ;;  %v1712_v28 = vld [vmem:[%s2076_s1 + $0x40] sm:$0xff]   ;;  %v1716_v40 = vld [vmem:[%s2076_s1 + $0x178] sm:$0xff]  }
  0x14   : > { %1560 = vmatprep.subr.bf16.mxu1 %v1693_v9  ;;  %v1709_v25 = vld [vmem:[%s2076_s1 + $0xc8] sm:$0xff]   ;;  %v1713_v29 = vld [vmem:[%s2076_s1 + $0xc0] sm:$0xff]   ;;  %v1717_v41 = vld [vmem:[%s2076_s1 + $0x1f8] sm:$0xff]  }
  0x15   : > { %v1710_v26 = vld [vmem:[%s2076_s1 + $0x8] sm:$0xff]   ;;  %v1714_v30 = vld [vmem:[%s2076_s1] sm:$0xff]   ;;  %v1718_v42 = vld [vmem:[%s2076_s1 + $0x138] sm:$0xff]  }
  0x16   : > { %1521 = vmatpush3.bf16.msra.mxu0 %v1694_v10  ;;  %v1711_v27 = vld [vmem:[%s2076_s1 + $0x88] sm:$0xff]   ;;  %v1715_v31 = vld [vmem:[%s2076_s1 + $0x80] sm:$0xff]   ;;  %v1719_v43 = vld [vmem:[%s2076_s1 + $0x1b8] sm:$0xff]  }
  0x17   : > { %1561 = vmatpush3.bf16.msra.mxu1 %v1695_v11  ;;  %1522 = vmatprep.subr.bf16.mxu0 %v1696_v12  ;;  %v222_v32 = vld [vmem:[%s1888_s8] sm:$0xff]  ;;  %v223_v34 = vld [vmem:[%s1888_s8 + $0x8] sm:$0xff]  ;;  %v1720_v44 = vld [vmem:[%s2076_s1 + $0x170] sm:$0xff]  }
  0x18   : > { %1562 = vmatprep.subr.bf16.mxu1 %v1697_v13  ;;  %v226_v33 = vld [vmem:[%s1888_s8 + $0x20] sm:$0xff]  ;;  %v227_v37 = vld [vmem:[%s1888_s8 + $0x28] sm:$0xff]  ;;  %v1721_v45 = vld [vmem:[%s2076_s1 + $0x1f0] sm:$0xff]  }
  0x19   : > { %v1378_v35 = vcombine.low %v222_v32, %v226_v33  ;;  %v1379_v36 = vcombine.high %v222_v32, %v226_v33  ;;  %v1380_v38 = vcombine.low %v223_v34, %v227_v37  ;;  %v1381_v39 = vcombine.high %v223_v34, %v227_v37  ;;  %v1722_v46 = vld [vmem:[%s2076_s1 + $0x130] sm:$0xff]   ;;  %v230_v48 = vld [vmem:[%s1888_s8 + $0x40] sm:$0xff]  ;;  %v231_v51 = vld [vmem:[%s1888_s8 + $0x48] sm:$0xff] }
  0x1a   : > { %1523 = vmatpush3.bf16.msra.mxu0 %v1698_v14  ;;  %v1723_v47 = vld [vmem:[%s2076_s1 + $0x1b0] sm:$0xff]   ;;  %v234_v49 = vld [vmem:[%s1888_s8 + $0x60] sm:$0xff]  ;;  %v235_v52 = vld [vmem:[%s1888_s8 + $0x68] sm:$0xff] }
  0x1b   : > { %1563 = vmatpush3.bf16.msra.mxu1 %v1699_v15  ;;  %1524 = vmatprep.subr.bf16.mxu0 %v1700_v16  ;;  %v1387_v50 = vcombine.high %v230_v48, %v234_v49  ;;  %v1386_v53 = vcombine.low %v230_v48, %v234_v49  ;;  %v1389_v54 = vcombine.high %v231_v51, %v235_v52  ;;  %v1724_v56 = vld [vmem:[%s2076_s1 + $0x168] sm:$0xff]   ;;  %v1728_v60 = vld [vmem:[%s2076_s1 + $0x160] sm:$0xff]   ;;  %v1732_v8 = vld [vmem:[%s2076_s1 + $0x158] sm:$0xff]  }
  0x1c   : > { %1564 = vmatprep.subr.bf16.mxu1 %v1701_v17  ;;  %958 = vmatprep.mubr.bf16.mxu0 %v1379_v36  ;;  %v1388_v55 = vcombine.low %v231_v51, %v235_v52  ;;  %v1725_v57 = vld [vmem:[%s2076_s1 + $0x1e8] sm:$0xff]   ;;  %v1729_v61 = vld [vmem:[%s2076_s1 + $0x1e0] sm:$0xff]   ;;  %v1733_v9 = vld [vmem:[%s2076_s1 + $0x1d8] sm:$0xff]  }
  0x1d   : > { %1023 = vmatprep.mubr.bf16.mxu1 %v1381_v39  ;;  %v1726_v58 = vld [vmem:[%s2076_s1 + $0x128] sm:$0xff]   ;;  %v1730_v62 = vld [vmem:[%s2076_s1 + $0x120] sm:$0xff]   ;;  %v1734_v10 = vld [vmem:[%s2076_s1 + $0x118] sm:$0xff]  }
  0x1e   : > { %1525 = vmatpush3.bf16.msra.mxu0 %v1702_v18  ;;  %v1727_v59 = vld [vmem:[%s2076_s1 + $0x1a8] sm:$0xff]   ;;  %v1731_v63 = vld [vmem:[%s2076_s1 + $0x1a0] sm:$0xff]   ;;  %v1735_v11 = vld [vmem:[%s2076_s1 + $0x198] sm:$0xff]  }
  0x1f   : > { %1565 = vmatpush3.bf16.msra.mxu1 %v1703_v19  ;;  %1526 = vmatprep.subr.bf16.mxu0 %v1704_v20  ;;  %v238_v0 = vld [vmem:[%s1888_s8 + $0x80] sm:$0xff]  ;;  %v239_v2 = vld [vmem:[%s1888_s8 + $0x88] sm:$0xff]  ;;  %v1736_v12 = vld [vmem:[%s2076_s1 + $0x150] sm:$0xff]  }
  0x20   : > { %1566 = vmatprep.subr.bf16.mxu1 %v1705_v21  ;;  %v242_v1 = vld [vmem:[%s1888_s8 + $0xa0] sm:$0xff]  ;;  %v243_v3 = vld [vmem:[%s1888_s8 + $0xa8] sm:$0xff]  ;;  %v1737_v13 = vld [vmem:[%s2076_s1 + $0x1d0] sm:$0xff]  }
  0x21   : > { %v1395_v4 = vcombine.high %v238_v0, %v242_v1  ;;  %v1397_v5 = vcombine.high %v239_v2, %v243_v3  ;;  %v1394_v6 = vcombine.low %v238_v0, %v242_v1  ;;  %v1396_v7 = vcombine.low %v239_v2, %v243_v3  ;;  %v1738_v14 = vld [vmem:[%s2076_s1 + $0x110] sm:$0xff]   ;;  %v246_v16 = vld [vmem:[%s1888_s8 + $0xc0] sm:$0xff]  ;;  %v247_v18 = vld [vmem:[%s1888_s8 + $0xc8] sm:$0xff] }
  0x22   : > { %1527 = vmatpush3.bf16.msra.mxu0 %v1706_v22  ;;  %v1739_v15 = vld [vmem:[%s2076_s1 + $0x190] sm:$0xff]   ;;  %v250_v17 = vld [vmem:[%s1888_s8 + $0xe0] sm:$0xff]  ;;  %v251_v20 = vld [vmem:[%s1888_s8 + $0xe8] sm:$0xff] }
  0x23   : > { %1567 = vmatpush3.bf16.msra.mxu1 %v1707_v23  ;;  %1528 = vmatprep.subr.bf16.mxu0 %v1708_v24  ;;  %v1403_v19 = vcombine.high %v246_v16, %v250_v17  ;;  %v1402_v21 = vcombine.low %v246_v16, %v250_v17  ;;  %v1405_v22 = vcombine.high %v247_v18, %v251_v20  ;;  %v1740_v24 = vld [vmem:[%s2076_s1 + $0x148] sm:$0xff]   ;;  %v224_v32 = vld [vmem:[%s1888_s8 + $0x10] sm:$0xff]  ;;  %v225_v36 = vld [vmem:[%s1888_s8 + $0x18] sm:$0xff] }
  0x24   : > { %1568 = vmatprep.subr.bf16.mxu1 %v1709_v25  ;;  %v1404_v23 = vcombine.low %v247_v18, %v251_v20  ;;  %v1741_v25 = vld [vmem:[%s2076_s1 + $0x1c8] sm:$0xff]   ;;  %v228_v33 = vld [vmem:[%s1888_s8 + $0x30] sm:$0xff]  ;;  %v229_v37 = vld [vmem:[%s1888_s8 + $0x38] sm:$0xff] }
  0x25   : > { %v1382_v34 = vcombine.low %v224_v32, %v228_v33  ;;  %v1384_v39 = vcombine.low %v225_v36, %v229_v37  ;;  %v241_v48 = vld [vmem:[%s1888_s8 + $0x98] sm:$0xff] }
  0x26   : > { %1529 = vmatpush3.bf16.msra.mxu0 %v1710_v26  ;;  %v1742_v26 = vld [vmem:[%s2076_s1 + $0x108] sm:$0xff]   ;;  %v245_v49 = vld [vmem:[%s1888_s8 + $0xb8] sm:$0xff] }
  0x27   : > { %1569 = vmatpush3.bf16.msra.mxu1 %v1711_v27  ;;  %1530 = vmatprep.subr.bf16.mxu0 %v1712_v28  ;;  %v1743_v27 = vld [vmem:[%s2076_s1 + $0x188] sm:$0xff]   ;;  %v1744_v28 = vld [vmem:[%s2076_s1 + $0x140] sm:$0xff]  }
  0x28   : > { %1570 = vmatprep.subr.bf16.mxu1 %v1713_v29  ;;  %v1745_v29 = vld [vmem:[%s2076_s1 + $0x1c0] sm:$0xff]  }
  0x2a   : > { %1531 = vmatpush3.bf16.msra.mxu0 %v1714_v30  ;;  %v1746_v30 = vld [vmem:[%s2076_s1 + $0x100] sm:$0xff]  }
  0x2b   : > { %1571 = vmatpush3.bf16.msra.mxu1 %v1715_v31  ;;  %1596 = vmatprep.subr.bf16.mxu0 %v1716_v40  ;;  %v1747_v31 = vld [vmem:[%s2076_s1 + $0x180] sm:$0xff]   ;;  %v1385_v40 = vcombine.high %v225_v36, %v229_v37 }
  0x2c   : > { %1636 = vmatprep.subr.bf16.mxu1 %v1717_v41  ;;  %v236_v41 = vld [vmem:[%s1888_s8 + $0x70] sm:$0xff] }
  0x2d   : > { %959 = vmatmul.mubr.bf16.vlgmr.msra.gmra.mxu0 %v1378_v35  ;;  %v1383_v35 = vcombine.high %v224_v32, %v228_v33 }
  0x2e   : > { %1024 = vmatmul.mubr.bf16.vlgmr.msra.gmra.mxu1 %v1380_v38  ;;  %1597 = vmatpush3.bf16.msra.mxu0 %v1718_v42  ;;  %v232_v38 = vld [vmem:[%s1888_s8 + $0x50] sm:$0xff]  ;;  %v233_v42 = vld [vmem:[%s1888_s8 + $0x58] sm:$0xff] }
  0x2f   : > { %1637 = vmatpush3.bf16.msra.mxu1 %v1719_v43  ;;  %1598 = vmatprep.subr.bf16.mxu0 %v1720_v44  ;;  %v237_v43 = vld [vmem:[%s1888_s8 + $0x78] sm:$0xff]  ;;  %v1391_v44 = vcombine.high %v232_v38, %v236_v41 }
  0x30   : > { %1638 = vmatprep.subr.bf16.mxu1 %v1721_v45  ;;  %966 = vmatprep.mubr.bf16.mxu0 %v1387_v50  ;;  %v1393_v45 = vcombine.high %v233_v42, %v237_v43  ;;  %v1390_v50 = vcombine.low %v232_v38, %v236_v41  ;;  %v1392_v51 = vcombine.low %v233_v42, %v237_v43 }
  0x31   : > { %1031 = vmatprep.mubr.bf16.mxu1 %v1389_v54  ;;  %v248_v54 = vld [vmem:[%s1888_s8 + $0xd0] sm:$0xff] }
  0x32   : > { %1599 = vmatpush3.bf16.msra.mxu0 %v1722_v46  ;;  %v240_v46 = vld [vmem:[%s1888_s8 + $0x90] sm:$0xff] }
  0x33   : > { %1639 = vmatpush3.bf16.msra.mxu1 %v1723_v47  ;;  %1600 = vmatprep.subr.bf16.mxu0 %v1724_v56  ;;  %v244_v47 = vld [vmem:[%s1888_s8 + $0xb0] sm:$0xff]  ;;  %v249_v56 = vld [vmem:[%s1888_s8 + $0xd8] sm:$0xff] }
  0x34   : > { %1640 = vmatprep.subr.bf16.mxu1 %v1725_v57  ;;  %v1399_v52 = vcombine.high %v240_v46, %v244_v47  ;;  %v253_v57 = vld [vmem:[%s1888_s8 + $0xf8] sm:$0xff] }
  0x35   : > { %967 = vmatmul.mubr.bf16.gmra.mxu0 %v1386_v53  ;;  %v1401_v53 = vcombine.high %v241_v48, %v245_v49 }
  0x36   : > { %1032 = vmatmul.mubr.bf16.gmra.mxu1 %v1388_v55  ;;  %1601 = vmatpush3.bf16.msra.mxu0 %v1726_v58  ;;  %v252_v55 = vld [vmem:[%s1888_s8 + $0xf0] sm:$0xff]  ;;  %v1398_v58 = vcombine.low %v240_v46, %v244_v47  ;;  %s1377_s8 = sshll.u32 %s2081_s25, 2 }
  0x37   : > { %1641 = vmatpush3.bf16.msra.mxu1 %v1727_v59  ;;  %1602 = vmatprep.subr.bf16.mxu0 %v1728_v60  ;;  %v1400_v59 = vcombine.low %v241_v48, %v245_v49  ;;  %v1407_v60 = vcombine.high %v248_v54, %v252_v55  ;;  %s2048_s13 = scalar_lea.vmem %s2077_s2, %s1377_s8 }
  0x38   : > { %1642 = vmatprep.subr.bf16.mxu1 %v1729_v61  ;;  %974 = vmatprep.mubr.bf16.mxu0 %v1395_v4  ;;  %v1409_v61 = vcombine.high %v249_v56, %v253_v57 }
  0x39   : > { %1039 = vmatprep.mubr.bf16.mxu1 %v1397_v5 }
  0x3a   : > { %1603 = vmatpush3.bf16.msra.mxu0 %v1730_v62  ;;  %v1406_v62 = vcombine.low %v248_v54, %v252_v55 }
  0x3b   : > { %1643 = vmatpush3.bf16.msra.mxu1 %v1731_v63  ;;  %1604 = vmatprep.subr.bf16.mxu0 %v1732_v8  ;;  %v1408_v63 = vcombine.low %v249_v56, %v253_v57 }
  0x3c   : > { %1644 = vmatprep.subr.bf16.mxu1 %v1733_v9 }
  0x3d   : > { %975 = vmatmul.mubr.bf16.gmra.mxu0 %v1394_v6 }
  0x3e   : > { %1040 = vmatmul.mubr.bf16.gmra.mxu1 %v1396_v7  ;;  %1605 = vmatpush3.bf16.msra.mxu0 %v1734_v10 }
  0x3f   : > { %1645 = vmatpush3.bf16.msra.mxu1 %v1735_v11  ;;  %1606 = vmatprep.subr.bf16.mxu0 %v1736_v12 }
  0x40   : > { %1646 = vmatprep.subr.bf16.mxu1 %v1737_v13  ;;  %982 = vmatprep.mubr.bf16.mxu0 %v1403_v19 }
  0x41   : > { %1047 = vmatprep.mubr.bf16.mxu1 %v1405_v22 }
  0x42   : > { %1607 = vmatpush3.bf16.msra.mxu0 %v1738_v14 }
  0x43   : > { %1647 = vmatpush3.bf16.msra.mxu1 %v1739_v15  ;;  %1608 = vmatprep.subr.bf16.mxu0 %v1740_v24 }
  0x44   : > { %1648 = vmatprep.subr.bf16.mxu1 %v1741_v25 }
  0x45   : > { %983 = vmatmul.mubr.bf16.gmra.mxu0 %v1402_v21 }
  0x46   : > { %1048 = vmatmul.mubr.bf16.gmra.mxu1 %v1404_v23  ;;  %1609 = vmatpush3.bf16.msra.mxu0 %v1742_v26 }
  0x47   : > { %1649 = vmatpush3.bf16.msra.mxu1 %v1743_v27  ;;  %1610 = vmatprep.subr.bf16.mxu0 %v1744_v28 }
  0x48   : > { %1650 = vmatprep.subr.bf16.mxu1 %v1745_v29  ;;  %1088 = vmatprep.mubr.bf16.mxu0 %v1383_v35 }
  0x49   : > { %1153 = vmatprep.mubr.bf16.mxu1 %v1385_v40 }
  0x4a   : > { %1611 = vmatpush3.bf16.msra.mxu0 %v1746_v30 }
  0x4b   : > { %1651 = vmatpush3.bf16.msra.mxu1 %v1747_v31 }
  0x4d   : > { %1089 = vmatmul.mubr.bf16.vlgmr.msra.gmra.mxu0 %v1382_v34 }
  0x4e   : > { %1154 = vmatmul.mubr.bf16.vlgmr.msra.gmra.mxu1 %v1384_v39  ;;  %1096 = vmatprep.mubr.bf16.mxu0 %v1391_v44 }
  0x4f   : > { %1161 = vmatprep.mubr.bf16.mxu1 %v1393_v45 }
  0x55   : > { %1097 = vmatmul.mubr.bf16.gmra.mxu0 %v1390_v50 }
  0x56   : > { %1162 = vmatmul.mubr.bf16.gmra.mxu1 %v1392_v51  ;;  %1104 = vmatprep.mubr.bf16.mxu0 %v1399_v52 }
  0x57   : > { %1169 = vmatprep.mubr.bf16.mxu1 %v1401_v53 }
  0x5d   : > { %1105 = vmatmul.mubr.bf16.gmra.mxu0 %v1398_v58 }
  0x5e   : > { %1170 = vmatmul.mubr.bf16.gmra.mxu1 %v1400_v59  ;;  %1112 = vmatprep.mubr.bf16.mxu0 %v1407_v60 }
  0x5f   : > { %1177 = vmatprep.mubr.bf16.mxu1 %v1409_v61 }
  0x65   : > { %1113 = vmatmul.mubr.bf16.gmra.mxu0 %v1406_v62 }
  0x66   : > { %1178 = vmatmul.mubr.bf16.gmra.mxu1 %v1408_v63 }
  0xed   : > { %v1532_v0 = vpop.f32.mrf.mxu0 }
  0xee   : > { %v1572_v1 = vpop.f32.mrf.mxu1 }
  0xef   : > { %v1533_v2 = vpop.f32.mrf.mxu0 }
  0xf0   : > { %v1573_v3 = vpop.f32.mrf.mxu1  ;;  %v1534_v33 = vadd.f32 %v1533_v2, %v1532_v0 }
  0xf1   : > { %v1535_v4 = vpop.f32.mrf.mxu0  ;;  %v1574_v34 = vadd.f32 %v1573_v3, %v1572_v1 }
  0xf2   : > { %v1575_v5 = vpop.f32.mrf.mxu1 }
  0xf3   : > { %v1536_v6 = vpop.f32.mrf.mxu0  ;;  %v1026_v42 = vadd.f32 %v1574_v34, %v1534_v33 }
  0xf4   : > { %v1576_v7 = vpop.f32.mrf.mxu1  ;;  %v1537_v37 = vadd.f32 %v1536_v6, %v1535_v4 }
  0xf5   : > { %v1538_v8 = vpop.f32.mrf.mxu0  ;;  %v1577_v38 = vadd.f32 %v1576_v7, %v1575_v5 }
  0xf6   : > { %v1578_v9 = vpop.f32.mrf.mxu1 }
  0xf7   : > { %v1539_v10 = vpop.f32.mrf.mxu0  ;;  %v1029_v45 = vadd.f32 %v1577_v38, %v1537_v37 }
  0xf8   : > { %v1579_v11 = vpop.f32.mrf.mxu1  ;;  %v1540_v49 = vadd.f32 %v1539_v10, %v1538_v8 }
  0xf9   : > { %v1541_v12 = vpop.f32.mrf.mxu0  ;;  %v1580_v51 = vadd.f32 %v1579_v11, %v1578_v9 }
  0xfa   : > { %v1581_v13 = vpop.f32.mrf.mxu1 }
  0xfb   : > { %v1542_v14 = vpop.f32.mrf.mxu0  ;;  %v1034_v0 = vadd.f32 %v1580_v51, %v1540_v49 }
  0xfc   : > { %v1582_v15 = vpop.f32.mrf.mxu1  ;;  %v1543_v56 = vadd.f32 %v1542_v14, %v1541_v12 }
  0xfd   : > { %v1544_v16 = vpop.f32.mrf.mxu0  ;;  %v1583_v58 = vadd.f32 %v1582_v15, %v1581_v13 }
  0xfe   : > { %v1584_v17 = vpop.f32.mrf.mxu1 }
  0xff   : > { %v1545_v18 = vpop.f32.mrf.mxu0  ;;  %v1037_v6 = vadd.f32 %v1583_v58, %v1543_v56 }
 0x100   : > { %v1585_v19 = vpop.f32.mrf.mxu1  ;;  %v1546_v3 = vadd.f32 %v1545_v18, %v1544_v16 }
 0x101   : > { %v2024_v20 = vpop.f32.mrf.mxu0  ;;  %v1586_v4 = vadd.f32 %v1585_v19, %v1584_v17 }
 0x102   : > { %v2026_v21 = vpop.f32.mrf.mxu1 }
 0x103   : > { %v1548_v22 = vpop.f32.mrf.mxu0  ;;  %v1042_v15 = vadd.f32 %v1586_v4, %v1546_v3 }
 0x104   : > { %v1588_v23 = vpop.f32.mrf.mxu1 }
 0x105   : > { %v2028_v24 = vpop.f32.mrf.mxu0  ;;  %v1589_v34 = vadd.f32 %v1588_v23, %v2026_v21 }
 0x106   : > { %v2030_v25 = vpop.f32.mrf.mxu1 }
 0x107   : > { %v2032_v26 = vpop.f32.mrf.mxu0 }
 0x108   : > { %v2034_v27 = vpop.f32.mrf.mxu1 }
 0x109   : > { %v2036_v28 = vpop.f32.mrf.mxu0 }
 0x10a   : > { %v2038_v29 = vpop.f32.mrf.mxu1 }
 0x10b   : > { %v2040_v30 = vpop.f32.mrf.mxu0 }
 0x10c   : > { %v2042_v31 = vpop.f32.mrf.mxu1  ;;  %v1555_v51 = vadd.f32 %v2040_v30, %v2036_v28 }
 0x10d   : > { %v1612_v32 = vpop.f32.mrf.mxu0 }
 0x10e   : > { %v1652_v35 = vpop.f32.mrf.mxu1 }
 0x10f   : > { %v1613_v36 = vpop.f32.mrf.mxu0 }
 0x110   : > { %v1614_v39 = vadd.f32 %v1613_v36, %v1612_v32  ;;  %v1653_v40 = vpop.f32.mrf.mxu1  ;;  %v1549_v32 = vadd.f32 %v1548_v22, %v2024_v20  ;;  %v1592_v20 = vadd.f32 %v2034_v27, %v2030_v25 }
 0x111   : > { %v1615_v41 = vpop.f32.mrf.mxu0  ;;  %v1654_v52 = vadd.f32 %v1653_v40, %v1652_v35 }
 0x112   : > { %v1655_v43 = vpop.f32.mrf.mxu1  ;;  %v1091_v46 = vadd.f32 %v1614_v39, %v1026_v42  ;;  %v1045_v42 = vadd.f32 %v1589_v34, %v1549_v32 }
 0x113   : > { %v1616_v44 = vpop.f32.mrf.mxu0 }
 0x114   : > { %v1617_v47 = vadd.f32 %v1616_v44, %v1615_v41  ;;  %v1656_v48 = vpop.f32.mrf.mxu1  ;;  %v1156_v59 = vadd.f32 %v1654_v52, %v1091_v46 }
 0x115   : > { %v1618_v50 = vpop.f32.mrf.mxu0  ;;  %v1657_v54 = vadd.f32 %v1656_v48, %v1655_v43  ;;  %v1552_v43 = vadd.f32 %v2032_v26, %v2028_v24  ;;  %v1595_v24 = vadd.f32 %v2042_v31, %v2038_v29 }
 0x116   : > { %v1094_v53 = vadd.f32 %v1617_v47, %v1029_v45  ;;  %v1658_v55 = vpop.f32.mrf.mxu1  ;;  %v1240_v23 = vmul.f32 %v1156_v59, %v1156_v59 }
 0x117   : > { %v1619_v57 = vpop.f32.mrf.mxu0  ;;  %v1050_v27 = vadd.f32 %v1592_v20, %v1552_v43  ;;  %v1053_v30 = vadd.f32 %v1595_v24, %v1555_v51 }
 0x118   : > { %v1159_v60 = vadd.f32 %v1657_v54, %v1094_v53  ;;  %v1620_v61 = vadd.f32 %v1619_v57, %v1618_v50  ;;  %v1659_v62 = vpop.f32.mrf.mxu1 }
 0x119   : > { %v1621_v63 = vpop.f32.mrf.mxu0  ;;  %v1660_v11 = vadd.f32 %v1659_v62, %v1658_v55 }
 0x11a   : > { %v1496_v1 = vpack.c.bf16 %v1159_v60, %v1156_v59  ;;  %v1661_v2 = vpop.f32.mrf.mxu1  ;;  %v1099_v7 = vadd.f32 %v1620_v61, %v1034_v0  ;;  %v1241_v39 = vmul.f32 %v1159_v60, %v1159_v60  ;;  %v1226_v47 = vadd.f32 %v1159_v60, %v1156_v59 }
 0x11b   : > { %v1622_v5 = vpop.f32.mrf.mxu0 }
 0x11c   : > { %1497 = vst [vmem:[%s2048_s13] sm:$0xff] %v1496_v1   ;;  %v1623_v8 = vadd.f32 %v1622_v5, %v1621_v63  ;;  %v1662_v9 = vpop.f32.mrf.mxu1  ;;  %v1164_v16 = vadd.f32 %v1660_v11, %v1099_v7  ;;  %v1248_v26 = vadd.f32 %v1241_v39, %v1240_v23 }
 0x11d   : > { %v1624_v10 = vpop.f32.mrf.mxu0  ;;  %v1663_v13 = vadd.f32 %v1662_v9, %v1661_v2 }
 0x11e   : > { %v1102_v12 = vadd.f32 %v1623_v8, %v1037_v6  ;;  %v1664_v14 = vpop.f32.mrf.mxu1  ;;  %v1242_v44 = vmul.f32 %v1164_v16, %v1164_v16  ;;  %v1227_v53 = vadd.f32 %v1226_v47, %v1164_v16 }
 0x11f   : > { %v1625_v33 = vpop.f32.mrf.mxu0 }
 0x120   : > { %v1167_v17 = vadd.f32 %v1663_v13, %v1102_v12  ;;  %v1626_v18 = vadd.f32 %v1625_v33, %v1624_v10  ;;  %v1665_v19 = vpop.f32.mrf.mxu1  ;;  %v1249_v57 = vadd.f32 %v1248_v26, %v1242_v44 }
 0x121   : > { %v1627_v35 = vpop.f32.mrf.mxu0  ;;  %v1666_v40 = vadd.f32 %v1665_v19, %v1664_v14 }
 0x122   : > { %v1501_v36 = vpack.c.bf16 %v1167_v17, %v1164_v16  ;;  %v1107_v37 = vadd.f32 %v1626_v18, %v1042_v15  ;;  %v1667_v38 = vpop.f32.mrf.mxu1  ;;  %v1243_v52 = vmul.f32 %v1167_v17, %v1167_v17  ;;  %v1228_v60 = vadd.f32 %v1227_v53, %v1167_v17 }
 0x123   : > { %v1628_v41 = vpop.f32.mrf.mxu0 }
 0x124   : > { %1513 = vst [vmem:[%s2048_s13 + $0x8] sm:$0xff] %v1501_v36   ;;  %v1629_v21 = vadd.f32 %v1628_v41, %v1627_v35  ;;  %v1668_v22 = vpop.f32.mrf.mxu1  ;;  %v1172_v45 = vadd.f32 %v1666_v40, %v1107_v37  ;;  %v1250_v0 = vadd.f32 %v1249_v57, %v1243_v52 }
 0x125   : > { %v1630_v46 = vpop.f32.mrf.mxu0  ;;  %v1669_v49 = vadd.f32 %v1668_v22, %v1667_v38 }
 0x126   : > { %v1110_v48 = vadd.f32 %v1629_v21, %v1045_v42  ;;  %v1670_v50 = vpop.f32.mrf.mxu1  ;;  %v1244_v58 = vmul.f32 %v1172_v45, %v1172_v45  ;;  %v1229_v31 = vadd.f32 %v1228_v60, %v1172_v45 }
 0x127   : > { %v1631_v25 = vpop.f32.mrf.mxu0 }
 0x128   : > { %v1175_v54 = vadd.f32 %v1669_v49, %v1110_v48  ;;  %v1632_v55 = vadd.f32 %v1631_v25, %v1630_v46  ;;  %v1671_v56 = vpop.f32.mrf.mxu1  ;;  %v1251_v5 = vadd.f32 %v1250_v0, %v1244_v58 }
 0x129   : > { %v1633_v59 = vpop.f32.mrf.mxu0  ;;  %v1672_v63 = vadd.f32 %v1671_v56, %v1670_v50 }
 0x12a   : > { %v1506_v61 = vpack.c.bf16 %v1175_v54, %v1172_v45  ;;  %v1115_v62 = vadd.f32 %v1632_v55, %v1050_v27  ;;  %v1673_v28 = vpop.f32.mrf.mxu1  ;;  %v1245_v1 = vmul.f32 %v1175_v54, %v1175_v54  ;;  %v1230_v6 = vadd.f32 %v1229_v31, %v1175_v54 }
 0x12b   : > { %v1634_v29 = vpop.f32.mrf.mxu0 }
 0x12c   : > { %1514 = vst [vmem:[%s2048_s13 + $0x10] sm:$0xff] %v1506_v61   ;;  %v1180_v2 = vadd.f32 %v1672_v63, %v1115_v62  ;;  %v1635_v3 = vadd.f32 %v1634_v29, %v1633_v59  ;;  %v1674_v4 = vpop.f32.mrf.mxu1  ;;  %v1252_v10 = vadd.f32 %v1251_v5, %v1245_v1 }
 0x12d   : > { %v1675_v9 = vadd.f32 %v1674_v4, %v1673_v28 }
 0x12e   : > { %v1246_v7 = vmul.f32 %v1180_v2, %v1180_v2  ;;  %v1118_v8 = vadd.f32 %v1635_v3, %v1053_v30  ;;  %v1231_v11 = vadd.f32 %v1230_v6, %v1180_v2 }
 0x130   : > { %v1183_v12 = vadd.f32 %v1675_v9, %v1118_v8  ;;  %v1253_v13 = vadd.f32 %v1252_v10, %v1246_v7 }
 0x132   : > { %v1511_v14 = vpack.c.bf16 %v1183_v12, %v1180_v2  ;;  %v1232_v15 = vadd.f32 %v1231_v11, %v1183_v12  ;;  %v1247_v32 = vmul.f32 %v1183_v12, %v1183_v12 }
 0x134   : > { %1515 = vst [vmem:[%s2048_s13 + $0x18] sm:$0xff] %v1511_v14   ;;  %v1233_v33 = vrot.slane %v1232_v15, 4  ;;  %v1254_v34 = vadd.f32 %v1253_v13, %v1247_v32 }
 0x136   : > { %v1234_v16 = vadd.f32 %v1233_v33, %v1232_v15  ;;  %v1255_v17 = vrot.slane %v1254_v34, 4 }
 0x138   : > { %v1235_v18 = vrot.slane %v1234_v16, 2  ;;  %v1256_v19 = vadd.f32 %v1255_v17, %v1254_v34 }
 0x13a   : > { %v1236_v35 = vadd.f32 %v1235_v18, %v1234_v16  ;;  %v1257_v36 = vrot.slane %v1256_v19, 2 }
 0x13c   : > { %v1237_v37 = vrot.slane %v1236_v35, 1  ;;  %v1258_v38 = vadd.f32 %v1257_v36, %v1256_v19 }
 0x13e   : > { %v1238_v39 = vadd.f32 %v1237_v37, %v1236_v35  ;;  %v1259_v40 = vrot.slane %v1258_v38, 1 }
 0x140   : > { %1239 = vst [vmem:[%s217_s17] sm:$0x1] %v1238_v39  ;;  %v1260_v41 = vadd.f32 %v1259_v40, %v1258_v38 }
 0x142   : > { %1261 = vst [vmem:[%s220_s20] sm:$0x1] %v1260_v41 }
 0x143 PF: > { %s15_s15 = sadd.s32 1, %s1754_s15  }
 0x144   : > { %p12_p5 = scmp.ge.s32.totalorder %s15_s15, 4  }
 0x146   :  { %14 = sbr.rel (!%p12_p5) target bundleno = 1 (0x1), region = 82 }

// kernel: forward_real.10
= control target key start
LH: loop header
LB: loop body
LE: loop exit
PB: predicated region body
PF: predicated region fallthrough
CT: control target
= control target key end

     0   :  { %s447_s12 = smov 0   ;;  %s477_s0 = inlined_call_operand.vmem [shape: bf16[128,128], index: 0, kind: input, shape index: {}]   ;;  %s478_s1 = inlined_call_operand.vmem [shape: f32[1,128], index: 1, kind: input, shape index: {}]   ;;  %s479_s2 = inlined_call_operand.vmem [shape: f32[1,128], index: 2, kind: input, shape index: {}]   ;;  %s480_s3 = inlined_call_operand.vmem [shape: bf16[128,128], index: 3, kind: output, shape index: {}]  }
   0x1 LB: > { %s340_s13 = sadd.s32 4294967295, %s425_s12   ;;  %p344_p0 = scmp.ge.s32.totalorder %s425_s12, 1  ;;  %s425_s12 = sphi %s447_s12, %s13_s12  }
   0x2   : > { %p138_p1 = scmp.lt.s32.totalorder %s425_s12, 3 }
   0x4   : > { %p139_p2 = pnand %p344_p0, %p138_p1 }
   0x5   : > { %s345_s14 = sshll.u32 (!%p139_p2), %s340_s13, 3 }
   0x6   : > { %142 = sbr.rel (%p139_p2) target bundleno = 32 (0x20), region = 32  ;;  %p163_p3 = scmp.lt.s32.totalorder (!%p139_p2), %s345_s14, 15 }
   0xb   : > { %s482_s14 = smov (!%p163_p3, %s345_s14), 15  ;;  %v349_v0 = vld [vmem:[%s478_s1] ss:$0 sm:$0xff] }
   0xc   : > { %s346_s15 = sshll.u32 %s482_s14, 2  ;;  %v350_v13 = vld [vmem:[%s479_s2] ss:$0 sm:$0xff] }
   0xd   : > { %s166_s18 = scalar_lea.vmem %s477_s0, %s346_s15  ;;  %s172_s25 = scalar_lea.vmem %s480_s3, %s346_s15 }
   0xe   : > { %v370_v1 = vld [vmem:[%s166_s18] sm:$0xff]   ;;  %v405_v2 = vld [vmem:[%s166_s18 + $0x8] sm:$0xff]   ;;  %v406_v3 = vld [vmem:[%s166_s18 + $0x10] sm:$0xff]  }
   0xf   : > { %v371_v4 = vunpack.c.l.bf16 %v370_v1  ;;  %v372_v5 = vunpack.c.h.bf16 %v370_v1  ;;  %v375_v6 = vunpack.c.l.bf16 %v405_v2  ;;  %v376_v7 = vunpack.c.h.bf16 %v405_v2  ;;  %v407_v8 = vld [vmem:[%s166_s18 + $0x18] sm:$0xff]  }
  0x10   : > { %v379_v9 = vunpack.c.l.bf16 %v406_v3  ;;  %v380_v10 = vunpack.c.h.bf16 %v406_v3  ;;  %v383_v11 = vunpack.c.l.bf16 %v407_v8  ;;  %v384_v12 = vunpack.c.h.bf16 %v407_v8 }
  0x11   : > { %v197_v14 = vmul.f32 %v371_v4, %v349_v0  ;;  %v198_v15 = vmul.f32 %v372_v5, %v349_v0  ;;  %v199_v16 = vmul.f32 %v375_v6, %v349_v0  ;;  %v200_v17 = vmul.f32 %v376_v7, %v349_v0 }
  0x12   : > { %v201_v18 = vmul.f32 %v379_v9, %v349_v0  ;;  %v202_v19 = vmul.f32 %v380_v10, %v349_v0  ;;  %v203_v20 = vmul.f32 %v383_v11, %v349_v0  ;;  %v204_v21 = vmul.f32 %v384_v12, %v349_v0 }
  0x13   : > { %v212_v22 = vadd.f32 %v350_v13, %v197_v14  ;;  %v213_v23 = vadd.f32 %v350_v13, %v198_v15  ;;  %v214_v24 = vadd.f32 %v350_v13, %v199_v16  ;;  %v215_v25 = vadd.f32 %v350_v13, %v200_v17 }
  0x14   : > { %v216_v26 = vadd.f32 %v350_v13, %v201_v18  ;;  %v217_v27 = vadd.f32 %v350_v13, %v202_v19  ;;  %v218_v28 = vadd.f32 %v350_v13, %v203_v20  ;;  %v219_v29 = vadd.f32 %v350_v13, %v204_v21 }
  0x15   : > { %vm220_vm0 = vcmp.ge.f32.partialorder %v212_v22, 0.0  ;;  %vm221_vm1 = vcmp.ge.f32.partialorder %v213_v23, 0.0  ;;  %v228_v30 = vmul.f32 0.2, %v212_v22  ;;  %v229_v31 = vmul.f32 0.2, %v213_v23 }
  0x16   : > { %vm222_vm2 = vcmp.ge.f32.partialorder %v214_v24, 0.0  ;;  %vm223_vm3 = vcmp.ge.f32.partialorder %v215_v25, 0.0  ;;  %v230_v32 = vmul.f32 0.2, %v214_v24  ;;  %v231_v33 = vmul.f32 0.2, %v215_v25 }
  0x17   : > { %v236_v34 = vsel %vm220_vm0, %v212_v22, %v228_v30  ;;  %v237_v35 = vsel %vm221_vm1, %v213_v23, %v229_v31  ;;  %vm224_vm4 = vcmp.ge.f32.partialorder %v216_v26, 0.0  ;;  %vm225_vm5 = vcmp.ge.f32.partialorder %v217_v27, 0.0 }
  0x18   : > { %v388_v36 = vpack.c.bf16 %v237_v35, %v236_v34  ;;  %v238_v37 = vsel %vm222_vm2, %v214_v24, %v230_v32  ;;  %v239_v38 = vsel %vm223_vm3, %v215_v25, %v231_v33  ;;  %v232_v39 = vmul.f32 0.2, %v216_v26 }
  0x19   : > { %v393_v40 = vpack.c.bf16 %v239_v38, %v238_v37  ;;  %v233_v41 = vmul.f32 0.2, %v217_v27  ;;  %vm226_vm6 = vcmp.ge.f32.partialorder %v218_v28, 0.0  ;;  %vm227_vm7 = vcmp.ge.f32.partialorder %v219_v29, 0.0 }
  0x1a   : > { %389 = vst [vmem:[%s172_s25] sm:$0xff] %v388_v36   ;;  %v240_v42 = vsel %vm224_vm4, %v216_v26, %v232_v39  ;;  %v234_v43 = vmul.f32 0.2, %v218_v28  ;;  %v235_v44 = vmul.f32 0.2, %v219_v29 }
  0x1b   : > { %408 = vst [vmem:[%s172_s25 + $0x8] sm:$0xff] %v393_v40   ;;  %v241_v45 = vsel %vm225_vm5, %v217_v27, %v233_v41 }
  0x1c   : > { %v398_v46 = vpack.c.bf16 %v241_v45, %v240_v42  ;;  %v242_v47 = vsel %vm226_vm6, %v218_v28, %v234_v43  ;;  %v243_v48 = vsel %vm227_vm7, %v219_v29, %v235_v44 }
  0x1d   : > { %v403_v49 = vpack.c.bf16 %v243_v48, %v242_v47 }
  0x1e   : > { %409 = vst [vmem:[%s172_s25 + $0x10] sm:$0xff] %v398_v46  }
  0x1f   : > { %410 = vst [vmem:[%s172_s25 + $0x18] sm:$0xff] %v403_v49  }
  0x20 PF: > { %s13_s12 = sadd.s32 1, %s425_s12  }
  0x21   : > { %p10_p4 = scmp.ge.s32.totalorder %s13_s12, 4  }
  0x23   :  { %12 = sbr.rel (!%p10_p4) target bundleno = 1 (0x1), region = 62 }

// kernel: forward_real.12
= control target key start
LH: loop header
LB: loop body
LE: loop exit
PB: predicated region body
PF: predicated region fallthrough
CT: control target
= control target key end

     0   :  { %s356_s12 = smov 0   ;;  %s382_s0 = inlined_call_operand.vmem [shape: bf16[32,256], index: 0, kind: input, shape index: {}]   ;;  %s383_s1 = inlined_call_operand.vmem [shape: f32[1,256], index: 1, kind: input, shape index: {}]   ;;  %s384_s2 = inlined_call_operand.vmem [shape: f32[1,256], index: 2, kind: input, shape index: {}]   ;;  %s385_s3 = inlined_call_operand.vmem [shape: bf16[32,256], index: 3, kind: output, shape index: {}]  }
   0x1 LB: > { %s301_s13 = sadd.s32 4294967295, %s334_s12   ;;  %p305_p0 = scmp.ge.s32.totalorder %s334_s12, 1  ;;  %s334_s12 = sphi %s356_s12, %s13_s12  }
   0x2   : > { %p139_p1 = scmp.lt.s32.totalorder %s334_s12, 3 }
   0x4   : > { %p140_p2 = pnand %p305_p0, %p139_p1 }
   0x5   : > { %s306_s14 = sshll.u32 (!%p140_p2), %s301_s13, 1 }
   0x6   : > { %143 = sbr.rel (%p140_p2) target bundleno = 30 (0x1e), region = 32  ;;  %p166_p3 = scmp.lt.s32.totalorder (!%p140_p2), %s306_s14, 3 }
   0xb   : > { %v187_v0 = vlaneseq  ;;  %s387_s14 = smov (!%p166_p3, %s306_s14), 3  ;;  %v185_v2 = vld [vmem:[%s383_s1] sm:$0x3] }
   0xc   : > { %v201_v5 = vld [vmem:[%s384_s2] sm:$0x3]  ;;  %s316_s19 = sshll.u32 %s387_s14, 3 }
   0xd   : > { %v188_v1 = vshrl.u32 %v187_v0, 7  ;;  %s170_s22 = scalar_lea.vmem %s382_s0, %s316_s19  ;;  %s177_s25 = scalar_lea.vmem %s385_s3, %s316_s19 }
   0xe   : > { %v179_v8 = vld [vmem:[%s170_s22] sm:$0xff]  ;;  %v180_v9 = vld [vmem:[%s170_s22 + $0x8] sm:$0xff] }
   0xf   : > { %v189_v3 = vsub.s32 0, %v188_v1  ;;  %v193_v4 = vsub.s32 1, %v188_v1  ;;  %v181_v12 = vunpack.c.l.bf16 %v179_v8  ;;  %v182_v13 = vunpack.c.h.bf16 %v179_v8 }
  0x10   : > { %v183_v14 = vunpack.c.l.bf16 %v180_v9  ;;  %v184_v15 = vunpack.c.h.bf16 %v180_v9 }
  0x11   : > { %v190_v6 = vrot.slane %v185_v2, %v189_v3  ;;  %v194_v7 = vrot.slane %v185_v2, %v193_v4  ;;  %v206_v10 = vrot.slane %v201_v5, %v189_v3  ;;  %v210_v11 = vrot.slane %v201_v5, %v193_v4 }
  0x13   : > { %v197_v16 = vmul.f32 %v190_v6, %v181_v12  ;;  %v198_v17 = vmul.f32 %v194_v7, %v182_v13  ;;  %v199_v18 = vmul.f32 %v190_v6, %v183_v14  ;;  %v200_v19 = vmul.f32 %v194_v7, %v184_v15 }
  0x15   : > { %v213_v20 = vadd.f32 %v206_v10, %v197_v16  ;;  %v214_v21 = vadd.f32 %v210_v11, %v198_v17  ;;  %v215_v22 = vadd.f32 %v206_v10, %v199_v18  ;;  %v216_v23 = vadd.f32 %v210_v11, %v200_v19 }
  0x17   : > { %vm217_vm0 = vcmp.ge.f32.partialorder %v213_v20, 0.0  ;;  %vm218_vm1 = vcmp.ge.f32.partialorder %v214_v21, 0.0  ;;  %v221_v24 = vmul.f32 0.2, %v213_v20  ;;  %v222_v25 = vmul.f32 0.2, %v214_v21 }
  0x18   : > { %vm219_vm2 = vcmp.ge.f32.partialorder %v215_v22, 0.0  ;;  %vm220_vm3 = vcmp.ge.f32.partialorder %v216_v23, 0.0  ;;  %v223_v26 = vmul.f32 0.2, %v215_v22  ;;  %v224_v27 = vmul.f32 0.2, %v216_v23 }
  0x19   : > { %v225_v28 = vsel %vm217_vm0, %v213_v20, %v221_v24  ;;  %v226_v29 = vsel %vm218_vm1, %v214_v21, %v222_v25 }
  0x1a   : > { %v318_v30 = vpack.c.bf16 %v226_v29, %v225_v28  ;;  %v227_v31 = vsel %vm219_vm2, %v215_v22, %v223_v26  ;;  %v228_v32 = vsel %vm220_vm3, %v216_v23, %v224_v27 }
  0x1b   : > { %v319_v33 = vpack.c.bf16 %v228_v32, %v227_v31 }
  0x1c   : > { %241 = vst [vmem:[%s177_s25] sm:$0xff] %v318_v30 }
  0x1d   : > { %242 = vst [vmem:[%s177_s25 + $0x8] sm:$0xff] %v319_v33 }
  0x1e PF: > { %s13_s12 = sadd.s32 1, %s334_s12  }
  0x1f   : > { %p10_p4 = scmp.ge.s32.totalorder %s13_s12, 4  }
  0x21   :  { %12 = sbr.rel (!%p10_p4) target bundleno = 1 (0x1), region = 62 }

// kernel: forward_real.11
= control target key start
LH: loop header
LB: loop body
LE: loop exit
PB: predicated region body
PF: predicated region fallthrough
CT: control target
= control target key end

     0   :  { %s3131_s15 = smov 0   ;;  %s3997_s0 = inlined_call_operand.vmem [shape: bf16[32,2048], index: 0, kind: input, shape index: {}]   ;;  %s3998_s1 = inlined_call_operand.vmem [shape: bf16[2048,256], index: 1, kind: input, shape index: {}]   ;;  %s3999_s2 = inlined_call_operand.vmem [shape: bf16[32,256], index: 2, kind: output, shape index: {0}]   ;;  %s4000_s3 = inlined_call_operand.vmem [shape: f32[2,1,256], index: 3, kind: output, shape index: {1}]   ;;  %s4001_s4 = inlined_call_operand.vmem [shape: f32[2,1,256], index: 4, kind: output, shape index: {2}]  }
   0x1 LB: > { %s3137_s16 = sadd.s32 4294967295, %s3103_s15   ;;  %p2415_p0 = scmp.ge.s32.totalorder %s3103_s15, 1  ;;  %s3103_s15 = sphi %s3131_s15, %s15_s15  }
   0x2   : > { %p169_p1 = scmp.lt.s32.totalorder %s3103_s15, 3 }
   0x4   : > { %p170_p2 = pnand %p2415_p0, %p169_p1 }
   0x5   : > { %s2416_s29 = sshll.u32 (!%p170_p2), %s3137_s16, 1  ;;  %p219_p4 = scmp.lt.s32.totalorder (!%p170_p2), %s3137_s16, 1 }
   0x6   : > { %173 = sbr.rel (%p170_p2) target bundleno = 495 (0x1ef), region = 28  ;;  %p206_p3 = scmp.lt.s32.totalorder (!%p170_p2), %s2416_s29, 3 }
   0xb   : > { %v2713_v0 = vld [vmem:[%s3998_s1 + $0x74] ss:$8 sps:$4 sm:$0xff]   ;;  %v2717_v2 = vld [vmem:[%s3998_s1 + $0x70] ss:$8 sps:$4 sm:$0xff]   ;;  %v2719_v4 = vld [vmem:[%s3998_s1 + $0x64] ss:$8 sps:$4 sm:$0xff]  }
   0xc   : > { %v2715_v1 = vld [vmem:[%s3998_s1 + $0x174] ss:$8 sps:$4 sm:$0xff]   ;;  %1859 = vmatprep.subr.bf16.mxu0 %v2713_v0  ;;  %v2718_v3 = vld [vmem:[%s3998_s1 + $0x170] ss:$8 sps:$4 sm:$0xff]   ;;  %v2721_v5 = vld [vmem:[%s3998_s1 + $0x164] ss:$8 sps:$4 sm:$0xff]  }
   0xd   : > { %1902 = vmatprep.subr.bf16.mxu1 %v2715_v1  ;;  %1860 = vmatpush1.bf16.msra.mxu0 %v2717_v2  ;;  %v2723_v6 = vld [vmem:[%s3998_s1 + $0x60] ss:$8 sps:$4 sm:$0xff]   ;;  %v2725_v8 = vld [vmem:[%s3998_s1 + $0x54] ss:$8 sps:$4 sm:$0xff]   ;;  %v2729_v10 = vld [vmem:[%s3998_s1 + $0x50] ss:$8 sps:$4 sm:$0xff]  }
   0xe   : > { %1903 = vmatpush1.bf16.msra.mxu1 %v2718_v3  ;;  %1861 = vmatprep.subr.bf16.mxu0 %v2719_v4  ;;  %v2724_v7 = vld [vmem:[%s3998_s1 + $0x160] ss:$8 sps:$4 sm:$0xff]   ;;  %v2727_v9 = vld [vmem:[%s3998_s1 + $0x154] ss:$8 sps:$4 sm:$0xff]   ;;  %v2730_v11 = vld [vmem:[%s3998_s1 + $0x150] ss:$8 sps:$4 sm:$0xff]  }
   0xf   : > { %1904 = vmatprep.subr.bf16.mxu1 %v2721_v5  ;;  %v2731_v12 = vld [vmem:[%s3998_s1 + $0x44] ss:$8 sps:$4 sm:$0xff]   ;;  %v2735_v14 = vld [vmem:[%s3998_s1 + $0x40] ss:$8 sps:$4 sm:$0xff]   ;;  %v2737_v16 = vld [vmem:[%s3998_s1 + $0x34] ss:$8 sps:$4 sm:$0xff]  }
  0x10   : > { %v2733_v13 = vld [vmem:[%s3998_s1 + $0x144] ss:$8 sps:$4 sm:$0xff]   ;;  %v2736_v15 = vld [vmem:[%s3998_s1 + $0x140] ss:$8 sps:$4 sm:$0xff]   ;;  %v2739_v17 = vld [vmem:[%s3998_s1 + $0x134] ss:$8 sps:$4 sm:$0xff]  }
  0x11   : > { %1862 = vmatpush1.bf16.msra.mxu0 %v2723_v6  ;;  %v2741_v18 = vld [vmem:[%s3998_s1 + $0x30] ss:$8 sps:$4 sm:$0xff]   ;;  %v2743_v20 = vld [vmem:[%s3998_s1 + $0x24] ss:$8 sps:$4 sm:$0xff]   ;;  %v2747_v22 = vld [vmem:[%s3998_s1 + $0x20] ss:$8 sps:$4 sm:$0xff]  }
  0x12   : > { %1905 = vmatpush1.bf16.msra.mxu1 %v2724_v7  ;;  %1863 = vmatprep.subr.bf16.mxu0 %v2725_v8  ;;  %v2742_v19 = vld [vmem:[%s3998_s1 + $0x130] ss:$8 sps:$4 sm:$0xff]   ;;  %v2745_v21 = vld [vmem:[%s3998_s1 + $0x124] ss:$8 sps:$4 sm:$0xff]   ;;  %v2748_v23 = vld [vmem:[%s3998_s1 + $0x120] ss:$8 sps:$4 sm:$0xff]  }
  0x13   : > { %1906 = vmatprep.subr.bf16.mxu1 %v2727_v9  ;;  %v2749_v24 = vld [vmem:[%s3998_s1 + $0x14] ss:$8 sps:$4 sm:$0xff]   ;;  %v2753_v26 = vld [vmem:[%s3998_s1 + $0x10] ss:$8 sps:$4 sm:$0xff]   ;;  %v2755_v28 = vld [vmem:[%s3998_s1 + $0x4] ss:$8 sps:$4 sm:$0xff]  }
  0x14   : > { %v2751_v25 = vld [vmem:[%s3998_s1 + $0x114] ss:$8 sps:$4 sm:$0xff]   ;;  %v2754_v27 = vld [vmem:[%s3998_s1 + $0x110] ss:$8 sps:$4 sm:$0xff]   ;;  %v2757_v29 = vld [vmem:[%s3998_s1 + $0x104] ss:$8 sps:$4 sm:$0xff]  }
  0x15   : > { %1864 = vmatpush1.bf16.msra.mxu0 %v2729_v10  ;;  %v2759_v30 = vld [vmem:[%s3998_s1] ss:$8 sps:$4 sm:$0xff]   ;;  %v2761_v32 = vld [vmem:[%s3998_s1 + $0xf4] ss:$8 sps:$4 sm:$0xff]   ;;  %v2765_v34 = vld [vmem:[%s3998_s1 + $0xf0] ss:$8 sps:$4 sm:$0xff]  }
  0x16   : > { %1907 = vmatpush1.bf16.msra.mxu1 %v2730_v11  ;;  %1865 = vmatprep.subr.bf16.mxu0 %v2731_v12  ;;  %v2760_v31 = vld [vmem:[%s3998_s1 + $0x100] ss:$8 sps:$4 sm:$0xff]   ;;  %v2763_v33 = vld [vmem:[%s3998_s1 + $0x1f4] ss:$8 sps:$4 sm:$0xff]   ;;  %v2766_v35 = vld [vmem:[%s3998_s1 + $0x1f0] ss:$8 sps:$4 sm:$0xff]  }
  0x17   : > { %1908 = vmatprep.subr.bf16.mxu1 %v2733_v13  ;;  %v2767_v36 = vld [vmem:[%s3998_s1 + $0xe4] ss:$8 sps:$4 sm:$0xff]   ;;  %s4003_s29 = smov (!%p206_p3, %s2416_s29), 3  ;;  %v2771_v38 = vld [vmem:[%s3998_s1 + $0xe0] ss:$8 sps:$4 sm:$0xff]   ;;  %s4005_s16 = smov (!%p219_p4, %s3137_s16), 1 }
  0x18   : > { %v2769_v37 = vld [vmem:[%s3998_s1 + $0x1e4] ss:$8 sps:$4 sm:$0xff]   ;;  %v2772_v39 = vld [vmem:[%s3998_s1 + $0x1e0] ss:$8 sps:$4 sm:$0xff]   ;;  %v2773_v40 = vld [vmem:[%s3998_s1 + $0xd4] ss:$8 sps:$4 sm:$0xff]  }
  0x19   : > { %1866 = vmatpush1.bf16.msra.mxu0 %v2735_v14  ;;  %s2700_s28 = sshll.u32 %s4003_s29, 6  ;;  %v2775_v41 = vld [vmem:[%s3998_s1 + $0x1d4] ss:$8 sps:$4 sm:$0xff]   ;;  %v2777_v42 = vld [vmem:[%s3998_s1 + $0xd0] ss:$8 sps:$4 sm:$0xff]   ;;  %s2701_s13 = sshll.u32 %s4003_s29, 3 }
  0x1a   : > { %1909 = vmatpush1.bf16.msra.mxu1 %v2736_v15  ;;  %1867 = vmatprep.subr.bf16.mxu0 %v2737_v16  ;;  %v2778_v43 = vld [vmem:[%s3998_s1 + $0x1d0] ss:$8 sps:$4 sm:$0xff]   ;;  %s3280_s12 = scalar_lea.vmem %s3997_s0, %s2700_s28  ;;  %v2779_v44 = vld [vmem:[%s3998_s1 + $0xc4] ss:$8 sps:$4 sm:$0xff]   ;;  %v2783_v46 = vld [vmem:[%s3998_s1 + $0xc0] ss:$8 sps:$4 sm:$0xff]   ;;  %s217_s18 = scalar_lea.vmem %s3999_s2, %s2701_s13 }
  0x1b   : > { %1910 = vmatprep.subr.bf16.mxu1 %v2739_v17  ;;  %v2781_v45 = vld [vmem:[%s3998_s1 + $0x1c4] ss:$8 sps:$4 sm:$0xff]   ;;  %v2784_v47 = vld [vmem:[%s3998_s1 + $0x1c0] ss:$8 sps:$4 sm:$0xff]   ;;  %v2785_v52 = vld [vmem:[%s3998_s1 + $0xb4] ss:$8 sps:$4 sm:$0xff]  }
  0x1c   : > { %v227_v48 = vld [vmem:[%s3280_s12] sm:$0xff]  ;;  %v228_v50 = vld [vmem:[%s3280_s12 + $0x8] sm:$0xff]  ;;  %v2787_v54 = vld [vmem:[%s3998_s1 + $0x1b4] ss:$8 sps:$4 sm:$0xff]   ;;  %s2422_s29 = sshll.u32 %s4005_s16, 1 }
  0x1d   : > { %1868 = vmatpush1.bf16.msra.mxu0 %v2741_v18  ;;  %v235_v49 = vld [vmem:[%s3280_s12 + $0x40] sm:$0xff]  ;;  %v236_v51 = vld [vmem:[%s3280_s12 + $0x48] sm:$0xff]  ;;  %v2789_v56 = vld [vmem:[%s3998_s1 + $0xb0] ss:$8 sps:$4 sm:$0xff]   ;;  %s222_s21 = scalar_lea.vmem %s4000_s3, %s2422_s29  ;;  %s226_s24 = scalar_lea.vmem %s4001_s4, %s2422_s29 }
  0x1e   : > { %1911 = vmatpush1.bf16.msra.mxu1 %v2742_v19  ;;  %1869 = vmatprep.subr.bf16.mxu0 %v2743_v20  ;;  %v2425_v53 = vcombine.high %v227_v48, %v235_v49  ;;  %v2427_v55 = vcombine.high %v228_v50, %v236_v51  ;;  %v2790_v57 = vld [vmem:[%s3998_s1 + $0x1b0] ss:$8 sps:$4 sm:$0xff]   ;;  %v2791_v58 = vld [vmem:[%s3998_s1 + $0xa4] ss:$8 sps:$4 sm:$0xff]   ;;  %v2795_v60 = vld [vmem:[%s3998_s1 + $0xa0] ss:$8 sps:$4 sm:$0xff]   ;;  %v2424_v8 = vcombine.low %v227_v48, %v235_v49 }
  0x1f   : > { %1912 = vmatprep.subr.bf16.mxu1 %v2745_v21  ;;  %v2793_v59 = vld [vmem:[%s3998_s1 + $0x1a4] ss:$8 sps:$4 sm:$0xff]   ;;  %v2796_v61 = vld [vmem:[%s3998_s1 + $0x1a0] ss:$8 sps:$4 sm:$0xff]   ;;  %v2797_v62 = vld [vmem:[%s3998_s1 + $0x94] ss:$8 sps:$4 sm:$0xff]   ;;  %v2426_v9 = vcombine.low %v228_v50, %v236_v51 }
  0x20   : > { %1891 = vmatprep.mubr.bf16.mxu0 %v2425_v53  ;;  %1934 = vmatprep.mubr.bf16.mxu1 %v2427_v55  ;;  %v2799_v63 = vld [vmem:[%s3998_s1 + $0x194] ss:$8 sps:$4 sm:$0xff]   ;;  %v2801_v0 = vld [vmem:[%s3998_s1 + $0x90] ss:$8 sps:$4 sm:$0xff]   ;;  %v2803_v2 = vld [vmem:[%s3998_s1 + $0x84] ss:$8 sps:$4 sm:$0xff]  }
  0x21   : > { %1870 = vmatpush1.bf16.msra.mxu0 %v2747_v22  ;;  %v2802_v1 = vld [vmem:[%s3998_s1 + $0x190] ss:$8 sps:$4 sm:$0xff]   ;;  %v2805_v3 = vld [vmem:[%s3998_s1 + $0x184] ss:$8 sps:$4 sm:$0xff]   ;;  %v2807_v4 = vld [vmem:[%s3998_s1 + $0x80] ss:$8 sps:$4 sm:$0xff]  }
  0x22   : > { %1913 = vmatpush1.bf16.msra.mxu1 %v2748_v23  ;;  %1871 = vmatprep.subr.bf16.mxu0 %v2749_v24  ;;  %v2808_v5 = vld [vmem:[%s3998_s1 + $0x180] ss:$8 sps:$4 sm:$0xff]   ;;  %v2811_v6 = vld [vmem:[%s3998_s1 + $0x274] ss:$8 sps:$4 sm:$0xff]   ;;  %v2809_v10 = vld [vmem:[%s3998_s1 + $0x270] ss:$8 sps:$4 sm:$0xff]  }
  0x23   : > { %1914 = vmatprep.subr.bf16.mxu1 %v2751_v25  ;;  %v2814_v7 = vld [vmem:[%s3998_s1 + $0x374] ss:$8 sps:$4 sm:$0xff]   ;;  %v2812_v11 = vld [vmem:[%s3998_s1 + $0x370] ss:$8 sps:$4 sm:$0xff]   ;;  %v2817_v12 = vld [vmem:[%s3998_s1 + $0x264] ss:$8 sps:$4 sm:$0xff]  }
  0x24   : > { %v2820_v13 = vld [vmem:[%s3998_s1 + $0x364] ss:$8 sps:$4 sm:$0xff]   ;;  %v2815_v14 = vld [vmem:[%s3998_s1 + $0x260] ss:$8 sps:$4 sm:$0xff]   ;;  %v2823_v16 = vld [vmem:[%s3998_s1 + $0x254] ss:$8 sps:$4 sm:$0xff]  }
  0x25   : > { %1872 = vmatpush1.bf16.msra.mxu0 %v2753_v26  ;;  %v2818_v15 = vld [vmem:[%s3998_s1 + $0x360] ss:$8 sps:$4 sm:$0xff]   ;;  %v2826_v17 = vld [vmem:[%s3998_s1 + $0x354] ss:$8 sps:$4 sm:$0xff]   ;;  %v2821_v18 = vld [vmem:[%s3998_s1 + $0x250] ss:$8 sps:$4 sm:$0xff]  }
  0x26   : > { %1915 = vmatpush1.bf16.msra.mxu1 %v2754_v27  ;;  %1873 = vmatprep.subr.bf16.mxu0 %v2755_v28  ;;  %v2824_v19 = vld [vmem:[%s3998_s1 + $0x350] ss:$8 sps:$4 sm:$0xff]   ;;  %v2829_v20 = vld [vmem:[%s3998_s1 + $0x244] ss:$8 sps:$4 sm:$0xff]   ;;  %v2827_v22 = vld [vmem:[%s3998_s1 + $0x240] ss:$8 sps:$4 sm:$0xff]  }
  0x27   : > { %1916 = vmatprep.subr.bf16.mxu1 %v2757_v29  ;;  %v2832_v21 = vld [vmem:[%s3998_s1 + $0x344] ss:$8 sps:$4 sm:$0xff]   ;;  %v2830_v23 = vld [vmem:[%s3998_s1 + $0x340] ss:$8 sps:$4 sm:$0xff]   ;;  %v2835_v24 = vld [vmem:[%s3998_s1 + $0x234] ss:$8 sps:$4 sm:$0xff]  }
  0x28   : > { %v2838_v25 = vld [vmem:[%s3998_s1 + $0x334] ss:$8 sps:$4 sm:$0xff]   ;;  %v2833_v26 = vld [vmem:[%s3998_s1 + $0x230] ss:$8 sps:$4 sm:$0xff]   ;;  %v2841_v28 = vld [vmem:[%s3998_s1 + $0x224] ss:$8 sps:$4 sm:$0xff]  }
  0x29   : > { %1874 = vmatpush1.bf16.msra.mxu0 %v2759_v30  ;;  %v2836_v27 = vld [vmem:[%s3998_s1 + $0x330] ss:$8 sps:$4 sm:$0xff]   ;;  %v2844_v29 = vld [vmem:[%s3998_s1 + $0x324] ss:$8 sps:$4 sm:$0xff]   ;;  %v2839_v30 = vld [vmem:[%s3998_s1 + $0x220] ss:$8 sps:$4 sm:$0xff]  }
  0x2a   : > { %1917 = vmatpush1.bf16.msra.mxu1 %v2760_v31  ;;  %1875 = vmatprep.subr.bf16.mxu0 %v2761_v32  ;;  %v2842_v31 = vld [vmem:[%s3998_s1 + $0x320] ss:$8 sps:$4 sm:$0xff]   ;;  %v2847_v32 = vld [vmem:[%s3998_s1 + $0x214] ss:$8 sps:$4 sm:$0xff]   ;;  %v2857_v48 = vld [vmem:[%s3998_s1 + $0x2f0] ss:$8 sps:$4 sm:$0xff]  }
  0x2b   : > { %1918 = vmatprep.subr.bf16.mxu1 %v2763_v33  ;;  %v2850_v33 = vld [vmem:[%s3998_s1 + $0x314] ss:$8 sps:$4 sm:$0xff]   ;;  %v2860_v49 = vld [vmem:[%s3998_s1 + $0x3f0] ss:$8 sps:$4 sm:$0xff]   ;;  %v2865_v50 = vld [vmem:[%s3998_s1 + $0x2e4] ss:$8 sps:$4 sm:$0xff]  }
  0x2c   : > { %v2868_v51 = vld [vmem:[%s3998_s1 + $0x3e4] ss:$8 sps:$4 sm:$0xff]   ;;  %v2866_v53 = vld [vmem:[%s3998_s1 + $0x3e0] ss:$8 sps:$4 sm:$0xff]   ;;  %v2874_v55 = vld [vmem:[%s3998_s1 + $0x3d4] ss:$8 sps:$4 sm:$0xff]  }
  0x2d   : > { %1876 = vmatpush2.bf16.msra.mxu0 %v2765_v34  ;;  %v2845_v34 = vld [vmem:[%s3998_s1 + $0x210] ss:$8 sps:$4 sm:$0xff]  }
  0x2e   : > { %1919 = vmatpush2.bf16.msra.mxu1 %v2766_v35  ;;  %1877 = vmatprep.subr.bf16.mxu0 %v2767_v36  ;;  %v2848_v35 = vld [vmem:[%s3998_s1 + $0x310] ss:$8 sps:$4 sm:$0xff]  }
  0x2f   : > { %1920 = vmatprep.subr.bf16.mxu1 %v2769_v37  ;;  %v3431_v36 = vld [vmem:[%s3280_s12 + $0x10] sm:$0xff] }
  0x30   : > { %v3434_v37 = vld [vmem:[%s3280_s12 + $0x50] sm:$0xff] }
  0x31   : > { %1878 = vmatpush2.bf16.msra.mxu0 %v2771_v38  ;;  %v3437_v38 = vld [vmem:[%s3280_s12 + $0x18] sm:$0xff] }
  0x32   : > { %1921 = vmatpush2.bf16.msra.mxu1 %v2772_v39  ;;  %1879 = vmatprep.subr.bf16.mxu0 %v2773_v40  ;;  %v3440_v39 = vld [vmem:[%s3280_s12 + $0x58] sm:$0xff]  ;;  %v2853_v40 = vld [vmem:[%s3998_s1 + $0x204] ss:$8 sps:$4 sm:$0xff]  }
  0x33   : > { %1922 = vmatprep.subr.bf16.mxu1 %v2775_v41  ;;  %v2429_v41 = vcombine.high %v3431_v36, %v3434_v37 }
  0x35   : > { %1880 = vmatpush2.bf16.msra.mxu0 %v2777_v42  ;;  %v2856_v42 = vld [vmem:[%s3998_s1 + $0x304] ss:$8 sps:$4 sm:$0xff]  }
  0x36   : > { %1923 = vmatpush2.bf16.msra.mxu1 %v2778_v43  ;;  %1881 = vmatprep.subr.bf16.mxu0 %v2779_v44  ;;  %v2431_v43 = vcombine.high %v3437_v38, %v3440_v39  ;;  %v2851_v44 = vld [vmem:[%s3998_s1 + $0x200] ss:$8 sps:$4 sm:$0xff]  }
  0x37   : > { %1924 = vmatprep.subr.bf16.mxu1 %v2781_v45  ;;  %v2854_v45 = vld [vmem:[%s3998_s1 + $0x300] ss:$8 sps:$4 sm:$0xff]  }
  0x39   : > { %1882 = vmatpush2.bf16.msra.mxu0 %v2783_v46  ;;  %v2859_v46 = vld [vmem:[%s3998_s1 + $0x2f4] ss:$8 sps:$4 sm:$0xff]  }
  0x3a   : > { %1925 = vmatpush2.bf16.msra.mxu1 %v2784_v47  ;;  %1883 = vmatprep.subr.bf16.mxu0 %v2785_v52  ;;  %v2862_v47 = vld [vmem:[%s3998_s1 + $0x3f4] ss:$8 sps:$4 sm:$0xff]   ;;  %v2863_v52 = vld [vmem:[%s3998_s1 + $0x2e0] ss:$8 sps:$4 sm:$0xff]  }
  0x3b   : > { %1926 = vmatprep.subr.bf16.mxu1 %v2787_v54  ;;  %v2871_v54 = vld [vmem:[%s3998_s1 + $0x2d4] ss:$8 sps:$4 sm:$0xff]  }
  0x3d   : > { %1884 = vmatpush2.bf16.msra.mxu0 %v2789_v56  ;;  %v2869_v56 = vld [vmem:[%s3998_s1 + $0x2d0] ss:$8 sps:$4 sm:$0xff]  }
  0x3e   : > { %1927 = vmatpush2.bf16.msra.mxu1 %v2790_v57  ;;  %1885 = vmatprep.subr.bf16.mxu0 %v2791_v58  ;;  %v2872_v57 = vld [vmem:[%s3998_s1 + $0x3d0] ss:$8 sps:$4 sm:$0xff]   ;;  %v2877_v58 = vld [vmem:[%s3998_s1 + $0x2c4] ss:$8 sps:$4 sm:$0xff]  }
  0x3f   : > { %1928 = vmatprep.subr.bf16.mxu1 %v2793_v59  ;;  %v2880_v59 = vld [vmem:[%s3998_s1 + $0x3c4] ss:$8 sps:$4 sm:$0xff]  }
  0x41   : > { %1886 = vmatpush2.bf16.msra.mxu0 %v2795_v60  ;;  %v2875_v60 = vld [vmem:[%s3998_s1 + $0x2c0] ss:$8 sps:$4 sm:$0xff]  }
  0x42   : > { %1929 = vmatpush2.bf16.msra.mxu1 %v2796_v61  ;;  %1887 = vmatprep.subr.bf16.mxu0 %v2797_v62  ;;  %v2878_v61 = vld [vmem:[%s3998_s1 + $0x3c0] ss:$8 sps:$4 sm:$0xff]   ;;  %v2883_v62 = vld [vmem:[%s3998_s1 + $0x2b4] ss:$8 sps:$4 sm:$0xff]  }
  0x43   : > { %1930 = vmatprep.subr.bf16.mxu1 %v2799_v63  ;;  %v2886_v63 = vld [vmem:[%s3998_s1 + $0x3b4] ss:$8 sps:$4 sm:$0xff]  }
  0x45   : > { %1888 = vmatpush2.bf16.msra.mxu0 %v2801_v0  ;;  %v2881_v0 = vld [vmem:[%s3998_s1 + $0x2b0] ss:$8 sps:$4 sm:$0xff]  }
  0x46   : > { %1931 = vmatpush2.bf16.msra.mxu1 %v2802_v1  ;;  %1889 = vmatprep.subr.bf16.mxu0 %v2803_v2  ;;  %v2884_v1 = vld [vmem:[%s3998_s1 + $0x3b0] ss:$8 sps:$4 sm:$0xff]   ;;  %v2889_v2 = vld [vmem:[%s3998_s1 + $0x2a4] ss:$8 sps:$4 sm:$0xff]  }
  0x47   : > { %1932 = vmatprep.subr.bf16.mxu1 %v2805_v3  ;;  %v2892_v3 = vld [vmem:[%s3998_s1 + $0x3a4] ss:$8 sps:$4 sm:$0xff]  }
  0x49   : > { %1890 = vmatpush2.bf16.msra.mxu0 %v2807_v4  ;;  %v2887_v4 = vld [vmem:[%s3998_s1 + $0x2a0] ss:$8 sps:$4 sm:$0xff]  }
  0x4a   : > { %1933 = vmatpush2.bf16.msra.mxu1 %v2808_v5  ;;  %1945 = vmatprep.subr.bf16.mxu0 %v2811_v6  ;;  %v2890_v5 = vld [vmem:[%s3998_s1 + $0x3a0] ss:$8 sps:$4 sm:$0xff]   ;;  %v2895_v6 = vld [vmem:[%s3998_s1 + $0x294] ss:$8 sps:$4 sm:$0xff]  }
  0x4b   : > { %1988 = vmatprep.subr.bf16.mxu1 %v2814_v7  ;;  %v2898_v7 = vld [vmem:[%s3998_s1 + $0x394] ss:$8 sps:$4 sm:$0xff]  }
  0x4c   : > { %1892 = vmatmul.mubr.bf16.vlgmr.msra.gmra.mxu0 %v2424_v8  ;;  %v2893_v8 = vld [vmem:[%s3998_s1 + $0x290] ss:$8 sps:$4 sm:$0xff]  }
  0x4d   : > { %1935 = vmatmul.mubr.bf16.vlgmr.msra.gmra.mxu1 %v2426_v9  ;;  %1946 = vmatpush1.bf16.msra.mxu0 %v2809_v10  ;;  %v2896_v9 = vld [vmem:[%s3998_s1 + $0x390] ss:$8 sps:$4 sm:$0xff]   ;;  %v2901_v10 = vld [vmem:[%s3998_s1 + $0x284] ss:$8 sps:$4 sm:$0xff]  }
  0x4e   : > { %1989 = vmatpush1.bf16.msra.mxu1 %v2812_v11  ;;  %1947 = vmatprep.subr.bf16.mxu0 %v2817_v12  ;;  %v2904_v11 = vld [vmem:[%s3998_s1 + $0x384] ss:$8 sps:$4 sm:$0xff]   ;;  %v2899_v12 = vld [vmem:[%s3998_s1 + $0x280] ss:$8 sps:$4 sm:$0xff]  }
  0x4f   : > { %1990 = vmatprep.subr.bf16.mxu1 %v2820_v13  ;;  %1977 = vmatprep.mubr.bf16.mxu0 %v2429_v41  ;;  %v2902_v13 = vld [vmem:[%s3998_s1 + $0x380] ss:$8 sps:$4 sm:$0xff]   ;;  %v2932_v41 = vld [vmem:[%s3998_s1 + $0x530] ss:$8 sps:$4 sm:$0xff]  }
  0x50   : > { %2020 = vmatprep.mubr.bf16.mxu1 %v2431_v43  ;;  %v2940_v43 = vld [vmem:[%s3998_s1 + $0x524] ss:$8 sps:$4 sm:$0xff]  }
  0x51   : > { %1948 = vmatpush1.bf16.msra.mxu0 %v2815_v14  ;;  %v2907_v14 = vld [vmem:[%s3998_s1 + $0x474] ss:$8 sps:$4 sm:$0xff]  }
  0x52   : > { %1991 = vmatpush1.bf16.msra.mxu1 %v2818_v15  ;;  %1949 = vmatprep.subr.bf16.mxu0 %v2823_v16  ;;  %v2910_v15 = vld [vmem:[%s3998_s1 + $0x574] ss:$8 sps:$4 sm:$0xff]   ;;  %v2428_v16 = vcombine.low %v3431_v36, %v3434_v37  ;;  %v2923_v36 = vld [vmem:[%s3998_s1 + $0x440] ss:$8 sps:$4 sm:$0xff]  }
  0x53   : > { %1992 = vmatprep.subr.bf16.mxu1 %v2826_v17  ;;  %v2430_v17 = vcombine.low %v3437_v38, %v3440_v39  ;;  %v2926_v37 = vld [vmem:[%s3998_s1 + $0x540] ss:$8 sps:$4 sm:$0xff]   ;;  %v2931_v38 = vld [vmem:[%s3998_s1 + $0x434] ss:$8 sps:$4 sm:$0xff]  }
  0x54   : > { %v2934_v39 = vld [vmem:[%s3998_s1 + $0x534] ss:$8 sps:$4 sm:$0xff]  }
  0x55   : > { %1950 = vmatpush1.bf16.msra.mxu0 %v2821_v18  ;;  %v2905_v18 = vld [vmem:[%s3998_s1 + $0x470] ss:$8 sps:$4 sm:$0xff]  }
  0x56   : > { %1993 = vmatpush1.bf16.msra.mxu1 %v2824_v19  ;;  %1951 = vmatprep.subr.bf16.mxu0 %v2829_v20  ;;  %v2908_v19 = vld [vmem:[%s3998_s1 + $0x570] ss:$8 sps:$4 sm:$0xff]   ;;  %v2913_v20 = vld [vmem:[%s3998_s1 + $0x464] ss:$8 sps:$4 sm:$0xff]  }
  0x57   : > { %1994 = vmatprep.subr.bf16.mxu1 %v2832_v21  ;;  %v2916_v21 = vld [vmem:[%s3998_s1 + $0x564] ss:$8 sps:$4 sm:$0xff]  }
  0x59   : > { %1952 = vmatpush1.bf16.msra.mxu0 %v2827_v22  ;;  %v2911_v22 = vld [vmem:[%s3998_s1 + $0x460] ss:$8 sps:$4 sm:$0xff]  }
  0x5a   : > { %1995 = vmatpush1.bf16.msra.mxu1 %v2830_v23  ;;  %1953 = vmatprep.subr.bf16.mxu0 %v2835_v24  ;;  %v2914_v23 = vld [vmem:[%s3998_s1 + $0x560] ss:$8 sps:$4 sm:$0xff]  }
  0x5b   : > { %1996 = vmatprep.subr.bf16.mxu1 %v2838_v25  ;;  %v3583_v24 = vld [vmem:[%s3280_s12 + $0x20] sm:$0xff] }
  0x5c   : > { %v3586_v25 = vld [vmem:[%s3280_s12 + $0x60] sm:$0xff] }
  0x5d   : > { %1954 = vmatpush1.bf16.msra.mxu0 %v2833_v26  ;;  %v3589_v26 = vld [vmem:[%s3280_s12 + $0x28] sm:$0xff] }
  0x5e   : > { %1997 = vmatpush1.bf16.msra.mxu1 %v2836_v27  ;;  %1955 = vmatprep.subr.bf16.mxu0 %v2841_v28  ;;  %v3592_v27 = vld [vmem:[%s3280_s12 + $0x68] sm:$0xff]  ;;  %v2919_v28 = vld [vmem:[%s3998_s1 + $0x454] ss:$8 sps:$4 sm:$0xff]  }
  0x5f   : > { %1998 = vmatprep.subr.bf16.mxu1 %v2844_v29  ;;  %v2433_v29 = vcombine.high %v3583_v24, %v3586_v25 }
  0x61   : > { %1956 = vmatpush1.bf16.msra.mxu0 %v2839_v30  ;;  %v2922_v30 = vld [vmem:[%s3998_s1 + $0x554] ss:$8 sps:$4 sm:$0xff]  }
  0x62   : > { %1999 = vmatpush1.bf16.msra.mxu1 %v2842_v31  ;;  %1957 = vmatprep.subr.bf16.mxu0 %v2847_v32  ;;  %v2435_v31 = vcombine.high %v3589_v26, %v3592_v27  ;;  %v2917_v32 = vld [vmem:[%s3998_s1 + $0x450] ss:$8 sps:$4 sm:$0xff]  }
  0x63   : > { %2000 = vmatprep.subr.bf16.mxu1 %v2850_v33  ;;  %v2920_v33 = vld [vmem:[%s3998_s1 + $0x550] ss:$8 sps:$4 sm:$0xff]  }
  0x65   : > { %1958 = vmatpush1.bf16.msra.mxu0 %v2845_v34  ;;  %v2925_v34 = vld [vmem:[%s3998_s1 + $0x444] ss:$8 sps:$4 sm:$0xff]  }
  0x66   : > { %2001 = vmatpush1.bf16.msra.mxu1 %v2848_v35  ;;  %1959 = vmatprep.subr.bf16.mxu0 %v2853_v40  ;;  %v2928_v35 = vld [vmem:[%s3998_s1 + $0x544] ss:$8 sps:$4 sm:$0xff]   ;;  %v2929_v40 = vld [vmem:[%s3998_s1 + $0x430] ss:$8 sps:$4 sm:$0xff]  }
  0x67   : > { %2002 = vmatprep.subr.bf16.mxu1 %v2856_v42  ;;  %v2937_v42 = vld [vmem:[%s3998_s1 + $0x424] ss:$8 sps:$4 sm:$0xff]  }
  0x69   : > { %1960 = vmatpush1.bf16.msra.mxu0 %v2851_v44  ;;  %v2935_v44 = vld [vmem:[%s3998_s1 + $0x420] ss:$8 sps:$4 sm:$0xff]  }
  0x6a   : > { %2003 = vmatpush1.bf16.msra.mxu1 %v2854_v45  ;;  %1961 = vmatprep.subr.bf16.mxu0 %v2859_v46  ;;  %v2938_v45 = vld [vmem:[%s3998_s1 + $0x520] ss:$8 sps:$4 sm:$0xff]   ;;  %v2943_v46 = vld [vmem:[%s3998_s1 + $0x414] ss:$8 sps:$4 sm:$0xff]  }
  0x6b   : > { %2004 = vmatprep.subr.bf16.mxu1 %v2862_v47  ;;  %v2946_v47 = vld [vmem:[%s3998_s1 + $0x514] ss:$8 sps:$4 sm:$0xff]  }
  0x6d   : > { %1962 = vmatpush2.bf16.msra.mxu0 %v2857_v48  ;;  %v2941_v48 = vld [vmem:[%s3998_s1 + $0x410] ss:$8 sps:$4 sm:$0xff]  }
  0x6e   : > { %2005 = vmatpush2.bf16.msra.mxu1 %v2860_v49  ;;  %1963 = vmatprep.subr.bf16.mxu0 %v2865_v50  ;;  %v2944_v49 = vld [vmem:[%s3998_s1 + $0x510] ss:$8 sps:$4 sm:$0xff]   ;;  %v2949_v50 = vld [vmem:[%s3998_s1 + $0x404] ss:$8 sps:$4 sm:$0xff]  }
  0x6f   : > { %2006 = vmatprep.subr.bf16.mxu1 %v2868_v51  ;;  %v2952_v51 = vld [vmem:[%s3998_s1 + $0x504] ss:$8 sps:$4 sm:$0xff]  }
  0x71   : > { %1964 = vmatpush2.bf16.msra.mxu0 %v2863_v52  ;;  %v2947_v52 = vld [vmem:[%s3998_s1 + $0x400] ss:$8 sps:$4 sm:$0xff]  }
  0x72   : > { %2007 = vmatpush2.bf16.msra.mxu1 %v2866_v53  ;;  %1965 = vmatprep.subr.bf16.mxu0 %v2871_v54  ;;  %v2950_v53 = vld [vmem:[%s3998_s1 + $0x500] ss:$8 sps:$4 sm:$0xff]   ;;  %v2955_v54 = vld [vmem:[%s3998_s1 + $0x4f4] ss:$8 sps:$4 sm:$0xff]  }
  0x73   : > { %2008 = vmatprep.subr.bf16.mxu1 %v2874_v55  ;;  %v2958_v55 = vld [vmem:[%s3998_s1 + $0x5f4] ss:$8 sps:$4 sm:$0xff]  }
  0x75   : > { %1966 = vmatpush2.bf16.msra.mxu0 %v2869_v56  ;;  %v2953_v56 = vld [vmem:[%s3998_s1 + $0x4f0] ss:$8 sps:$4 sm:$0xff]  }
  0x76   : > { %2009 = vmatpush2.bf16.msra.mxu1 %v2872_v57  ;;  %1967 = vmatprep.subr.bf16.mxu0 %v2877_v58  ;;  %v2956_v57 = vld [vmem:[%s3998_s1 + $0x5f0] ss:$8 sps:$4 sm:$0xff]   ;;  %v2961_v58 = vld [vmem:[%s3998_s1 + $0x4e4] ss:$8 sps:$4 sm:$0xff]  }
  0x77   : > { %2010 = vmatprep.subr.bf16.mxu1 %v2880_v59  ;;  %v2964_v59 = vld [vmem:[%s3998_s1 + $0x5e4] ss:$8 sps:$4 sm:$0xff]  }
  0x79   : > { %1968 = vmatpush2.bf16.msra.mxu0 %v2875_v60  ;;  %v2959_v60 = vld [vmem:[%s3998_s1 + $0x4e0] ss:$8 sps:$4 sm:$0xff]  }
  0x7a   : > { %2011 = vmatpush2.bf16.msra.mxu1 %v2878_v61  ;;  %1969 = vmatprep.subr.bf16.mxu0 %v2883_v62  ;;  %v2962_v61 = vld [vmem:[%s3998_s1 + $0x5e0] ss:$8 sps:$4 sm:$0xff]   ;;  %v2967_v62 = vld [vmem:[%s3998_s1 + $0x4d4] ss:$8 sps:$4 sm:$0xff]  }
  0x7b   : > { %2012 = vmatprep.subr.bf16.mxu1 %v2886_v63  ;;  %v2970_v63 = vld [vmem:[%s3998_s1 + $0x5d4] ss:$8 sps:$4 sm:$0xff]  }
  0x7d   : > { %1970 = vmatpush2.bf16.msra.mxu0 %v2881_v0  ;;  %v2965_v0 = vld [vmem:[%s3998_s1 + $0x4d0] ss:$8 sps:$4 sm:$0xff]  }
  0x7e   : > { %2013 = vmatpush2.bf16.msra.mxu1 %v2884_v1  ;;  %1971 = vmatprep.subr.bf16.mxu0 %v2889_v2  ;;  %v2968_v1 = vld [vmem:[%s3998_s1 + $0x5d0] ss:$8 sps:$4 sm:$0xff]   ;;  %v2973_v2 = vld [vmem:[%s3998_s1 + $0x4c4] ss:$8 sps:$4 sm:$0xff]  }
  0x7f   : > { %2014 = vmatprep.subr.bf16.mxu1 %v2892_v3  ;;  %v2976_v3 = vld [vmem:[%s3998_s1 + $0x5c4] ss:$8 sps:$4 sm:$0xff]  }
  0x81   : > { %1972 = vmatpush2.bf16.msra.mxu0 %v2887_v4  ;;  %v2971_v4 = vld [vmem:[%s3998_s1 + $0x4c0] ss:$8 sps:$4 sm:$0xff]  }
  0x82   : > { %2015 = vmatpush2.bf16.msra.mxu1 %v2890_v5  ;;  %1973 = vmatprep.subr.bf16.mxu0 %v2895_v6  ;;  %v2974_v5 = vld [vmem:[%s3998_s1 + $0x5c0] ss:$8 sps:$4 sm:$0xff]   ;;  %v2979_v6 = vld [vmem:[%s3998_s1 + $0x4b4] ss:$8 sps:$4 sm:$0xff]  }
  0x83   : > { %2016 = vmatprep.subr.bf16.mxu1 %v2898_v7  ;;  %v2982_v7 = vld [vmem:[%s3998_s1 + $0x5b4] ss:$8 sps:$4 sm:$0xff]  }
  0x85   : > { %1974 = vmatpush2.bf16.msra.mxu0 %v2893_v8  ;;  %v2977_v8 = vld [vmem:[%s3998_s1 + $0x4b0] ss:$8 sps:$4 sm:$0xff]  }
  0x86   : > { %2017 = vmatpush2.bf16.msra.mxu1 %v2896_v9  ;;  %1975 = vmatprep.subr.bf16.mxu0 %v2901_v10  ;;  %v2980_v9 = vld [vmem:[%s3998_s1 + $0x5b0] ss:$8 sps:$4 sm:$0xff]   ;;  %v2985_v10 = vld [vmem:[%s3998_s1 + $0x4a4] ss:$8 sps:$4 sm:$0xff]  }
  0x87   : > { %2018 = vmatprep.subr.bf16.mxu1 %v2904_v11  ;;  %v2988_v11 = vld [vmem:[%s3998_s1 + $0x5a4] ss:$8 sps:$4 sm:$0xff]  }
  0x89   : > { %1976 = vmatpush2.bf16.msra.mxu0 %v2899_v12  ;;  %v2983_v12 = vld [vmem:[%s3998_s1 + $0x4a0] ss:$8 sps:$4 sm:$0xff]  }
  0x8a   : > { %2019 = vmatpush2.bf16.msra.mxu1 %v2902_v13  ;;  %2031 = vmatprep.subr.bf16.mxu0 %v2907_v14  ;;  %v2986_v13 = vld [vmem:[%s3998_s1 + $0x5a0] ss:$8 sps:$4 sm:$0xff]   ;;  %v2991_v14 = vld [vmem:[%s3998_s1 + $0x494] ss:$8 sps:$4 sm:$0xff]  }
  0x8b   : > { %2074 = vmatprep.subr.bf16.mxu1 %v2910_v15  ;;  %v2994_v15 = vld [vmem:[%s3998_s1 + $0x594] ss:$8 sps:$4 sm:$0xff]  }
  0x8c   : > { %1978 = vmatmul.mubr.bf16.vlgmr.msra.gmra.mxu0 %v2428_v16  ;;  %v2989_v16 = vld [vmem:[%s3998_s1 + $0x490] ss:$8 sps:$4 sm:$0xff]  }
  0x8d   : > { %2021 = vmatmul.mubr.bf16.vlgmr.msra.gmra.mxu1 %v2430_v17  ;;  %2032 = vmatpush1.bf16.msra.mxu0 %v2905_v18  ;;  %v2992_v17 = vld [vmem:[%s3998_s1 + $0x590] ss:$8 sps:$4 sm:$0xff]   ;;  %v2997_v18 = vld [vmem:[%s3998_s1 + $0x484] ss:$8 sps:$4 sm:$0xff]  }
  0x8e   : > { %2075 = vmatpush1.bf16.msra.mxu1 %v2908_v19  ;;  %2033 = vmatprep.subr.bf16.mxu0 %v2913_v20  ;;  %v3000_v19 = vld [vmem:[%s3998_s1 + $0x584] ss:$8 sps:$4 sm:$0xff]   ;;  %v2995_v20 = vld [vmem:[%s3998_s1 + $0x480] ss:$8 sps:$4 sm:$0xff]  }
  0x8f   : > { %2076 = vmatprep.subr.bf16.mxu1 %v2916_v21  ;;  %2063 = vmatprep.mubr.bf16.mxu0 %v2433_v29  ;;  %v2998_v21 = vld [vmem:[%s3998_s1 + $0x580] ss:$8 sps:$4 sm:$0xff]   ;;  %v2432_v29 = vcombine.low %v3583_v24, %v3586_v25  ;;  %v3009_v24 = vld [vmem:[%s3998_s1 + $0x664] ss:$8 sps:$4 sm:$0xff]  }
  0x90   : > { %2106 = vmatprep.mubr.bf16.mxu1 %v2435_v31  ;;  %v3780_v31 = vld [vmem:[%s3280_s12 + $0x70] sm:$0xff]  ;;  %v3012_v25 = vld [vmem:[%s3998_s1 + $0x764] ss:$8 sps:$4 sm:$0xff]  }
  0x91   : > { %2034 = vmatpush1.bf16.msra.mxu0 %v2911_v22  ;;  %v3003_v22 = vld [vmem:[%s3998_s1 + $0x674] ss:$8 sps:$4 sm:$0xff]  }
  0x92   : > { %2077 = vmatpush1.bf16.msra.mxu1 %v2914_v23  ;;  %2035 = vmatprep.subr.bf16.mxu0 %v2919_v28  ;;  %v3006_v23 = vld [vmem:[%s3998_s1 + $0x774] ss:$8 sps:$4 sm:$0xff]  }
  0x93   : > { %2078 = vmatprep.subr.bf16.mxu1 %v2922_v30  ;;  %v3773_v28 = vld [vmem:[%s3280_s12 + $0x30] sm:$0xff]  ;;  %v2434_v30 = vcombine.low %v3589_v26, %v3592_v27 }
  0x94   : > { %v2437_v26 = vcombine.high %v3773_v28, %v3780_v31 }
  0x95   : > { %2036 = vmatpush1.bf16.msra.mxu0 %v2917_v32  ;;  %v3783_v32 = vld [vmem:[%s3280_s12 + $0x38] sm:$0xff] }
  0x96   : > { %2079 = vmatpush1.bf16.msra.mxu1 %v2920_v33  ;;  %2037 = vmatprep.subr.bf16.mxu0 %v2925_v34  ;;  %v3786_v33 = vld [vmem:[%s3280_s12 + $0x78] sm:$0xff] }
  0x97   : > { %2080 = vmatprep.subr.bf16.mxu1 %v2928_v35  ;;  %v3001_v34 = vld [vmem:[%s3998_s1 + $0x670] ss:$8 sps:$4 sm:$0xff]   ;;  %v2439_v27 = vcombine.high %v3783_v32, %v3786_v33 }
  0x98   : > { %v3004_v35 = vld [vmem:[%s3998_s1 + $0x770] ss:$8 sps:$4 sm:$0xff]  }
  0x99   : > { %2038 = vmatpush1.bf16.msra.mxu0 %v2923_v36  ;;  %v3007_v36 = vld [vmem:[%s3998_s1 + $0x660] ss:$8 sps:$4 sm:$0xff]  }
  0x9a   : > { %2081 = vmatpush1.bf16.msra.mxu1 %v2926_v37  ;;  %2039 = vmatprep.subr.bf16.mxu0 %v2931_v38  ;;  %v3010_v37 = vld [vmem:[%s3998_s1 + $0x760] ss:$8 sps:$4 sm:$0xff]   ;;  %v3015_v38 = vld [vmem:[%s3998_s1 + $0x654] ss:$8 sps:$4 sm:$0xff]  }
  0x9b   : > { %2082 = vmatprep.subr.bf16.mxu1 %v2934_v39  ;;  %v3018_v39 = vld [vmem:[%s3998_s1 + $0x754] ss:$8 sps:$4 sm:$0xff]  }
  0x9d   : > { %2040 = vmatpush1.bf16.msra.mxu0 %v2929_v40  ;;  %v3013_v40 = vld [vmem:[%s3998_s1 + $0x650] ss:$8 sps:$4 sm:$0xff]  }
  0x9e   : > { %2083 = vmatpush1.bf16.msra.mxu1 %v2932_v41  ;;  %2041 = vmatprep.subr.bf16.mxu0 %v2937_v42  ;;  %v3016_v41 = vld [vmem:[%s3998_s1 + $0x750] ss:$8 sps:$4 sm:$0xff]   ;;  %v3021_v42 = vld [vmem:[%s3998_s1 + $0x644] ss:$8 sps:$4 sm:$0xff]  }
  0x9f   : > { %2084 = vmatprep.subr.bf16.mxu1 %v2940_v43  ;;  %v3024_v43 = vld [vmem:[%s3998_s1 + $0x744] ss:$8 sps:$4 sm:$0xff]  }
  0xa1   : > { %2042 = vmatpush1.bf16.msra.mxu0 %v2935_v44  ;;  %v3019_v44 = vld [vmem:[%s3998_s1 + $0x640] ss:$8 sps:$4 sm:$0xff]  }
  0xa2   : > { %2085 = vmatpush1.bf16.msra.mxu1 %v2938_v45  ;;  %2043 = vmatprep.subr.bf16.mxu0 %v2943_v46  ;;  %v3022_v45 = vld [vmem:[%s3998_s1 + $0x740] ss:$8 sps:$4 sm:$0xff]   ;;  %v3027_v46 = vld [vmem:[%s3998_s1 + $0x634] ss:$8 sps:$4 sm:$0xff]  }
  0xa3   : > { %2086 = vmatprep.subr.bf16.mxu1 %v2946_v47  ;;  %v3030_v47 = vld [vmem:[%s3998_s1 + $0x734] ss:$8 sps:$4 sm:$0xff]  }
  0xa5   : > { %2044 = vmatpush1.bf16.msra.mxu0 %v2941_v48  ;;  %v3025_v48 = vld [vmem:[%s3998_s1 + $0x630] ss:$8 sps:$4 sm:$0xff]  }
  0xa6   : > { %2087 = vmatpush1.bf16.msra.mxu1 %v2944_v49  ;;  %2045 = vmatprep.subr.bf16.mxu0 %v2949_v50  ;;  %v3028_v49 = vld [vmem:[%s3998_s1 + $0x730] ss:$8 sps:$4 sm:$0xff]   ;;  %v3033_v50 = vld [vmem:[%s3998_s1 + $0x624] ss:$8 sps:$4 sm:$0xff]  }
  0xa7   : > { %2088 = vmatprep.subr.bf16.mxu1 %v2952_v51  ;;  %v3036_v51 = vld [vmem:[%s3998_s1 + $0x724] ss:$8 sps:$4 sm:$0xff]  }
  0xa9   : > { %2046 = vmatpush1.bf16.msra.mxu0 %v2947_v52  ;;  %v3031_v52 = vld [vmem:[%s3998_s1 + $0x620] ss:$8 sps:$4 sm:$0xff]  }
  0xaa   : > { %2089 = vmatpush1.bf16.msra.mxu1 %v2950_v53  ;;  %2047 = vmatprep.subr.bf16.mxu0 %v2955_v54  ;;  %v3034_v53 = vld [vmem:[%s3998_s1 + $0x720] ss:$8 sps:$4 sm:$0xff]   ;;  %v3039_v54 = vld [vmem:[%s3998_s1 + $0x614] ss:$8 sps:$4 sm:$0xff]  }
  0xab   : > { %2090 = vmatprep.subr.bf16.mxu1 %v2958_v55  ;;  %v3042_v55 = vld [vmem:[%s3998_s1 + $0x714] ss:$8 sps:$4 sm:$0xff]  }
  0xad   : > { %2048 = vmatpush2.bf16.msra.mxu0 %v2953_v56  ;;  %v3037_v56 = vld [vmem:[%s3998_s1 + $0x610] ss:$8 sps:$4 sm:$0xff]  }
  0xae   : > { %2091 = vmatpush2.bf16.msra.mxu1 %v2956_v57  ;;  %2049 = vmatprep.subr.bf16.mxu0 %v2961_v58  ;;  %v3040_v57 = vld [vmem:[%s3998_s1 + $0x710] ss:$8 sps:$4 sm:$0xff]   ;;  %v3045_v58 = vld [vmem:[%s3998_s1 + $0x604] ss:$8 sps:$4 sm:$0xff]  }
  0xaf   : > { %2092 = vmatprep.subr.bf16.mxu1 %v2964_v59  ;;  %v3048_v59 = vld [vmem:[%s3998_s1 + $0x704] ss:$8 sps:$4 sm:$0xff]  }
  0xb1   : > { %2050 = vmatpush2.bf16.msra.mxu0 %v2959_v60  ;;  %v3043_v60 = vld [vmem:[%s3998_s1 + $0x600] ss:$8 sps:$4 sm:$0xff]  }
  0xb2   : > { %2093 = vmatpush2.bf16.msra.mxu1 %v2962_v61  ;;  %2051 = vmatprep.subr.bf16.mxu0 %v2967_v62  ;;  %v3046_v61 = vld [vmem:[%s3998_s1 + $0x700] ss:$8 sps:$4 sm:$0xff]   ;;  %v3051_v62 = vld [vmem:[%s3998_s1 + $0x6f4] ss:$8 sps:$4 sm:$0xff]  }
  0xb3   : > { %2094 = vmatprep.subr.bf16.mxu1 %v2970_v63  ;;  %v3054_v63 = vld [vmem:[%s3998_s1 + $0x7f4] ss:$8 sps:$4 sm:$0xff]  }
  0xb5   : > { %2052 = vmatpush2.bf16.msra.mxu0 %v2965_v0  ;;  %v3049_v0 = vld [vmem:[%s3998_s1 + $0x6f0] ss:$8 sps:$4 sm:$0xff]  }
  0xb6   : > { %2095 = vmatpush2.bf16.msra.mxu1 %v2968_v1  ;;  %2053 = vmatprep.subr.bf16.mxu0 %v2973_v2  ;;  %v3052_v1 = vld [vmem:[%s3998_s1 + $0x7f0] ss:$8 sps:$4 sm:$0xff]   ;;  %v3057_v2 = vld [vmem:[%s3998_s1 + $0x6e4] ss:$8 sps:$4 sm:$0xff]  }
  0xb7   : > { %2096 = vmatprep.subr.bf16.mxu1 %v2976_v3  ;;  %v3060_v3 = vld [vmem:[%s3998_s1 + $0x7e4] ss:$8 sps:$4 sm:$0xff]  }
  0xb9   : > { %2054 = vmatpush2.bf16.msra.mxu0 %v2971_v4  ;;  %v3055_v4 = vld [vmem:[%s3998_s1 + $0x6e0] ss:$8 sps:$4 sm:$0xff]  }
  0xba   : > { %2097 = vmatpush2.bf16.msra.mxu1 %v2974_v5  ;;  %2055 = vmatprep.subr.bf16.mxu0 %v2979_v6  ;;  %v3058_v5 = vld [vmem:[%s3998_s1 + $0x7e0] ss:$8 sps:$4 sm:$0xff]   ;;  %v3063_v6 = vld [vmem:[%s3998_s1 + $0x6d4] ss:$8 sps:$4 sm:$0xff]  }
  0xbb   : > { %2098 = vmatprep.subr.bf16.mxu1 %v2982_v7  ;;  %v3066_v7 = vld [vmem:[%s3998_s1 + $0x7d4] ss:$8 sps:$4 sm:$0xff]  }
  0xbd   : > { %2056 = vmatpush2.bf16.msra.mxu0 %v2977_v8  ;;  %v3061_v8 = vld [vmem:[%s3998_s1 + $0x6d0] ss:$8 sps:$4 sm:$0xff]  }
  0xbe   : > { %2099 = vmatpush2.bf16.msra.mxu1 %v2980_v9  ;;  %2057 = vmatprep.subr.bf16.mxu0 %v2985_v10  ;;  %v3064_v9 = vld [vmem:[%s3998_s1 + $0x7d0] ss:$8 sps:$4 sm:$0xff]   ;;  %v3069_v10 = vld [vmem:[%s3998_s1 + $0x6c4] ss:$8 sps:$4 sm:$0xff]  }
  0xbf   : > { %2100 = vmatprep.subr.bf16.mxu1 %v2988_v11  ;;  %v3072_v11 = vld [vmem:[%s3998_s1 + $0x7c4] ss:$8 sps:$4 sm:$0xff]  }
  0xc1   : > { %2058 = vmatpush2.bf16.msra.mxu0 %v2983_v12  ;;  %v3067_v12 = vld [vmem:[%s3998_s1 + $0x6c0] ss:$8 sps:$4 sm:$0xff]  }
  0xc2   : > { %2101 = vmatpush2.bf16.msra.mxu1 %v2986_v13  ;;  %2059 = vmatprep.subr.bf16.mxu0 %v2991_v14  ;;  %v3070_v13 = vld [vmem:[%s3998_s1 + $0x7c0] ss:$8 sps:$4 sm:$0xff]   ;;  %v3075_v14 = vld [vmem:[%s3998_s1 + $0x6b4] ss:$8 sps:$4 sm:$0xff]  }
  0xc3   : > { %2102 = vmatprep.subr.bf16.mxu1 %v2994_v15  ;;  %v3078_v15 = vld [vmem:[%s3998_s1 + $0x7b4] ss:$8 sps:$4 sm:$0xff]  }
  0xc5   : > { %2060 = vmatpush2.bf16.msra.mxu0 %v2989_v16  ;;  %v3073_v16 = vld [vmem:[%s3998_s1 + $0x6b0] ss:$8 sps:$4 sm:$0xff]  }
  0xc6   : > { %2103 = vmatpush2.bf16.msra.mxu1 %v2992_v17  ;;  %2061 = vmatprep.subr.bf16.mxu0 %v2997_v18  ;;  %v3076_v17 = vld [vmem:[%s3998_s1 + $0x7b0] ss:$8 sps:$4 sm:$0xff]   ;;  %v3081_v18 = vld [vmem:[%s3998_s1 + $0x6a4] ss:$8 sps:$4 sm:$0xff]  }
  0xc7   : > { %2104 = vmatprep.subr.bf16.mxu1 %v3000_v19  ;;  %v3084_v19 = vld [vmem:[%s3998_s1 + $0x7a4] ss:$8 sps:$4 sm:$0xff]  }
  0xc9   : > { %2062 = vmatpush2.bf16.msra.mxu0 %v2995_v20  ;;  %v3079_v20 = vld [vmem:[%s3998_s1 + $0x6a0] ss:$8 sps:$4 sm:$0xff]  }
  0xca   : > { %2105 = vmatpush2.bf16.msra.mxu1 %v2998_v21  ;;  %2117 = vmatprep.subr.bf16.mxu0 %v3003_v22  ;;  %v3082_v21 = vld [vmem:[%s3998_s1 + $0x7a0] ss:$8 sps:$4 sm:$0xff]   ;;  %v3087_v22 = vld [vmem:[%s3998_s1 + $0x694] ss:$8 sps:$4 sm:$0xff]  }
  0xcb   : > { %2160 = vmatprep.subr.bf16.mxu1 %v3006_v23  ;;  %v3090_v23 = vld [vmem:[%s3998_s1 + $0x794] ss:$8 sps:$4 sm:$0xff]  }
  0xcc   : > { %2064 = vmatmul.mubr.bf16.vlgmr.msra.gmra.mxu0 %v2432_v29  ;;  %v3085_v29 = vld [vmem:[%s3998_s1 + $0x690] ss:$8 sps:$4 sm:$0xff]  }
  0xcd   : > { %2107 = vmatmul.mubr.bf16.vlgmr.msra.gmra.mxu1 %v2434_v30  ;;  %2118 = vmatpush1.bf16.msra.mxu0 %v3001_v34  ;;  %v3088_v30 = vld [vmem:[%s3998_s1 + $0x790] ss:$8 sps:$4 sm:$0xff]   ;;  %v3093_v34 = vld [vmem:[%s3998_s1 + $0x684] ss:$8 sps:$4 sm:$0xff]  }
  0xce   : > { %2161 = vmatpush1.bf16.msra.mxu1 %v3004_v35  ;;  %2119 = vmatprep.subr.bf16.mxu0 %v3009_v24  ;;  %v3096_v35 = vld [vmem:[%s3998_s1 + $0x784] ss:$8 sps:$4 sm:$0xff]   ;;  %v3091_v24 = vld [vmem:[%s3998_s1 + $0x680] ss:$8 sps:$4 sm:$0xff]  }
  0xcf   : > { %2162 = vmatprep.subr.bf16.mxu1 %v3012_v25  ;;  %2149 = vmatprep.mubr.bf16.mxu0 %v2437_v26  ;;  %v3094_v25 = vld [vmem:[%s3998_s1 + $0x780] ss:$8 sps:$4 sm:$0xff]   ;;  %v2436_v26 = vcombine.low %v3773_v28, %v3780_v31 }
  0xd0   : > { %2192 = vmatprep.mubr.bf16.mxu1 %v2439_v27  ;;  %v2438_v27 = vcombine.low %v3783_v32, %v3786_v33 }
  0xd1   : > { %2120 = vmatpush1.bf16.msra.mxu0 %v3007_v36 }
  0xd2   : > { %2163 = vmatpush1.bf16.msra.mxu1 %v3010_v37  ;;  %2121 = vmatprep.subr.bf16.mxu0 %v3015_v38 }
  0xd3   : > { %2164 = vmatprep.subr.bf16.mxu1 %v3018_v39 }
  0xd5   : > { %2122 = vmatpush1.bf16.msra.mxu0 %v3013_v40 }
  0xd6   : > { %2165 = vmatpush1.bf16.msra.mxu1 %v3016_v41  ;;  %2123 = vmatprep.subr.bf16.mxu0 %v3021_v42 }
  0xd7   : > { %2166 = vmatprep.subr.bf16.mxu1 %v3024_v43 }
  0xd9   : > { %2124 = vmatpush1.bf16.msra.mxu0 %v3019_v44 }
  0xda   : > { %2167 = vmatpush1.bf16.msra.mxu1 %v3022_v45  ;;  %2125 = vmatprep.subr.bf16.mxu0 %v3027_v46 }
  0xdb   : > { %2168 = vmatprep.subr.bf16.mxu1 %v3030_v47 }
  0xdd   : > { %2126 = vmatpush1.bf16.msra.mxu0 %v3025_v48 }
  0xde   : > { %2169 = vmatpush1.bf16.msra.mxu1 %v3028_v49  ;;  %2127 = vmatprep.subr.bf16.mxu0 %v3033_v50 }
  0xdf   : > { %2170 = vmatprep.subr.bf16.mxu1 %v3036_v51 }
  0xe1   : > { %2128 = vmatpush1.bf16.msra.mxu0 %v3031_v52 }
  0xe2   : > { %2171 = vmatpush1.bf16.msra.mxu1 %v3034_v53  ;;  %2129 = vmatprep.subr.bf16.mxu0 %v3039_v54 }
  0xe3   : > { %2172 = vmatprep.subr.bf16.mxu1 %v3042_v55 }
  0xe5   : > { %2130 = vmatpush1.bf16.msra.mxu0 %v3037_v56 }
  0xe6   : > { %2173 = vmatpush1.bf16.msra.mxu1 %v3040_v57  ;;  %2131 = vmatprep.subr.bf16.mxu0 %v3045_v58 }
  0xe7   : > { %2174 = vmatprep.subr.bf16.mxu1 %v3048_v59 }
  0xe9   : > { %2132 = vmatpush1.bf16.msra.mxu0 %v3043_v60 }
  0xea   : > { %2175 = vmatpush1.bf16.msra.mxu1 %v3046_v61  ;;  %2133 = vmatprep.subr.bf16.mxu0 %v3051_v62 }
  0xeb   : > { %2176 = vmatprep.subr.bf16.mxu1 %v3054_v63 }
  0xed   : > { %2134 = vmatpush2.bf16.msra.mxu0 %v3049_v0 }
  0xee   : > { %2177 = vmatpush2.bf16.msra.mxu1 %v3052_v1  ;;  %2135 = vmatprep.subr.bf16.mxu0 %v3057_v2 }
  0xef   : > { %2178 = vmatprep.subr.bf16.mxu1 %v3060_v3 }
  0xf1   : > { %2136 = vmatpush2.bf16.msra.mxu0 %v3055_v4 }
  0xf2   : > { %2179 = vmatpush2.bf16.msra.mxu1 %v3058_v5  ;;  %2137 = vmatprep.subr.bf16.mxu0 %v3063_v6 }
  0xf3   : > { %2180 = vmatprep.subr.bf16.mxu1 %v3066_v7 }
  0xf5   : > { %2138 = vmatpush2.bf16.msra.mxu0 %v3061_v8 }
  0xf6   : > { %2181 = vmatpush2.bf16.msra.mxu1 %v3064_v9  ;;  %2139 = vmatprep.subr.bf16.mxu0 %v3069_v10 }
  0xf7   : > { %2182 = vmatprep.subr.bf16.mxu1 %v3072_v11 }
  0xf9   : > { %2140 = vmatpush2.bf16.msra.mxu0 %v3067_v12 }
  0xfa   : > { %2183 = vmatpush2.bf16.msra.mxu1 %v3070_v13  ;;  %2141 = vmatprep.subr.bf16.mxu0 %v3075_v14 }
  0xfb   : > { %2184 = vmatprep.subr.bf16.mxu1 %v3078_v15 }
  0xfd   : > { %2142 = vmatpush2.bf16.msra.mxu0 %v3073_v16 }
  0xfe   : > { %2185 = vmatpush2.bf16.msra.mxu1 %v3076_v17  ;;  %2143 = vmatprep.subr.bf16.mxu0 %v3081_v18 }
  0xff   : > { %2186 = vmatprep.subr.bf16.mxu1 %v3084_v19 }
 0x101   : > { %2144 = vmatpush2.bf16.msra.mxu0 %v3079_v20 }
 0x102   : > { %2187 = vmatpush2.bf16.msra.mxu1 %v3082_v21  ;;  %2145 = vmatprep.subr.bf16.mxu0 %v3087_v22 }
 0x103   : > { %2188 = vmatprep.subr.bf16.mxu1 %v3090_v23 }
 0x105   : > { %2146 = vmatpush2.bf16.msra.mxu0 %v3085_v29 }
 0x106   : > { %2189 = vmatpush2.bf16.msra.mxu1 %v3088_v30  ;;  %2147 = vmatprep.subr.bf16.mxu0 %v3093_v34 }
 0x107   : > { %2190 = vmatprep.subr.bf16.mxu1 %v3096_v35 }
 0x109   : > { %2148 = vmatpush2.bf16.msra.mxu0 %v3091_v24 }
 0x10a   : > { %2191 = vmatpush2.bf16.msra.mxu1 %v3094_v25 }
 0x10c   : > { %2150 = vmatmul.mubr.bf16.vlgmr.msra.gmra.mxu0 %v2436_v26  ;;  %v1893_v36 = vpop.f32.mrf.mxu0 }
 0x10d   : > { %2193 = vmatmul.mubr.bf16.vlgmr.msra.gmra.mxu1 %v2438_v27  ;;  %v1936_v37 = vpop.f32.mrf.mxu1 }
 0x10e   : > { %v1895_v38 = vpop.f32.mrf.mxu0  ;;  %v1937_v50 = vadd.f32 %v1936_v37, %v1893_v36 }
 0x10f   : > { %v1938_v39 = vpop.f32.mrf.mxu1 }
 0x110   : > { %v1897_v40 = vpop.f32.mrf.mxu0  ;;  %v1939_v51 = vadd.f32 %v1938_v39, %v1895_v38 }
 0x111   : > { %v1940_v41 = vpop.f32.mrf.mxu1 }
 0x112   : > { %v1899_v42 = vpop.f32.mrf.mxu0  ;;  %v1941_v55 = vadd.f32 %v1940_v41, %v1897_v40 }
 0x113   : > { %v1942_v43 = vpop.f32.mrf.mxu1 }
 0x114   : > { %v1943_v57 = vadd.f32 %v1942_v43, %v1899_v42 }
 0x14c   : > { %v1979_v44 = vpop.f32.mrf.mxu0 }
 0x14d   : > { %v2022_v45 = vpop.f32.mrf.mxu1  ;;  %v1980_v52 = vadd.f32 %v1979_v44, %v1937_v50 }
 0x14e   : > { %v1981_v46 = vpop.f32.mrf.mxu0 }
 0x14f   : > { %v2024_v47 = vpop.f32.mrf.mxu1  ;;  %v1982_v56 = vadd.f32 %v1981_v46, %v1939_v51  ;;  %v2023_v58 = vadd.f32 %v2022_v45, %v1980_v52  ;;  %v3105_v45 = vmov 1966171168  }
 0x150   : > { %v1983_v28 = vpop.f32.mrf.mxu0  ;;  %v2235_v46 = vunpack.c.l.s4 %v3105_v45 }
 0x151   : > { %v2026_v31 = vpop.f32.mrf.mxu1  ;;  %v1984_v59 = vadd.f32 %v1983_v28, %v1941_v55  ;;  %v2025_v62 = vadd.f32 %v2024_v47, %v1982_v56 }
 0x152   : > { %v1985_v48 = vpop.f32.mrf.mxu0  ;;  %v2236_v52 = vunpack.c.0.s8 %v2235_v46 }
 0x153   : > { %v2028_v32 = vpop.f32.mrf.mxu1  ;;  %v1986_v63 = vadd.f32 %v1985_v48, %v1943_v57  ;;  %v2027_v1 = vadd.f32 %v2026_v31, %v1984_v59 }
 0x155   : > { %v2029_v5 = vadd.f32 %v2028_v32, %v1986_v63  ;;  %v2237_v32 = vlaneseq }
 0x157   : > { %v2238_v57 = vshrl.u32 %v2237_v32, 7  ;;  %vm2251_vm0 = vcmp.lt.s32.totalorder %v2237_v32, 256 }
 0x18c   : > { %v2065_v33 = vpop.f32.mrf.mxu0 }
 0x18d   : > { %v2108_v49 = vpop.f32.mrf.mxu1  ;;  %v2066_v0 = vadd.f32 %v2065_v33, %v2023_v58 }
 0x18e   : > { %v2067_v53 = vpop.f32.mrf.mxu0 }
 0x18f   : > { %v2110_v54 = vpop.f32.mrf.mxu1  ;;  %v2068_v2 = vadd.f32 %v2067_v53, %v2025_v62  ;;  %v2109_v6 = vadd.f32 %v2108_v49, %v2066_v0  ;;  %v2239_v0 = vsub.s32 %v2236_v52, %v2238_v57 }
 0x190   : > { %v2069_v60 = vpop.f32.mrf.mxu0 }
 0x191   : > { %v2112_v61 = vpop.f32.mrf.mxu1  ;;  %v2070_v7 = vadd.f32 %v2069_v60, %v2027_v1  ;;  %v2111_v10 = vadd.f32 %v2110_v54, %v2068_v2 }
 0x192   : > { %v2071_v3 = vpop.f32.mrf.mxu0 }
 0x193   : > { %v2114_v4 = vpop.f32.mrf.mxu1  ;;  %v2072_v11 = vadd.f32 %v2071_v3, %v2029_v5  ;;  %v2113_v15 = vadd.f32 %v2112_v61, %v2070_v7 }
 0x195   : > { %v2115_v19 = vadd.f32 %v2114_v4, %v2072_v11 }
 0x1cc   : > { %v2151_v8 = vpop.f32.mrf.mxu0 }
 0x1cd   : > { %v2194_v9 = vpop.f32.mrf.mxu1  ;;  %v2152_v12 = vadd.f32 %v2151_v8, %v2109_v6 }
 0x1ce   : > { %v2153_v13 = vpop.f32.mrf.mxu0 }
 0x1cf   : > { %v2196_v14 = vpop.f32.mrf.mxu1  ;;  %v2154_v16 = vadd.f32 %v2153_v13, %v2111_v10  ;;  %v2195_v20 = vadd.f32 %v2194_v9, %v2152_v12 }
 0x1d0   : > { %v2155_v17 = vpop.f32.mrf.mxu0 }
 0x1d1   : > { %v2198_v18 = vpop.f32.mrf.mxu1  ;;  %v2197_v21 = vadd.f32 %v2196_v14, %v2154_v16  ;;  %v2156_v22 = vadd.f32 %v2155_v17, %v2113_v15  ;;  %v2254_v24 = vmul.f32 %v2195_v20, %v2195_v20 }
 0x1d2   : > { %v2157_v23 = vpop.f32.mrf.mxu0 }
 0x1d3   : > { %v2702_v29 = vpack.c.bf16 %v2197_v21, %v2195_v20  ;;  %v2199_v30 = vadd.f32 %v2198_v18, %v2156_v22  ;;  %v2158_v34 = vadd.f32 %v2157_v23, %v2115_v19  ;;  %v2200_v35 = vpop.f32.mrf.mxu1  ;;  %v2255_v40 = vmul.f32 %v2197_v21, %v2197_v21 }
 0x1d5   : > { %2215 = vst [vmem:[%s217_s18] sm:$0xff] %v2702_v29  ;;  %v2217_v25 = vadd.f32 %v2199_v30, %v2195_v20  ;;  %v2256_v26 = vmul.f32 %v2199_v30, %v2199_v30  ;;  %v2201_v27 = vadd.f32 %v2200_v35, %v2158_v34 }
 0x1d7   : > { %v2218_v36 = vrot.slane %v2217_v25, 4  ;;  %v2258_v37 = vadd.f32 %v2256_v26, %v2254_v24  ;;  %v2703_v38 = vpack.c.bf16 %v2201_v27, %v2199_v30  ;;  %v2224_v39 = vadd.f32 %v2201_v27, %v2197_v21 }
 0x1d8   : > { %v2257_v41 = vmul.f32 %v2201_v27, %v2201_v27 }
 0x1d9   : > { %v2219_v42 = vadd.f32 %v2218_v36, %v2217_v25  ;;  %v2259_v43 = vrot.slane %v2258_v37, 4  ;;  %2216 = vst [vmem:[%s217_s18 + $0x8] sm:$0xff] %v2703_v38  ;;  %v2225_v44 = vrot.slane %v2224_v39, 4 }
 0x1da   : > { %v2265_v47 = vadd.f32 %v2257_v41, %v2255_v40 }
 0x1db   : > { %v2220_v28 = vrot.slane %v2219_v42, 2  ;;  %v2260_v31 = vadd.f32 %v2259_v43, %v2258_v37  ;;  %v2226_v48 = vadd.f32 %v2225_v44, %v2224_v39 }
 0x1dc   : > { %v2266_v33 = vrot.slane %v2265_v47, 4 }
 0x1dd   : > { %v2221_v49 = vadd.f32 %v2220_v28, %v2219_v42  ;;  %v2261_v50 = vrot.slane %v2260_v31, 2  ;;  %v2227_v51 = vrot.slane %v2226_v48, 2 }
 0x1de   : > { %v2267_v53 = vadd.f32 %v2266_v33, %v2265_v47 }
 0x1df   : > { %v2222_v54 = vrot.slane %v2221_v49, 1  ;;  %v2262_v55 = vadd.f32 %v2261_v50, %v2260_v31  ;;  %v2228_v56 = vadd.f32 %v2227_v51, %v2226_v48 }
 0x1e0   : > { %v2268_v58 = vrot.slane %v2267_v53, 2 }
 0x1e1   : > { %v2229_v59 = vrot.slane %v2228_v56, 1  ;;  %v2263_v60 = vrot.slane %v2262_v55, 1  ;;  %v2223_v62 = vadd.f32 %v2222_v54, %v2221_v49 }
 0x1e2   : > { %v2269_v61 = vadd.f32 %v2268_v58, %v2267_v53 }
 0x1e3   : > { %v2230_v63 = vadd.f32 %v2229_v59, %v2228_v56  ;;  %v2264_v3 = vadd.f32 %v2263_v60, %v2262_v55 }
 0x1e4   : > { %v2270_v1 = vrot.slane %v2269_v61, 1 }
 0x1e5   : > { %v2233_v2 = vcombine.low %v2223_v62, %v2230_v63 }
 0x1e6   : > { %v2271_v4 = vadd.f32 %v2270_v1, %v2269_v61 }
 0x1e7   : > { %v2240_v5 = vrot.slane %v2233_v2, %v2239_v0 }
 0x1e8   : > { %v2274_v6 = vcombine.low %v2264_v3, %v2271_v4 }
 0x1e9   : > { %v2247_v7 = vrot.slane %v2240_v5, %v2239_v0 }
 0x1ea   : > { %v2281_v8 = vrot.slane %v2274_v6, %v2239_v0 }
 0x1eb   : > { %2253 = vst.msk [vmem:[%s222_s21] sm:$0x3] %vm2251_vm0, %v2247_v7 }
 0x1ec   : > { %v2288_v9 = vrot.slane %v2281_v8, %v2239_v0 }
 0x1ee   : > { %2290 = vst.msk [vmem:[%s226_s24] sm:$0x3] %vm2251_vm0, %v2288_v9 }
 0x1ef PF: > { %s15_s15 = sadd.s32 1, %s3103_s15  }
 0x1f0   : > { %p12_p5 = scmp.ge.s32.totalorder %s15_s15, 4  }
 0x1f2   :  { %14 = sbr.rel (!%p12_p5) target bundleno = 1 (0x1), region = 82 }

// kernel: forward_real.14
= control target key start
LH: loop header
LB: loop body
LE: loop exit
PB: predicated region body
PF: predicated region fallthrough
CT: control target
= control target key end

     0   :  { %s420_s12 = smov 0   ;;  %s450_s0 = inlined_call_operand.vmem [shape: bf16[32,512], index: 0, kind: input, shape index: {}]   ;;  %s451_s1 = inlined_call_operand.vmem [shape: f32[1,512], index: 1, kind: input, shape index: {}]   ;;  %s452_s2 = inlined_call_operand.vmem [shape: f32[1,512], index: 2, kind: input, shape index: {}]   ;;  %s453_s3 = inlined_call_operand.vmem [shape: bf16[32,512], index: 3, kind: output, shape index: {}]  }
   0x1 LB: > { %s361_s13 = sadd.s32 4294967295, %s398_s12   ;;  %p365_p0 = scmp.ge.s32.totalorder %s398_s12, 1  ;;  %s398_s12 = sphi %s420_s12, %s13_s12  }
   0x2   : > { %p139_p1 = scmp.lt.s32.totalorder %s398_s12, 3 }
   0x4   : > { %p140_p2 = pnand %p365_p0, %p139_p1 }
   0x5   : > { %s366_s14 = sshll.u32 (!%p140_p2), %s361_s13, 1 }
   0x6   : > { %143 = sbr.rel (%p140_p2) target bundleno = 35 (0x23), region = 32  ;;  %p166_p3 = scmp.lt.s32.totalorder (!%p140_p2), %s366_s14, 3 }
   0xb   : > { %v193_v0 = vlaneseq  ;;  %s455_s14 = smov (!%p166_p3, %s366_s14), 3  ;;  %v191_v2 = vld [vmem:[%s451_s1] sm:$0xf] }
   0xc   : > { %v221_v3 = vld [vmem:[%s452_s2] sm:$0xf]  ;;  %s378_s19 = sshll.u32 %s455_s14, 4 }
   0xd   : > { %v194_v1 = vshrl.u32 %v193_v0, 7  ;;  %s170_s22 = scalar_lea.vmem %s450_s0, %s378_s19  ;;  %s177_s25 = scalar_lea.vmem %s453_s3, %s378_s19 }
   0xe   : > { %v179_v12 = vld [vmem:[%s170_s22] sm:$0xff]  ;;  %v180_v13 = vld [vmem:[%s170_s22 + $0x8] sm:$0xff]  ;;  %v181_v14 = vld [vmem:[%s170_s22 + $0x10] sm:$0xff] }
   0xf   : > { %v195_v4 = vsub.s32 0, %v194_v1  ;;  %v199_v5 = vsub.s32 1, %v194_v1  ;;  %v203_v6 = vsub.s32 2, %v194_v1  ;;  %v207_v7 = vsub.s32 3, %v194_v1  ;;  %v182_v19 = vld [vmem:[%s170_s22 + $0x18] sm:$0xff] }
  0x10   : > { %v183_v20 = vunpack.c.l.bf16 %v179_v12  ;;  %v184_v21 = vunpack.c.h.bf16 %v179_v12  ;;  %v185_v22 = vunpack.c.l.bf16 %v180_v13  ;;  %v186_v23 = vunpack.c.h.bf16 %v180_v13 }
  0x11   : > { %v196_v8 = vrot.slane %v191_v2, %v195_v4  ;;  %v200_v9 = vrot.slane %v191_v2, %v199_v5  ;;  %v226_v10 = vrot.slane %v221_v3, %v195_v4  ;;  %v230_v11 = vrot.slane %v221_v3, %v199_v5 }
  0x12   : > { %v204_v15 = vrot.slane %v191_v2, %v203_v6  ;;  %v208_v16 = vrot.slane %v191_v2, %v207_v7  ;;  %v234_v17 = vrot.slane %v221_v3, %v203_v6  ;;  %v238_v18 = vrot.slane %v221_v3, %v207_v7 }
  0x13   : > { %v187_v24 = vunpack.c.l.bf16 %v181_v14  ;;  %v188_v25 = vunpack.c.h.bf16 %v181_v14  ;;  %v189_v26 = vunpack.c.l.bf16 %v182_v19  ;;  %v190_v27 = vunpack.c.h.bf16 %v182_v19 }
  0x14   : > { %v213_v28 = vmul.f32 %v196_v8, %v183_v20  ;;  %v214_v29 = vmul.f32 %v200_v9, %v184_v21  ;;  %v215_v30 = vmul.f32 %v204_v15, %v185_v22  ;;  %v216_v31 = vmul.f32 %v208_v16, %v186_v23 }
  0x15   : > { %v217_v32 = vmul.f32 %v196_v8, %v187_v24  ;;  %v218_v33 = vmul.f32 %v200_v9, %v188_v25  ;;  %v219_v34 = vmul.f32 %v204_v15, %v189_v26  ;;  %v220_v35 = vmul.f32 %v208_v16, %v190_v27 }
  0x16   : > { %v243_v36 = vadd.f32 %v226_v10, %v213_v28  ;;  %v244_v37 = vadd.f32 %v230_v11, %v214_v29  ;;  %v245_v38 = vadd.f32 %v234_v17, %v215_v30  ;;  %v246_v39 = vadd.f32 %v238_v18, %v216_v31 }
  0x17   : > { %v247_v40 = vadd.f32 %v226_v10, %v217_v32  ;;  %v248_v41 = vadd.f32 %v230_v11, %v218_v33  ;;  %v249_v42 = vadd.f32 %v234_v17, %v219_v34  ;;  %v250_v43 = vadd.f32 %v238_v18, %v220_v35 }
  0x18   : > { %vm251_vm0 = vcmp.ge.f32.partialorder %v243_v36, 0.0  ;;  %vm252_vm1 = vcmp.ge.f32.partialorder %v244_v37, 0.0  ;;  %v259_v44 = vmul.f32 0.2, %v243_v36  ;;  %v260_v45 = vmul.f32 0.2, %v244_v37 }
  0x19   : > { %vm253_vm2 = vcmp.ge.f32.partialorder %v245_v38, 0.0  ;;  %vm254_vm3 = vcmp.ge.f32.partialorder %v246_v39, 0.0  ;;  %v261_v46 = vmul.f32 0.2, %v245_v38  ;;  %v262_v47 = vmul.f32 0.2, %v246_v39 }
  0x1a   : > { %v267_v48 = vsel %vm251_vm0, %v243_v36, %v259_v44  ;;  %v268_v49 = vsel %vm252_vm1, %v244_v37, %v260_v45  ;;  %vm255_vm4 = vcmp.ge.f32.partialorder %v247_v40, 0.0  ;;  %vm256_vm5 = vcmp.ge.f32.partialorder %v248_v41, 0.0 }
  0x1b   : > { %v380_v50 = vpack.c.bf16 %v268_v49, %v267_v48  ;;  %v269_v51 = vsel %vm253_vm2, %v245_v38, %v261_v46  ;;  %v270_v52 = vsel %vm254_vm3, %v246_v39, %v262_v47  ;;  %v263_v53 = vmul.f32 0.2, %v247_v40 }
  0x1c   : > { %v381_v54 = vpack.c.bf16 %v270_v52, %v269_v51  ;;  %v264_v55 = vmul.f32 0.2, %v248_v41  ;;  %vm257_vm6 = vcmp.ge.f32.partialorder %v249_v42, 0.0  ;;  %vm258_vm7 = vcmp.ge.f32.partialorder %v250_v43, 0.0 }
  0x1d   : > { %299 = vst [vmem:[%s177_s25] sm:$0xff] %v380_v50  ;;  %v271_v56 = vsel %vm255_vm4, %v247_v40, %v263_v53  ;;  %v265_v57 = vmul.f32 0.2, %v249_v42  ;;  %v266_v58 = vmul.f32 0.2, %v250_v43 }
  0x1e   : > { %300 = vst [vmem:[%s177_s25 + $0x8] sm:$0xff] %v381_v54  ;;  %v272_v59 = vsel %vm256_vm5, %v248_v41, %v264_v55 }
  0x1f   : > { %v382_v60 = vpack.c.bf16 %v272_v59, %v271_v56  ;;  %v273_v61 = vsel %vm257_vm6, %v249_v42, %v265_v57  ;;  %v274_v62 = vsel %vm258_vm7, %v250_v43, %v266_v58 }
  0x20   : > { %v383_v63 = vpack.c.bf16 %v274_v62, %v273_v61 }
  0x21   : > { %301 = vst [vmem:[%s177_s25 + $0x10] sm:$0xff] %v382_v60 }
  0x22   : > { %302 = vst [vmem:[%s177_s25 + $0x18] sm:$0xff] %v383_v63 }
  0x23 PF: > { %s13_s12 = sadd.s32 1, %s398_s12  }
  0x24   : > { %p10_p4 = scmp.ge.s32.totalorder %s13_s12, 4  }
  0x26   :  { %12 = sbr.rel (!%p10_p4) target bundleno = 1 (0x1), region = 62 }

// kernel: forward_real.13
= control target key start
LH: loop header
LB: loop body
LE: loop exit
PB: predicated region body
PF: predicated region fallthrough
CT: control target
= control target key end

     0   :  { %s10875_s15 = smov 0   ;;  %s14409_s0 = inlined_call_operand.vmem [shape: bf16[32,4096], index: 0, kind: input, shape index: {}]   ;;  %s14410_s1 = inlined_call_operand.vmem [shape: bf16[4096,512], index: 1, kind: input, shape index: {}]   ;;  %s14411_s2 = inlined_call_operand.vmem [shape: bf16[32,512], index: 2, kind: output, shape index: {0}]   ;;  %s14412_s3 = inlined_call_operand.vmem [shape: f32[2,1,512], index: 3, kind: output, shape index: {1}]   ;;  %s14413_s4 = inlined_call_operand.vmem [shape: f32[2,1,512], index: 4, kind: output, shape index: {2}]  }
   0x1 LB: > { %s10881_s16 = sadd.s32 4294967295, %s10847_s15   ;;  %p8219_p0 = scmp.ge.s32.totalorder %s10847_s15, 1  ;;  %s10847_s15 = sphi %s10875_s15, %s15_s15  }
   0x2   : > { %p169_p1 = scmp.lt.s32.totalorder %s10847_s15, 3 }
   0x4   : > { %p170_p2 = pnand %p8219_p0, %p169_p1 }
   0x6   : > { %173 = sbr.rel (%p170_p2) target bundleno = 1265 (0x4f1), region = 28 }
   0xb   : > { %v9305_v0 = vld [vmem:[%s14410_s1 + $0xe4] ss:$16 sps:$4 sm:$0xff]   ;;  %v9309_v2 = vld [vmem:[%s14410_s1 + $0xe0] ss:$16 sps:$4 sm:$0xff]   ;;  %s8220_s29 = sshll.u32 %s10881_s16, 1  ;;  %p219_p4 = scmp.lt.s32.totalorder %s10881_s16, 1 }
   0xc   : > { %v9307_v1 = vld [vmem:[%s14410_s1 + $0x2e4] ss:$16 sps:$4 sm:$0xff]   ;;  %6563 = vmatprep.subr.bf16.mxu0 %v9305_v0  ;;  %v9310_v3 = vld [vmem:[%s14410_s1 + $0x2e0] ss:$16 sps:$4 sm:$0xff]   ;;  %p206_p3 = scmp.lt.s32.totalorder %s8220_s29, 3 }
   0xd   : > { %6606 = vmatprep.subr.bf16.mxu1 %v9307_v1  ;;  %v9311_v4 = vld [vmem:[%s14410_s1 + $0xc4] ss:$16 sps:$4 sm:$0xff]   ;;  %6564 = vmatpush1.bf16.msra.mxu0 %v9309_v2  ;;  %v9315_v6 = vld [vmem:[%s14410_s1 + $0xc0] ss:$16 sps:$4 sm:$0xff]   ;;  %s14432_s16 = smov (!%p219_p4, %s10881_s16), 1 }
   0xe   : > { %6607 = vmatpush1.bf16.msra.mxu1 %v9310_v3  ;;  %v9313_v5 = vld [vmem:[%s14410_s1 + $0x2c4] ss:$16 sps:$4 sm:$0xff]   ;;  %6565 = vmatprep.subr.bf16.mxu0 %v9311_v4  ;;  %v9316_v7 = vld [vmem:[%s14410_s1 + $0x2c0] ss:$16 sps:$4 sm:$0xff]   ;;  %s14430_s29 = smov (!%p206_p3, %s8220_s29), 3 }
   0xf   : > { %6608 = vmatprep.subr.bf16.mxu1 %v9313_v5  ;;  %v9317_v8 = vld [vmem:[%s14410_s1 + $0xa4] ss:$16 sps:$4 sm:$0xff]   ;;  %v9321_v10 = vld [vmem:[%s14410_s1 + $0xa0] ss:$16 sps:$4 sm:$0xff]   ;;  %s9290_s28 = sshll.u32 %s14430_s29, 7  ;;  %s9291_s9 = sshll.u32 %s14430_s29, 4 }
  0x10   : > { %v9319_v9 = vld [vmem:[%s14410_s1 + $0x2a4] ss:$16 sps:$4 sm:$0xff]   ;;  %v9322_v11 = vld [vmem:[%s14410_s1 + $0x2a0] ss:$16 sps:$4 sm:$0xff]   ;;  %s11024_s12 = scalar_lea.vmem %s14409_s0, %s9290_s28  ;;  %s13432_s17 = scalar_lea.vmem %s14411_s2, %s9291_s9 }
  0x11   : > { %6566 = vmatpush1.bf16.msra.mxu0 %v9315_v6  ;;  %v9323_v12 = vld [vmem:[%s14410_s1 + $0x84] ss:$16 sps:$4 sm:$0xff]   ;;  %v9327_v14 = vld [vmem:[%s14410_s1 + $0x80] ss:$16 sps:$4 sm:$0xff]   ;;  %v228_v50 = vld [vmem:[%s11024_s12 + $0x8] sm:$0xff] }
  0x12   : > { %6609 = vmatpush1.bf16.msra.mxu1 %v9316_v7  ;;  %6567 = vmatprep.subr.bf16.mxu0 %v9317_v8  ;;  %v9325_v13 = vld [vmem:[%s14410_s1 + $0x284] ss:$16 sps:$4 sm:$0xff]   ;;  %v9328_v15 = vld [vmem:[%s14410_s1 + $0x280] ss:$16 sps:$4 sm:$0xff]   ;;  %v244_v51 = vld [vmem:[%s11024_s12 + $0x88] sm:$0xff] }
  0x13   : > { %6610 = vmatprep.subr.bf16.mxu1 %v9319_v9  ;;  %v9329_v16 = vld [vmem:[%s14410_s1 + $0x64] ss:$16 sps:$4 sm:$0xff]   ;;  %v9333_v18 = vld [vmem:[%s14410_s1 + $0x60] ss:$16 sps:$4 sm:$0xff]   ;;  %v11050_v55 = vcombine.high %v228_v50, %v244_v51  ;;  %v11104_v9 = vcombine.low %v228_v50, %v244_v51 }
  0x14   : > { %v9331_v17 = vld [vmem:[%s14410_s1 + $0x264] ss:$16 sps:$4 sm:$0xff]   ;;  %v9334_v19 = vld [vmem:[%s14410_s1 + $0x260] ss:$16 sps:$4 sm:$0xff]  }
  0x15   : > { %6568 = vmatpush1.bf16.msra.mxu0 %v9321_v10  ;;  %v9335_v20 = vld [vmem:[%s14410_s1 + $0x44] ss:$16 sps:$4 sm:$0xff]   ;;  %v9339_v22 = vld [vmem:[%s14410_s1 + $0x40] ss:$16 sps:$4 sm:$0xff]   ;;  %6638 = vmatprep.mubr.bf16.mxu1 %v11050_v55 }
  0x16   : > { %6611 = vmatpush1.bf16.msra.mxu1 %v9322_v11  ;;  %6569 = vmatprep.subr.bf16.mxu0 %v9323_v12  ;;  %v9337_v21 = vld [vmem:[%s14410_s1 + $0x244] ss:$16 sps:$4 sm:$0xff]   ;;  %v9340_v23 = vld [vmem:[%s14410_s1 + $0x240] ss:$16 sps:$4 sm:$0xff]  }
  0x17   : > { %6612 = vmatprep.subr.bf16.mxu1 %v9325_v13  ;;  %v9341_v24 = vld [vmem:[%s14410_s1 + $0x24] ss:$16 sps:$4 sm:$0xff]   ;;  %v9345_v26 = vld [vmem:[%s14410_s1 + $0x20] ss:$16 sps:$4 sm:$0xff]  }
  0x18   : > { %v9343_v25 = vld [vmem:[%s14410_s1 + $0x224] ss:$16 sps:$4 sm:$0xff]   ;;  %v9346_v27 = vld [vmem:[%s14410_s1 + $0x220] ss:$16 sps:$4 sm:$0xff]  }
  0x19   : > { %6570 = vmatpush1.bf16.msra.mxu0 %v9327_v14  ;;  %v9347_v28 = vld [vmem:[%s14410_s1 + $0x4] ss:$16 sps:$4 sm:$0xff]   ;;  %v9351_v30 = vld [vmem:[%s14410_s1] ss:$16 sps:$4 sm:$0xff]  }
  0x1a   : > { %6613 = vmatpush1.bf16.msra.mxu1 %v9328_v15  ;;  %6571 = vmatprep.subr.bf16.mxu0 %v9329_v16  ;;  %v9349_v29 = vld [vmem:[%s14410_s1 + $0x204] ss:$16 sps:$4 sm:$0xff]   ;;  %v9352_v31 = vld [vmem:[%s14410_s1 + $0x200] ss:$16 sps:$4 sm:$0xff]  }
  0x1b   : > { %6614 = vmatprep.subr.bf16.mxu1 %v9331_v17  ;;  %v9353_v32 = vld [vmem:[%s14410_s1 + $0x1e4] ss:$16 sps:$4 sm:$0xff]   ;;  %v9357_v34 = vld [vmem:[%s14410_s1 + $0x1e0] ss:$16 sps:$4 sm:$0xff]  }
  0x1c   : > { %v9355_v33 = vld [vmem:[%s14410_s1 + $0x3e4] ss:$16 sps:$4 sm:$0xff]   ;;  %v9358_v35 = vld [vmem:[%s14410_s1 + $0x3e0] ss:$16 sps:$4 sm:$0xff]  }
  0x1d   : > { %6572 = vmatpush1.bf16.msra.mxu0 %v9333_v18  ;;  %v9359_v36 = vld [vmem:[%s14410_s1 + $0x1c4] ss:$16 sps:$4 sm:$0xff]   ;;  %v9363_v38 = vld [vmem:[%s14410_s1 + $0x1c0] ss:$16 sps:$4 sm:$0xff]  }
  0x1e   : > { %6615 = vmatpush1.bf16.msra.mxu1 %v9334_v19  ;;  %6573 = vmatprep.subr.bf16.mxu0 %v9335_v20  ;;  %v9361_v37 = vld [vmem:[%s14410_s1 + $0x3c4] ss:$16 sps:$4 sm:$0xff]   ;;  %v9364_v39 = vld [vmem:[%s14410_s1 + $0x3c0] ss:$16 sps:$4 sm:$0xff]  }
  0x1f   : > { %6616 = vmatprep.subr.bf16.mxu1 %v9337_v21  ;;  %v9365_v40 = vld [vmem:[%s14410_s1 + $0x1a4] ss:$16 sps:$4 sm:$0xff]   ;;  %v9369_v42 = vld [vmem:[%s14410_s1 + $0x1a0] ss:$16 sps:$4 sm:$0xff]  }
  0x20   : > { %v9367_v41 = vld [vmem:[%s14410_s1 + $0x3a4] ss:$16 sps:$4 sm:$0xff]   ;;  %v9370_v43 = vld [vmem:[%s14410_s1 + $0x3a0] ss:$16 sps:$4 sm:$0xff]  }
  0x21   : > { %6574 = vmatpush1.bf16.msra.mxu0 %v9339_v22  ;;  %v9371_v44 = vld [vmem:[%s14410_s1 + $0x184] ss:$16 sps:$4 sm:$0xff]   ;;  %v9375_v46 = vld [vmem:[%s14410_s1 + $0x180] ss:$16 sps:$4 sm:$0xff]  }
  0x22   : > { %6617 = vmatpush1.bf16.msra.mxu1 %v9340_v23  ;;  %6575 = vmatprep.subr.bf16.mxu0 %v9341_v24  ;;  %v9373_v45 = vld [vmem:[%s14410_s1 + $0x384] ss:$16 sps:$4 sm:$0xff]   ;;  %v9376_v47 = vld [vmem:[%s14410_s1 + $0x380] ss:$16 sps:$4 sm:$0xff]  }
  0x23   : > { %6618 = vmatprep.subr.bf16.mxu1 %v9343_v25  ;;  %v227_v48 = vld [vmem:[%s11024_s12] sm:$0xff] }
  0x24   : > { %v243_v49 = vld [vmem:[%s11024_s12 + $0x80] sm:$0xff] }
  0x25   : > { %6576 = vmatpush1.bf16.msra.mxu0 %v9345_v26  ;;  %v9377_v52 = vld [vmem:[%s14410_s1 + $0x164] ss:$16 sps:$4 sm:$0xff]   ;;  %v11045_v53 = vcombine.high %v227_v48, %v243_v49  ;;  %v9381_v56 = vld [vmem:[%s14410_s1 + $0x160] ss:$16 sps:$4 sm:$0xff]   ;;  %v11102_v8 = vcombine.low %v227_v48, %v243_v49 }
  0x26   : > { %6619 = vmatpush1.bf16.msra.mxu1 %v9346_v27  ;;  %6577 = vmatprep.subr.bf16.mxu0 %v9347_v28  ;;  %v9379_v54 = vld [vmem:[%s14410_s1 + $0x364] ss:$16 sps:$4 sm:$0xff]   ;;  %v9382_v57 = vld [vmem:[%s14410_s1 + $0x360] ss:$16 sps:$4 sm:$0xff]  }
  0x27   : > { %6620 = vmatprep.subr.bf16.mxu1 %v9349_v29  ;;  %6595 = vmatprep.mubr.bf16.mxu0 %v11045_v53  ;;  %v9383_v58 = vld [vmem:[%s14410_s1 + $0x144] ss:$16 sps:$4 sm:$0xff]   ;;  %v9387_v60 = vld [vmem:[%s14410_s1 + $0x140] ss:$16 sps:$4 sm:$0xff]  }
  0x28   : > { %v9385_v59 = vld [vmem:[%s14410_s1 + $0x344] ss:$16 sps:$4 sm:$0xff]   ;;  %v9388_v61 = vld [vmem:[%s14410_s1 + $0x340] ss:$16 sps:$4 sm:$0xff]  }
  0x29   : > { %6578 = vmatpush1.bf16.msra.mxu0 %v9351_v30  ;;  %v9389_v62 = vld [vmem:[%s14410_s1 + $0x124] ss:$16 sps:$4 sm:$0xff]   ;;  %v9393_v0 = vld [vmem:[%s14410_s1 + $0x120] ss:$16 sps:$4 sm:$0xff]  }
  0x2a   : > { %6621 = vmatpush1.bf16.msra.mxu1 %v9352_v31  ;;  %6579 = vmatprep.subr.bf16.mxu0 %v9353_v32  ;;  %v9391_v63 = vld [vmem:[%s14410_s1 + $0x324] ss:$16 sps:$4 sm:$0xff]   ;;  %v9394_v1 = vld [vmem:[%s14410_s1 + $0x320] ss:$16 sps:$4 sm:$0xff]  }
  0x2b   : > { %6622 = vmatprep.subr.bf16.mxu1 %v9355_v33  ;;  %v9395_v2 = vld [vmem:[%s14410_s1 + $0x104] ss:$16 sps:$4 sm:$0xff]   ;;  %v9399_v4 = vld [vmem:[%s14410_s1 + $0x100] ss:$16 sps:$4 sm:$0xff]  }
  0x2c   : > { %v9397_v3 = vld [vmem:[%s14410_s1 + $0x304] ss:$16 sps:$4 sm:$0xff]   ;;  %v9400_v5 = vld [vmem:[%s14410_s1 + $0x300] ss:$16 sps:$4 sm:$0xff]  }
  0x2d   : > { %6580 = vmatpush2.bf16.msra.mxu0 %v9357_v34  ;;  %v9403_v6 = vld [vmem:[%s14410_s1 + $0x4e4] ss:$16 sps:$4 sm:$0xff]   ;;  %v9401_v10 = vld [vmem:[%s14410_s1 + $0x4e0] ss:$16 sps:$4 sm:$0xff]  }
  0x2e   : > { %6623 = vmatpush2.bf16.msra.mxu1 %v9358_v35  ;;  %6581 = vmatprep.subr.bf16.mxu0 %v9359_v36  ;;  %v9406_v7 = vld [vmem:[%s14410_s1 + $0x6e4] ss:$16 sps:$4 sm:$0xff]   ;;  %v9404_v11 = vld [vmem:[%s14410_s1 + $0x6e0] ss:$16 sps:$4 sm:$0xff]  }
  0x2f   : > { %6624 = vmatprep.subr.bf16.mxu1 %v9361_v37  ;;  %v9409_v12 = vld [vmem:[%s14410_s1 + $0x4c4] ss:$16 sps:$4 sm:$0xff]   ;;  %v9407_v14 = vld [vmem:[%s14410_s1 + $0x4c0] ss:$16 sps:$4 sm:$0xff]  }
  0x30   : > { %v9412_v13 = vld [vmem:[%s14410_s1 + $0x6c4] ss:$16 sps:$4 sm:$0xff]   ;;  %v9410_v15 = vld [vmem:[%s14410_s1 + $0x6c0] ss:$16 sps:$4 sm:$0xff]  }
  0x31   : > { %6582 = vmatpush2.bf16.msra.mxu0 %v9363_v38  ;;  %v9415_v16 = vld [vmem:[%s14410_s1 + $0x4a4] ss:$16 sps:$4 sm:$0xff]   ;;  %v9413_v18 = vld [vmem:[%s14410_s1 + $0x4a0] ss:$16 sps:$4 sm:$0xff]   ;;  %v11193_v38 = vld [vmem:[%s11024_s12 + $0x18] sm:$0xff] }
  0x32   : > { %6625 = vmatpush2.bf16.msra.mxu1 %v9364_v39  ;;  %6583 = vmatprep.subr.bf16.mxu0 %v9365_v40  ;;  %v9418_v17 = vld [vmem:[%s14410_s1 + $0x6a4] ss:$16 sps:$4 sm:$0xff]   ;;  %v9416_v19 = vld [vmem:[%s14410_s1 + $0x6a0] ss:$16 sps:$4 sm:$0xff]   ;;  %v11196_v39 = vld [vmem:[%s11024_s12 + $0x98] sm:$0xff] }
  0x33   : > { %6626 = vmatprep.subr.bf16.mxu1 %v9367_v41  ;;  %v9421_v20 = vld [vmem:[%s14410_s1 + $0x484] ss:$16 sps:$4 sm:$0xff]   ;;  %v9419_v22 = vld [vmem:[%s14410_s1 + $0x480] ss:$16 sps:$4 sm:$0xff]  }
  0x34   : > { %v9424_v21 = vld [vmem:[%s14410_s1 + $0x684] ss:$16 sps:$4 sm:$0xff]   ;;  %v9422_v23 = vld [vmem:[%s14410_s1 + $0x680] ss:$16 sps:$4 sm:$0xff]  }
  0x35   : > { %6584 = vmatpush2.bf16.msra.mxu0 %v9369_v42  ;;  %v9427_v24 = vld [vmem:[%s14410_s1 + $0x464] ss:$16 sps:$4 sm:$0xff]   ;;  %v9425_v26 = vld [vmem:[%s14410_s1 + $0x460] ss:$16 sps:$4 sm:$0xff]  }
  0x36   : > { %6627 = vmatpush2.bf16.msra.mxu1 %v9370_v43  ;;  %6585 = vmatprep.subr.bf16.mxu0 %v9371_v44  ;;  %v9430_v25 = vld [vmem:[%s14410_s1 + $0x664] ss:$16 sps:$4 sm:$0xff]   ;;  %v9428_v27 = vld [vmem:[%s14410_s1 + $0x660] ss:$16 sps:$4 sm:$0xff]   ;;  %v11210_v43 = vcombine.high %v11193_v38, %v11196_v39 }
  0x37   : > { %6628 = vmatprep.subr.bf16.mxu1 %v9373_v45  ;;  %v9433_v28 = vld [vmem:[%s14410_s1 + $0x444] ss:$16 sps:$4 sm:$0xff]   ;;  %v9431_v30 = vld [vmem:[%s14410_s1 + $0x440] ss:$16 sps:$4 sm:$0xff]  }
  0x38   : > { %v9436_v29 = vld [vmem:[%s14410_s1 + $0x644] ss:$16 sps:$4 sm:$0xff]   ;;  %v9434_v31 = vld [vmem:[%s14410_s1 + $0x640] ss:$16 sps:$4 sm:$0xff]  }
  0x39   : > { %6586 = vmatpush2.bf16.msra.mxu0 %v9375_v46  ;;  %v9439_v32 = vld [vmem:[%s14410_s1 + $0x424] ss:$16 sps:$4 sm:$0xff]   ;;  %v9437_v34 = vld [vmem:[%s14410_s1 + $0x420] ss:$16 sps:$4 sm:$0xff]  }
  0x3a   : > { %6629 = vmatpush2.bf16.msra.mxu1 %v9376_v47  ;;  %6587 = vmatprep.subr.bf16.mxu0 %v9377_v52  ;;  %v9442_v33 = vld [vmem:[%s14410_s1 + $0x624] ss:$16 sps:$4 sm:$0xff]   ;;  %v9440_v35 = vld [vmem:[%s14410_s1 + $0x620] ss:$16 sps:$4 sm:$0xff]  }
  0x3b   : > { %6630 = vmatprep.subr.bf16.mxu1 %v9379_v54  ;;  %v11187_v36 = vld [vmem:[%s11024_s12 + $0x10] sm:$0xff] }
  0x3c   : > { %v11190_v37 = vld [vmem:[%s11024_s12 + $0x90] sm:$0xff] }
  0x3d   : > { %6588 = vmatpush2.bf16.msra.mxu0 %v9381_v56  ;;  %v9445_v40 = vld [vmem:[%s14410_s1 + $0x404] ss:$16 sps:$4 sm:$0xff]   ;;  %v11203_v41 = vcombine.high %v11187_v36, %v11190_v37  ;;  %v9443_v44 = vld [vmem:[%s14410_s1 + $0x400] ss:$16 sps:$4 sm:$0xff]  }
  0x3e   : > { %6631 = vmatpush2.bf16.msra.mxu1 %v9382_v57  ;;  %6589 = vmatprep.subr.bf16.mxu0 %v9383_v58  ;;  %v9448_v42 = vld [vmem:[%s14410_s1 + $0x604] ss:$16 sps:$4 sm:$0xff]   ;;  %v9446_v45 = vld [vmem:[%s14410_s1 + $0x600] ss:$16 sps:$4 sm:$0xff]  }
  0x3f   : > { %6632 = vmatprep.subr.bf16.mxu1 %v9385_v59  ;;  %v9451_v46 = vld [vmem:[%s14410_s1 + $0x5e4] ss:$16 sps:$4 sm:$0xff]   ;;  %v9449_v48 = vld [vmem:[%s14410_s1 + $0x5e0] ss:$16 sps:$4 sm:$0xff]  }
  0x40   : > { %v9454_v47 = vld [vmem:[%s14410_s1 + $0x7e4] ss:$16 sps:$4 sm:$0xff]   ;;  %v9452_v49 = vld [vmem:[%s14410_s1 + $0x7e0] ss:$16 sps:$4 sm:$0xff]  }
  0x41   : > { %6590 = vmatpush2.bf16.msra.mxu0 %v9387_v60  ;;  %v9457_v50 = vld [vmem:[%s14410_s1 + $0x5c4] ss:$16 sps:$4 sm:$0xff]   ;;  %v9455_v52 = vld [vmem:[%s14410_s1 + $0x5c0] ss:$16 sps:$4 sm:$0xff]  }
  0x42   : > { %6633 = vmatpush2.bf16.msra.mxu1 %v9388_v61  ;;  %6591 = vmatprep.subr.bf16.mxu0 %v9389_v62  ;;  %v9460_v51 = vld [vmem:[%s14410_s1 + $0x7c4] ss:$16 sps:$4 sm:$0xff]   ;;  %v9458_v54 = vld [vmem:[%s14410_s1 + $0x7c0] ss:$16 sps:$4 sm:$0xff]  }
  0x43   : > { %6634 = vmatprep.subr.bf16.mxu1 %v9391_v63  ;;  %v9463_v56 = vld [vmem:[%s14410_s1 + $0x5a4] ss:$16 sps:$4 sm:$0xff]   ;;  %v9461_v58 = vld [vmem:[%s14410_s1 + $0x5a0] ss:$16 sps:$4 sm:$0xff]  }
  0x44   : > { %v9466_v57 = vld [vmem:[%s14410_s1 + $0x7a4] ss:$16 sps:$4 sm:$0xff]   ;;  %v9464_v59 = vld [vmem:[%s14410_s1 + $0x7a0] ss:$16 sps:$4 sm:$0xff]  }
  0x45   : > { %6592 = vmatpush2.bf16.msra.mxu0 %v9393_v0  ;;  %v9469_v60 = vld [vmem:[%s14410_s1 + $0x584] ss:$16 sps:$4 sm:$0xff]   ;;  %v9467_v62 = vld [vmem:[%s14410_s1 + $0x580] ss:$16 sps:$4 sm:$0xff]  }
  0x46   : > { %6635 = vmatpush2.bf16.msra.mxu1 %v9394_v1  ;;  %6593 = vmatprep.subr.bf16.mxu0 %v9395_v2  ;;  %v9472_v61 = vld [vmem:[%s14410_s1 + $0x784] ss:$16 sps:$4 sm:$0xff]   ;;  %v9470_v63 = vld [vmem:[%s14410_s1 + $0x780] ss:$16 sps:$4 sm:$0xff]  }
  0x47   : > { %6636 = vmatprep.subr.bf16.mxu1 %v9397_v3  ;;  %v9475_v0 = vld [vmem:[%s14410_s1 + $0x564] ss:$16 sps:$4 sm:$0xff]   ;;  %v9473_v2 = vld [vmem:[%s14410_s1 + $0x560] ss:$16 sps:$4 sm:$0xff]  }
  0x48   : > { %v9478_v1 = vld [vmem:[%s14410_s1 + $0x764] ss:$16 sps:$4 sm:$0xff]   ;;  %v9476_v3 = vld [vmem:[%s14410_s1 + $0x760] ss:$16 sps:$4 sm:$0xff]  }
  0x49   : > { %6594 = vmatpush2.bf16.msra.mxu0 %v9399_v4  ;;  %v9481_v4 = vld [vmem:[%s14410_s1 + $0x544] ss:$16 sps:$4 sm:$0xff]  }
  0x4a   : > { %6637 = vmatpush2.bf16.msra.mxu1 %v9400_v5  ;;  %6649 = vmatprep.subr.bf16.mxu0 %v9403_v6  ;;  %v9484_v5 = vld [vmem:[%s14410_s1 + $0x744] ss:$16 sps:$4 sm:$0xff]   ;;  %v9479_v6 = vld [vmem:[%s14410_s1 + $0x540] ss:$16 sps:$4 sm:$0xff]  }
  0x4b   : > { %6692 = vmatprep.subr.bf16.mxu1 %v9406_v7  ;;  %v9482_v7 = vld [vmem:[%s14410_s1 + $0x740] ss:$16 sps:$4 sm:$0xff]  }
  0x4c   : > { %6596 = vmatmul.mubr.bf16.vlgmr.msra.gmra.mxu0 %v11102_v8 }
  0x4d   : > { %6639 = vmatmul.mubr.bf16.vlgmr.msra.gmra.mxu1 %v11104_v9  ;;  %6650 = vmatpush1.bf16.msra.mxu0 %v9401_v10  ;;  %v9487_v10 = vld [vmem:[%s14410_s1 + $0x524] ss:$16 sps:$4 sm:$0xff]  }
  0x4e   : > { %6693 = vmatpush1.bf16.msra.mxu1 %v9404_v11  ;;  %6651 = vmatprep.subr.bf16.mxu0 %v9409_v12  ;;  %v9490_v11 = vld [vmem:[%s14410_s1 + $0x724] ss:$16 sps:$4 sm:$0xff]   ;;  %v9485_v12 = vld [vmem:[%s14410_s1 + $0x520] ss:$16 sps:$4 sm:$0xff]  }
  0x4f   : > { %6694 = vmatprep.subr.bf16.mxu1 %v9412_v13  ;;  %6681 = vmatprep.mubr.bf16.mxu0 %v11203_v41  ;;  %v9488_v13 = vld [vmem:[%s14410_s1 + $0x720] ss:$16 sps:$4 sm:$0xff]  }
  0x50   : > { %6724 = vmatprep.mubr.bf16.mxu1 %v11210_v43 }
  0x51   : > { %6652 = vmatpush1.bf16.msra.mxu0 %v9407_v14  ;;  %v9493_v14 = vld [vmem:[%s14410_s1 + $0x504] ss:$16 sps:$4 sm:$0xff]  }
  0x52   : > { %6695 = vmatpush1.bf16.msra.mxu1 %v9410_v15  ;;  %6653 = vmatprep.subr.bf16.mxu0 %v9415_v16  ;;  %v9496_v15 = vld [vmem:[%s14410_s1 + $0x704] ss:$16 sps:$4 sm:$0xff]   ;;  %v9491_v16 = vld [vmem:[%s14410_s1 + $0x500] ss:$16 sps:$4 sm:$0xff]  }
  0x53   : > { %6696 = vmatprep.subr.bf16.mxu1 %v9418_v17  ;;  %v9494_v17 = vld [vmem:[%s14410_s1 + $0x700] ss:$16 sps:$4 sm:$0xff]  }
  0x55   : > { %6654 = vmatpush1.bf16.msra.mxu0 %v9413_v18  ;;  %v9499_v18 = vld [vmem:[%s14410_s1 + $0x8e4] ss:$16 sps:$4 sm:$0xff]  }
  0x56   : > { %6697 = vmatpush1.bf16.msra.mxu1 %v9416_v19  ;;  %6655 = vmatprep.subr.bf16.mxu0 %v9421_v20  ;;  %v9502_v19 = vld [vmem:[%s14410_s1 + $0xae4] ss:$16 sps:$4 sm:$0xff]   ;;  %v11324_v20 = vcombine.low %v11187_v36, %v11190_v37  ;;  %v9509_v36 = vld [vmem:[%s14410_s1 + $0x8a0] ss:$16 sps:$4 sm:$0xff]  }
  0x57   : > { %6698 = vmatprep.subr.bf16.mxu1 %v9424_v21  ;;  %v11328_v21 = vcombine.low %v11193_v38, %v11196_v39  ;;  %v9512_v37 = vld [vmem:[%s14410_s1 + $0xaa0] ss:$16 sps:$4 sm:$0xff]   ;;  %v9517_v38 = vld [vmem:[%s14410_s1 + $0x884] ss:$16 sps:$4 sm:$0xff]  }
  0x58   : > { %v9520_v39 = vld [vmem:[%s14410_s1 + $0xa84] ss:$16 sps:$4 sm:$0xff]  }
  0x59   : > { %6656 = vmatpush1.bf16.msra.mxu0 %v9419_v22  ;;  %v9497_v22 = vld [vmem:[%s14410_s1 + $0x8e0] ss:$16 sps:$4 sm:$0xff]  }
  0x5a   : > { %6699 = vmatpush1.bf16.msra.mxu1 %v9422_v23  ;;  %6657 = vmatprep.subr.bf16.mxu0 %v9427_v24  ;;  %v9500_v23 = vld [vmem:[%s14410_s1 + $0xae0] ss:$16 sps:$4 sm:$0xff]   ;;  %v9505_v24 = vld [vmem:[%s14410_s1 + $0x8c4] ss:$16 sps:$4 sm:$0xff]  }
  0x5b   : > { %6700 = vmatprep.subr.bf16.mxu1 %v9430_v25  ;;  %v9508_v25 = vld [vmem:[%s14410_s1 + $0xac4] ss:$16 sps:$4 sm:$0xff]  }
  0x5d   : > { %6658 = vmatpush1.bf16.msra.mxu0 %v9425_v26  ;;  %v9503_v26 = vld [vmem:[%s14410_s1 + $0x8c0] ss:$16 sps:$4 sm:$0xff]  }
  0x5e   : > { %6701 = vmatpush1.bf16.msra.mxu1 %v9428_v27  ;;  %6659 = vmatprep.subr.bf16.mxu0 %v9433_v28  ;;  %v9506_v27 = vld [vmem:[%s14410_s1 + $0xac0] ss:$16 sps:$4 sm:$0xff]  }
  0x5f   : > { %6702 = vmatprep.subr.bf16.mxu1 %v9436_v29  ;;  %v11349_v28 = vld [vmem:[%s11024_s12 + $0x20] sm:$0xff] }
  0x60   : > { %v11354_v29 = vld [vmem:[%s11024_s12 + $0xa0] sm:$0xff] }
  0x61   : > { %6660 = vmatpush1.bf16.msra.mxu0 %v9431_v30  ;;  %v11357_v30 = vld [vmem:[%s11024_s12 + $0x28] sm:$0xff] }
  0x62   : > { %6703 = vmatpush1.bf16.msra.mxu1 %v9434_v31  ;;  %6661 = vmatprep.subr.bf16.mxu0 %v9439_v32  ;;  %v11360_v31 = vld [vmem:[%s11024_s12 + $0xa8] sm:$0xff]  ;;  %v9511_v32 = vld [vmem:[%s14410_s1 + $0x8a4] ss:$16 sps:$4 sm:$0xff]  }
  0x63   : > { %6704 = vmatprep.subr.bf16.mxu1 %v9442_v33  ;;  %v11367_v33 = vcombine.high %v11349_v28, %v11354_v29 }
  0x65   : > { %6662 = vmatpush1.bf16.msra.mxu0 %v9437_v34  ;;  %v9514_v34 = vld [vmem:[%s14410_s1 + $0xaa4] ss:$16 sps:$4 sm:$0xff]  }
  0x66   : > { %6705 = vmatpush1.bf16.msra.mxu1 %v9440_v35  ;;  %6663 = vmatprep.subr.bf16.mxu0 %v9445_v40  ;;  %v11374_v35 = vcombine.high %v11357_v30, %v11360_v31  ;;  %v9515_v40 = vld [vmem:[%s14410_s1 + $0x880] ss:$16 sps:$4 sm:$0xff]  }
  0x67   : > { %6706 = vmatprep.subr.bf16.mxu1 %v9448_v42  ;;  %v9518_v42 = vld [vmem:[%s14410_s1 + $0xa80] ss:$16 sps:$4 sm:$0xff]  }
  0x69   : > { %6664 = vmatpush1.bf16.msra.mxu0 %v9443_v44  ;;  %v9523_v44 = vld [vmem:[%s14410_s1 + $0x864] ss:$16 sps:$4 sm:$0xff]  }
  0x6a   : > { %6707 = vmatpush1.bf16.msra.mxu1 %v9446_v45  ;;  %6665 = vmatprep.subr.bf16.mxu0 %v9451_v46  ;;  %v9526_v45 = vld [vmem:[%s14410_s1 + $0xa64] ss:$16 sps:$4 sm:$0xff]   ;;  %v9521_v46 = vld [vmem:[%s14410_s1 + $0x860] ss:$16 sps:$4 sm:$0xff]  }
  0x6b   : > { %6708 = vmatprep.subr.bf16.mxu1 %v9454_v47  ;;  %v9524_v47 = vld [vmem:[%s14410_s1 + $0xa60] ss:$16 sps:$4 sm:$0xff]  }
  0x6d   : > { %6666 = vmatpush2.bf16.msra.mxu0 %v9449_v48  ;;  %v9529_v48 = vld [vmem:[%s14410_s1 + $0x844] ss:$16 sps:$4 sm:$0xff]  }
  0x6e   : > { %6709 = vmatpush2.bf16.msra.mxu1 %v9452_v49  ;;  %6667 = vmatprep.subr.bf16.mxu0 %v9457_v50  ;;  %v9532_v49 = vld [vmem:[%s14410_s1 + $0xa44] ss:$16 sps:$4 sm:$0xff]   ;;  %v9527_v50 = vld [vmem:[%s14410_s1 + $0x840] ss:$16 sps:$4 sm:$0xff]  }
  0x6f   : > { %6710 = vmatprep.subr.bf16.mxu1 %v9460_v51  ;;  %v9530_v51 = vld [vmem:[%s14410_s1 + $0xa40] ss:$16 sps:$4 sm:$0xff]  }
  0x71   : > { %6668 = vmatpush2.bf16.msra.mxu0 %v9455_v52  ;;  %v9535_v52 = vld [vmem:[%s14410_s1 + $0x824] ss:$16 sps:$4 sm:$0xff]  }
  0x72   : > { %6711 = vmatpush2.bf16.msra.mxu1 %v9458_v54  ;;  %6669 = vmatprep.subr.bf16.mxu0 %v9463_v56  ;;  %v9538_v54 = vld [vmem:[%s14410_s1 + $0xa24] ss:$16 sps:$4 sm:$0xff]   ;;  %v9533_v56 = vld [vmem:[%s14410_s1 + $0x820] ss:$16 sps:$4 sm:$0xff]  }
  0x73   : > { %6712 = vmatprep.subr.bf16.mxu1 %v9466_v57  ;;  %v9536_v57 = vld [vmem:[%s14410_s1 + $0xa20] ss:$16 sps:$4 sm:$0xff]  }
  0x75   : > { %6670 = vmatpush2.bf16.msra.mxu0 %v9461_v58  ;;  %v9541_v58 = vld [vmem:[%s14410_s1 + $0x804] ss:$16 sps:$4 sm:$0xff]  }
  0x76   : > { %6713 = vmatpush2.bf16.msra.mxu1 %v9464_v59  ;;  %6671 = vmatprep.subr.bf16.mxu0 %v9469_v60  ;;  %v9544_v59 = vld [vmem:[%s14410_s1 + $0xa04] ss:$16 sps:$4 sm:$0xff]   ;;  %v9539_v60 = vld [vmem:[%s14410_s1 + $0x800] ss:$16 sps:$4 sm:$0xff]  }
  0x77   : > { %6714 = vmatprep.subr.bf16.mxu1 %v9472_v61  ;;  %v9542_v61 = vld [vmem:[%s14410_s1 + $0xa00] ss:$16 sps:$4 sm:$0xff]  }
  0x79   : > { %6672 = vmatpush2.bf16.msra.mxu0 %v9467_v62  ;;  %v9547_v62 = vld [vmem:[%s14410_s1 + $0x9e4] ss:$16 sps:$4 sm:$0xff]  }
  0x7a   : > { %6715 = vmatpush2.bf16.msra.mxu1 %v9470_v63  ;;  %6673 = vmatprep.subr.bf16.mxu0 %v9475_v0  ;;  %v9550_v63 = vld [vmem:[%s14410_s1 + $0xbe4] ss:$16 sps:$4 sm:$0xff]   ;;  %v9545_v0 = vld [vmem:[%s14410_s1 + $0x9e0] ss:$16 sps:$4 sm:$0xff]  }
  0x7b   : > { %6716 = vmatprep.subr.bf16.mxu1 %v9478_v1  ;;  %v9548_v1 = vld [vmem:[%s14410_s1 + $0xbe0] ss:$16 sps:$4 sm:$0xff]  }
  0x7d   : > { %6674 = vmatpush2.bf16.msra.mxu0 %v9473_v2  ;;  %v9553_v2 = vld [vmem:[%s14410_s1 + $0x9c4] ss:$16 sps:$4 sm:$0xff]  }
  0x7e   : > { %6717 = vmatpush2.bf16.msra.mxu1 %v9476_v3  ;;  %6675 = vmatprep.subr.bf16.mxu0 %v9481_v4  ;;  %v9556_v3 = vld [vmem:[%s14410_s1 + $0xbc4] ss:$16 sps:$4 sm:$0xff]   ;;  %v9551_v4 = vld [vmem:[%s14410_s1 + $0x9c0] ss:$16 sps:$4 sm:$0xff]  }
  0x7f   : > { %6718 = vmatprep.subr.bf16.mxu1 %v9484_v5  ;;  %v9554_v5 = vld [vmem:[%s14410_s1 + $0xbc0] ss:$16 sps:$4 sm:$0xff]  }
  0x81   : > { %6676 = vmatpush2.bf16.msra.mxu0 %v9479_v6  ;;  %v9559_v6 = vld [vmem:[%s14410_s1 + $0x9a4] ss:$16 sps:$4 sm:$0xff]  }
  0x82   : > { %6719 = vmatpush2.bf16.msra.mxu1 %v9482_v7  ;;  %6677 = vmatprep.subr.bf16.mxu0 %v9487_v10  ;;  %v9562_v7 = vld [vmem:[%s14410_s1 + $0xba4] ss:$16 sps:$4 sm:$0xff]   ;;  %v9557_v10 = vld [vmem:[%s14410_s1 + $0x9a0] ss:$16 sps:$4 sm:$0xff]  }
  0x83   : > { %6720 = vmatprep.subr.bf16.mxu1 %v9490_v11  ;;  %v9560_v11 = vld [vmem:[%s14410_s1 + $0xba0] ss:$16 sps:$4 sm:$0xff]  }
  0x85   : > { %6678 = vmatpush2.bf16.msra.mxu0 %v9485_v12  ;;  %v9565_v12 = vld [vmem:[%s14410_s1 + $0x984] ss:$16 sps:$4 sm:$0xff]  }
  0x86   : > { %6721 = vmatpush2.bf16.msra.mxu1 %v9488_v13  ;;  %6679 = vmatprep.subr.bf16.mxu0 %v9493_v14  ;;  %v9568_v13 = vld [vmem:[%s14410_s1 + $0xb84] ss:$16 sps:$4 sm:$0xff]   ;;  %v9563_v14 = vld [vmem:[%s14410_s1 + $0x980] ss:$16 sps:$4 sm:$0xff]  }
  0x87   : > { %6722 = vmatprep.subr.bf16.mxu1 %v9496_v15  ;;  %v9566_v15 = vld [vmem:[%s14410_s1 + $0xb80] ss:$16 sps:$4 sm:$0xff]  }
  0x89   : > { %6680 = vmatpush2.bf16.msra.mxu0 %v9491_v16  ;;  %v9571_v16 = vld [vmem:[%s14410_s1 + $0x964] ss:$16 sps:$4 sm:$0xff]  }
  0x8a   : > { %6723 = vmatpush2.bf16.msra.mxu1 %v9494_v17  ;;  %6735 = vmatprep.subr.bf16.mxu0 %v9499_v18  ;;  %v9574_v17 = vld [vmem:[%s14410_s1 + $0xb64] ss:$16 sps:$4 sm:$0xff]   ;;  %v9569_v18 = vld [vmem:[%s14410_s1 + $0x960] ss:$16 sps:$4 sm:$0xff]  }
  0x8b   : > { %6778 = vmatprep.subr.bf16.mxu1 %v9502_v19  ;;  %v9572_v19 = vld [vmem:[%s14410_s1 + $0xb60] ss:$16 sps:$4 sm:$0xff]  }
  0x8c   : > { %6682 = vmatmul.mubr.bf16.vlgmr.msra.gmra.mxu0 %v11324_v20 }
  0x8d   : > { %6725 = vmatmul.mubr.bf16.vlgmr.msra.gmra.mxu1 %v11328_v21  ;;  %6736 = vmatpush1.bf16.msra.mxu0 %v9497_v22  ;;  %v9577_v22 = vld [vmem:[%s14410_s1 + $0x944] ss:$16 sps:$4 sm:$0xff]  }
  0x8e   : > { %6779 = vmatpush1.bf16.msra.mxu1 %v9500_v23  ;;  %6737 = vmatprep.subr.bf16.mxu0 %v9505_v24  ;;  %v9580_v23 = vld [vmem:[%s14410_s1 + $0xb44] ss:$16 sps:$4 sm:$0xff]   ;;  %v9575_v24 = vld [vmem:[%s14410_s1 + $0x940] ss:$16 sps:$4 sm:$0xff]  }
  0x8f   : > { %6780 = vmatprep.subr.bf16.mxu1 %v9508_v25  ;;  %6767 = vmatprep.mubr.bf16.mxu0 %v11367_v33  ;;  %v9578_v25 = vld [vmem:[%s14410_s1 + $0xb40] ss:$16 sps:$4 sm:$0xff]  }
  0x90   : > { %6810 = vmatprep.mubr.bf16.mxu1 %v11374_v35 }
  0x91   : > { %6738 = vmatpush1.bf16.msra.mxu0 %v9503_v26  ;;  %v9583_v26 = vld [vmem:[%s14410_s1 + $0x924] ss:$16 sps:$4 sm:$0xff]  }
  0x92   : > { %6781 = vmatpush1.bf16.msra.mxu1 %v9506_v27  ;;  %6739 = vmatprep.subr.bf16.mxu0 %v9511_v32  ;;  %v9586_v27 = vld [vmem:[%s14410_s1 + $0xb24] ss:$16 sps:$4 sm:$0xff]   ;;  %v9581_v32 = vld [vmem:[%s14410_s1 + $0x920] ss:$16 sps:$4 sm:$0xff]  }
  0x93   : > { %6782 = vmatprep.subr.bf16.mxu1 %v9514_v34  ;;  %v9584_v34 = vld [vmem:[%s14410_s1 + $0xb20] ss:$16 sps:$4 sm:$0xff]  }
  0x95   : > { %6740 = vmatpush1.bf16.msra.mxu0 %v9509_v36  ;;  %v9589_v36 = vld [vmem:[%s14410_s1 + $0x904] ss:$16 sps:$4 sm:$0xff]  }
  0x96   : > { %6783 = vmatpush1.bf16.msra.mxu1 %v9512_v37  ;;  %6741 = vmatprep.subr.bf16.mxu0 %v9517_v38  ;;  %v9592_v37 = vld [vmem:[%s14410_s1 + $0xb04] ss:$16 sps:$4 sm:$0xff]   ;;  %v9587_v38 = vld [vmem:[%s14410_s1 + $0x900] ss:$16 sps:$4 sm:$0xff]  }
  0x97   : > { %6784 = vmatprep.subr.bf16.mxu1 %v9520_v39  ;;  %v9590_v39 = vld [vmem:[%s14410_s1 + $0xb00] ss:$16 sps:$4 sm:$0xff]  }
  0x99   : > { %6742 = vmatpush1.bf16.msra.mxu0 %v9515_v40  ;;  %v9595_v40 = vld [vmem:[%s14410_s1 + $0xce4] ss:$16 sps:$4 sm:$0xff]  }
  0x9a   : > { %6785 = vmatpush1.bf16.msra.mxu1 %v9518_v42  ;;  %6743 = vmatprep.subr.bf16.mxu0 %v9523_v44  ;;  %v9598_v42 = vld [vmem:[%s14410_s1 + $0xee4] ss:$16 sps:$4 sm:$0xff]   ;;  %v9593_v44 = vld [vmem:[%s14410_s1 + $0xce0] ss:$16 sps:$4 sm:$0xff]  }
  0x9b   : > { %6786 = vmatprep.subr.bf16.mxu1 %v9526_v45  ;;  %v9596_v45 = vld [vmem:[%s14410_s1 + $0xee0] ss:$16 sps:$4 sm:$0xff]  }
  0x9d   : > { %6744 = vmatpush1.bf16.msra.mxu0 %v9521_v46  ;;  %v11553_v46 = vld [vmem:[%s11024_s12 + $0x30] sm:$0xff] }
  0x9e   : > { %6787 = vmatpush1.bf16.msra.mxu1 %v9524_v47  ;;  %6745 = vmatprep.subr.bf16.mxu0 %v9529_v48  ;;  %v11556_v47 = vld [vmem:[%s11024_s12 + $0xb0] sm:$0xff]  ;;  %v11560_v48 = vcombine.low %v11349_v28, %v11354_v29 }
  0x9f   : > { %6788 = vmatprep.subr.bf16.mxu1 %v9532_v49  ;;  %v11564_v49 = vcombine.low %v11357_v30, %v11360_v31  ;;  %v9604_v28 = vld [vmem:[%s14410_s1 + $0xec4] ss:$16 sps:$4 sm:$0xff]   ;;  %v11580_v29 = vcombine.high %v11553_v46, %v11556_v47  ;;  %v9599_v31 = vld [vmem:[%s14410_s1 + $0xcc0] ss:$16 sps:$4 sm:$0xff]  }
  0xa1   : > { %6746 = vmatpush1.bf16.msra.mxu0 %v9527_v50  ;;  %v11567_v50 = vld [vmem:[%s11024_s12 + $0x38] sm:$0xff] }
  0xa2   : > { %6789 = vmatpush1.bf16.msra.mxu1 %v9530_v51  ;;  %6747 = vmatprep.subr.bf16.mxu0 %v9535_v52  ;;  %v11570_v51 = vld [vmem:[%s11024_s12 + $0xb8] sm:$0xff]  ;;  %v9601_v52 = vld [vmem:[%s14410_s1 + $0xcc4] ss:$16 sps:$4 sm:$0xff]  }
  0xa3   : > { %6790 = vmatprep.subr.bf16.mxu1 %v9538_v54  ;;  %v11584_v30 = vcombine.high %v11567_v50, %v11570_v51  ;;  %v9602_v54 = vld [vmem:[%s14410_s1 + $0xec0] ss:$16 sps:$4 sm:$0xff]  }
  0xa5   : > { %6748 = vmatpush1.bf16.msra.mxu0 %v9533_v56  ;;  %v9607_v56 = vld [vmem:[%s14410_s1 + $0xca4] ss:$16 sps:$4 sm:$0xff]  }
  0xa6   : > { %6791 = vmatpush1.bf16.msra.mxu1 %v9536_v57  ;;  %6749 = vmatprep.subr.bf16.mxu0 %v9541_v58  ;;  %v9610_v57 = vld [vmem:[%s14410_s1 + $0xea4] ss:$16 sps:$4 sm:$0xff]   ;;  %v9605_v58 = vld [vmem:[%s14410_s1 + $0xca0] ss:$16 sps:$4 sm:$0xff]  }
  0xa7   : > { %6792 = vmatprep.subr.bf16.mxu1 %v9544_v59  ;;  %v9608_v59 = vld [vmem:[%s14410_s1 + $0xea0] ss:$16 sps:$4 sm:$0xff]  }
  0xa9   : > { %6750 = vmatpush1.bf16.msra.mxu0 %v9539_v60  ;;  %v9613_v60 = vld [vmem:[%s14410_s1 + $0xc84] ss:$16 sps:$4 sm:$0xff]  }
  0xaa   : > { %6793 = vmatpush1.bf16.msra.mxu1 %v9542_v61  ;;  %6751 = vmatprep.subr.bf16.mxu0 %v9547_v62  ;;  %v9616_v61 = vld [vmem:[%s14410_s1 + $0xe84] ss:$16 sps:$4 sm:$0xff]   ;;  %v9611_v62 = vld [vmem:[%s14410_s1 + $0xc80] ss:$16 sps:$4 sm:$0xff]  }
  0xab   : > { %6794 = vmatprep.subr.bf16.mxu1 %v9550_v63  ;;  %v9614_v63 = vld [vmem:[%s14410_s1 + $0xe80] ss:$16 sps:$4 sm:$0xff]  }
  0xad   : > { %6752 = vmatpush2.bf16.msra.mxu0 %v9545_v0  ;;  %v9619_v0 = vld [vmem:[%s14410_s1 + $0xc64] ss:$16 sps:$4 sm:$0xff]  }
  0xae   : > { %6795 = vmatpush2.bf16.msra.mxu1 %v9548_v1  ;;  %6753 = vmatprep.subr.bf16.mxu0 %v9553_v2  ;;  %v9622_v1 = vld [vmem:[%s14410_s1 + $0xe64] ss:$16 sps:$4 sm:$0xff]   ;;  %v9617_v2 = vld [vmem:[%s14410_s1 + $0xc60] ss:$16 sps:$4 sm:$0xff]  }
  0xaf   : > { %6796 = vmatprep.subr.bf16.mxu1 %v9556_v3  ;;  %v9620_v3 = vld [vmem:[%s14410_s1 + $0xe60] ss:$16 sps:$4 sm:$0xff]  }
  0xb1   : > { %6754 = vmatpush2.bf16.msra.mxu0 %v9551_v4  ;;  %v9625_v4 = vld [vmem:[%s14410_s1 + $0xc44] ss:$16 sps:$4 sm:$0xff]  }
  0xb2   : > { %6797 = vmatpush2.bf16.msra.mxu1 %v9554_v5  ;;  %6755 = vmatprep.subr.bf16.mxu0 %v9559_v6  ;;  %v9628_v5 = vld [vmem:[%s14410_s1 + $0xe44] ss:$16 sps:$4 sm:$0xff]   ;;  %v9623_v6 = vld [vmem:[%s14410_s1 + $0xc40] ss:$16 sps:$4 sm:$0xff]  }
  0xb3   : > { %6798 = vmatprep.subr.bf16.mxu1 %v9562_v7  ;;  %v9626_v7 = vld [vmem:[%s14410_s1 + $0xe40] ss:$16 sps:$4 sm:$0xff]  }
  0xb5   : > { %6756 = vmatpush2.bf16.msra.mxu0 %v9557_v10  ;;  %v9631_v10 = vld [vmem:[%s14410_s1 + $0xc24] ss:$16 sps:$4 sm:$0xff]  }
  0xb6   : > { %6799 = vmatpush2.bf16.msra.mxu1 %v9560_v11  ;;  %6757 = vmatprep.subr.bf16.mxu0 %v9565_v12  ;;  %v9634_v11 = vld [vmem:[%s14410_s1 + $0xe24] ss:$16 sps:$4 sm:$0xff]   ;;  %v9629_v12 = vld [vmem:[%s14410_s1 + $0xc20] ss:$16 sps:$4 sm:$0xff]  }
  0xb7   : > { %6800 = vmatprep.subr.bf16.mxu1 %v9568_v13  ;;  %v9632_v13 = vld [vmem:[%s14410_s1 + $0xe20] ss:$16 sps:$4 sm:$0xff]  }
  0xb9   : > { %6758 = vmatpush2.bf16.msra.mxu0 %v9563_v14  ;;  %v9637_v14 = vld [vmem:[%s14410_s1 + $0xc04] ss:$16 sps:$4 sm:$0xff]  }
  0xba   : > { %6801 = vmatpush2.bf16.msra.mxu1 %v9566_v15  ;;  %6759 = vmatprep.subr.bf16.mxu0 %v9571_v16  ;;  %v9640_v15 = vld [vmem:[%s14410_s1 + $0xe04] ss:$16 sps:$4 sm:$0xff]   ;;  %v9635_v16 = vld [vmem:[%s14410_s1 + $0xc00] ss:$16 sps:$4 sm:$0xff]  }
  0xbb   : > { %6802 = vmatprep.subr.bf16.mxu1 %v9574_v17  ;;  %v9638_v17 = vld [vmem:[%s14410_s1 + $0xe00] ss:$16 sps:$4 sm:$0xff]  }
  0xbd   : > { %6760 = vmatpush2.bf16.msra.mxu0 %v9569_v18  ;;  %v9643_v18 = vld [vmem:[%s14410_s1 + $0xde4] ss:$16 sps:$4 sm:$0xff]  }
  0xbe   : > { %6803 = vmatpush2.bf16.msra.mxu1 %v9572_v19  ;;  %6761 = vmatprep.subr.bf16.mxu0 %v9577_v22  ;;  %v9646_v19 = vld [vmem:[%s14410_s1 + $0xfe4] ss:$16 sps:$4 sm:$0xff]   ;;  %v9641_v22 = vld [vmem:[%s14410_s1 + $0xde0] ss:$16 sps:$4 sm:$0xff]  }
  0xbf   : > { %6804 = vmatprep.subr.bf16.mxu1 %v9580_v23  ;;  %v9644_v23 = vld [vmem:[%s14410_s1 + $0xfe0] ss:$16 sps:$4 sm:$0xff]  }
  0xc1   : > { %6762 = vmatpush2.bf16.msra.mxu0 %v9575_v24  ;;  %v9649_v24 = vld [vmem:[%s14410_s1 + $0xdc4] ss:$16 sps:$4 sm:$0xff]  }
  0xc2   : > { %6805 = vmatpush2.bf16.msra.mxu1 %v9578_v25  ;;  %6763 = vmatprep.subr.bf16.mxu0 %v9583_v26  ;;  %v9652_v25 = vld [vmem:[%s14410_s1 + $0xfc4] ss:$16 sps:$4 sm:$0xff]   ;;  %v9647_v26 = vld [vmem:[%s14410_s1 + $0xdc0] ss:$16 sps:$4 sm:$0xff]  }
  0xc3   : > { %6806 = vmatprep.subr.bf16.mxu1 %v9586_v27  ;;  %v9650_v27 = vld [vmem:[%s14410_s1 + $0xfc0] ss:$16 sps:$4 sm:$0xff]  }
  0xc5   : > { %6764 = vmatpush2.bf16.msra.mxu0 %v9581_v32  ;;  %v9655_v32 = vld [vmem:[%s14410_s1 + $0xda4] ss:$16 sps:$4 sm:$0xff]  }
  0xc6   : > { %6807 = vmatpush2.bf16.msra.mxu1 %v9584_v34  ;;  %6765 = vmatprep.subr.bf16.mxu0 %v9589_v36  ;;  %v9658_v34 = vld [vmem:[%s14410_s1 + $0xfa4] ss:$16 sps:$4 sm:$0xff]   ;;  %v9653_v36 = vld [vmem:[%s14410_s1 + $0xda0] ss:$16 sps:$4 sm:$0xff]  }
  0xc7   : > { %6808 = vmatprep.subr.bf16.mxu1 %v9592_v37  ;;  %v9656_v37 = vld [vmem:[%s14410_s1 + $0xfa0] ss:$16 sps:$4 sm:$0xff]  }
  0xc9   : > { %6766 = vmatpush2.bf16.msra.mxu0 %v9587_v38  ;;  %v9661_v38 = vld [vmem:[%s14410_s1 + $0xd84] ss:$16 sps:$4 sm:$0xff]  }
  0xca   : > { %6809 = vmatpush2.bf16.msra.mxu1 %v9590_v39  ;;  %6821 = vmatprep.subr.bf16.mxu0 %v9595_v40  ;;  %v9664_v39 = vld [vmem:[%s14410_s1 + $0xf84] ss:$16 sps:$4 sm:$0xff]   ;;  %v9659_v40 = vld [vmem:[%s14410_s1 + $0xd80] ss:$16 sps:$4 sm:$0xff]  }
  0xcb   : > { %6864 = vmatprep.subr.bf16.mxu1 %v9598_v42  ;;  %v9662_v42 = vld [vmem:[%s14410_s1 + $0xf80] ss:$16 sps:$4 sm:$0xff]  }
  0xcc   : > { %6768 = vmatmul.mubr.bf16.vlgmr.msra.gmra.mxu0 %v11560_v48 }
  0xcd   : > { %6811 = vmatmul.mubr.bf16.vlgmr.msra.gmra.mxu1 %v11564_v49  ;;  %6822 = vmatpush1.bf16.msra.mxu0 %v9593_v44  ;;  %v9667_v44 = vld [vmem:[%s14410_s1 + $0xd64] ss:$16 sps:$4 sm:$0xff]  }
  0xce   : > { %6865 = vmatpush1.bf16.msra.mxu1 %v9596_v45  ;;  %6823 = vmatprep.subr.bf16.mxu0 %v9601_v52  ;;  %v9670_v45 = vld [vmem:[%s14410_s1 + $0xf64] ss:$16 sps:$4 sm:$0xff]   ;;  %v9665_v52 = vld [vmem:[%s14410_s1 + $0xd60] ss:$16 sps:$4 sm:$0xff]  }
  0xcf   : > { %6866 = vmatprep.subr.bf16.mxu1 %v9604_v28  ;;  %6853 = vmatprep.mubr.bf16.mxu0 %v11580_v29  ;;  %v9668_v28 = vld [vmem:[%s14410_s1 + $0xf60] ss:$16 sps:$4 sm:$0xff]  }
  0xd0   : > { %6896 = vmatprep.mubr.bf16.mxu1 %v11584_v30 }
  0xd1   : > { %6824 = vmatpush1.bf16.msra.mxu0 %v9599_v31  ;;  %v9673_v31 = vld [vmem:[%s14410_s1 + $0xd44] ss:$16 sps:$4 sm:$0xff]  }
  0xd2   : > { %6867 = vmatpush1.bf16.msra.mxu1 %v9602_v54  ;;  %6825 = vmatprep.subr.bf16.mxu0 %v9607_v56  ;;  %v9676_v54 = vld [vmem:[%s14410_s1 + $0xf44] ss:$16 sps:$4 sm:$0xff]   ;;  %v9671_v56 = vld [vmem:[%s14410_s1 + $0xd40] ss:$16 sps:$4 sm:$0xff]  }
  0xd3   : > { %6868 = vmatprep.subr.bf16.mxu1 %v9610_v57  ;;  %v9674_v57 = vld [vmem:[%s14410_s1 + $0xf40] ss:$16 sps:$4 sm:$0xff]  }
  0xd5   : > { %6826 = vmatpush1.bf16.msra.mxu0 %v9605_v58  ;;  %v9679_v58 = vld [vmem:[%s14410_s1 + $0xd24] ss:$16 sps:$4 sm:$0xff]  }
  0xd6   : > { %6869 = vmatpush1.bf16.msra.mxu1 %v9608_v59  ;;  %6827 = vmatprep.subr.bf16.mxu0 %v9613_v60  ;;  %v9682_v59 = vld [vmem:[%s14410_s1 + $0xf24] ss:$16 sps:$4 sm:$0xff]   ;;  %v9677_v60 = vld [vmem:[%s14410_s1 + $0xd20] ss:$16 sps:$4 sm:$0xff]  }
  0xd7   : > { %6870 = vmatprep.subr.bf16.mxu1 %v9616_v61  ;;  %v9680_v61 = vld [vmem:[%s14410_s1 + $0xf20] ss:$16 sps:$4 sm:$0xff]  }
  0xd9   : > { %6828 = vmatpush1.bf16.msra.mxu0 %v9611_v62  ;;  %v9685_v62 = vld [vmem:[%s14410_s1 + $0xd04] ss:$16 sps:$4 sm:$0xff]  }
  0xda   : > { %6871 = vmatpush1.bf16.msra.mxu1 %v9614_v63  ;;  %6829 = vmatprep.subr.bf16.mxu0 %v9619_v0  ;;  %v9688_v63 = vld [vmem:[%s14410_s1 + $0xf04] ss:$16 sps:$4 sm:$0xff]   ;;  %v9683_v0 = vld [vmem:[%s14410_s1 + $0xd00] ss:$16 sps:$4 sm:$0xff]  }
  0xdb   : > { %6872 = vmatprep.subr.bf16.mxu1 %v9622_v1  ;;  %v9686_v1 = vld [vmem:[%s14410_s1 + $0xf00] ss:$16 sps:$4 sm:$0xff]  }
  0xdd   : > { %6830 = vmatpush1.bf16.msra.mxu0 %v9617_v2  ;;  %v9691_v2 = vld [vmem:[%s14410_s1 + $0x10e4] ss:$16 sps:$4 sm:$0xff]  }
  0xde   : > { %6873 = vmatpush1.bf16.msra.mxu1 %v9620_v3  ;;  %6831 = vmatprep.subr.bf16.mxu0 %v9625_v4  ;;  %v9694_v3 = vld [vmem:[%s14410_s1 + $0x12e4] ss:$16 sps:$4 sm:$0xff]   ;;  %v9689_v4 = vld [vmem:[%s14410_s1 + $0x10e0] ss:$16 sps:$4 sm:$0xff]  }
  0xdf   : > { %6874 = vmatprep.subr.bf16.mxu1 %v9628_v5  ;;  %v9692_v5 = vld [vmem:[%s14410_s1 + $0x12e0] ss:$16 sps:$4 sm:$0xff]  }
  0xe1   : > { %6832 = vmatpush1.bf16.msra.mxu0 %v9623_v6  ;;  %v11777_v6 = vld [vmem:[%s11024_s12 + $0x40] sm:$0xff] }
  0xe2   : > { %6875 = vmatpush1.bf16.msra.mxu1 %v9626_v7  ;;  %6833 = vmatprep.subr.bf16.mxu0 %v9631_v10  ;;  %v11780_v7 = vld [vmem:[%s11024_s12 + $0xc0] sm:$0xff]  ;;  %v11784_v10 = vcombine.low %v11553_v46, %v11556_v47 }
  0xe3   : > { %6876 = vmatprep.subr.bf16.mxu1 %v9634_v11  ;;  %v11788_v11 = vcombine.low %v11567_v50, %v11570_v51  ;;  %v9700_v46 = vld [vmem:[%s14410_s1 + $0x12c4] ss:$16 sps:$4 sm:$0xff]   ;;  %v11804_v47 = vcombine.high %v11777_v6, %v11780_v7  ;;  %v9695_v51 = vld [vmem:[%s14410_s1 + $0x10c0] ss:$16 sps:$4 sm:$0xff]  }
  0xe5   : > { %6834 = vmatpush1.bf16.msra.mxu0 %v9629_v12  ;;  %v11791_v12 = vld [vmem:[%s11024_s12 + $0x48] sm:$0xff] }
  0xe6   : > { %6877 = vmatpush1.bf16.msra.mxu1 %v9632_v13  ;;  %6835 = vmatprep.subr.bf16.mxu0 %v9637_v14  ;;  %v11794_v13 = vld [vmem:[%s11024_s12 + $0xc8] sm:$0xff]  ;;  %v9697_v14 = vld [vmem:[%s14410_s1 + $0x10c4] ss:$16 sps:$4 sm:$0xff]  }
  0xe7   : > { %6878 = vmatprep.subr.bf16.mxu1 %v9640_v15  ;;  %v11808_v50 = vcombine.high %v11791_v12, %v11794_v13  ;;  %v9698_v15 = vld [vmem:[%s14410_s1 + $0x12c0] ss:$16 sps:$4 sm:$0xff]  }
  0xe9   : > { %6836 = vmatpush1.bf16.msra.mxu0 %v9635_v16  ;;  %v9703_v16 = vld [vmem:[%s14410_s1 + $0x10a4] ss:$16 sps:$4 sm:$0xff]  }
  0xea   : > { %6879 = vmatpush1.bf16.msra.mxu1 %v9638_v17  ;;  %6837 = vmatprep.subr.bf16.mxu0 %v9643_v18  ;;  %v9706_v17 = vld [vmem:[%s14410_s1 + $0x12a4] ss:$16 sps:$4 sm:$0xff]   ;;  %v9701_v18 = vld [vmem:[%s14410_s1 + $0x10a0] ss:$16 sps:$4 sm:$0xff]  }
  0xeb   : > { %6880 = vmatprep.subr.bf16.mxu1 %v9646_v19  ;;  %v9704_v19 = vld [vmem:[%s14410_s1 + $0x12a0] ss:$16 sps:$4 sm:$0xff]  }
  0xed   : > { %6838 = vmatpush2.bf16.msra.mxu0 %v9641_v22  ;;  %v9709_v22 = vld [vmem:[%s14410_s1 + $0x1084] ss:$16 sps:$4 sm:$0xff]  }
  0xee   : > { %6881 = vmatpush2.bf16.msra.mxu1 %v9644_v23  ;;  %6839 = vmatprep.subr.bf16.mxu0 %v9649_v24  ;;  %v9712_v23 = vld [vmem:[%s14410_s1 + $0x1284] ss:$16 sps:$4 sm:$0xff]   ;;  %v9707_v24 = vld [vmem:[%s14410_s1 + $0x1080] ss:$16 sps:$4 sm:$0xff]  }
  0xef   : > { %6882 = vmatprep.subr.bf16.mxu1 %v9652_v25  ;;  %v9710_v25 = vld [vmem:[%s14410_s1 + $0x1280] ss:$16 sps:$4 sm:$0xff]  }
  0xf1   : > { %6840 = vmatpush2.bf16.msra.mxu0 %v9647_v26  ;;  %v9715_v26 = vld [vmem:[%s14410_s1 + $0x1064] ss:$16 sps:$4 sm:$0xff]  }
  0xf2   : > { %6883 = vmatpush2.bf16.msra.mxu1 %v9650_v27  ;;  %6841 = vmatprep.subr.bf16.mxu0 %v9655_v32  ;;  %v9718_v27 = vld [vmem:[%s14410_s1 + $0x1264] ss:$16 sps:$4 sm:$0xff]   ;;  %v9713_v32 = vld [vmem:[%s14410_s1 + $0x1060] ss:$16 sps:$4 sm:$0xff]  }
  0xf3   : > { %6884 = vmatprep.subr.bf16.mxu1 %v9658_v34  ;;  %v9716_v34 = vld [vmem:[%s14410_s1 + $0x1260] ss:$16 sps:$4 sm:$0xff]  }
  0xf5   : > { %6842 = vmatpush2.bf16.msra.mxu0 %v9653_v36  ;;  %v9721_v36 = vld [vmem:[%s14410_s1 + $0x1044] ss:$16 sps:$4 sm:$0xff]  }
  0xf6   : > { %6885 = vmatpush2.bf16.msra.mxu1 %v9656_v37  ;;  %6843 = vmatprep.subr.bf16.mxu0 %v9661_v38  ;;  %v9724_v37 = vld [vmem:[%s14410_s1 + $0x1244] ss:$16 sps:$4 sm:$0xff]   ;;  %v9719_v38 = vld [vmem:[%s14410_s1 + $0x1040] ss:$16 sps:$4 sm:$0xff]  }
  0xf7   : > { %6886 = vmatprep.subr.bf16.mxu1 %v9664_v39  ;;  %v9722_v39 = vld [vmem:[%s14410_s1 + $0x1240] ss:$16 sps:$4 sm:$0xff]  }
  0xf9   : > { %6844 = vmatpush2.bf16.msra.mxu0 %v9659_v40  ;;  %v9727_v40 = vld [vmem:[%s14410_s1 + $0x1024] ss:$16 sps:$4 sm:$0xff]  }
  0xfa   : > { %6887 = vmatpush2.bf16.msra.mxu1 %v9662_v42  ;;  %6845 = vmatprep.subr.bf16.mxu0 %v9667_v44  ;;  %v9730_v42 = vld [vmem:[%s14410_s1 + $0x1224] ss:$16 sps:$4 sm:$0xff]   ;;  %v9725_v44 = vld [vmem:[%s14410_s1 + $0x1020] ss:$16 sps:$4 sm:$0xff]  }
  0xfb   : > { %6888 = vmatprep.subr.bf16.mxu1 %v9670_v45  ;;  %v9728_v45 = vld [vmem:[%s14410_s1 + $0x1220] ss:$16 sps:$4 sm:$0xff]  }
  0xfd   : > { %6846 = vmatpush2.bf16.msra.mxu0 %v9665_v52  ;;  %v9733_v52 = vld [vmem:[%s14410_s1 + $0x1004] ss:$16 sps:$4 sm:$0xff]  }
  0xfe   : > { %6889 = vmatpush2.bf16.msra.mxu1 %v9668_v28  ;;  %6847 = vmatprep.subr.bf16.mxu0 %v9673_v31  ;;  %v9736_v28 = vld [vmem:[%s14410_s1 + $0x1204] ss:$16 sps:$4 sm:$0xff]   ;;  %v9731_v31 = vld [vmem:[%s14410_s1 + $0x1000] ss:$16 sps:$4 sm:$0xff]  }
  0xff   : > { %6890 = vmatprep.subr.bf16.mxu1 %v9676_v54  ;;  %v9734_v54 = vld [vmem:[%s14410_s1 + $0x1200] ss:$16 sps:$4 sm:$0xff]  }
 0x101   : > { %6848 = vmatpush2.bf16.msra.mxu0 %v9671_v56  ;;  %v9739_v56 = vld [vmem:[%s14410_s1 + $0x11e4] ss:$16 sps:$4 sm:$0xff]  }
 0x102   : > { %6891 = vmatpush2.bf16.msra.mxu1 %v9674_v57  ;;  %6849 = vmatprep.subr.bf16.mxu0 %v9679_v58  ;;  %v9742_v57 = vld [vmem:[%s14410_s1 + $0x13e4] ss:$16 sps:$4 sm:$0xff]   ;;  %v9737_v58 = vld [vmem:[%s14410_s1 + $0x11e0] ss:$16 sps:$4 sm:$0xff]  }
 0x103   : > { %6892 = vmatprep.subr.bf16.mxu1 %v9682_v59  ;;  %v9740_v59 = vld [vmem:[%s14410_s1 + $0x13e0] ss:$16 sps:$4 sm:$0xff]  }
 0x105   : > { %6850 = vmatpush2.bf16.msra.mxu0 %v9677_v60  ;;  %v9745_v60 = vld [vmem:[%s14410_s1 + $0x11c4] ss:$16 sps:$4 sm:$0xff]  }
 0x106   : > { %6893 = vmatpush2.bf16.msra.mxu1 %v9680_v61  ;;  %6851 = vmatprep.subr.bf16.mxu0 %v9685_v62  ;;  %v9748_v61 = vld [vmem:[%s14410_s1 + $0x13c4] ss:$16 sps:$4 sm:$0xff]   ;;  %v9743_v62 = vld [vmem:[%s14410_s1 + $0x11c0] ss:$16 sps:$4 sm:$0xff]  }
 0x107   : > { %6894 = vmatprep.subr.bf16.mxu1 %v9688_v63  ;;  %v9746_v63 = vld [vmem:[%s14410_s1 + $0x13c0] ss:$16 sps:$4 sm:$0xff]  }
 0x109   : > { %6852 = vmatpush2.bf16.msra.mxu0 %v9683_v0  ;;  %v9751_v0 = vld [vmem:[%s14410_s1 + $0x11a4] ss:$16 sps:$4 sm:$0xff]  }
 0x10a   : > { %6895 = vmatpush2.bf16.msra.mxu1 %v9686_v1  ;;  %6907 = vmatprep.subr.bf16.mxu0 %v9691_v2  ;;  %v9754_v1 = vld [vmem:[%s14410_s1 + $0x13a4] ss:$16 sps:$4 sm:$0xff]   ;;  %v9749_v2 = vld [vmem:[%s14410_s1 + $0x11a0] ss:$16 sps:$4 sm:$0xff]  }
 0x10b   : > { %6950 = vmatprep.subr.bf16.mxu1 %v9694_v3  ;;  %v9752_v3 = vld [vmem:[%s14410_s1 + $0x13a0] ss:$16 sps:$4 sm:$0xff]  }
 0x10c   : > { %6854 = vmatmul.mubr.bf16.vlgmr.msra.gmra.mxu0 %v11784_v10 }
 0x10d   : > { %6897 = vmatmul.mubr.bf16.vlgmr.msra.gmra.mxu1 %v11788_v11  ;;  %6908 = vmatpush1.bf16.msra.mxu0 %v9689_v4  ;;  %v9757_v4 = vld [vmem:[%s14410_s1 + $0x1184] ss:$16 sps:$4 sm:$0xff]  }
 0x10e   : > { %6951 = vmatpush1.bf16.msra.mxu1 %v9692_v5  ;;  %6909 = vmatprep.subr.bf16.mxu0 %v9697_v14  ;;  %v9760_v5 = vld [vmem:[%s14410_s1 + $0x1384] ss:$16 sps:$4 sm:$0xff]   ;;  %v9755_v14 = vld [vmem:[%s14410_s1 + $0x1180] ss:$16 sps:$4 sm:$0xff]  }
 0x10f   : > { %6952 = vmatprep.subr.bf16.mxu1 %v9700_v46  ;;  %6939 = vmatprep.mubr.bf16.mxu0 %v11804_v47  ;;  %v9758_v46 = vld [vmem:[%s14410_s1 + $0x1380] ss:$16 sps:$4 sm:$0xff]  }
 0x110   : > { %6982 = vmatprep.mubr.bf16.mxu1 %v11808_v50 }
 0x111   : > { %6910 = vmatpush1.bf16.msra.mxu0 %v9695_v51  ;;  %v9763_v51 = vld [vmem:[%s14410_s1 + $0x1164] ss:$16 sps:$4 sm:$0xff]  }
 0x112   : > { %6953 = vmatpush1.bf16.msra.mxu1 %v9698_v15  ;;  %6911 = vmatprep.subr.bf16.mxu0 %v9703_v16  ;;  %v9766_v15 = vld [vmem:[%s14410_s1 + $0x1364] ss:$16 sps:$4 sm:$0xff]   ;;  %v9761_v16 = vld [vmem:[%s14410_s1 + $0x1160] ss:$16 sps:$4 sm:$0xff]  }
 0x113   : > { %6954 = vmatprep.subr.bf16.mxu1 %v9706_v17  ;;  %v9764_v17 = vld [vmem:[%s14410_s1 + $0x1360] ss:$16 sps:$4 sm:$0xff]  }
 0x115   : > { %6912 = vmatpush1.bf16.msra.mxu0 %v9701_v18  ;;  %v9769_v18 = vld [vmem:[%s14410_s1 + $0x1144] ss:$16 sps:$4 sm:$0xff]  }
 0x116   : > { %6955 = vmatpush1.bf16.msra.mxu1 %v9704_v19  ;;  %6913 = vmatprep.subr.bf16.mxu0 %v9709_v22  ;;  %v9772_v19 = vld [vmem:[%s14410_s1 + $0x1344] ss:$16 sps:$4 sm:$0xff]   ;;  %v9767_v22 = vld [vmem:[%s14410_s1 + $0x1140] ss:$16 sps:$4 sm:$0xff]  }
 0x117   : > { %6956 = vmatprep.subr.bf16.mxu1 %v9712_v23  ;;  %v9770_v23 = vld [vmem:[%s14410_s1 + $0x1340] ss:$16 sps:$4 sm:$0xff]  }
 0x119   : > { %6914 = vmatpush1.bf16.msra.mxu0 %v9707_v24  ;;  %v9775_v24 = vld [vmem:[%s14410_s1 + $0x1124] ss:$16 sps:$4 sm:$0xff]  }
 0x11a   : > { %6957 = vmatpush1.bf16.msra.mxu1 %v9710_v25  ;;  %6915 = vmatprep.subr.bf16.mxu0 %v9715_v26  ;;  %v9778_v25 = vld [vmem:[%s14410_s1 + $0x1324] ss:$16 sps:$4 sm:$0xff]   ;;  %v9773_v26 = vld [vmem:[%s14410_s1 + $0x1120] ss:$16 sps:$4 sm:$0xff]  }
 0x11b   : > { %6958 = vmatprep.subr.bf16.mxu1 %v9718_v27  ;;  %v9776_v27 = vld [vmem:[%s14410_s1 + $0x1320] ss:$16 sps:$4 sm:$0xff]  }
 0x11d   : > { %6916 = vmatpush1.bf16.msra.mxu0 %v9713_v32  ;;  %v9781_v32 = vld [vmem:[%s14410_s1 + $0x1104] ss:$16 sps:$4 sm:$0xff]  }
 0x11e   : > { %6959 = vmatpush1.bf16.msra.mxu1 %v9716_v34  ;;  %6917 = vmatprep.subr.bf16.mxu0 %v9721_v36  ;;  %v9784_v34 = vld [vmem:[%s14410_s1 + $0x1304] ss:$16 sps:$4 sm:$0xff]   ;;  %v9779_v36 = vld [vmem:[%s14410_s1 + $0x1100] ss:$16 sps:$4 sm:$0xff]  }
 0x11f   : > { %6960 = vmatprep.subr.bf16.mxu1 %v9724_v37  ;;  %v9782_v37 = vld [vmem:[%s14410_s1 + $0x1300] ss:$16 sps:$4 sm:$0xff]  }
 0x121   : > { %6918 = vmatpush1.bf16.msra.mxu0 %v9719_v38  ;;  %v9787_v38 = vld [vmem:[%s14410_s1 + $0x14e4] ss:$16 sps:$4 sm:$0xff]  }
 0x122   : > { %6961 = vmatpush1.bf16.msra.mxu1 %v9722_v39  ;;  %6919 = vmatprep.subr.bf16.mxu0 %v9727_v40  ;;  %v9790_v39 = vld [vmem:[%s14410_s1 + $0x16e4] ss:$16 sps:$4 sm:$0xff]  }
 0x123   : > { %6962 = vmatprep.subr.bf16.mxu1 %v9730_v42  ;;  %v11995_v40 = vld [vmem:[%s11024_s12 + $0x50] sm:$0xff] }
 0x124   : > { %v9785_v42 = vld [vmem:[%s14410_s1 + $0x14e0] ss:$16 sps:$4 sm:$0xff]  }
 0x125   : > { %6920 = vmatpush1.bf16.msra.mxu0 %v9725_v44  ;;  %v12002_v44 = vcombine.low %v11777_v6, %v11780_v7  ;;  %v9793_v6 = vld [vmem:[%s14410_s1 + $0x14c4] ss:$16 sps:$4 sm:$0xff]  }
 0x126   : > { %6963 = vmatpush1.bf16.msra.mxu1 %v9728_v45  ;;  %6921 = vmatprep.subr.bf16.mxu0 %v9733_v52  ;;  %v12006_v45 = vcombine.low %v11791_v12, %v11794_v13  ;;  %v12009_v52 = vld [vmem:[%s11024_s12 + $0xd0] sm:$0xff] }
 0x127   : > { %6964 = vmatprep.subr.bf16.mxu1 %v9736_v28  ;;  %v12012_v28 = vld [vmem:[%s11024_s12 + $0x58] sm:$0xff]  ;;  %v9796_v7 = vld [vmem:[%s14410_s1 + $0x16c4] ss:$16 sps:$4 sm:$0xff]   ;;  %v9791_v12 = vld [vmem:[%s14410_s1 + $0x14c0] ss:$16 sps:$4 sm:$0xff]  }
 0x128   : > { %v9794_v13 = vld [vmem:[%s14410_s1 + $0x16c0] ss:$16 sps:$4 sm:$0xff]  }
 0x129   : > { %6922 = vmatpush1.bf16.msra.mxu0 %v9731_v31  ;;  %v12015_v31 = vld [vmem:[%s11024_s12 + $0xd8] sm:$0xff] }
 0x12a   : > { %6965 = vmatpush1.bf16.msra.mxu1 %v9734_v54  ;;  %6923 = vmatprep.subr.bf16.mxu0 %v9739_v56  ;;  %v9788_v54 = vld [vmem:[%s14410_s1 + $0x16e0] ss:$16 sps:$4 sm:$0xff]   ;;  %v12034_v56 = vcombine.high %v11995_v40, %v12009_v52 }
 0x12b   : > { %6966 = vmatprep.subr.bf16.mxu1 %v9742_v57  ;;  %v12038_v57 = vcombine.high %v12012_v28, %v12015_v31 }
 0x12d   : > { %6924 = vmatpush2.bf16.msra.mxu0 %v9737_v58  ;;  %v9799_v58 = vld [vmem:[%s14410_s1 + $0x14a4] ss:$16 sps:$4 sm:$0xff]  }
 0x12e   : > { %6967 = vmatpush2.bf16.msra.mxu1 %v9740_v59  ;;  %6925 = vmatprep.subr.bf16.mxu0 %v9745_v60  ;;  %v9802_v59 = vld [vmem:[%s14410_s1 + $0x16a4] ss:$16 sps:$4 sm:$0xff]   ;;  %v9797_v60 = vld [vmem:[%s14410_s1 + $0x14a0] ss:$16 sps:$4 sm:$0xff]  }
 0x12f   : > { %6968 = vmatprep.subr.bf16.mxu1 %v9748_v61  ;;  %v9800_v61 = vld [vmem:[%s14410_s1 + $0x16a0] ss:$16 sps:$4 sm:$0xff]  }
 0x131   : > { %6926 = vmatpush2.bf16.msra.mxu0 %v9743_v62  ;;  %v9805_v62 = vld [vmem:[%s14410_s1 + $0x1484] ss:$16 sps:$4 sm:$0xff]  }
 0x132   : > { %6969 = vmatpush2.bf16.msra.mxu1 %v9746_v63  ;;  %6927 = vmatprep.subr.bf16.mxu0 %v9751_v0  ;;  %v9808_v63 = vld [vmem:[%s14410_s1 + $0x1684] ss:$16 sps:$4 sm:$0xff]   ;;  %v9803_v0 = vld [vmem:[%s14410_s1 + $0x1480] ss:$16 sps:$4 sm:$0xff]  }
 0x133   : > { %6970 = vmatprep.subr.bf16.mxu1 %v9754_v1  ;;  %v9806_v1 = vld [vmem:[%s14410_s1 + $0x1680] ss:$16 sps:$4 sm:$0xff]  }
 0x135   : > { %6928 = vmatpush2.bf16.msra.mxu0 %v9749_v2  ;;  %v9811_v2 = vld [vmem:[%s14410_s1 + $0x1464] ss:$16 sps:$4 sm:$0xff]  }
 0x136   : > { %6971 = vmatpush2.bf16.msra.mxu1 %v9752_v3  ;;  %6929 = vmatprep.subr.bf16.mxu0 %v9757_v4  ;;  %v9814_v3 = vld [vmem:[%s14410_s1 + $0x1664] ss:$16 sps:$4 sm:$0xff]   ;;  %v9809_v4 = vld [vmem:[%s14410_s1 + $0x1460] ss:$16 sps:$4 sm:$0xff]  }
 0x137   : > { %6972 = vmatprep.subr.bf16.mxu1 %v9760_v5  ;;  %v9812_v5 = vld [vmem:[%s14410_s1 + $0x1660] ss:$16 sps:$4 sm:$0xff]  }
 0x139   : > { %6930 = vmatpush2.bf16.msra.mxu0 %v9755_v14  ;;  %v9817_v14 = vld [vmem:[%s14410_s1 + $0x1444] ss:$16 sps:$4 sm:$0xff]  }
 0x13a   : > { %6973 = vmatpush2.bf16.msra.mxu1 %v9758_v46  ;;  %6931 = vmatprep.subr.bf16.mxu0 %v9763_v51  ;;  %v9820_v46 = vld [vmem:[%s14410_s1 + $0x1644] ss:$16 sps:$4 sm:$0xff]   ;;  %v9815_v51 = vld [vmem:[%s14410_s1 + $0x1440] ss:$16 sps:$4 sm:$0xff]  }
 0x13b   : > { %6974 = vmatprep.subr.bf16.mxu1 %v9766_v15  ;;  %v9818_v15 = vld [vmem:[%s14410_s1 + $0x1640] ss:$16 sps:$4 sm:$0xff]  }
 0x13d   : > { %6932 = vmatpush2.bf16.msra.mxu0 %v9761_v16  ;;  %v9823_v16 = vld [vmem:[%s14410_s1 + $0x1424] ss:$16 sps:$4 sm:$0xff]  }
 0x13e   : > { %6975 = vmatpush2.bf16.msra.mxu1 %v9764_v17  ;;  %6933 = vmatprep.subr.bf16.mxu0 %v9769_v18  ;;  %v9826_v17 = vld [vmem:[%s14410_s1 + $0x1624] ss:$16 sps:$4 sm:$0xff]   ;;  %v9821_v18 = vld [vmem:[%s14410_s1 + $0x1420] ss:$16 sps:$4 sm:$0xff]  }
 0x13f   : > { %6976 = vmatprep.subr.bf16.mxu1 %v9772_v19  ;;  %v9824_v19 = vld [vmem:[%s14410_s1 + $0x1620] ss:$16 sps:$4 sm:$0xff]  }
 0x141   : > { %6934 = vmatpush2.bf16.msra.mxu0 %v9767_v22  ;;  %v9829_v22 = vld [vmem:[%s14410_s1 + $0x1404] ss:$16 sps:$4 sm:$0xff]  }
 0x142   : > { %6977 = vmatpush2.bf16.msra.mxu1 %v9770_v23  ;;  %6935 = vmatprep.subr.bf16.mxu0 %v9775_v24  ;;  %v9832_v23 = vld [vmem:[%s14410_s1 + $0x1604] ss:$16 sps:$4 sm:$0xff]   ;;  %v9827_v24 = vld [vmem:[%s14410_s1 + $0x1400] ss:$16 sps:$4 sm:$0xff]  }
 0x143   : > { %6978 = vmatprep.subr.bf16.mxu1 %v9778_v25  ;;  %v9830_v25 = vld [vmem:[%s14410_s1 + $0x1600] ss:$16 sps:$4 sm:$0xff]  }
 0x145   : > { %6936 = vmatpush2.bf16.msra.mxu0 %v9773_v26  ;;  %v9835_v26 = vld [vmem:[%s14410_s1 + $0x15e4] ss:$16 sps:$4 sm:$0xff]  }
 0x146   : > { %6979 = vmatpush2.bf16.msra.mxu1 %v9776_v27  ;;  %6937 = vmatprep.subr.bf16.mxu0 %v9781_v32  ;;  %v9838_v27 = vld [vmem:[%s14410_s1 + $0x17e4] ss:$16 sps:$4 sm:$0xff]   ;;  %v9833_v32 = vld [vmem:[%s14410_s1 + $0x15e0] ss:$16 sps:$4 sm:$0xff]  }
 0x147   : > { %6980 = vmatprep.subr.bf16.mxu1 %v9784_v34  ;;  %v9836_v34 = vld [vmem:[%s14410_s1 + $0x17e0] ss:$16 sps:$4 sm:$0xff]  }
 0x149   : > { %6938 = vmatpush2.bf16.msra.mxu0 %v9779_v36  ;;  %v9841_v36 = vld [vmem:[%s14410_s1 + $0x15c4] ss:$16 sps:$4 sm:$0xff]  }
 0x14a   : > { %6981 = vmatpush2.bf16.msra.mxu1 %v9782_v37  ;;  %6993 = vmatprep.subr.bf16.mxu0 %v9787_v38  ;;  %v9844_v37 = vld [vmem:[%s14410_s1 + $0x17c4] ss:$16 sps:$4 sm:$0xff]   ;;  %v9839_v38 = vld [vmem:[%s14410_s1 + $0x15c0] ss:$16 sps:$4 sm:$0xff]  }
 0x14b   : > { %7036 = vmatprep.subr.bf16.mxu1 %v9790_v39  ;;  %v9842_v39 = vld [vmem:[%s14410_s1 + $0x17c0] ss:$16 sps:$4 sm:$0xff]  }
 0x14c   : > { %6940 = vmatmul.mubr.bf16.vlgmr.msra.gmra.mxu0 %v12002_v44 }
 0x14d   : > { %6983 = vmatmul.mubr.bf16.vlgmr.msra.gmra.mxu1 %v12006_v45  ;;  %6994 = vmatpush1.bf16.msra.mxu0 %v9785_v42  ;;  %v9847_v42 = vld [vmem:[%s14410_s1 + $0x15a4] ss:$16 sps:$4 sm:$0xff]  }
 0x14e   : > { %7037 = vmatpush1.bf16.msra.mxu1 %v9788_v54  ;;  %6995 = vmatprep.subr.bf16.mxu0 %v9793_v6  ;;  %v9850_v54 = vld [vmem:[%s14410_s1 + $0x17a4] ss:$16 sps:$4 sm:$0xff]   ;;  %v9845_v6 = vld [vmem:[%s14410_s1 + $0x15a0] ss:$16 sps:$4 sm:$0xff]  }
 0x14f   : > { %7038 = vmatprep.subr.bf16.mxu1 %v9796_v7  ;;  %7025 = vmatprep.mubr.bf16.mxu0 %v12034_v56  ;;  %v9848_v7 = vld [vmem:[%s14410_s1 + $0x17a0] ss:$16 sps:$4 sm:$0xff]  }
 0x150   : > { %7068 = vmatprep.mubr.bf16.mxu1 %v12038_v57 }
 0x151   : > { %6996 = vmatpush1.bf16.msra.mxu0 %v9791_v12  ;;  %v9853_v12 = vld [vmem:[%s14410_s1 + $0x1584] ss:$16 sps:$4 sm:$0xff]  }
 0x152   : > { %7039 = vmatpush1.bf16.msra.mxu1 %v9794_v13  ;;  %6997 = vmatprep.subr.bf16.mxu0 %v9799_v58  ;;  %v9856_v13 = vld [vmem:[%s14410_s1 + $0x1784] ss:$16 sps:$4 sm:$0xff]   ;;  %v9851_v58 = vld [vmem:[%s14410_s1 + $0x1580] ss:$16 sps:$4 sm:$0xff]  }
 0x153   : > { %7040 = vmatprep.subr.bf16.mxu1 %v9802_v59  ;;  %v9854_v59 = vld [vmem:[%s14410_s1 + $0x1780] ss:$16 sps:$4 sm:$0xff]  }
 0x155   : > { %6998 = vmatpush1.bf16.msra.mxu0 %v9797_v60  ;;  %v9859_v60 = vld [vmem:[%s14410_s1 + $0x1564] ss:$16 sps:$4 sm:$0xff]  }
 0x156   : > { %7041 = vmatpush1.bf16.msra.mxu1 %v9800_v61  ;;  %6999 = vmatprep.subr.bf16.mxu0 %v9805_v62  ;;  %v9862_v61 = vld [vmem:[%s14410_s1 + $0x1764] ss:$16 sps:$4 sm:$0xff]   ;;  %v9857_v62 = vld [vmem:[%s14410_s1 + $0x1560] ss:$16 sps:$4 sm:$0xff]  }
 0x157   : > { %7042 = vmatprep.subr.bf16.mxu1 %v9808_v63  ;;  %v9860_v63 = vld [vmem:[%s14410_s1 + $0x1760] ss:$16 sps:$4 sm:$0xff]  }
 0x159   : > { %7000 = vmatpush1.bf16.msra.mxu0 %v9803_v0  ;;  %v9865_v0 = vld [vmem:[%s14410_s1 + $0x1544] ss:$16 sps:$4 sm:$0xff]  }
 0x15a   : > { %7043 = vmatpush1.bf16.msra.mxu1 %v9806_v1  ;;  %7001 = vmatprep.subr.bf16.mxu0 %v9811_v2  ;;  %v9868_v1 = vld [vmem:[%s14410_s1 + $0x1744] ss:$16 sps:$4 sm:$0xff]   ;;  %v9863_v2 = vld [vmem:[%s14410_s1 + $0x1540] ss:$16 sps:$4 sm:$0xff]  }
 0x15b   : > { %7044 = vmatprep.subr.bf16.mxu1 %v9814_v3  ;;  %v9866_v3 = vld [vmem:[%s14410_s1 + $0x1740] ss:$16 sps:$4 sm:$0xff]  }
 0x15d   : > { %7002 = vmatpush1.bf16.msra.mxu0 %v9809_v4  ;;  %v9871_v4 = vld [vmem:[%s14410_s1 + $0x1524] ss:$16 sps:$4 sm:$0xff]  }
 0x15e   : > { %7045 = vmatpush1.bf16.msra.mxu1 %v9812_v5  ;;  %7003 = vmatprep.subr.bf16.mxu0 %v9817_v14  ;;  %v9874_v5 = vld [vmem:[%s14410_s1 + $0x1724] ss:$16 sps:$4 sm:$0xff]   ;;  %v9869_v14 = vld [vmem:[%s14410_s1 + $0x1520] ss:$16 sps:$4 sm:$0xff]  }
 0x15f   : > { %7046 = vmatprep.subr.bf16.mxu1 %v9820_v46  ;;  %v9872_v46 = vld [vmem:[%s14410_s1 + $0x1720] ss:$16 sps:$4 sm:$0xff]  }
 0x161   : > { %7004 = vmatpush1.bf16.msra.mxu0 %v9815_v51  ;;  %v9877_v51 = vld [vmem:[%s14410_s1 + $0x1504] ss:$16 sps:$4 sm:$0xff]  }
 0x162   : > { %7047 = vmatpush1.bf16.msra.mxu1 %v9818_v15  ;;  %7005 = vmatprep.subr.bf16.mxu0 %v9823_v16  ;;  %v9880_v15 = vld [vmem:[%s14410_s1 + $0x1704] ss:$16 sps:$4 sm:$0xff]   ;;  %v9875_v16 = vld [vmem:[%s14410_s1 + $0x1500] ss:$16 sps:$4 sm:$0xff]  }
 0x163   : > { %7048 = vmatprep.subr.bf16.mxu1 %v9826_v17  ;;  %v9878_v17 = vld [vmem:[%s14410_s1 + $0x1700] ss:$16 sps:$4 sm:$0xff]  }
 0x165   : > { %7006 = vmatpush1.bf16.msra.mxu0 %v9821_v18  ;;  %v9883_v18 = vld [vmem:[%s14410_s1 + $0x18e4] ss:$16 sps:$4 sm:$0xff]  }
 0x166   : > { %7049 = vmatpush1.bf16.msra.mxu1 %v9824_v19  ;;  %7007 = vmatprep.subr.bf16.mxu0 %v9829_v22  ;;  %v9886_v19 = vld [vmem:[%s14410_s1 + $0x1ae4] ss:$16 sps:$4 sm:$0xff]  }
 0x167   : > { %7050 = vmatprep.subr.bf16.mxu1 %v9832_v23  ;;  %v12219_v22 = vld [vmem:[%s11024_s12 + $0x60] sm:$0xff] }
 0x168   : > { %v9881_v23 = vld [vmem:[%s14410_s1 + $0x18e0] ss:$16 sps:$4 sm:$0xff]  }
 0x169   : > { %7008 = vmatpush1.bf16.msra.mxu0 %v9827_v24  ;;  %v12226_v24 = vcombine.low %v11995_v40, %v12009_v52  ;;  %v9889_v40 = vld [vmem:[%s14410_s1 + $0x18c4] ss:$16 sps:$4 sm:$0xff]  }
 0x16a   : > { %7051 = vmatpush1.bf16.msra.mxu1 %v9830_v25  ;;  %7009 = vmatprep.subr.bf16.mxu0 %v9835_v26  ;;  %v12230_v25 = vcombine.low %v12012_v28, %v12015_v31  ;;  %v12233_v26 = vld [vmem:[%s11024_s12 + $0xe0] sm:$0xff] }
 0x16b   : > { %7052 = vmatprep.subr.bf16.mxu1 %v9838_v27  ;;  %v12236_v27 = vld [vmem:[%s11024_s12 + $0x68] sm:$0xff]  ;;  %v9892_v52 = vld [vmem:[%s14410_s1 + $0x1ac4] ss:$16 sps:$4 sm:$0xff]   ;;  %v9887_v28 = vld [vmem:[%s14410_s1 + $0x18c0] ss:$16 sps:$4 sm:$0xff]  }
 0x16c   : > { %v9890_v31 = vld [vmem:[%s14410_s1 + $0x1ac0] ss:$16 sps:$4 sm:$0xff]  }
 0x16d   : > { %7010 = vmatpush2.bf16.msra.mxu0 %v9833_v32  ;;  %v12239_v32 = vld [vmem:[%s11024_s12 + $0xe8] sm:$0xff] }
 0x16e   : > { %7053 = vmatpush2.bf16.msra.mxu1 %v9836_v34  ;;  %7011 = vmatprep.subr.bf16.mxu0 %v9841_v36  ;;  %v9884_v34 = vld [vmem:[%s14410_s1 + $0x1ae0] ss:$16 sps:$4 sm:$0xff]   ;;  %v12258_v36 = vcombine.high %v12219_v22, %v12233_v26 }
 0x16f   : > { %7054 = vmatprep.subr.bf16.mxu1 %v9844_v37  ;;  %v12262_v37 = vcombine.high %v12236_v27, %v12239_v32 }
 0x171   : > { %7012 = vmatpush2.bf16.msra.mxu0 %v9839_v38  ;;  %v9895_v38 = vld [vmem:[%s14410_s1 + $0x18a4] ss:$16 sps:$4 sm:$0xff]  }
 0x172   : > { %7055 = vmatpush2.bf16.msra.mxu1 %v9842_v39  ;;  %7013 = vmatprep.subr.bf16.mxu0 %v9847_v42  ;;  %v9898_v39 = vld [vmem:[%s14410_s1 + $0x1aa4] ss:$16 sps:$4 sm:$0xff]   ;;  %v9893_v42 = vld [vmem:[%s14410_s1 + $0x18a0] ss:$16 sps:$4 sm:$0xff]  }
 0x173   : > { %7056 = vmatprep.subr.bf16.mxu1 %v9850_v54  ;;  %v9896_v54 = vld [vmem:[%s14410_s1 + $0x1aa0] ss:$16 sps:$4 sm:$0xff]  }
 0x175   : > { %7014 = vmatpush2.bf16.msra.mxu0 %v9845_v6  ;;  %v9901_v6 = vld [vmem:[%s14410_s1 + $0x1884] ss:$16 sps:$4 sm:$0xff]  }
 0x176   : > { %7057 = vmatpush2.bf16.msra.mxu1 %v9848_v7  ;;  %7015 = vmatprep.subr.bf16.mxu0 %v9853_v12  ;;  %v9904_v7 = vld [vmem:[%s14410_s1 + $0x1a84] ss:$16 sps:$4 sm:$0xff]   ;;  %v9899_v12 = vld [vmem:[%s14410_s1 + $0x1880] ss:$16 sps:$4 sm:$0xff]  }
 0x177   : > { %7058 = vmatprep.subr.bf16.mxu1 %v9856_v13  ;;  %v9902_v13 = vld [vmem:[%s14410_s1 + $0x1a80] ss:$16 sps:$4 sm:$0xff]  }
 0x179   : > { %7016 = vmatpush2.bf16.msra.mxu0 %v9851_v58  ;;  %v9907_v58 = vld [vmem:[%s14410_s1 + $0x1864] ss:$16 sps:$4 sm:$0xff]  }
 0x17a   : > { %7059 = vmatpush2.bf16.msra.mxu1 %v9854_v59  ;;  %7017 = vmatprep.subr.bf16.mxu0 %v9859_v60  ;;  %v9910_v59 = vld [vmem:[%s14410_s1 + $0x1a64] ss:$16 sps:$4 sm:$0xff]   ;;  %v9905_v60 = vld [vmem:[%s14410_s1 + $0x1860] ss:$16 sps:$4 sm:$0xff]  }
 0x17b   : > { %7060 = vmatprep.subr.bf16.mxu1 %v9862_v61  ;;  %v9908_v61 = vld [vmem:[%s14410_s1 + $0x1a60] ss:$16 sps:$4 sm:$0xff]  }
 0x17d   : > { %7018 = vmatpush2.bf16.msra.mxu0 %v9857_v62  ;;  %v9913_v62 = vld [vmem:[%s14410_s1 + $0x1844] ss:$16 sps:$4 sm:$0xff]  }
 0x17e   : > { %7061 = vmatpush2.bf16.msra.mxu1 %v9860_v63  ;;  %7019 = vmatprep.subr.bf16.mxu0 %v9865_v0  ;;  %v9916_v63 = vld [vmem:[%s14410_s1 + $0x1a44] ss:$16 sps:$4 sm:$0xff]   ;;  %v9911_v0 = vld [vmem:[%s14410_s1 + $0x1840] ss:$16 sps:$4 sm:$0xff]  }
 0x17f   : > { %7062 = vmatprep.subr.bf16.mxu1 %v9868_v1  ;;  %v9914_v1 = vld [vmem:[%s14410_s1 + $0x1a40] ss:$16 sps:$4 sm:$0xff]  }
 0x181   : > { %7020 = vmatpush2.bf16.msra.mxu0 %v9863_v2  ;;  %v9919_v2 = vld [vmem:[%s14410_s1 + $0x1824] ss:$16 sps:$4 sm:$0xff]  }
 0x182   : > { %7063 = vmatpush2.bf16.msra.mxu1 %v9866_v3  ;;  %7021 = vmatprep.subr.bf16.mxu0 %v9871_v4  ;;  %v9922_v3 = vld [vmem:[%s14410_s1 + $0x1a24] ss:$16 sps:$4 sm:$0xff]   ;;  %v9917_v4 = vld [vmem:[%s14410_s1 + $0x1820] ss:$16 sps:$4 sm:$0xff]  }
 0x183   : > { %7064 = vmatprep.subr.bf16.mxu1 %v9874_v5  ;;  %v9920_v5 = vld [vmem:[%s14410_s1 + $0x1a20] ss:$16 sps:$4 sm:$0xff]  }
 0x185   : > { %7022 = vmatpush2.bf16.msra.mxu0 %v9869_v14  ;;  %v9925_v14 = vld [vmem:[%s14410_s1 + $0x1804] ss:$16 sps:$4 sm:$0xff]  }
 0x186   : > { %7065 = vmatpush2.bf16.msra.mxu1 %v9872_v46  ;;  %7023 = vmatprep.subr.bf16.mxu0 %v9877_v51  ;;  %v9928_v46 = vld [vmem:[%s14410_s1 + $0x1a04] ss:$16 sps:$4 sm:$0xff]   ;;  %v9923_v51 = vld [vmem:[%s14410_s1 + $0x1800] ss:$16 sps:$4 sm:$0xff]  }
 0x187   : > { %7066 = vmatprep.subr.bf16.mxu1 %v9880_v15  ;;  %v9926_v15 = vld [vmem:[%s14410_s1 + $0x1a00] ss:$16 sps:$4 sm:$0xff]  }
 0x189   : > { %7024 = vmatpush2.bf16.msra.mxu0 %v9875_v16  ;;  %v9931_v16 = vld [vmem:[%s14410_s1 + $0x19e4] ss:$16 sps:$4 sm:$0xff]  }
 0x18a   : > { %7067 = vmatpush2.bf16.msra.mxu1 %v9878_v17  ;;  %7079 = vmatprep.subr.bf16.mxu0 %v9883_v18  ;;  %v9934_v17 = vld [vmem:[%s14410_s1 + $0x1be4] ss:$16 sps:$4 sm:$0xff]   ;;  %v9929_v18 = vld [vmem:[%s14410_s1 + $0x19e0] ss:$16 sps:$4 sm:$0xff]  }
 0x18b   : > { %7122 = vmatprep.subr.bf16.mxu1 %v9886_v19  ;;  %v9932_v19 = vld [vmem:[%s14410_s1 + $0x1be0] ss:$16 sps:$4 sm:$0xff]  }
 0x18c   : > { %7026 = vmatmul.mubr.bf16.vlgmr.msra.gmra.mxu0 %v12226_v24 }
 0x18d   : > { %7069 = vmatmul.mubr.bf16.vlgmr.msra.gmra.mxu1 %v12230_v25  ;;  %7080 = vmatpush1.bf16.msra.mxu0 %v9881_v23  ;;  %v9937_v23 = vld [vmem:[%s14410_s1 + $0x19c4] ss:$16 sps:$4 sm:$0xff]  }
 0x18e   : > { %7123 = vmatpush1.bf16.msra.mxu1 %v9884_v34  ;;  %7081 = vmatprep.subr.bf16.mxu0 %v9889_v40  ;;  %v9940_v34 = vld [vmem:[%s14410_s1 + $0x1bc4] ss:$16 sps:$4 sm:$0xff]   ;;  %v9935_v40 = vld [vmem:[%s14410_s1 + $0x19c0] ss:$16 sps:$4 sm:$0xff]  }
 0x18f   : > { %7124 = vmatprep.subr.bf16.mxu1 %v9892_v52  ;;  %7111 = vmatprep.mubr.bf16.mxu0 %v12258_v36  ;;  %v9938_v52 = vld [vmem:[%s14410_s1 + $0x1bc0] ss:$16 sps:$4 sm:$0xff]  }
 0x190   : > { %7154 = vmatprep.mubr.bf16.mxu1 %v12262_v37 }
 0x191   : > { %7082 = vmatpush1.bf16.msra.mxu0 %v9887_v28  ;;  %v9943_v28 = vld [vmem:[%s14410_s1 + $0x19a4] ss:$16 sps:$4 sm:$0xff]  }
 0x192   : > { %7125 = vmatpush1.bf16.msra.mxu1 %v9890_v31  ;;  %7083 = vmatprep.subr.bf16.mxu0 %v9895_v38  ;;  %v9946_v31 = vld [vmem:[%s14410_s1 + $0x1ba4] ss:$16 sps:$4 sm:$0xff]   ;;  %v9941_v38 = vld [vmem:[%s14410_s1 + $0x19a0] ss:$16 sps:$4 sm:$0xff]  }
 0x193   : > { %7126 = vmatprep.subr.bf16.mxu1 %v9898_v39  ;;  %v9944_v39 = vld [vmem:[%s14410_s1 + $0x1ba0] ss:$16 sps:$4 sm:$0xff]  }
 0x195   : > { %7084 = vmatpush1.bf16.msra.mxu0 %v9893_v42  ;;  %v9949_v42 = vld [vmem:[%s14410_s1 + $0x1984] ss:$16 sps:$4 sm:$0xff]  }
 0x196   : > { %7127 = vmatpush1.bf16.msra.mxu1 %v9896_v54  ;;  %7085 = vmatprep.subr.bf16.mxu0 %v9901_v6  ;;  %v9952_v54 = vld [vmem:[%s14410_s1 + $0x1b84] ss:$16 sps:$4 sm:$0xff]   ;;  %v9947_v6 = vld [vmem:[%s14410_s1 + $0x1980] ss:$16 sps:$4 sm:$0xff]  }
 0x197   : > { %7128 = vmatprep.subr.bf16.mxu1 %v9904_v7  ;;  %v9950_v7 = vld [vmem:[%s14410_s1 + $0x1b80] ss:$16 sps:$4 sm:$0xff]  }
 0x199   : > { %7086 = vmatpush1.bf16.msra.mxu0 %v9899_v12  ;;  %v9955_v12 = vld [vmem:[%s14410_s1 + $0x1964] ss:$16 sps:$4 sm:$0xff]  }
 0x19a   : > { %7129 = vmatpush1.bf16.msra.mxu1 %v9902_v13  ;;  %7087 = vmatprep.subr.bf16.mxu0 %v9907_v58  ;;  %v9958_v13 = vld [vmem:[%s14410_s1 + $0x1b64] ss:$16 sps:$4 sm:$0xff]   ;;  %v9953_v58 = vld [vmem:[%s14410_s1 + $0x1960] ss:$16 sps:$4 sm:$0xff]  }
 0x19b   : > { %7130 = vmatprep.subr.bf16.mxu1 %v9910_v59  ;;  %v9956_v59 = vld [vmem:[%s14410_s1 + $0x1b60] ss:$16 sps:$4 sm:$0xff]  }
 0x19d   : > { %7088 = vmatpush1.bf16.msra.mxu0 %v9905_v60  ;;  %v9961_v60 = vld [vmem:[%s14410_s1 + $0x1944] ss:$16 sps:$4 sm:$0xff]  }
 0x19e   : > { %7131 = vmatpush1.bf16.msra.mxu1 %v9908_v61  ;;  %7089 = vmatprep.subr.bf16.mxu0 %v9913_v62  ;;  %v9964_v61 = vld [vmem:[%s14410_s1 + $0x1b44] ss:$16 sps:$4 sm:$0xff]   ;;  %v9959_v62 = vld [vmem:[%s14410_s1 + $0x1940] ss:$16 sps:$4 sm:$0xff]  }
 0x19f   : > { %7132 = vmatprep.subr.bf16.mxu1 %v9916_v63  ;;  %v9962_v63 = vld [vmem:[%s14410_s1 + $0x1b40] ss:$16 sps:$4 sm:$0xff]  }
 0x1a1   : > { %7090 = vmatpush1.bf16.msra.mxu0 %v9911_v0  ;;  %v9967_v0 = vld [vmem:[%s14410_s1 + $0x1924] ss:$16 sps:$4 sm:$0xff]  }
 0x1a2   : > { %7133 = vmatpush1.bf16.msra.mxu1 %v9914_v1  ;;  %7091 = vmatprep.subr.bf16.mxu0 %v9919_v2  ;;  %v9970_v1 = vld [vmem:[%s14410_s1 + $0x1b24] ss:$16 sps:$4 sm:$0xff]   ;;  %v9965_v2 = vld [vmem:[%s14410_s1 + $0x1920] ss:$16 sps:$4 sm:$0xff]  }
 0x1a3   : > { %7134 = vmatprep.subr.bf16.mxu1 %v9922_v3  ;;  %v9968_v3 = vld [vmem:[%s14410_s1 + $0x1b20] ss:$16 sps:$4 sm:$0xff]  }
 0x1a5   : > { %7092 = vmatpush1.bf16.msra.mxu0 %v9917_v4  ;;  %v9973_v4 = vld [vmem:[%s14410_s1 + $0x1904] ss:$16 sps:$4 sm:$0xff]  }
 0x1a6   : > { %7135 = vmatpush1.bf16.msra.mxu1 %v9920_v5  ;;  %7093 = vmatprep.subr.bf16.mxu0 %v9925_v14  ;;  %v9976_v5 = vld [vmem:[%s14410_s1 + $0x1b04] ss:$16 sps:$4 sm:$0xff]   ;;  %v9971_v14 = vld [vmem:[%s14410_s1 + $0x1900] ss:$16 sps:$4 sm:$0xff]  }
 0x1a7   : > { %7136 = vmatprep.subr.bf16.mxu1 %v9928_v46  ;;  %v9974_v46 = vld [vmem:[%s14410_s1 + $0x1b00] ss:$16 sps:$4 sm:$0xff]  }
 0x1a9   : > { %7094 = vmatpush1.bf16.msra.mxu0 %v9923_v51  ;;  %v9979_v51 = vld [vmem:[%s14410_s1 + $0x1ce4] ss:$16 sps:$4 sm:$0xff]  }
 0x1aa   : > { %7137 = vmatpush1.bf16.msra.mxu1 %v9926_v15  ;;  %7095 = vmatprep.subr.bf16.mxu0 %v9931_v16  ;;  %v9982_v15 = vld [vmem:[%s14410_s1 + $0x1ee4] ss:$16 sps:$4 sm:$0xff]  }
 0x1ab   : > { %7138 = vmatprep.subr.bf16.mxu1 %v9934_v17  ;;  %v12443_v16 = vld [vmem:[%s11024_s12 + $0x70] sm:$0xff] }
 0x1ac   : > { %v12446_v17 = vld [vmem:[%s11024_s12 + $0xf0] sm:$0xff] }
 0x1ad   : > { %7096 = vmatpush2.bf16.msra.mxu0 %v9929_v18  ;;  %v12449_v18 = vld [vmem:[%s11024_s12 + $0x78] sm:$0xff] }
 0x1ae   : > { %7139 = vmatpush2.bf16.msra.mxu1 %v9932_v19  ;;  %7097 = vmatprep.subr.bf16.mxu0 %v9937_v23  ;;  %v12452_v19 = vld [vmem:[%s11024_s12 + $0xf8] sm:$0xff]  ;;  %v9977_v23 = vld [vmem:[%s14410_s1 + $0x1ce0] ss:$16 sps:$4 sm:$0xff]  }
 0x1af   : > { %7140 = vmatprep.subr.bf16.mxu1 %v9940_v34  ;;  %v9980_v34 = vld [vmem:[%s14410_s1 + $0x1ee0] ss:$16 sps:$4 sm:$0xff]  }
 0x1b1   : > { %7098 = vmatpush2.bf16.msra.mxu0 %v9935_v40  ;;  %v12462_v40 = vcombine.low %v12219_v22, %v12233_v26  ;;  %v9983_v22 = vld [vmem:[%s14410_s1 + $0x1cc0] ss:$16 sps:$4 sm:$0xff]  }
 0x1b2   : > { %7141 = vmatpush2.bf16.msra.mxu1 %v9938_v52  ;;  %7099 = vmatprep.subr.bf16.mxu0 %v9943_v28  ;;  %v12466_v52 = vcombine.low %v12236_v27, %v12239_v32  ;;  %v9985_v28 = vld [vmem:[%s14410_s1 + $0x1cc4] ss:$16 sps:$4 sm:$0xff]   ;;  %v9986_v26 = vld [vmem:[%s14410_s1 + $0x1ec0] ss:$16 sps:$4 sm:$0xff]   ;;  %v12482_v27 = vcombine.high %v12443_v16, %v12446_v17  ;;  %v12486_v32 = vcombine.high %v12449_v18, %v12452_v19 }
 0x1b3   : > { %7142 = vmatprep.subr.bf16.mxu1 %v9946_v31  ;;  %v9988_v31 = vld [vmem:[%s14410_s1 + $0x1ec4] ss:$16 sps:$4 sm:$0xff]  }
 0x1b4   : > { %14419 = vst [vmem:[#allocation2_spill] sm:$0xff] %v12466_v52  ;;  %14420 = vst [vmem:[#allocation3_spill] sm:$0xff] %v12482_v27 }
 0x1b5   : > { %7100 = vmatpush2.bf16.msra.mxu0 %v9941_v38  ;;  %14421 = vst [vmem:[#allocation4_spill] sm:$0xff] %v12486_v32  ;;  %v9991_v38 = vld [vmem:[%s14410_s1 + $0x1ca4] ss:$16 sps:$4 sm:$0xff]  }
 0x1b6   : > { %7143 = vmatpush2.bf16.msra.mxu1 %v9944_v39  ;;  %7101 = vmatprep.subr.bf16.mxu0 %v9949_v42  ;;  %v9994_v39 = vld [vmem:[%s14410_s1 + $0x1ea4] ss:$16 sps:$4 sm:$0xff]   ;;  %v9989_v42 = vld [vmem:[%s14410_s1 + $0x1ca0] ss:$16 sps:$4 sm:$0xff]  }
 0x1b7   : > { %7144 = vmatprep.subr.bf16.mxu1 %v9952_v54  ;;  %v9992_v54 = vld [vmem:[%s14410_s1 + $0x1ea0] ss:$16 sps:$4 sm:$0xff]  }
 0x1b9   : > { %7102 = vmatpush2.bf16.msra.mxu0 %v9947_v6  ;;  %v9997_v6 = vld [vmem:[%s14410_s1 + $0x1c84] ss:$16 sps:$4 sm:$0xff]  }
 0x1ba   : > { %7145 = vmatpush2.bf16.msra.mxu1 %v9950_v7  ;;  %7103 = vmatprep.subr.bf16.mxu0 %v9955_v12  ;;  %v10000_v7 = vld [vmem:[%s14410_s1 + $0x1e84] ss:$16 sps:$4 sm:$0xff]   ;;  %v9995_v12 = vld [vmem:[%s14410_s1 + $0x1c80] ss:$16 sps:$4 sm:$0xff]  }
 0x1bb   : > { %7146 = vmatprep.subr.bf16.mxu1 %v9958_v13  ;;  %v9998_v13 = vld [vmem:[%s14410_s1 + $0x1e80] ss:$16 sps:$4 sm:$0xff]  }
 0x1bd   : > { %7104 = vmatpush2.bf16.msra.mxu0 %v9953_v58  ;;  %v10003_v58 = vld [vmem:[%s14410_s1 + $0x1c64] ss:$16 sps:$4 sm:$0xff]  }
 0x1be   : > { %7147 = vmatpush2.bf16.msra.mxu1 %v9956_v59  ;;  %7105 = vmatprep.subr.bf16.mxu0 %v9961_v60  ;;  %v10006_v59 = vld [vmem:[%s14410_s1 + $0x1e64] ss:$16 sps:$4 sm:$0xff]   ;;  %v10001_v60 = vld [vmem:[%s14410_s1 + $0x1c60] ss:$16 sps:$4 sm:$0xff]  }
 0x1bf   : > { %7148 = vmatprep.subr.bf16.mxu1 %v9964_v61  ;;  %v10004_v61 = vld [vmem:[%s14410_s1 + $0x1e60] ss:$16 sps:$4 sm:$0xff]  }
 0x1c1   : > { %7106 = vmatpush2.bf16.msra.mxu0 %v9959_v62  ;;  %v10009_v62 = vld [vmem:[%s14410_s1 + $0x1c44] ss:$16 sps:$4 sm:$0xff]  }
 0x1c2   : > { %7149 = vmatpush2.bf16.msra.mxu1 %v9962_v63  ;;  %7107 = vmatprep.subr.bf16.mxu0 %v9967_v0  ;;  %v10012_v63 = vld [vmem:[%s14410_s1 + $0x1e44] ss:$16 sps:$4 sm:$0xff]   ;;  %v10007_v0 = vld [vmem:[%s14410_s1 + $0x1c40] ss:$16 sps:$4 sm:$0xff]  }
 0x1c3   : > { %7150 = vmatprep.subr.bf16.mxu1 %v9970_v1  ;;  %v10010_v1 = vld [vmem:[%s14410_s1 + $0x1e40] ss:$16 sps:$4 sm:$0xff]  }
 0x1c5   : > { %7108 = vmatpush2.bf16.msra.mxu0 %v9965_v2  ;;  %v10015_v2 = vld [vmem:[%s14410_s1 + $0x1c24] ss:$16 sps:$4 sm:$0xff]  }
 0x1c6   : > { %7151 = vmatpush2.bf16.msra.mxu1 %v9968_v3  ;;  %7109 = vmatprep.subr.bf16.mxu0 %v9973_v4  ;;  %v10018_v3 = vld [vmem:[%s14410_s1 + $0x1e24] ss:$16 sps:$4 sm:$0xff]   ;;  %v10013_v4 = vld [vmem:[%s14410_s1 + $0x1c20] ss:$16 sps:$4 sm:$0xff]  }
 0x1c7   : > { %7152 = vmatprep.subr.bf16.mxu1 %v9976_v5  ;;  %v10016_v5 = vld [vmem:[%s14410_s1 + $0x1e20] ss:$16 sps:$4 sm:$0xff]  }
 0x1c9   : > { %7110 = vmatpush2.bf16.msra.mxu0 %v9971_v14  ;;  %v10021_v14 = vld [vmem:[%s14410_s1 + $0x1c04] ss:$16 sps:$4 sm:$0xff]  }
 0x1ca   : > { %7153 = vmatpush2.bf16.msra.mxu1 %v9974_v46  ;;  %7165 = vmatprep.subr.bf16.mxu0 %v9979_v51  ;;  %v10024_v46 = vld [vmem:[%s14410_s1 + $0x1e04] ss:$16 sps:$4 sm:$0xff]   ;;  %v10019_v51 = vld [vmem:[%s14410_s1 + $0x1c00] ss:$16 sps:$4 sm:$0xff]  }
 0x1cb   : > { %7208 = vmatprep.subr.bf16.mxu1 %v9982_v15  ;;  %v10022_v15 = vld [vmem:[%s14410_s1 + $0x1e00] ss:$16 sps:$4 sm:$0xff]  }
 0x1cc   : > { %7112 = vmatmul.mubr.bf16.vlgmr.msra.gmra.mxu0 %v12462_v40 }
 0x1cd   : > { %7155 = vmatmul.mubr.bf16.vlgmr.msra.gmra.mxu1 %v12466_v52  ;;  %7166 = vmatpush1.bf16.msra.mxu0 %v9977_v23  ;;  %v10027_v23 = vld [vmem:[%s14410_s1 + $0x1de4] ss:$16 sps:$4 sm:$0xff]  }
 0x1ce   : > { %7209 = vmatpush1.bf16.msra.mxu1 %v9980_v34  ;;  %7167 = vmatprep.subr.bf16.mxu0 %v9985_v28  ;;  %v10030_v34 = vld [vmem:[%s14410_s1 + $0x1fe4] ss:$16 sps:$4 sm:$0xff]   ;;  %v10025_v28 = vld [vmem:[%s14410_s1 + $0x1de0] ss:$16 sps:$4 sm:$0xff]  }
 0x1cf   : > { %7210 = vmatprep.subr.bf16.mxu1 %v9988_v31  ;;  %7197 = vmatprep.mubr.bf16.mxu0 %v12482_v27  ;;  %v10028_v31 = vld [vmem:[%s14410_s1 + $0x1fe0] ss:$16 sps:$4 sm:$0xff]  }
 0x1d0   : > { %7240 = vmatprep.mubr.bf16.mxu1 %v12486_v32 }
 0x1d1   : > { %7168 = vmatpush1.bf16.msra.mxu0 %v9983_v22  ;;  %v10033_v22 = vld [vmem:[%s14410_s1 + $0x1dc4] ss:$16 sps:$4 sm:$0xff]  }
 0x1d2   : > { %7211 = vmatpush1.bf16.msra.mxu1 %v9986_v26  ;;  %7169 = vmatprep.subr.bf16.mxu0 %v9991_v38  ;;  %v10036_v26 = vld [vmem:[%s14410_s1 + $0x1fc4] ss:$16 sps:$4 sm:$0xff]   ;;  %v10031_v38 = vld [vmem:[%s14410_s1 + $0x1dc0] ss:$16 sps:$4 sm:$0xff]  }
 0x1d3   : > { %7212 = vmatprep.subr.bf16.mxu1 %v9994_v39  ;;  %v10034_v39 = vld [vmem:[%s14410_s1 + $0x1fc0] ss:$16 sps:$4 sm:$0xff]  }
 0x1d5   : > { %7170 = vmatpush1.bf16.msra.mxu0 %v9989_v42  ;;  %v10039_v42 = vld [vmem:[%s14410_s1 + $0x1da4] ss:$16 sps:$4 sm:$0xff]  }
 0x1d6   : > { %7213 = vmatpush1.bf16.msra.mxu1 %v9992_v54  ;;  %7171 = vmatprep.subr.bf16.mxu0 %v9997_v6  ;;  %v10042_v54 = vld [vmem:[%s14410_s1 + $0x1fa4] ss:$16 sps:$4 sm:$0xff]   ;;  %v10037_v6 = vld [vmem:[%s14410_s1 + $0x1da0] ss:$16 sps:$4 sm:$0xff]  }
 0x1d7   : > { %7214 = vmatprep.subr.bf16.mxu1 %v10000_v7  ;;  %v10040_v7 = vld [vmem:[%s14410_s1 + $0x1fa0] ss:$16 sps:$4 sm:$0xff]  }
 0x1d9   : > { %7172 = vmatpush1.bf16.msra.mxu0 %v9995_v12  ;;  %v10045_v12 = vld [vmem:[%s14410_s1 + $0x1d84] ss:$16 sps:$4 sm:$0xff]  }
 0x1da   : > { %7215 = vmatpush1.bf16.msra.mxu1 %v9998_v13  ;;  %7173 = vmatprep.subr.bf16.mxu0 %v10003_v58  ;;  %v10048_v13 = vld [vmem:[%s14410_s1 + $0x1f84] ss:$16 sps:$4 sm:$0xff]   ;;  %v10043_v58 = vld [vmem:[%s14410_s1 + $0x1d80] ss:$16 sps:$4 sm:$0xff]  }
 0x1db   : > { %7216 = vmatprep.subr.bf16.mxu1 %v10006_v59  ;;  %v10046_v59 = vld [vmem:[%s14410_s1 + $0x1f80] ss:$16 sps:$4 sm:$0xff]  }
 0x1dd   : > { %7174 = vmatpush1.bf16.msra.mxu0 %v10001_v60  ;;  %v10051_v60 = vld [vmem:[%s14410_s1 + $0x1d64] ss:$16 sps:$4 sm:$0xff]  }
 0x1de   : > { %7217 = vmatpush1.bf16.msra.mxu1 %v10004_v61  ;;  %7175 = vmatprep.subr.bf16.mxu0 %v10009_v62  ;;  %v10054_v61 = vld [vmem:[%s14410_s1 + $0x1f64] ss:$16 sps:$4 sm:$0xff]   ;;  %v10049_v62 = vld [vmem:[%s14410_s1 + $0x1d60] ss:$16 sps:$4 sm:$0xff]  }
 0x1df   : > { %7218 = vmatprep.subr.bf16.mxu1 %v10012_v63  ;;  %v10052_v63 = vld [vmem:[%s14410_s1 + $0x1f60] ss:$16 sps:$4 sm:$0xff]  }
 0x1e1   : > { %7176 = vmatpush1.bf16.msra.mxu0 %v10007_v0  ;;  %v10057_v0 = vld [vmem:[%s14410_s1 + $0x1d44] ss:$16 sps:$4 sm:$0xff]  }
 0x1e2   : > { %7219 = vmatpush1.bf16.msra.mxu1 %v10010_v1  ;;  %7177 = vmatprep.subr.bf16.mxu0 %v10015_v2  ;;  %v10060_v1 = vld [vmem:[%s14410_s1 + $0x1f44] ss:$16 sps:$4 sm:$0xff]   ;;  %v10055_v2 = vld [vmem:[%s14410_s1 + $0x1d40] ss:$16 sps:$4 sm:$0xff]  }
 0x1e3   : > { %7220 = vmatprep.subr.bf16.mxu1 %v10018_v3  ;;  %v10058_v3 = vld [vmem:[%s14410_s1 + $0x1f40] ss:$16 sps:$4 sm:$0xff]  }
 0x1e5   : > { %7178 = vmatpush1.bf16.msra.mxu0 %v10013_v4  ;;  %v10063_v4 = vld [vmem:[%s14410_s1 + $0x1d24] ss:$16 sps:$4 sm:$0xff]  }
 0x1e6   : > { %7221 = vmatpush1.bf16.msra.mxu1 %v10016_v5  ;;  %7179 = vmatprep.subr.bf16.mxu0 %v10021_v14  ;;  %v10066_v5 = vld [vmem:[%s14410_s1 + $0x1f24] ss:$16 sps:$4 sm:$0xff]   ;;  %v10061_v14 = vld [vmem:[%s14410_s1 + $0x1d20] ss:$16 sps:$4 sm:$0xff]  }
 0x1e7   : > { %7222 = vmatprep.subr.bf16.mxu1 %v10024_v46  ;;  %v10064_v46 = vld [vmem:[%s14410_s1 + $0x1f20] ss:$16 sps:$4 sm:$0xff]  }
 0x1e9   : > { %7180 = vmatpush1.bf16.msra.mxu0 %v10019_v51  ;;  %v10069_v51 = vld [vmem:[%s14410_s1 + $0x1d04] ss:$16 sps:$4 sm:$0xff]  }
 0x1ea   : > { %7223 = vmatpush1.bf16.msra.mxu1 %v10022_v15  ;;  %7181 = vmatprep.subr.bf16.mxu0 %v10027_v23  ;;  %v10072_v15 = vld [vmem:[%s14410_s1 + $0x1f04] ss:$16 sps:$4 sm:$0xff]   ;;  %v10067_v23 = vld [vmem:[%s14410_s1 + $0x1d00] ss:$16 sps:$4 sm:$0xff]  }
 0x1eb   : > { %7224 = vmatprep.subr.bf16.mxu1 %v10030_v34  ;;  %v10070_v34 = vld [vmem:[%s14410_s1 + $0x1f00] ss:$16 sps:$4 sm:$0xff]  }
 0x1ed   : > { %7182 = vmatpush2.bf16.msra.mxu0 %v10025_v28  ;;  %v10075_v28 = vld [vmem:[%s14410_s1 + $0xec] ss:$16 sps:$4 sm:$0xff]  }
 0x1ee   : > { %7225 = vmatpush2.bf16.msra.mxu1 %v10028_v31  ;;  %7183 = vmatprep.subr.bf16.mxu0 %v10033_v22  ;;  %v10078_v31 = vld [vmem:[%s14410_s1 + $0x2ec] ss:$16 sps:$4 sm:$0xff]   ;;  %v10073_v22 = vld [vmem:[%s14410_s1 + $0xe8] ss:$16 sps:$4 sm:$0xff]  }
 0x1ef   : > { %7226 = vmatprep.subr.bf16.mxu1 %v10036_v26  ;;  %v10076_v26 = vld [vmem:[%s14410_s1 + $0x2e8] ss:$16 sps:$4 sm:$0xff]  }
 0x1f1   : > { %7184 = vmatpush2.bf16.msra.mxu0 %v10031_v38  ;;  %v12674_v38 = vcombine.low %v12443_v16, %v12446_v17  ;;  %v10079_v16 = vld [vmem:[%s14410_s1 + $0xc8] ss:$16 sps:$4 sm:$0xff]  }
 0x1f2   : > { %7227 = vmatpush2.bf16.msra.mxu1 %v10034_v39  ;;  %7185 = vmatprep.subr.bf16.mxu0 %v10039_v42  ;;  %v12678_v39 = vcombine.low %v12449_v18, %v12452_v19  ;;  %v10081_v42 = vld [vmem:[%s14410_s1 + $0xcc] ss:$16 sps:$4 sm:$0xff]   ;;  %v10082_v17 = vld [vmem:[%s14410_s1 + $0x2c8] ss:$16 sps:$4 sm:$0xff]  }
 0x1f3   : > { %7228 = vmatprep.subr.bf16.mxu1 %v10042_v54  ;;  %14422 = vst [vmem:[#allocation5_spill] sm:$0xff] %v12674_v38  ;;  %v10084_v54 = vld [vmem:[%s14410_s1 + $0x2cc] ss:$16 sps:$4 sm:$0xff]  }
 0x1f4   : > { %14423 = vst [vmem:[#allocation6_spill] sm:$0xff] %v12678_v39  ;;  %v10087_v18 = vld [vmem:[%s14410_s1 + $0xac] ss:$16 sps:$4 sm:$0xff]  }
 0x1f5   : > { %7186 = vmatpush2.bf16.msra.mxu0 %v10037_v6  ;;  %v10090_v19 = vld [vmem:[%s14410_s1 + $0x2ac] ss:$16 sps:$4 sm:$0xff]   ;;  %v10085_v6 = vld [vmem:[%s14410_s1 + $0xa8] ss:$16 sps:$4 sm:$0xff]  }
 0x1f6   : > { %7229 = vmatpush2.bf16.msra.mxu1 %v10040_v7  ;;  %7187 = vmatprep.subr.bf16.mxu0 %v10045_v12  ;;  %v10088_v7 = vld [vmem:[%s14410_s1 + $0x2a8] ss:$16 sps:$4 sm:$0xff]   ;;  %v10093_v12 = vld [vmem:[%s14410_s1 + $0x8c] ss:$16 sps:$4 sm:$0xff]  }
 0x1f7   : > { %7230 = vmatprep.subr.bf16.mxu1 %v10048_v13  ;;  %v10096_v13 = vld [vmem:[%s14410_s1 + $0x28c] ss:$16 sps:$4 sm:$0xff]  }
 0x1f9   : > { %7188 = vmatpush2.bf16.msra.mxu0 %v10043_v58  ;;  %v10099_v58 = vld [vmem:[%s14410_s1 + $0x6c] ss:$16 sps:$4 sm:$0xff]  }
 0x1fa   : > { %7231 = vmatpush2.bf16.msra.mxu1 %v10046_v59  ;;  %7189 = vmatprep.subr.bf16.mxu0 %v10051_v60  ;;  %v10102_v59 = vld [vmem:[%s14410_s1 + $0x26c] ss:$16 sps:$4 sm:$0xff]   ;;  %v10097_v60 = vld [vmem:[%s14410_s1 + $0x68] ss:$16 sps:$4 sm:$0xff]  }
 0x1fb   : > { %7232 = vmatprep.subr.bf16.mxu1 %v10054_v61  ;;  %v10100_v61 = vld [vmem:[%s14410_s1 + $0x268] ss:$16 sps:$4 sm:$0xff]  }
 0x1fd   : > { %7190 = vmatpush2.bf16.msra.mxu0 %v10049_v62  ;;  %v10105_v62 = vld [vmem:[%s14410_s1 + $0x4c] ss:$16 sps:$4 sm:$0xff]  }
 0x1fe   : > { %7233 = vmatpush2.bf16.msra.mxu1 %v10052_v63  ;;  %7191 = vmatprep.subr.bf16.mxu0 %v10057_v0  ;;  %v10108_v63 = vld [vmem:[%s14410_s1 + $0x24c] ss:$16 sps:$4 sm:$0xff]   ;;  %v10103_v0 = vld [vmem:[%s14410_s1 + $0x48] ss:$16 sps:$4 sm:$0xff]  }
 0x1ff   : > { %7234 = vmatprep.subr.bf16.mxu1 %v10060_v1  ;;  %v10106_v1 = vld [vmem:[%s14410_s1 + $0x248] ss:$16 sps:$4 sm:$0xff]  }
 0x201   : > { %7192 = vmatpush2.bf16.msra.mxu0 %v10055_v2  ;;  %v10111_v2 = vld [vmem:[%s14410_s1 + $0x2c] ss:$16 sps:$4 sm:$0xff]  }
 0x202   : > { %7235 = vmatpush2.bf16.msra.mxu1 %v10058_v3  ;;  %7193 = vmatprep.subr.bf16.mxu0 %v10063_v4  ;;  %v10114_v3 = vld [vmem:[%s14410_s1 + $0x22c] ss:$16 sps:$4 sm:$0xff]   ;;  %v10109_v4 = vld [vmem:[%s14410_s1 + $0x28] ss:$16 sps:$4 sm:$0xff]  }
 0x203   : > { %7236 = vmatprep.subr.bf16.mxu1 %v10066_v5  ;;  %v10112_v5 = vld [vmem:[%s14410_s1 + $0x228] ss:$16 sps:$4 sm:$0xff]  }
 0x205   : > { %7194 = vmatpush2.bf16.msra.mxu0 %v10061_v14  ;;  %v10117_v14 = vld [vmem:[%s14410_s1 + $0xc] ss:$16 sps:$4 sm:$0xff]  }
 0x206   : > { %7237 = vmatpush2.bf16.msra.mxu1 %v10064_v46  ;;  %7195 = vmatprep.subr.bf16.mxu0 %v10069_v51  ;;  %v10120_v46 = vld [vmem:[%s14410_s1 + $0x20c] ss:$16 sps:$4 sm:$0xff]   ;;  %v10115_v51 = vld [vmem:[%s14410_s1 + $0x8] ss:$16 sps:$4 sm:$0xff]  }
 0x207   : > { %7238 = vmatprep.subr.bf16.mxu1 %v10072_v15  ;;  %v10118_v15 = vld [vmem:[%s14410_s1 + $0x208] ss:$16 sps:$4 sm:$0xff]  }
 0x209   : > { %7196 = vmatpush2.bf16.msra.mxu0 %v10067_v23  ;;  %v10123_v23 = vld [vmem:[%s14410_s1 + $0x1ec] ss:$16 sps:$4 sm:$0xff]  }
 0x20a   : > { %7239 = vmatpush2.bf16.msra.mxu1 %v10070_v34  ;;  %7251 = vmatprep.subr.bf16.mxu0 %v10075_v28  ;;  %v10126_v34 = vld [vmem:[%s14410_s1 + $0x3ec] ss:$16 sps:$4 sm:$0xff]   ;;  %v10121_v28 = vld [vmem:[%s14410_s1 + $0x1e8] ss:$16 sps:$4 sm:$0xff]  }
 0x20b   : > { %7294 = vmatprep.subr.bf16.mxu1 %v10078_v31  ;;  %v10124_v31 = vld [vmem:[%s14410_s1 + $0x3e8] ss:$16 sps:$4 sm:$0xff]  }
 0x20c   : > { %7198 = vmatmul.mubr.bf16.vlgmr.msra.gmra.mxu0 %v12674_v38 }
 0x20d   : > { %7241 = vmatmul.mubr.bf16.vlgmr.msra.gmra.mxu1 %v12678_v39  ;;  %7252 = vmatpush1.bf16.msra.mxu0 %v10073_v22  ;;  %v10129_v22 = vld [vmem:[%s14410_s1 + $0x1cc] ss:$16 sps:$4 sm:$0xff]  }
 0x20e   : > { %7295 = vmatpush1.bf16.msra.mxu1 %v10076_v26  ;;  %7253 = vmatprep.subr.bf16.mxu0 %v10081_v42  ;;  %v10132_v26 = vld [vmem:[%s14410_s1 + $0x3cc] ss:$16 sps:$4 sm:$0xff]   ;;  %v10127_v42 = vld [vmem:[%s14410_s1 + $0x1c8] ss:$16 sps:$4 sm:$0xff]  }
 0x20f   : > { %7296 = vmatprep.subr.bf16.mxu1 %v10084_v54  ;;  %7283 = vmatprep.mubr.bf16.mxu0 %v11045_v53  ;;  %v10091_v53 = vld [vmem:[%s14410_s1 + $0x88] ss:$16 sps:$4 sm:$0xff]   ;;  %v10315_v39 = vld [vmem:[%s14410_s1 + $0x9ec] ss:$16 sps:$4 sm:$0xff]  }
 0x210   : > { %7326 = vmatprep.mubr.bf16.mxu1 %v11050_v55  ;;  %v10094_v55 = vld [vmem:[%s14410_s1 + $0x288] ss:$16 sps:$4 sm:$0xff]  }
 0x211   : > { %7254 = vmatpush1.bf16.msra.mxu0 %v10079_v16  ;;  %v10130_v54 = vld [vmem:[%s14410_s1 + $0x3c8] ss:$16 sps:$4 sm:$0xff]   ;;  %v10135_v16 = vld [vmem:[%s14410_s1 + $0x1ac] ss:$16 sps:$4 sm:$0xff]  }
 0x212   : > { %7297 = vmatpush1.bf16.msra.mxu1 %v10082_v17  ;;  %7255 = vmatprep.subr.bf16.mxu0 %v10087_v18  ;;  %v10138_v17 = vld [vmem:[%s14410_s1 + $0x3ac] ss:$16 sps:$4 sm:$0xff]   ;;  %v10133_v18 = vld [vmem:[%s14410_s1 + $0x1a8] ss:$16 sps:$4 sm:$0xff]  }
 0x213   : > { %7298 = vmatprep.subr.bf16.mxu1 %v10090_v19  ;;  %v10136_v19 = vld [vmem:[%s14410_s1 + $0x3a8] ss:$16 sps:$4 sm:$0xff]  }
 0x215   : > { %7256 = vmatpush1.bf16.msra.mxu0 %v10085_v6  ;;  %v10141_v6 = vld [vmem:[%s14410_s1 + $0x18c] ss:$16 sps:$4 sm:$0xff]  }
 0x216   : > { %7299 = vmatpush1.bf16.msra.mxu1 %v10088_v7  ;;  %7257 = vmatprep.subr.bf16.mxu0 %v10093_v12  ;;  %v10144_v7 = vld [vmem:[%s14410_s1 + $0x38c] ss:$16 sps:$4 sm:$0xff]   ;;  %v10139_v12 = vld [vmem:[%s14410_s1 + $0x188] ss:$16 sps:$4 sm:$0xff]  }
 0x217   : > { %7300 = vmatprep.subr.bf16.mxu1 %v10096_v13  ;;  %v10142_v13 = vld [vmem:[%s14410_s1 + $0x388] ss:$16 sps:$4 sm:$0xff]  }
 0x219   : > { %7258 = vmatpush1.bf16.msra.mxu0 %v10091_v53  ;;  %v10147_v53 = vld [vmem:[%s14410_s1 + $0x16c] ss:$16 sps:$4 sm:$0xff]  }
 0x21a   : > { %7301 = vmatpush1.bf16.msra.mxu1 %v10094_v55  ;;  %7259 = vmatprep.subr.bf16.mxu0 %v10099_v58  ;;  %v10150_v55 = vld [vmem:[%s14410_s1 + $0x36c] ss:$16 sps:$4 sm:$0xff]   ;;  %v10145_v58 = vld [vmem:[%s14410_s1 + $0x168] ss:$16 sps:$4 sm:$0xff]  }
 0x21b   : > { %7302 = vmatprep.subr.bf16.mxu1 %v10102_v59  ;;  %v10148_v59 = vld [vmem:[%s14410_s1 + $0x368] ss:$16 sps:$4 sm:$0xff]  }
 0x21d   : > { %7260 = vmatpush1.bf16.msra.mxu0 %v10097_v60  ;;  %v10153_v60 = vld [vmem:[%s14410_s1 + $0x14c] ss:$16 sps:$4 sm:$0xff]  }
 0x21e   : > { %7303 = vmatpush1.bf16.msra.mxu1 %v10100_v61  ;;  %7261 = vmatprep.subr.bf16.mxu0 %v10105_v62  ;;  %v10156_v61 = vld [vmem:[%s14410_s1 + $0x34c] ss:$16 sps:$4 sm:$0xff]   ;;  %v10151_v62 = vld [vmem:[%s14410_s1 + $0x148] ss:$16 sps:$4 sm:$0xff]  }
 0x21f   : > { %7304 = vmatprep.subr.bf16.mxu1 %v10108_v63  ;;  %v10154_v63 = vld [vmem:[%s14410_s1 + $0x348] ss:$16 sps:$4 sm:$0xff]  }
 0x221   : > { %7262 = vmatpush1.bf16.msra.mxu0 %v10103_v0  ;;  %v10159_v0 = vld [vmem:[%s14410_s1 + $0x12c] ss:$16 sps:$4 sm:$0xff]  }
 0x222   : > { %7305 = vmatpush1.bf16.msra.mxu1 %v10106_v1  ;;  %7263 = vmatprep.subr.bf16.mxu0 %v10111_v2  ;;  %v10162_v1 = vld [vmem:[%s14410_s1 + $0x32c] ss:$16 sps:$4 sm:$0xff]   ;;  %v10157_v2 = vld [vmem:[%s14410_s1 + $0x128] ss:$16 sps:$4 sm:$0xff]  }
 0x223   : > { %7306 = vmatprep.subr.bf16.mxu1 %v10114_v3  ;;  %v10160_v3 = vld [vmem:[%s14410_s1 + $0x328] ss:$16 sps:$4 sm:$0xff]  }
 0x225   : > { %7264 = vmatpush1.bf16.msra.mxu0 %v10109_v4  ;;  %v10165_v4 = vld [vmem:[%s14410_s1 + $0x10c] ss:$16 sps:$4 sm:$0xff]  }
 0x226   : > { %7307 = vmatpush1.bf16.msra.mxu1 %v10112_v5  ;;  %7265 = vmatprep.subr.bf16.mxu0 %v10117_v14  ;;  %v10168_v5 = vld [vmem:[%s14410_s1 + $0x30c] ss:$16 sps:$4 sm:$0xff]   ;;  %v10163_v14 = vld [vmem:[%s14410_s1 + $0x108] ss:$16 sps:$4 sm:$0xff]  }
 0x227   : > { %7308 = vmatprep.subr.bf16.mxu1 %v10120_v46  ;;  %v10166_v46 = vld [vmem:[%s14410_s1 + $0x308] ss:$16 sps:$4 sm:$0xff]  }
 0x229   : > { %7266 = vmatpush1.bf16.msra.mxu0 %v10115_v51  ;;  %v10171_v51 = vld [vmem:[%s14410_s1 + $0x4ec] ss:$16 sps:$4 sm:$0xff]  }
 0x22a   : > { %7309 = vmatpush1.bf16.msra.mxu1 %v10118_v15  ;;  %7267 = vmatprep.subr.bf16.mxu0 %v10123_v23  ;;  %v10174_v15 = vld [vmem:[%s14410_s1 + $0x6ec] ss:$16 sps:$4 sm:$0xff]   ;;  %v10169_v23 = vld [vmem:[%s14410_s1 + $0x4e8] ss:$16 sps:$4 sm:$0xff]  }
 0x22b   : > { %7310 = vmatprep.subr.bf16.mxu1 %v10126_v34  ;;  %v10172_v34 = vld [vmem:[%s14410_s1 + $0x6e8] ss:$16 sps:$4 sm:$0xff]  }
 0x22d   : > { %7268 = vmatpush2.bf16.msra.mxu0 %v10121_v28  ;;  %v10177_v28 = vld [vmem:[%s14410_s1 + $0x4cc] ss:$16 sps:$4 sm:$0xff]  }
 0x22e   : > { %7311 = vmatpush2.bf16.msra.mxu1 %v10124_v31  ;;  %7269 = vmatprep.subr.bf16.mxu0 %v10129_v22  ;;  %v10180_v31 = vld [vmem:[%s14410_s1 + $0x6cc] ss:$16 sps:$4 sm:$0xff]   ;;  %v10175_v22 = vld [vmem:[%s14410_s1 + $0x4c8] ss:$16 sps:$4 sm:$0xff]  }
 0x22f   : > { %7312 = vmatprep.subr.bf16.mxu1 %v10132_v26  ;;  %v10178_v26 = vld [vmem:[%s14410_s1 + $0x6c8] ss:$16 sps:$4 sm:$0xff]  }
 0x231   : > { %7270 = vmatpush2.bf16.msra.mxu0 %v10127_v42  ;;  %v10183_v42 = vld [vmem:[%s14410_s1 + $0x4ac] ss:$16 sps:$4 sm:$0xff]  }
 0x232   : > { %7313 = vmatpush2.bf16.msra.mxu1 %v10130_v54  ;;  %7271 = vmatprep.subr.bf16.mxu0 %v10135_v16  ;;  %v10186_v54 = vld [vmem:[%s14410_s1 + $0x6ac] ss:$16 sps:$4 sm:$0xff]   ;;  %v10181_v16 = vld [vmem:[%s14410_s1 + $0x4a8] ss:$16 sps:$4 sm:$0xff]  }
 0x233   : > { %7314 = vmatprep.subr.bf16.mxu1 %v10138_v17  ;;  %v10192_v17 = vld [vmem:[%s14410_s1 + $0x68c] ss:$16 sps:$4 sm:$0xff]  }
 0x235   : > { %7272 = vmatpush2.bf16.msra.mxu0 %v10133_v18  ;;  %v10187_v18 = vld [vmem:[%s14410_s1 + $0x488] ss:$16 sps:$4 sm:$0xff]  }
 0x236   : > { %7315 = vmatpush2.bf16.msra.mxu1 %v10136_v19  ;;  %7273 = vmatprep.subr.bf16.mxu0 %v10141_v6  ;;  %v10198_v19 = vld [vmem:[%s14410_s1 + $0x66c] ss:$16 sps:$4 sm:$0xff]   ;;  %v10193_v6 = vld [vmem:[%s14410_s1 + $0x468] ss:$16 sps:$4 sm:$0xff]  }
 0x237   : > { %7316 = vmatprep.subr.bf16.mxu1 %v10144_v7  ;;  %v10196_v7 = vld [vmem:[%s14410_s1 + $0x668] ss:$16 sps:$4 sm:$0xff]  }
 0x239   : > { %7274 = vmatpush2.bf16.msra.mxu0 %v10139_v12  ;;  %v10201_v12 = vld [vmem:[%s14410_s1 + $0x44c] ss:$16 sps:$4 sm:$0xff]  }
 0x23a   : > { %7317 = vmatpush2.bf16.msra.mxu1 %v10142_v13  ;;  %7275 = vmatprep.subr.bf16.mxu0 %v10147_v53  ;;  %v10204_v13 = vld [vmem:[%s14410_s1 + $0x64c] ss:$16 sps:$4 sm:$0xff]   ;;  %v10199_v53 = vld [vmem:[%s14410_s1 + $0x448] ss:$16 sps:$4 sm:$0xff]  }
 0x23b   : > { %7318 = vmatprep.subr.bf16.mxu1 %v10150_v55  ;;  %v10202_v55 = vld [vmem:[%s14410_s1 + $0x648] ss:$16 sps:$4 sm:$0xff]  }
 0x23d   : > { %7276 = vmatpush2.bf16.msra.mxu0 %v10145_v58  ;;  %v10207_v58 = vld [vmem:[%s14410_s1 + $0x42c] ss:$16 sps:$4 sm:$0xff]  }
 0x23e   : > { %7319 = vmatpush2.bf16.msra.mxu1 %v10148_v59  ;;  %7277 = vmatprep.subr.bf16.mxu0 %v10153_v60  ;;  %v10210_v59 = vld [vmem:[%s14410_s1 + $0x62c] ss:$16 sps:$4 sm:$0xff]   ;;  %v10205_v60 = vld [vmem:[%s14410_s1 + $0x428] ss:$16 sps:$4 sm:$0xff]  }
 0x23f   : > { %7320 = vmatprep.subr.bf16.mxu1 %v10156_v61  ;;  %v10208_v61 = vld [vmem:[%s14410_s1 + $0x628] ss:$16 sps:$4 sm:$0xff]  }
 0x241   : > { %7278 = vmatpush2.bf16.msra.mxu0 %v10151_v62  ;;  %v10213_v62 = vld [vmem:[%s14410_s1 + $0x40c] ss:$16 sps:$4 sm:$0xff]  }
 0x242   : > { %7321 = vmatpush2.bf16.msra.mxu1 %v10154_v63  ;;  %7279 = vmatprep.subr.bf16.mxu0 %v10159_v0  ;;  %v10216_v63 = vld [vmem:[%s14410_s1 + $0x60c] ss:$16 sps:$4 sm:$0xff]   ;;  %v10211_v0 = vld [vmem:[%s14410_s1 + $0x408] ss:$16 sps:$4 sm:$0xff]  }
 0x243   : > { %7322 = vmatprep.subr.bf16.mxu1 %v10162_v1  ;;  %v10214_v1 = vld [vmem:[%s14410_s1 + $0x608] ss:$16 sps:$4 sm:$0xff]  }
 0x245   : > { %7280 = vmatpush2.bf16.msra.mxu0 %v10157_v2  ;;  %v10219_v2 = vld [vmem:[%s14410_s1 + $0x5ec] ss:$16 sps:$4 sm:$0xff]  }
 0x246   : > { %7323 = vmatpush2.bf16.msra.mxu1 %v10160_v3  ;;  %7281 = vmatprep.subr.bf16.mxu0 %v10165_v4  ;;  %v10222_v3 = vld [vmem:[%s14410_s1 + $0x7ec] ss:$16 sps:$4 sm:$0xff]   ;;  %v10217_v4 = vld [vmem:[%s14410_s1 + $0x5e8] ss:$16 sps:$4 sm:$0xff]  }
 0x247   : > { %7324 = vmatprep.subr.bf16.mxu1 %v10168_v5  ;;  %v10220_v5 = vld [vmem:[%s14410_s1 + $0x7e8] ss:$16 sps:$4 sm:$0xff]  }
 0x249   : > { %7282 = vmatpush2.bf16.msra.mxu0 %v10163_v14  ;;  %v12976_v14 = vpop.f32.mrf.mxu0 }
 0x24a   : > { %7325 = vmatpush2.bf16.msra.mxu1 %v10166_v46  ;;  %7337 = vmatprep.subr.bf16.mxu0 %v10171_v51  ;;  %v12978_v46 = vpop.f32.mrf.mxu1  ;;  %v10225_v51 = vld [vmem:[%s14410_s1 + $0x5cc] ss:$16 sps:$4 sm:$0xff]  }
 0x24b   : > { %7380 = vmatprep.subr.bf16.mxu1 %v10174_v15  ;;  %v10228_v15 = vld [vmem:[%s14410_s1 + $0x7cc] ss:$16 sps:$4 sm:$0xff]  }
 0x24c   : > { %7284 = vmatmul.mubr.bf16.vlgmr.msra.gmra.mxu0 %v11102_v8  ;;  %v10184_v8 = vld [vmem:[%s14410_s1 + $0x6a8] ss:$16 sps:$4 sm:$0xff]  }
 0x24d   : > { %7327 = vmatmul.mubr.bf16.vlgmr.msra.gmra.mxu1 %v11104_v9  ;;  %7338 = vmatpush1.bf16.msra.mxu0 %v10169_v23  ;;  %v10189_v9 = vld [vmem:[%s14410_s1 + $0x48c] ss:$16 sps:$4 sm:$0xff]   ;;  %v10223_v23 = vld [vmem:[%s14410_s1 + $0x5c8] ss:$16 sps:$4 sm:$0xff]  }
 0x24e   : > { %7381 = vmatpush1.bf16.msra.mxu1 %v10172_v34  ;;  %7339 = vmatprep.subr.bf16.mxu0 %v10177_v28  ;;  %v10226_v34 = vld [vmem:[%s14410_s1 + $0x7c8] ss:$16 sps:$4 sm:$0xff]   ;;  %v12992_v28 = vpop.f32.mrf.mxu0 }
 0x24f   : > { %7382 = vmatprep.subr.bf16.mxu1 %v10180_v31  ;;  %7369 = vmatprep.mubr.bf16.mxu0 %v11203_v41  ;;  %v10190_v41 = vld [vmem:[%s14410_s1 + $0x688] ss:$16 sps:$4 sm:$0xff]   ;;  %v12994_v31 = vpop.f32.mrf.mxu1 }
 0x250   : > { %7412 = vmatprep.mubr.bf16.mxu1 %v11210_v43  ;;  %v10195_v43 = vld [vmem:[%s14410_s1 + $0x46c] ss:$16 sps:$4 sm:$0xff]   ;;  %v6643_v38 = vadd.f32 %v12994_v31, %v12992_v28 }
 0x251   : > { %7340 = vmatpush1.bf16.msra.mxu0 %v10175_v22  ;;  %v10231_v22 = vld [vmem:[%s14410_s1 + $0x5ac] ss:$16 sps:$4 sm:$0xff]  }
 0x252   : > { %7383 = vmatpush1.bf16.msra.mxu1 %v10178_v26  ;;  %7341 = vmatprep.subr.bf16.mxu0 %v10183_v42  ;;  %v10234_v26 = vld [vmem:[%s14410_s1 + $0x7ac] ss:$16 sps:$4 sm:$0xff]   ;;  %v10229_v42 = vld [vmem:[%s14410_s1 + $0x5a8] ss:$16 sps:$4 sm:$0xff]  }
 0x253   : > { %7384 = vmatprep.subr.bf16.mxu1 %v10186_v54  ;;  %v10232_v54 = vld [vmem:[%s14410_s1 + $0x7a8] ss:$16 sps:$4 sm:$0xff]  }
 0x255   : > { %7342 = vmatpush1.bf16.msra.mxu0 %v10181_v16  ;;  %v13008_v16 = vpop.f32.mrf.mxu0 }
 0x256   : > { %7385 = vmatpush1.bf16.msra.mxu1 %v10184_v8  ;;  %7343 = vmatprep.subr.bf16.mxu0 %v10189_v9  ;;  %v13010_v8 = vpop.f32.mrf.mxu1  ;;  %v10237_v9 = vld [vmem:[%s14410_s1 + $0x58c] ss:$16 sps:$4 sm:$0xff]  }
 0x257   : > { %7386 = vmatprep.subr.bf16.mxu1 %v10192_v17  ;;  %v10240_v17 = vld [vmem:[%s14410_s1 + $0x78c] ss:$16 sps:$4 sm:$0xff]   ;;  %v6645_v28 = vadd.f32 %v13010_v8, %v13008_v16 }
 0x258   : > { %v10330_v8 = vld [vmem:[%s14410_s1 + $0xbac] ss:$16 sps:$4 sm:$0xff]  }
 0x259   : > { %7344 = vmatpush1.bf16.msra.mxu0 %v10187_v18  ;;  %v10235_v18 = vld [vmem:[%s14410_s1 + $0x588] ss:$16 sps:$4 sm:$0xff]  }
 0x25a   : > { %7387 = vmatpush1.bf16.msra.mxu1 %v10190_v41  ;;  %7345 = vmatprep.subr.bf16.mxu0 %v10195_v43  ;;  %v10238_v41 = vld [vmem:[%s14410_s1 + $0x788] ss:$16 sps:$4 sm:$0xff]   ;;  %v13024_v43 = vpop.f32.mrf.mxu0 }
 0x25b   : > { %7388 = vmatprep.subr.bf16.mxu1 %v10198_v19  ;;  %v13026_v19 = vpop.f32.mrf.mxu1 }
 0x25d   : > { %7346 = vmatpush1.bf16.msra.mxu0 %v10193_v6  ;;  %v10243_v6 = vld [vmem:[%s14410_s1 + $0x56c] ss:$16 sps:$4 sm:$0xff]  }
 0x25e   : > { %7389 = vmatpush1.bf16.msra.mxu1 %v10196_v7  ;;  %7347 = vmatprep.subr.bf16.mxu0 %v10201_v12  ;;  %v10246_v7 = vld [vmem:[%s14410_s1 + $0x76c] ss:$16 sps:$4 sm:$0xff]   ;;  %v13034_v12 = vpop.f32.mrf.mxu0 }
 0x25f   : > { %7390 = vmatprep.subr.bf16.mxu1 %v10204_v13  ;;  %v13036_v13 = vpop.f32.mrf.mxu1 }
 0x261   : > { %7348 = vmatpush1.bf16.msra.mxu0 %v10199_v53  ;;  %v10241_v53 = vld [vmem:[%s14410_s1 + $0x568] ss:$16 sps:$4 sm:$0xff]  }
 0x262   : > { %7391 = vmatpush1.bf16.msra.mxu1 %v10202_v55  ;;  %7349 = vmatprep.subr.bf16.mxu0 %v10207_v58  ;;  %v10244_v55 = vld [vmem:[%s14410_s1 + $0x768] ss:$16 sps:$4 sm:$0xff]   ;;  %v10249_v58 = vld [vmem:[%s14410_s1 + $0x54c] ss:$16 sps:$4 sm:$0xff]  }
 0x263   : > { %7392 = vmatprep.subr.bf16.mxu1 %v10210_v59  ;;  %v10252_v59 = vld [vmem:[%s14410_s1 + $0x74c] ss:$16 sps:$4 sm:$0xff]  }
 0x265   : > { %7350 = vmatpush1.bf16.msra.mxu0 %v10205_v60  ;;  %v13050_v60 = vpop.f32.mrf.mxu0 }
 0x266   : > { %7393 = vmatpush1.bf16.msra.mxu1 %v10208_v61  ;;  %7351 = vmatprep.subr.bf16.mxu0 %v10213_v62  ;;  %v13052_v61 = vpop.f32.mrf.mxu1  ;;  %v10247_v62 = vld [vmem:[%s14410_s1 + $0x548] ss:$16 sps:$4 sm:$0xff]   ;;  %v6686_v31 = vadd.f32 %v13050_v60, %v6643_v38 }
 0x267   : > { %7394 = vmatprep.subr.bf16.mxu1 %v10216_v63  ;;  %v10250_v63 = vld [vmem:[%s14410_s1 + $0x748] ss:$16 sps:$4 sm:$0xff]  }
 0x269   : > { %7352 = vmatpush1.bf16.msra.mxu0 %v10211_v0  ;;  %v10255_v0 = vld [vmem:[%s14410_s1 + $0x52c] ss:$16 sps:$4 sm:$0xff]  }
 0x26a   : > { %7395 = vmatpush1.bf16.msra.mxu1 %v10214_v1  ;;  %7353 = vmatprep.subr.bf16.mxu0 %v10219_v2  ;;  %v10258_v1 = vld [vmem:[%s14410_s1 + $0x72c] ss:$16 sps:$4 sm:$0xff]   ;;  %v13066_v2 = vpop.f32.mrf.mxu0 }
 0x26b   : > { %7396 = vmatprep.subr.bf16.mxu1 %v10222_v3  ;;  %v13068_v3 = vpop.f32.mrf.mxu1 }
 0x26d   : > { %7354 = vmatpush2.bf16.msra.mxu0 %v10217_v4  ;;  %v10253_v4 = vld [vmem:[%s14410_s1 + $0x528] ss:$16 sps:$4 sm:$0xff]  }
 0x26e   : > { %7397 = vmatpush2.bf16.msra.mxu1 %v10220_v5  ;;  %7355 = vmatprep.subr.bf16.mxu0 %v10225_v51  ;;  %v10256_v5 = vld [vmem:[%s14410_s1 + $0x728] ss:$16 sps:$4 sm:$0xff]   ;;  %v10261_v51 = vld [vmem:[%s14410_s1 + $0x50c] ss:$16 sps:$4 sm:$0xff]  }
 0x26f   : > { %7398 = vmatprep.subr.bf16.mxu1 %v10228_v15  ;;  %v10264_v15 = vld [vmem:[%s14410_s1 + $0x70c] ss:$16 sps:$4 sm:$0xff]  }
 0x271   : > { %7356 = vmatpush2.bf16.msra.mxu0 %v10223_v23  ;;  %v13082_v23 = vpop.f32.mrf.mxu0 }
 0x272   : > { %7399 = vmatpush2.bf16.msra.mxu1 %v10226_v34  ;;  %7357 = vmatprep.subr.bf16.mxu0 %v10231_v22  ;;  %v13084_v34 = vpop.f32.mrf.mxu1  ;;  %v10259_v22 = vld [vmem:[%s14410_s1 + $0x508] ss:$16 sps:$4 sm:$0xff]  }
 0x273   : > { %7400 = vmatprep.subr.bf16.mxu1 %v10234_v26  ;;  %v10262_v26 = vld [vmem:[%s14410_s1 + $0x708] ss:$16 sps:$4 sm:$0xff]  }
 0x275   : > { %7358 = vmatpush2.bf16.msra.mxu0 %v10229_v42  ;;  %v13092_v42 = vpop.f32.mrf.mxu0 }
 0x276   : > { %7401 = vmatpush2.bf16.msra.mxu1 %v10232_v54  ;;  %7359 = vmatprep.subr.bf16.mxu0 %v10237_v9  ;;  %v13094_v54 = vpop.f32.mrf.mxu1  ;;  %v10267_v9 = vld [vmem:[%s14410_s1 + $0x8ec] ss:$16 sps:$4 sm:$0xff]  }
 0x277   : > { %7402 = vmatprep.subr.bf16.mxu1 %v10240_v17  ;;  %v10270_v17 = vld [vmem:[%s14410_s1 + $0xaec] ss:$16 sps:$4 sm:$0xff]  }
 0x279   : > { %7360 = vmatpush2.bf16.msra.mxu0 %v10235_v18  ;;  %v10265_v18 = vld [vmem:[%s14410_s1 + $0x8e8] ss:$16 sps:$4 sm:$0xff]  }
 0x27a   : > { %7403 = vmatpush2.bf16.msra.mxu1 %v10238_v41  ;;  %7361 = vmatprep.subr.bf16.mxu0 %v10243_v6  ;;  %v10268_v41 = vld [vmem:[%s14410_s1 + $0xae8] ss:$16 sps:$4 sm:$0xff]   ;;  %v13108_v6 = vpop.f32.mrf.mxu0 }
 0x27b   : > { %7404 = vmatprep.subr.bf16.mxu1 %v10246_v7  ;;  %v13110_v7 = vpop.f32.mrf.mxu1 }
 0x27d   : > { %7362 = vmatpush2.bf16.msra.mxu0 %v10241_v53  ;;  %v10273_v53 = vld [vmem:[%s14410_s1 + $0x8cc] ss:$16 sps:$4 sm:$0xff]  }
 0x27e   : > { %7405 = vmatpush2.bf16.msra.mxu1 %v10244_v55  ;;  %7363 = vmatprep.subr.bf16.mxu0 %v10249_v58  ;;  %v10276_v55 = vld [vmem:[%s14410_s1 + $0xacc] ss:$16 sps:$4 sm:$0xff]   ;;  %v10271_v58 = vld [vmem:[%s14410_s1 + $0x8c8] ss:$16 sps:$4 sm:$0xff]  }
 0x27f   : > { %7406 = vmatprep.subr.bf16.mxu1 %v10252_v59  ;;  %v10274_v59 = vld [vmem:[%s14410_s1 + $0xac8] ss:$16 sps:$4 sm:$0xff]  }
 0x281   : > { %7364 = vmatpush2.bf16.msra.mxu0 %v10247_v62  ;;  %v13126_v62 = vpop.f32.mrf.mxu0 }
 0x282   : > { %7407 = vmatpush2.bf16.msra.mxu1 %v10250_v63  ;;  %7365 = vmatprep.subr.bf16.mxu0 %v10255_v0  ;;  %v13128_v63 = vpop.f32.mrf.mxu1  ;;  %v10277_v0 = vld [vmem:[%s14410_s1 + $0x8a8] ss:$16 sps:$4 sm:$0xff]  }
 0x283   : > { %7408 = vmatprep.subr.bf16.mxu1 %v10258_v1  ;;  %v10280_v1 = vld [vmem:[%s14410_s1 + $0xaa8] ss:$16 sps:$4 sm:$0xff]  }
 0x285   : > { %7366 = vmatpush2.bf16.msra.mxu0 %v10253_v4  ;;  %v13144_v4 = vpop.f32.mrf.mxu0 }
 0x286   : > { %7409 = vmatpush2.bf16.msra.mxu1 %v10256_v5  ;;  %7367 = vmatprep.subr.bf16.mxu0 %v10261_v51  ;;  %v13146_v5 = vpop.f32.mrf.mxu1 }
 0x287   : > { %7410 = vmatprep.subr.bf16.mxu1 %v10264_v15  ;;  %v13154_v51 = vpop.f32.mrf.mxu0 }
 0x288   : > { %v13156_v15 = vpop.f32.mrf.mxu1 }
 0x289   : > { %7368 = vmatpush2.bf16.msra.mxu0 %v10259_v22  ;;  %v10283_v22 = vld [vmem:[%s14410_s1 + $0x888] ss:$16 sps:$4 sm:$0xff]  }
 0x28a   : > { %7411 = vmatpush2.bf16.msra.mxu1 %v10262_v26  ;;  %7423 = vmatprep.subr.bf16.mxu0 %v10267_v9  ;;  %v10286_v26 = vld [vmem:[%s14410_s1 + $0xa88] ss:$16 sps:$4 sm:$0xff]   ;;  %v10291_v9 = vld [vmem:[%s14410_s1 + $0x86c] ss:$16 sps:$4 sm:$0xff]  }
 0x28b   : > { %7466 = vmatprep.subr.bf16.mxu1 %v10270_v17  ;;  %v10294_v17 = vld [vmem:[%s14410_s1 + $0xa6c] ss:$16 sps:$4 sm:$0xff]  }
 0x28c   : > { %7370 = vmatmul.mubr.bf16.vlgmr.msra.gmra.mxu0 %v11324_v20  ;;  %v10279_v20 = vld [vmem:[%s14410_s1 + $0x8ac] ss:$16 sps:$4 sm:$0xff]  }
 0x28d   : > { %7413 = vmatmul.mubr.bf16.vlgmr.msra.gmra.mxu1 %v11328_v21  ;;  %7424 = vmatpush1.bf16.msra.mxu0 %v10265_v18  ;;  %v10282_v21 = vld [vmem:[%s14410_s1 + $0xaac] ss:$16 sps:$4 sm:$0xff]   ;;  %v13170_v18 = vpop.f32.mrf.mxu0 }
 0x28e   : > { %7467 = vmatpush1.bf16.msra.mxu1 %v10268_v41  ;;  %7425 = vmatprep.subr.bf16.mxu0 %v10273_v53  ;;  %v13172_v41 = vpop.f32.mrf.mxu1  ;;  %v10289_v53 = vld [vmem:[%s14410_s1 + $0x868] ss:$16 sps:$4 sm:$0xff]  }
 0x28f   : > { %7468 = vmatprep.subr.bf16.mxu1 %v10276_v55  ;;  %7455 = vmatprep.mubr.bf16.mxu0 %v11367_v33  ;;  %v10285_v33 = vld [vmem:[%s14410_s1 + $0x88c] ss:$16 sps:$4 sm:$0xff]   ;;  %v10292_v55 = vld [vmem:[%s14410_s1 + $0xa68] ss:$16 sps:$4 sm:$0xff]  }
 0x290   : > { %7498 = vmatprep.mubr.bf16.mxu1 %v11374_v35  ;;  %v10288_v35 = vld [vmem:[%s14410_s1 + $0xa8c] ss:$16 sps:$4 sm:$0xff]  }
 0x291   : > { %7426 = vmatpush1.bf16.msra.mxu0 %v10271_v58  ;;  %v10297_v58 = vld [vmem:[%s14410_s1 + $0x84c] ss:$16 sps:$4 sm:$0xff]  }
 0x292   : > { %7469 = vmatpush1.bf16.msra.mxu1 %v10274_v59  ;;  %7427 = vmatprep.subr.bf16.mxu0 %v10279_v20  ;;  %v10300_v59 = vld [vmem:[%s14410_s1 + $0xa4c] ss:$16 sps:$4 sm:$0xff]   ;;  %v13186_v20 = vpop.f32.mrf.mxu0 }
 0x293   : > { %7470 = vmatprep.subr.bf16.mxu1 %v10282_v21  ;;  %v13188_v21 = vpop.f32.mrf.mxu1 }
 0x295   : > { %7428 = vmatpush1.bf16.msra.mxu0 %v10277_v0  ;;  %v10295_v0 = vld [vmem:[%s14410_s1 + $0x848] ss:$16 sps:$4 sm:$0xff]  }
 0x296   : > { %7471 = vmatpush1.bf16.msra.mxu1 %v10280_v1  ;;  %7429 = vmatprep.subr.bf16.mxu0 %v10285_v33  ;;  %v10298_v1 = vld [vmem:[%s14410_s1 + $0xa48] ss:$16 sps:$4 sm:$0xff]   ;;  %v10303_v33 = vld [vmem:[%s14410_s1 + $0x82c] ss:$16 sps:$4 sm:$0xff]  }
 0x297   : > { %7472 = vmatprep.subr.bf16.mxu1 %v10288_v35  ;;  %v10306_v35 = vld [vmem:[%s14410_s1 + $0xa2c] ss:$16 sps:$4 sm:$0xff]  }
 0x299   : > { %7430 = vmatpush1.bf16.msra.mxu0 %v10283_v22  ;;  %v13202_v22 = vpop.f32.mrf.mxu0 }
 0x29a   : > { %7473 = vmatpush1.bf16.msra.mxu1 %v10286_v26  ;;  %7431 = vmatprep.subr.bf16.mxu0 %v10291_v9  ;;  %v13204_v26 = vpop.f32.mrf.mxu1  ;;  %v10301_v9 = vld [vmem:[%s14410_s1 + $0x828] ss:$16 sps:$4 sm:$0xff]  }
 0x29b   : > { %7474 = vmatprep.subr.bf16.mxu1 %v10294_v17  ;;  %v10304_v17 = vld [vmem:[%s14410_s1 + $0xa28] ss:$16 sps:$4 sm:$0xff]  }
 0x29d   : > { %7432 = vmatpush1.bf16.msra.mxu0 %v10289_v53  ;;  %v13212_v53 = vpop.f32.mrf.mxu0 }
 0x29e   : > { %7475 = vmatpush1.bf16.msra.mxu1 %v10292_v55  ;;  %7433 = vmatprep.subr.bf16.mxu0 %v10297_v58  ;;  %v13214_v55 = vpop.f32.mrf.mxu1  ;;  %v10309_v58 = vld [vmem:[%s14410_s1 + $0x80c] ss:$16 sps:$4 sm:$0xff]  }
 0x29f   : > { %7476 = vmatprep.subr.bf16.mxu1 %v10300_v59  ;;  %v10312_v59 = vld [vmem:[%s14410_s1 + $0xa0c] ss:$16 sps:$4 sm:$0xff]  }
 0x2a1   : > { %7434 = vmatpush1.bf16.msra.mxu0 %v10295_v0  ;;  %v10307_v0 = vld [vmem:[%s14410_s1 + $0x808] ss:$16 sps:$4 sm:$0xff]  }
 0x2a2   : > { %7477 = vmatpush1.bf16.msra.mxu1 %v10298_v1  ;;  %7435 = vmatprep.subr.bf16.mxu0 %v10303_v33  ;;  %v10310_v1 = vld [vmem:[%s14410_s1 + $0xa08] ss:$16 sps:$4 sm:$0xff]   ;;  %v13228_v33 = vpop.f32.mrf.mxu0 }
 0x2a3   : > { %7478 = vmatprep.subr.bf16.mxu1 %v10306_v35  ;;  %v13230_v35 = vpop.f32.mrf.mxu1 }
 0x2a4   : > { %v13249_v27 = vpop.f32.mrf.mxu0 }
 0x2a5   : > { %7436 = vmatpush1.bf16.msra.mxu0 %v10301_v9  ;;  %v10318_v9 = vld [vmem:[%s14410_s1 + $0xbec] ss:$16 sps:$4 sm:$0xff]   ;;  %v13251_v52 = vpop.f32.mrf.mxu1 }
 0x2a6   : > { %7479 = vmatpush1.bf16.msra.mxu1 %v10304_v17  ;;  %7437 = vmatprep.subr.bf16.mxu0 %v10309_v58  ;;  %v6641_v17 = vadd.f32 %v12978_v46, %v12976_v14  ;;  %v10313_v58 = vld [vmem:[%s14410_s1 + $0x9e8] ss:$16 sps:$4 sm:$0xff]   ;;  %v10321_v14 = vld [vmem:[%s14410_s1 + $0x9cc] ss:$16 sps:$4 sm:$0xff]   ;;  %v13272_v16 = vpop.f32.mrf.mxu0 }
 0x2a7   : > { %7480 = vmatprep.subr.bf16.mxu1 %v10312_v59  ;;  %v10316_v59 = vld [vmem:[%s14410_s1 + $0xbe8] ss:$16 sps:$4 sm:$0xff]   ;;  %v10324_v46 = vld [vmem:[%s14410_s1 + $0xbcc] ss:$16 sps:$4 sm:$0xff]   ;;  %v13274_v38 = vpop.f32.mrf.mxu1 }
 0x2a8   : > { %v6684_v32 = vadd.f32 %v13034_v12, %v6641_v17  ;;  %v6647_v12 = vadd.f32 %v13026_v19, %v13024_v43  ;;  %v6729_v43 = vadd.f32 %v13052_v61, %v6686_v31  ;;  %v13285_v60 = vpop.f32.mrf.mxu0  ;;  %v10328_v61 = vld [vmem:[%s14410_s1 + $0xba8] ss:$16 sps:$4 sm:$0xff]  }
 0x2a9   : > { %7438 = vmatpush1.bf16.msra.mxu0 %v10307_v0 }
 0x2aa   : > { %7481 = vmatpush1.bf16.msra.mxu1 %v10310_v1  ;;  %7439 = vmatprep.subr.bf16.mxu0 %v10315_v39  ;;  %v6727_v0 = vadd.f32 %v13036_v13, %v6684_v32  ;;  %v6688_v39 = vadd.f32 %v13066_v2, %v6645_v28  ;;  %v10319_v1 = vld [vmem:[%s14410_s1 + $0x9c8] ss:$16 sps:$4 sm:$0xff]   ;;  %v10327_v32 = vld [vmem:[%s14410_s1 + $0x9ac] ss:$16 sps:$4 sm:$0xff]   ;;  %v6690_v19 = vadd.f32 %v13082_v23, %v6647_v12  ;;  %v13287_v2 = vpop.f32.mrf.mxu1 }
 0x2ab   : > { %7482 = vmatprep.subr.bf16.mxu1 %v10318_v9  ;;  %v10322_v9 = vld [vmem:[%s14410_s1 + $0xbc8] ss:$16 sps:$4 sm:$0xff]   ;;  %v10333_v23 = vld [vmem:[%s14410_s1 + $0x98c] ss:$16 sps:$4 sm:$0xff]  }
 0x2ac   : > { %v6770_v13 = vadd.f32 %v13092_v42, %v6727_v0  ;;  %v6731_v17 = vadd.f32 %v13068_v3, %v6688_v39  ;;  %v10336_v3 = vld [vmem:[%s14410_s1 + $0xb8c] ss:$16 sps:$4 sm:$0xff]   ;;  %v6733_v42 = vadd.f32 %v13084_v34, %v6690_v19  ;;  %v13306_v28 = vpop.f32.mrf.mxu1  ;;  %v10331_v39 = vld [vmem:[%s14410_s1 + $0x988] ss:$16 sps:$4 sm:$0xff]  }
 0x2ad   : > { %7440 = vmatpush2.bf16.msra.mxu0 %v10313_v58  ;;  %v6772_v58 = vadd.f32 %v13108_v6, %v6729_v43  ;;  %v10334_v34 = vld [vmem:[%s14410_s1 + $0xb88] ss:$16 sps:$4 sm:$0xff]  }
 0x2ae   : > { %7483 = vmatpush2.bf16.msra.mxu1 %v10316_v59  ;;  %7441 = vmatprep.subr.bf16.mxu0 %v10321_v14  ;;  %v10325_v59 = vld [vmem:[%s14410_s1 + $0x9a8] ss:$16 sps:$4 sm:$0xff]   ;;  %v6813_v6 = vadd.f32 %v13094_v54, %v6770_v13  ;;  %v6774_v14 = vadd.f32 %v13126_v62, %v6731_v17  ;;  %v6776_v12 = vadd.f32 %v13144_v4, %v6733_v42  ;;  %v10339_v54 = vld [vmem:[%s14410_s1 + $0x96c] ss:$16 sps:$4 sm:$0xff]  }
 0x2af   : > { %7484 = vmatprep.subr.bf16.mxu1 %v10324_v46  ;;  %v7029_v46 = vpop.f32.mrf.mxu0  ;;  %v6815_v31 = vadd.f32 %v13110_v7, %v6772_v58  ;;  %v10342_v7 = vld [vmem:[%s14410_s1 + $0xb6c] ss:$16 sps:$4 sm:$0xff]   ;;  %v10337_v43 = vld [vmem:[%s14410_s1 + $0x968] ss:$16 sps:$4 sm:$0xff]  }
 0x2b0   : > { %v6856_v0 = vadd.f32 %v13154_v51, %v6813_v6  ;;  %v6817_v62 = vadd.f32 %v13128_v63, %v6774_v14  ;;  %v10340_v63 = vld [vmem:[%s14410_s1 + $0xb68] ss:$16 sps:$4 sm:$0xff]  }
 0x2b1   : > { %7442 = vmatpush2.bf16.msra.mxu0 %v10319_v1  ;;  %v6858_v4 = vadd.f32 %v13170_v18, %v6815_v31  ;;  %v7031_v51 = vpop.f32.mrf.mxu0  ;;  %v13325_v1 = vpop.f32.mrf.mxu1 }
 0x2b2   : > { %7485 = vmatpush2.bf16.msra.mxu1 %v10322_v9  ;;  %7443 = vmatprep.subr.bf16.mxu0 %v10327_v32  ;;  %v6819_v9 = vadd.f32 %v13146_v5, %v6776_v12  ;;  %v6899_v32 = vadd.f32 %v13156_v15, %v6856_v0  ;;  %v10345_v5 = vld [vmem:[%s14410_s1 + $0x94c] ss:$16 sps:$4 sm:$0xff]   ;;  %v10349_v12 = vld [vmem:[%s14410_s1 + $0x928] ss:$16 sps:$4 sm:$0xff]  }
 0x2b3   : > { %7486 = vmatprep.subr.bf16.mxu1 %v10330_v8  ;;  %v6860_v8 = vadd.f32 %v13186_v20, %v6817_v62  ;;  %v10348_v15 = vld [vmem:[%s14410_s1 + $0xb4c] ss:$16 sps:$4 sm:$0xff]   ;;  %v6901_v18 = vadd.f32 %v13172_v41, %v6858_v4  ;;  %v7033_v13 = vpop.f32.mrf.mxu0  ;;  %v7076_v17 = vpop.f32.mrf.mxu1  ;;  %v10346_v41 = vld [vmem:[%s14410_s1 + $0xb48] ss:$16 sps:$4 sm:$0xff]  }
 0x2b4   : > { %v6862_v20 = vadd.f32 %v13202_v22, %v6819_v9  ;;  %v6942_v19 = vadd.f32 %v13212_v53, %v6899_v32  ;;  %v10354_v53 = vld [vmem:[%s14410_s1 + $0xb2c] ss:$16 sps:$4 sm:$0xff]   ;;  %v10358_v62 = vld [vmem:[%s14410_s1 + $0xb08] ss:$16 sps:$4 sm:$0xff]  }
 0x2b5   : > { %7444 = vmatpush2.bf16.msra.mxu0 %v10325_v59  ;;  %v6903_v58 = vadd.f32 %v13188_v21, %v6860_v8  ;;  %v6944_v59 = vadd.f32 %v13228_v33, %v6901_v18  ;;  %v7156_v22 = vpop.f32.mrf.mxu1  ;;  %v10351_v21 = vld [vmem:[%s14410_s1 + $0x92c] ss:$16 sps:$4 sm:$0xff]  }
 0x2b6   : > { %7487 = vmatpush2.bf16.msra.mxu1 %v10328_v61  ;;  %7445 = vmatprep.subr.bf16.mxu0 %v10333_v23  ;;  %v10343_v61 = vld [vmem:[%s14410_s1 + $0x948] ss:$16 sps:$4 sm:$0xff]   ;;  %v7113_v23 = vpop.f32.mrf.mxu0  ;;  %v6905_v33 = vadd.f32 %v13204_v26, %v6862_v20 }
 0x2b7   : > { %7488 = vmatprep.subr.bf16.mxu1 %v10336_v3  ;;  %v6985_v3 = vadd.f32 %v13214_v55, %v6942_v19  ;;  %v6946_v42 = vadd.f32 %v13249_v27, %v6903_v58  ;;  %v6987_v6 = vadd.f32 %v13230_v35, %v6944_v59  ;;  %v10352_v26 = vld [vmem:[%s14410_s1 + $0xb28] ss:$16 sps:$4 sm:$0xff]   ;;  %v7158_v55 = vpop.f32.mrf.mxu1  ;;  %v10357_v27 = vld [vmem:[%s14410_s1 + $0x90c] ss:$16 sps:$4 sm:$0xff]  }
 0x2b8   : > { %v6948_v14 = vadd.f32 %v13272_v16, %v6905_v33  ;;  %v7115_v0 = vpop.f32.mrf.mxu0  ;;  %v10360_v35 = vld [vmem:[%s14410_s1 + $0xb0c] ss:$16 sps:$4 sm:$0xff]  }
 0x2b9   : > { %7446 = vmatpush2.bf16.msra.mxu0 %v10331_v39  ;;  %v7028_v31 = vadd.f32 %v13285_v60, %v6985_v3  ;;  %v6989_v16 = vadd.f32 %v13251_v52, %v6946_v42  ;;  %v7030_v60 = vadd.f32 %v7029_v46, %v6987_v6  ;;  %v7160_v9 = vpop.f32.mrf.mxu1  ;;  %v10363_v52 = vld [vmem:[%s14410_s1 + $0xcec] ss:$16 sps:$4 sm:$0xff]  }
 0x2ba   : > { %7489 = vmatpush2.bf16.msra.mxu1 %v10334_v34  ;;  %7447 = vmatprep.subr.bf16.mxu0 %v10339_v54  ;;  %v6991_v39 = vadd.f32 %v13274_v38, %v6948_v14  ;;  %v7117_v4 = vpop.f32.mrf.mxu0  ;;  %v10366_v38 = vld [vmem:[%s14410_s1 + $0xeec] ss:$16 sps:$4 sm:$0xff]  }
 0x2bb   : > { %7490 = vmatprep.subr.bf16.mxu1 %v10342_v7  ;;  %v7071_v34 = vadd.f32 %v13287_v2, %v7028_v31  ;;  %v7032_v54 = vadd.f32 %v7031_v51, %v6989_v16  ;;  %v10355_v7 = vld [vmem:[%s14410_s1 + $0x908] ss:$16 sps:$4 sm:$0xff]   ;;  %v7073_v2 = vadd.f32 %v13306_v28, %v7030_v60  ;;  %v10369_v28 = vld [vmem:[%s14410_s1 + $0xccc] ss:$16 sps:$4 sm:$0xff]  }
 0x2bc   : > { %v7034_v46 = vadd.f32 %v7033_v13, %v6991_v39 }
 0x2bd   : > { %7448 = vmatpush2.bf16.msra.mxu0 %v10337_v43  ;;  %v7114_v51 = vadd.f32 %v7113_v23, %v7071_v34  ;;  %v7075_v32 = vadd.f32 %v13325_v1, %v7032_v54  ;;  %v7116_v8 = vadd.f32 %v7115_v0, %v7073_v2  ;;  %v10361_v43 = vld [vmem:[%s14410_s1 + $0xce8] ss:$16 sps:$4 sm:$0xff]   ;;  %v10372_v1 = vld [vmem:[%s14410_s1 + $0xecc] ss:$16 sps:$4 sm:$0xff]  }
 0x2be   : > { %7491 = vmatpush2.bf16.msra.mxu1 %v10340_v63  ;;  %7449 = vmatprep.subr.bf16.mxu0 %v10345_v5  ;;  %v10364_v63 = vld [vmem:[%s14410_s1 + $0xee8] ss:$16 sps:$4 sm:$0xff]   ;;  %v7119_v5 = vpop.f32.mrf.mxu0  ;;  %v7077_v18 = vadd.f32 %v7076_v17, %v7034_v46 }
 0x2bf   : > { %7492 = vmatprep.subr.bf16.mxu1 %v10348_v15  ;;  %v7162_v15 = vpop.f32.mrf.mxu1  ;;  %v7157_v20 = vadd.f32 %v7156_v22, %v7114_v51  ;;  %v7118_v19 = vadd.f32 %v7117_v4, %v7075_v32  ;;  %v7159_v59 = vadd.f32 %v7158_v55, %v7116_v8  ;;  %v10367_v23 = vld [vmem:[%s14410_s1 + $0xcc8] ss:$16 sps:$4 sm:$0xff]   ;;  %v10384_v55 = vld [vmem:[%s14410_s1 + $0xe8c] ss:$16 sps:$4 sm:$0xff]  }
 0x2c0   : > { %v10370_v17 = vld [vmem:[%s14410_s1 + $0xec8] ss:$16 sps:$4 sm:$0xff]  }
 0x2c1   : > { %7450 = vmatpush2.bf16.msra.mxu0 %v10343_v61  ;;  %v7120_v61 = vadd.f32 %v7119_v5, %v7077_v18  ;;  %v10376_v0 = vld [vmem:[%s14410_s1 + $0xea8] ss:$16 sps:$4 sm:$0xff]   ;;  %v10393_v18 = vld [vmem:[%s14410_s1 + $0xc4c] ss:$16 sps:$4 sm:$0xff]  }
 0x2c2   : > { %7493 = vmatpush2.bf16.msra.mxu1 %v10346_v41  ;;  %7451 = vmatprep.subr.bf16.mxu0 %v10351_v21  ;;  %v10382_v4 = vld [vmem:[%s14410_s1 + $0xe88] ss:$16 sps:$4 sm:$0xff]  }
 0x2c3   : > { %7494 = vmatprep.subr.bf16.mxu1 %v10354_v53  ;;  %v7161_v53 = vadd.f32 %v7160_v9, %v7118_v19  ;;  %v7163_v14 = vadd.f32 %v7162_v15, %v7120_v61  ;;  %v10387_v9 = vld [vmem:[%s14410_s1 + $0xc6c] ss:$16 sps:$4 sm:$0xff]   ;;  %v10385_v15 = vld [vmem:[%s14410_s1 + $0xc68] ss:$16 sps:$4 sm:$0xff]  }
 0x2c5   : > { %7452 = vmatpush2.bf16.msra.mxu0 %v10349_v12 }
 0x2c6   : > { %7495 = vmatpush2.bf16.msra.mxu1 %v10352_v26  ;;  %7453 = vmatprep.subr.bf16.mxu0 %v10357_v27  ;;  %v10373_v26 = vld [vmem:[%s14410_s1 + $0xca8] ss:$16 sps:$4 sm:$0xff]  }
 0x2c7   : > { %7496 = vmatprep.subr.bf16.mxu1 %v10360_v35 }
 0x2c9   : > { %7454 = vmatpush2.bf16.msra.mxu0 %v10355_v7 }
 0x2ca   : > { %7497 = vmatpush2.bf16.msra.mxu1 %v10358_v62  ;;  %7509 = vmatprep.subr.bf16.mxu0 %v10363_v52  ;;  %v10379_v62 = vld [vmem:[%s14410_s1 + $0xc88] ss:$16 sps:$4 sm:$0xff]   ;;  %v10390_v52 = vld [vmem:[%s14410_s1 + $0xe6c] ss:$16 sps:$4 sm:$0xff]  }
 0x2cb   : > { %7552 = vmatprep.subr.bf16.mxu1 %v10366_v38 }
 0x2cc   : > { %v7199_v13 = vpop.f32.mrf.mxu0  ;;  %7456 = vmatmul.mubr.bf16.vlgmr.msra.gmra.mxu0 %v11560_v48  ;;  %v10375_v48 = vld [vmem:[%s14410_s1 + $0xcac] ss:$16 sps:$4 sm:$0xff]  }
 0x2cd   : > { %v7242_v58 = vpop.f32.mrf.mxu1  ;;  %7499 = vmatmul.mubr.bf16.vlgmr.msra.gmra.mxu1 %v11564_v49  ;;  %v7200_v41 = vadd.f32 %v7199_v13, %v7157_v20  ;;  %7510 = vmatpush1.bf16.msra.mxu0 %v10361_v43  ;;  %v10378_v49 = vld [vmem:[%s14410_s1 + $0xeac] ss:$16 sps:$4 sm:$0xff]  }
 0x2ce   : > { %7553 = vmatpush1.bf16.msra.mxu1 %v10364_v63  ;;  %v7201_v22 = vpop.f32.mrf.mxu0  ;;  %7511 = vmatprep.subr.bf16.mxu0 %v10369_v28  ;;  %v10388_v28 = vld [vmem:[%s14410_s1 + $0xe68] ss:$16 sps:$4 sm:$0xff]   ;;  %v10396_v20 = vld [vmem:[%s14410_s1 + $0xe4c] ss:$16 sps:$4 sm:$0xff]  }
 0x2cf   : > { %v7244_v21 = vpop.f32.mrf.mxu1  ;;  %7554 = vmatprep.subr.bf16.mxu1 %v10372_v1  ;;  %v7202_v33 = vadd.f32 %v7201_v22, %v7159_v59  ;;  %7541 = vmatprep.mubr.bf16.mxu0 %v11580_v29  ;;  %v7243_v3 = vadd.f32 %v7242_v58, %v7200_v41  ;;  %v10394_v22 = vld [vmem:[%s14410_s1 + $0xe48] ss:$16 sps:$4 sm:$0xff]  }
 0x2d0   : > { %7584 = vmatprep.mubr.bf16.mxu1 %v11584_v30  ;;  %v7203_v42 = vpop.f32.mrf.mxu0  ;;  %v10381_v30 = vld [vmem:[%s14410_s1 + $0xc8c] ss:$16 sps:$4 sm:$0xff]  }
 0x2d1   : > { %v7246_v6 = vpop.f32.mrf.mxu1  ;;  %v7245_v31 = vadd.f32 %v7244_v21, %v7202_v33  ;;  %v7204_v12 = vadd.f32 %v7203_v42, %v7161_v53  ;;  %7512 = vmatpush1.bf16.msra.mxu0 %v10367_v23  ;;  %v8029_v60 = vmul.f32 %v7243_v3, %v7243_v3 }
 0x2d2   : > { %7555 = vmatpush1.bf16.msra.mxu1 %v10370_v17  ;;  %v7205_v29 = vpop.f32.mrf.mxu0  ;;  %7513 = vmatprep.subr.bf16.mxu0 %v10375_v48  ;;  %v10391_v17 = vld [vmem:[%s14410_s1 + $0xc48] ss:$16 sps:$4 sm:$0xff]   ;;  %v10399_v48 = vld [vmem:[%s14410_s1 + $0xc2c] ss:$16 sps:$4 sm:$0xff]  }
 0x2d3   : > { %7556 = vmatprep.subr.bf16.mxu1 %v10378_v49  ;;  %v9292_v27 = vpack.c.bf16 %v7245_v31, %v7243_v3  ;;  %v7247_v35 = vadd.f32 %v7246_v6, %v7204_v12  ;;  %v7206_v16 = vadd.f32 %v7205_v29, %v7163_v14  ;;  %v7248_v39 = vpop.f32.mrf.mxu1  ;;  %v8030_v32 = vmul.f32 %v7245_v31, %v7245_v31  ;;  %v10402_v49 = vld [vmem:[%s14410_s1 + $0xe2c] ss:$16 sps:$4 sm:$0xff]   ;;  %v10397_v14 = vld [vmem:[%s14410_s1 + $0xc28] ss:$16 sps:$4 sm:$0xff]  }
 0x2d4   : > { %v10408_v29 = vld [vmem:[%s14410_s1 + $0xe0c] ss:$16 sps:$4 sm:$0xff]  }
 0x2d5   : > { %7963 = vst [vmem:[%s13432_s17] sm:$0xff] %v9292_v27  ;;  %v7967_v34 = vadd.f32 %v7247_v35, %v7243_v3  ;;  %v8033_v54 = vmul.f32 %v7247_v35, %v7247_v35  ;;  %v7249_v7 = vadd.f32 %v7248_v39, %v7206_v16  ;;  %7514 = vmatpush1.bf16.msra.mxu0 %v10373_v26  ;;  %v10403_v16 = vld [vmem:[%s14410_s1 + $0xc08] ss:$16 sps:$4 sm:$0xff]  }
 0x2d6   : > { %7557 = vmatpush1.bf16.msra.mxu1 %v10376_v0  ;;  %7515 = vmatprep.subr.bf16.mxu0 %v10381_v30  ;;  %v10405_v0 = vld [vmem:[%s14410_s1 + $0xc0c] ss:$16 sps:$4 sm:$0xff]  }
 0x2d7   : > { %7558 = vmatprep.subr.bf16.mxu1 %v10384_v55  ;;  %v7968_v38 = vrot.slane %v7967_v34, 4  ;;  %v8037_v2 = vadd.f32 %v8033_v54, %v8029_v60  ;;  %v9294_v46 = vpack.c.bf16 %v7249_v7, %v7247_v35  ;;  %v7974_v51 = vadd.f32 %v7249_v7, %v7245_v31  ;;  %v10400_v31 = vld [vmem:[%s14410_s1 + $0xe28] ss:$16 sps:$4 sm:$0xff]   ;;  %v10411_v54 = vld [vmem:[%s14410_s1 + $0xdec] ss:$16 sps:$4 sm:$0xff]  }
 0x2d8   : > { %v8034_v8 = vmul.f32 %v7249_v7, %v7249_v7  ;;  %v10406_v60 = vld [vmem:[%s14410_s1 + $0xe08] ss:$16 sps:$4 sm:$0xff]   ;;  %v10414_v7 = vld [vmem:[%s14410_s1 + $0xfec] ss:$16 sps:$4 sm:$0xff]  }
 0x2d9   : > { %v7969_v43 = vadd.f32 %v7968_v38, %v7967_v34  ;;  %v8038_v63 = vrot.slane %v8037_v2, 4  ;;  %7965 = vst [vmem:[%s13432_s17 + $0x10] sm:$0xff] %v9294_v46  ;;  %v7975_v5 = vrot.slane %v7974_v51, 4  ;;  %7516 = vmatpush1.bf16.msra.mxu0 %v10379_v62  ;;  %v10420_v38 = vld [vmem:[%s14410_s1 + $0xfcc] ss:$16 sps:$4 sm:$0xff]  }
 0x2da   : > { %7559 = vmatpush1.bf16.msra.mxu1 %v10382_v4  ;;  %v8044_v1 = vadd.f32 %v8034_v8, %v8030_v32  ;;  %7517 = vmatprep.subr.bf16.mxu0 %v10387_v9  ;;  %v10409_v4 = vld [vmem:[%s14410_s1 + $0xde8] ss:$16 sps:$4 sm:$0xff]   ;;  %v10426_v32 = vld [vmem:[%s14410_s1 + $0xfac] ss:$16 sps:$4 sm:$0xff]  }
 0x2db   : > { %7560 = vmatprep.subr.bf16.mxu1 %v10390_v52  ;;  %v7970_v19 = vrot.slane %v7969_v43, 2  ;;  %v8039_v13 = vadd.f32 %v8038_v63, %v8037_v2  ;;  %v7976_v58 = vadd.f32 %v7975_v5, %v7974_v51  ;;  %v10412_v9 = vld [vmem:[%s14410_s1 + $0xfe8] ss:$16 sps:$4 sm:$0xff]   ;;  %v10417_v52 = vld [vmem:[%s14410_s1 + $0xdcc] ss:$16 sps:$4 sm:$0xff]  }
 0x2dc   : > { %v8045_v59 = vrot.slane %v8044_v1, 4  ;;  %v10415_v2 = vld [vmem:[%s14410_s1 + $0xdc8] ss:$16 sps:$4 sm:$0xff]   ;;  %v10423_v51 = vld [vmem:[%s14410_s1 + $0xdac] ss:$16 sps:$4 sm:$0xff]  }
 0x2dd   : > { %v7971_v61 = vadd.f32 %v7970_v19, %v7969_v43  ;;  %v8040_v41 = vrot.slane %v8039_v13, 2  ;;  %v7977_v23 = vrot.slane %v7976_v58, 2  ;;  %7518 = vmatpush1.bf16.msra.mxu0 %v10385_v15  ;;  %v10418_v46 = vld [vmem:[%s14410_s1 + $0xfc8] ss:$16 sps:$4 sm:$0xff]   ;;  %v10429_v63 = vld [vmem:[%s14410_s1 + $0xd8c] ss:$16 sps:$4 sm:$0xff]  }
 0x2de   : > { %7561 = vmatpush1.bf16.msra.mxu1 %v10388_v28  ;;  %v8046_v21 = vadd.f32 %v8045_v59, %v8044_v1  ;;  %7519 = vmatprep.subr.bf16.mxu0 %v10393_v18  ;;  %v10421_v8 = vld [vmem:[%s14410_s1 + $0xda8] ss:$16 sps:$4 sm:$0xff]   ;;  %v10432_v5 = vld [vmem:[%s14410_s1 + $0xf8c] ss:$16 sps:$4 sm:$0xff]  }
 0x2df   : > { %7562 = vmatprep.subr.bf16.mxu1 %v10396_v20  ;;  %v7972_v53 = vrot.slane %v7971_v61, 1  ;;  %v8041_v33 = vadd.f32 %v8040_v41, %v8039_v13  ;;  %v7978_v3 = vadd.f32 %v7977_v23, %v7976_v58  ;;  %v10424_v43 = vld [vmem:[%s14410_s1 + $0xfa8] ss:$16 sps:$4 sm:$0xff]   ;;  %v10435_v1 = vld [vmem:[%s14410_s1 + $0xd6c] ss:$16 sps:$4 sm:$0xff]  }
 0x2e0   : > { %v8047_v42 = vrot.slane %v8046_v21, 2  ;;  %v10427_v15 = vld [vmem:[%s14410_s1 + $0xd88] ss:$16 sps:$4 sm:$0xff]   ;;  %v10438_v18 = vld [vmem:[%s14410_s1 + $0xf6c] ss:$16 sps:$4 sm:$0xff]  }
 0x2e1   : > { %v7979_v6 = vrot.slane %v7978_v3, 1  ;;  %7520 = vmatpush1.bf16.msra.mxu0 %v10391_v17  ;;  %v8042_v12 = vrot.slane %v8041_v33, 1  ;;  %v13490_v30 = vadd.f32 %v7972_v53, %v7971_v61  ;;  %v10430_v28 = vld [vmem:[%s14410_s1 + $0xf88] ss:$16 sps:$4 sm:$0xff]   ;;  %v10441_v13 = vld [vmem:[%s14410_s1 + $0xd4c] ss:$16 sps:$4 sm:$0xff]  }
 0x2e2   : > { %7563 = vmatpush1.bf16.msra.mxu1 %v10394_v22  ;;  %v8048_v26 = vadd.f32 %v8047_v42, %v8046_v21  ;;  %7521 = vmatprep.subr.bf16.mxu0 %v10399_v48  ;;  %v10433_v20 = vld [vmem:[%s14410_s1 + $0xd68] ss:$16 sps:$4 sm:$0xff]   ;;  %v10444_v58 = vld [vmem:[%s14410_s1 + $0xf4c] ss:$16 sps:$4 sm:$0xff]  }
 0x2e3   : > { %7564 = vmatprep.subr.bf16.mxu1 %v10402_v49  ;;  %v13492_v55 = vadd.f32 %v7979_v6, %v7978_v3  ;;  %v13502_v39 = vadd.f32 %v8042_v12, %v8041_v33  ;;  %v10436_v19 = vld [vmem:[%s14410_s1 + $0xf68] ss:$16 sps:$4 sm:$0xff]   ;;  %v10447_v41 = vld [vmem:[%s14410_s1 + $0xd2c] ss:$16 sps:$4 sm:$0xff]  }
 0x2e4   : > { %v8049_v27 = vrot.slane %v8048_v26, 1  ;;  %v10439_v59 = vld [vmem:[%s14410_s1 + $0xd48] ss:$16 sps:$4 sm:$0xff]   ;;  %v10450_v23 = vld [vmem:[%s14410_s1 + $0xf2c] ss:$16 sps:$4 sm:$0xff]  }
 0x2e5   : > { %v7999_v35 = vcombine.low %v13490_v30, %v13492_v55  ;;  %7522 = vmatpush1.bf16.msra.mxu0 %v10397_v14  ;;  %v10442_v61 = vld [vmem:[%s14410_s1 + $0xf48] ss:$16 sps:$4 sm:$0xff]   ;;  %v10453_v21 = vld [vmem:[%s14410_s1 + $0xd0c] ss:$16 sps:$4 sm:$0xff]  }
 0x2e6   : > { %7565 = vmatpush1.bf16.msra.mxu1 %v10400_v31  ;;  %v13504_v34 = vadd.f32 %v8049_v27, %v8048_v26  ;;  %7523 = vmatprep.subr.bf16.mxu0 %v10405_v0  ;;  %v10445_v17 = vld [vmem:[%s14410_s1 + $0xd28] ss:$16 sps:$4 sm:$0xff]   ;;  %v10456_v48 = vld [vmem:[%s14410_s1 + $0xf0c] ss:$16 sps:$4 sm:$0xff]  }
 0x2e7   : > { %7566 = vmatprep.subr.bf16.mxu1 %v10408_v29  ;;  %v10448_v22 = vld [vmem:[%s14410_s1 + $0xf28] ss:$16 sps:$4 sm:$0xff]   ;;  %v10459_v33 = vld [vmem:[%s14410_s1 + $0x10ec] ss:$16 sps:$4 sm:$0xff]  }
 0x2e8   : > { %v8069_v62 = vcombine.low %v13502_v39, %v13504_v34  ;;  %v10451_v49 = vld [vmem:[%s14410_s1 + $0xd08] ss:$16 sps:$4 sm:$0xff]   ;;  %v10462_v3 = vld [vmem:[%s14410_s1 + $0x12ec] ss:$16 sps:$4 sm:$0xff]  }
 0x2e9   : > { %7524 = vmatpush1.bf16.msra.mxu0 %v10403_v16  ;;  %v10454_v53 = vld [vmem:[%s14410_s1 + $0xf08] ss:$16 sps:$4 sm:$0xff]   ;;  %v10465_v14 = vld [vmem:[%s14410_s1 + $0x10cc] ss:$16 sps:$4 sm:$0xff]  }
 0x2ea   : > { %7567 = vmatpush1.bf16.msra.mxu1 %v10406_v60  ;;  %7525 = vmatprep.subr.bf16.mxu0 %v10411_v54  ;;  %v10457_v42 = vld [vmem:[%s14410_s1 + $0x10e8] ss:$16 sps:$4 sm:$0xff]   ;;  %v10468_v31 = vld [vmem:[%s14410_s1 + $0x12cc] ss:$16 sps:$4 sm:$0xff]  }
 0x2eb   : > { %7568 = vmatprep.subr.bf16.mxu1 %v10414_v7  ;;  %v10460_v6 = vld [vmem:[%s14410_s1 + $0x12e8] ss:$16 sps:$4 sm:$0xff]   ;;  %v10471_v0 = vld [vmem:[%s14410_s1 + $0x10ac] ss:$16 sps:$4 sm:$0xff]  }
 0x2ec   : > { %v10463_v12 = vld [vmem:[%s14410_s1 + $0x10c8] ss:$16 sps:$4 sm:$0xff]   ;;  %v10477_v27 = vld [vmem:[%s14410_s1 + $0x108c] ss:$16 sps:$4 sm:$0xff]  }
 0x2ed   : > { %7526 = vmatpush2.bf16.msra.mxu0 %v10409_v4  ;;  %v10466_v26 = vld [vmem:[%s14410_s1 + $0x12c8] ss:$16 sps:$4 sm:$0xff]   ;;  %v10483_v60 = vld [vmem:[%s14410_s1 + $0x106c] ss:$16 sps:$4 sm:$0xff]  }
 0x2ee   : > { %7569 = vmatpush2.bf16.msra.mxu1 %v10412_v9  ;;  %7527 = vmatprep.subr.bf16.mxu0 %v10417_v52  ;;  %v10472_v29 = vld [vmem:[%s14410_s1 + $0x12a8] ss:$16 sps:$4 sm:$0xff]   ;;  %v10486_v54 = vld [vmem:[%s14410_s1 + $0x126c] ss:$16 sps:$4 sm:$0xff]  }
 0x2ef   : > { %7570 = vmatprep.subr.bf16.mxu1 %v10420_v38  ;;  %v10478_v16 = vld [vmem:[%s14410_s1 + $0x1288] ss:$16 sps:$4 sm:$0xff]   ;;  %v10489_v9 = vld [vmem:[%s14410_s1 + $0x104c] ss:$16 sps:$4 sm:$0xff]  }
 0x2f0   : > { %v10481_v7 = vld [vmem:[%s14410_s1 + $0x1068] ss:$16 sps:$4 sm:$0xff]   ;;  %v10492_v52 = vld [vmem:[%s14410_s1 + $0x124c] ss:$16 sps:$4 sm:$0xff]  }
 0x2f1   : > { %7528 = vmatpush2.bf16.msra.mxu0 %v10415_v2  ;;  %v10484_v4 = vld [vmem:[%s14410_s1 + $0x1268] ss:$16 sps:$4 sm:$0xff]  }
 0x2f2   : > { %7571 = vmatpush2.bf16.msra.mxu1 %v10418_v46  ;;  %7529 = vmatprep.subr.bf16.mxu0 %v10423_v51  ;;  %v10487_v38 = vld [vmem:[%s14410_s1 + $0x1048] ss:$16 sps:$4 sm:$0xff]   ;;  %v10495_v46 = vld [vmem:[%s14410_s1 + $0x102c] ss:$16 sps:$4 sm:$0xff]  }
 0x2f3   : > { %7572 = vmatprep.subr.bf16.mxu1 %v10426_v32  ;;  %v10490_v2 = vld [vmem:[%s14410_s1 + $0x1248] ss:$16 sps:$4 sm:$0xff]   ;;  %v10498_v51 = vld [vmem:[%s14410_s1 + $0x122c] ss:$16 sps:$4 sm:$0xff]  }
 0x2f4   : > { %v10493_v32 = vld [vmem:[%s14410_s1 + $0x1028] ss:$16 sps:$4 sm:$0xff]  }
 0x2f5   : > { %7530 = vmatpush2.bf16.msra.mxu0 %v10421_v8  ;;  %v10496_v8 = vld [vmem:[%s14410_s1 + $0x1228] ss:$16 sps:$4 sm:$0xff]  }
 0x2f6   : > { %7573 = vmatpush2.bf16.msra.mxu1 %v10424_v43  ;;  %7531 = vmatprep.subr.bf16.mxu0 %v10429_v63  ;;  %v10501_v43 = vld [vmem:[%s14410_s1 + $0x100c] ss:$16 sps:$4 sm:$0xff]  }
 0x2f7   : > { %7574 = vmatprep.subr.bf16.mxu1 %v10432_v5  ;;  %v10504_v63 = vld [vmem:[%s14410_s1 + $0x120c] ss:$16 sps:$4 sm:$0xff]   ;;  %v10499_v5 = vld [vmem:[%s14410_s1 + $0x1008] ss:$16 sps:$4 sm:$0xff]  }
 0x2f9   : > { %7532 = vmatpush2.bf16.msra.mxu0 %v10427_v15  ;;  %v10502_v15 = vld [vmem:[%s14410_s1 + $0x1208] ss:$16 sps:$4 sm:$0xff]  }
 0x2fa   : > { %7575 = vmatpush2.bf16.msra.mxu1 %v10430_v28  ;;  %7533 = vmatprep.subr.bf16.mxu0 %v10435_v1  ;;  %v10507_v28 = vld [vmem:[%s14410_s1 + $0x11ec] ss:$16 sps:$4 sm:$0xff]  }
 0x2fb   : > { %7576 = vmatprep.subr.bf16.mxu1 %v10438_v18  ;;  %v10510_v1 = vld [vmem:[%s14410_s1 + $0x13ec] ss:$16 sps:$4 sm:$0xff]   ;;  %v10505_v18 = vld [vmem:[%s14410_s1 + $0x11e8] ss:$16 sps:$4 sm:$0xff]  }
 0x2fd   : > { %7534 = vmatpush2.bf16.msra.mxu0 %v10433_v20  ;;  %v10508_v20 = vld [vmem:[%s14410_s1 + $0x13e8] ss:$16 sps:$4 sm:$0xff]  }
 0x2fe   : > { %7577 = vmatpush2.bf16.msra.mxu1 %v10436_v19  ;;  %7535 = vmatprep.subr.bf16.mxu0 %v10441_v13  ;;  %v10513_v19 = vld [vmem:[%s14410_s1 + $0x11cc] ss:$16 sps:$4 sm:$0xff]  }
 0x2ff   : > { %7578 = vmatprep.subr.bf16.mxu1 %v10444_v58  ;;  %v10516_v13 = vld [vmem:[%s14410_s1 + $0x13cc] ss:$16 sps:$4 sm:$0xff]   ;;  %v10511_v58 = vld [vmem:[%s14410_s1 + $0x11c8] ss:$16 sps:$4 sm:$0xff]  }
 0x301   : > { %7536 = vmatpush2.bf16.msra.mxu0 %v10439_v59  ;;  %v10514_v59 = vld [vmem:[%s14410_s1 + $0x13c8] ss:$16 sps:$4 sm:$0xff]  }
 0x302   : > { %7579 = vmatpush2.bf16.msra.mxu1 %v10442_v61  ;;  %7537 = vmatprep.subr.bf16.mxu0 %v10447_v41  ;;  %v10519_v61 = vld [vmem:[%s14410_s1 + $0x11ac] ss:$16 sps:$4 sm:$0xff]  }
 0x303   : > { %7580 = vmatprep.subr.bf16.mxu1 %v10450_v23  ;;  %v10522_v41 = vld [vmem:[%s14410_s1 + $0x13ac] ss:$16 sps:$4 sm:$0xff]   ;;  %v10517_v23 = vld [vmem:[%s14410_s1 + $0x11a8] ss:$16 sps:$4 sm:$0xff]  }
 0x305   : > { %7538 = vmatpush2.bf16.msra.mxu0 %v10445_v17  ;;  %v10520_v17 = vld [vmem:[%s14410_s1 + $0x13a8] ss:$16 sps:$4 sm:$0xff]  }
 0x306   : > { %7581 = vmatpush2.bf16.msra.mxu1 %v10448_v22  ;;  %7539 = vmatprep.subr.bf16.mxu0 %v10453_v21  ;;  %v10525_v22 = vld [vmem:[%s14410_s1 + $0x118c] ss:$16 sps:$4 sm:$0xff]  }
 0x307   : > { %7582 = vmatprep.subr.bf16.mxu1 %v10456_v48  ;;  %v10528_v21 = vld [vmem:[%s14410_s1 + $0x138c] ss:$16 sps:$4 sm:$0xff]   ;;  %v10523_v48 = vld [vmem:[%s14410_s1 + $0x1188] ss:$16 sps:$4 sm:$0xff]  }
 0x309   : > { %7540 = vmatpush2.bf16.msra.mxu0 %v10451_v49  ;;  %v10526_v49 = vld [vmem:[%s14410_s1 + $0x1388] ss:$16 sps:$4 sm:$0xff]  }
 0x30a   : > { %7583 = vmatpush2.bf16.msra.mxu1 %v10454_v53  ;;  %7595 = vmatprep.subr.bf16.mxu0 %v10459_v33  ;;  %v10531_v53 = vld [vmem:[%s14410_s1 + $0x116c] ss:$16 sps:$4 sm:$0xff]  }
 0x30b   : > { %7638 = vmatprep.subr.bf16.mxu1 %v10462_v3  ;;  %v10534_v33 = vld [vmem:[%s14410_s1 + $0x136c] ss:$16 sps:$4 sm:$0xff]   ;;  %v10529_v3 = vld [vmem:[%s14410_s1 + $0x1168] ss:$16 sps:$4 sm:$0xff]  }
 0x30c   : > { %7542 = vmatmul.mubr.bf16.vlgmr.msra.gmra.mxu0 %v11784_v10  ;;  %v10474_v10 = vld [vmem:[%s14410_s1 + $0x12ac] ss:$16 sps:$4 sm:$0xff]  }
 0x30d   : > { %7585 = vmatmul.mubr.bf16.vlgmr.msra.gmra.mxu1 %v11788_v11  ;;  %7596 = vmatpush1.bf16.msra.mxu0 %v10457_v42  ;;  %v10469_v11 = vld [vmem:[%s14410_s1 + $0x10a8] ss:$16 sps:$4 sm:$0xff]  }
 0x30e   : > { %7639 = vmatpush1.bf16.msra.mxu1 %v10460_v6  ;;  %7597 = vmatprep.subr.bf16.mxu0 %v10465_v14  ;;  %v10532_v42 = vld [vmem:[%s14410_s1 + $0x1368] ss:$16 sps:$4 sm:$0xff]   ;;  %v10537_v6 = vld [vmem:[%s14410_s1 + $0x114c] ss:$16 sps:$4 sm:$0xff]  }
 0x30f   : > { %7640 = vmatprep.subr.bf16.mxu1 %v10468_v31  ;;  %7627 = vmatprep.mubr.bf16.mxu0 %v11804_v47  ;;  %v10480_v47 = vld [vmem:[%s14410_s1 + $0x128c] ss:$16 sps:$4 sm:$0xff]   ;;  %v10535_v31 = vld [vmem:[%s14410_s1 + $0x1148] ss:$16 sps:$4 sm:$0xff]  }
 0x310   : > { %7670 = vmatprep.mubr.bf16.mxu1 %v11808_v50  ;;  %v10475_v50 = vld [vmem:[%s14410_s1 + $0x1088] ss:$16 sps:$4 sm:$0xff]   ;;  %v10540_v14 = vld [vmem:[%s14410_s1 + $0x134c] ss:$16 sps:$4 sm:$0xff]  }
 0x311   : > { %7598 = vmatpush1.bf16.msra.mxu0 %v10463_v12  ;;  %v10538_v12 = vld [vmem:[%s14410_s1 + $0x1348] ss:$16 sps:$4 sm:$0xff]  }
 0x312   : > { %7641 = vmatpush1.bf16.msra.mxu1 %v10466_v26  ;;  %7599 = vmatprep.subr.bf16.mxu0 %v10471_v0  ;;  %v10543_v26 = vld [vmem:[%s14410_s1 + $0x112c] ss:$16 sps:$4 sm:$0xff]  }
 0x313   : > { %7642 = vmatprep.subr.bf16.mxu1 %v10474_v10  ;;  %v10546_v0 = vld [vmem:[%s14410_s1 + $0x132c] ss:$16 sps:$4 sm:$0xff]   ;;  %v10541_v10 = vld [vmem:[%s14410_s1 + $0x1128] ss:$16 sps:$4 sm:$0xff]  }
 0x315   : > { %7600 = vmatpush1.bf16.msra.mxu0 %v10469_v11  ;;  %v10544_v11 = vld [vmem:[%s14410_s1 + $0x1328] ss:$16 sps:$4 sm:$0xff]  }
 0x316   : > { %7643 = vmatpush1.bf16.msra.mxu1 %v10472_v29  ;;  %7601 = vmatprep.subr.bf16.mxu0 %v10477_v27  ;;  %v10549_v29 = vld [vmem:[%s14410_s1 + $0x110c] ss:$16 sps:$4 sm:$0xff]  }
 0x317   : > { %7644 = vmatprep.subr.bf16.mxu1 %v10480_v47  ;;  %v10552_v27 = vld [vmem:[%s14410_s1 + $0x130c] ss:$16 sps:$4 sm:$0xff]   ;;  %v10547_v47 = vld [vmem:[%s14410_s1 + $0x1108] ss:$16 sps:$4 sm:$0xff]  }
 0x319   : > { %7602 = vmatpush1.bf16.msra.mxu0 %v10475_v50  ;;  %v10550_v50 = vld [vmem:[%s14410_s1 + $0x1308] ss:$16 sps:$4 sm:$0xff]  }
 0x31a   : > { %7645 = vmatpush1.bf16.msra.mxu1 %v10478_v16  ;;  %7603 = vmatprep.subr.bf16.mxu0 %v10483_v60  ;;  %v10555_v16 = vld [vmem:[%s14410_s1 + $0x14ec] ss:$16 sps:$4 sm:$0xff]  }
 0x31b   : > { %7646 = vmatprep.subr.bf16.mxu1 %v10486_v54  ;;  %v10558_v60 = vld [vmem:[%s14410_s1 + $0x16ec] ss:$16 sps:$4 sm:$0xff]   ;;  %v10553_v54 = vld [vmem:[%s14410_s1 + $0x14e8] ss:$16 sps:$4 sm:$0xff]  }
 0x31d   : > { %7604 = vmatpush1.bf16.msra.mxu0 %v10481_v7  ;;  %v10556_v7 = vld [vmem:[%s14410_s1 + $0x16e8] ss:$16 sps:$4 sm:$0xff]  }
 0x31e   : > { %7647 = vmatpush1.bf16.msra.mxu1 %v10484_v4  ;;  %7605 = vmatprep.subr.bf16.mxu0 %v10489_v9  ;;  %v10561_v4 = vld [vmem:[%s14410_s1 + $0x14cc] ss:$16 sps:$4 sm:$0xff]  }
 0x31f   : > { %7648 = vmatprep.subr.bf16.mxu1 %v10492_v52  ;;  %v10564_v9 = vld [vmem:[%s14410_s1 + $0x16cc] ss:$16 sps:$4 sm:$0xff]   ;;  %v10559_v52 = vld [vmem:[%s14410_s1 + $0x14c8] ss:$16 sps:$4 sm:$0xff]  }
 0x321   : > { %7606 = vmatpush1.bf16.msra.mxu0 %v10487_v38  ;;  %v10562_v38 = vld [vmem:[%s14410_s1 + $0x16c8] ss:$16 sps:$4 sm:$0xff]  }
 0x322   : > { %7649 = vmatpush1.bf16.msra.mxu1 %v10490_v2  ;;  %7607 = vmatprep.subr.bf16.mxu0 %v10495_v46  ;;  %v10567_v2 = vld [vmem:[%s14410_s1 + $0x14ac] ss:$16 sps:$4 sm:$0xff]   ;;  %v10568_v46 = vld [vmem:[%s14410_s1 + $0x16a8] ss:$16 sps:$4 sm:$0xff]  }
 0x323   : > { %7650 = vmatprep.subr.bf16.mxu1 %v10498_v51  ;;  %v10573_v51 = vld [vmem:[%s14410_s1 + $0x148c] ss:$16 sps:$4 sm:$0xff]  }
 0x325   : > { %7608 = vmatpush1.bf16.msra.mxu0 %v10493_v32  ;;  %v10574_v32 = vld [vmem:[%s14410_s1 + $0x1688] ss:$16 sps:$4 sm:$0xff]  }
 0x326   : > { %7651 = vmatpush1.bf16.msra.mxu1 %v10496_v8  ;;  %7609 = vmatprep.subr.bf16.mxu0 %v10501_v43  ;;  %v10579_v8 = vld [vmem:[%s14410_s1 + $0x146c] ss:$16 sps:$4 sm:$0xff]  }
 0x327   : > { %7652 = vmatprep.subr.bf16.mxu1 %v10504_v63  ;;  %v10582_v43 = vld [vmem:[%s14410_s1 + $0x166c] ss:$16 sps:$4 sm:$0xff]   ;;  %v10577_v63 = vld [vmem:[%s14410_s1 + $0x1468] ss:$16 sps:$4 sm:$0xff]  }
 0x329   : > { %7610 = vmatpush1.bf16.msra.mxu0 %v10499_v5  ;;  %v10580_v5 = vld [vmem:[%s14410_s1 + $0x1668] ss:$16 sps:$4 sm:$0xff]  }
 0x32a   : > { %7653 = vmatpush1.bf16.msra.mxu1 %v10502_v15  ;;  %7611 = vmatprep.subr.bf16.mxu0 %v10507_v28  ;;  %v10585_v15 = vld [vmem:[%s14410_s1 + $0x144c] ss:$16 sps:$4 sm:$0xff]  }
 0x32b   : > { %7654 = vmatprep.subr.bf16.mxu1 %v10510_v1  ;;  %v10588_v28 = vld [vmem:[%s14410_s1 + $0x164c] ss:$16 sps:$4 sm:$0xff]   ;;  %v10583_v1 = vld [vmem:[%s14410_s1 + $0x1448] ss:$16 sps:$4 sm:$0xff]  }
 0x32d   : > { %7612 = vmatpush2.bf16.msra.mxu0 %v10505_v18  ;;  %v10586_v18 = vld [vmem:[%s14410_s1 + $0x1648] ss:$16 sps:$4 sm:$0xff]  }
 0x32e   : > { %7655 = vmatpush2.bf16.msra.mxu1 %v10508_v20  ;;  %7613 = vmatprep.subr.bf16.mxu0 %v10513_v19  ;;  %v10591_v20 = vld [vmem:[%s14410_s1 + $0x142c] ss:$16 sps:$4 sm:$0xff]  }
 0x32f   : > { %7656 = vmatprep.subr.bf16.mxu1 %v10516_v13  ;;  %v10594_v19 = vld [vmem:[%s14410_s1 + $0x162c] ss:$16 sps:$4 sm:$0xff]   ;;  %v10589_v13 = vld [vmem:[%s14410_s1 + $0x1428] ss:$16 sps:$4 sm:$0xff]  }
 0x331   : > { %7614 = vmatpush2.bf16.msra.mxu0 %v10511_v58  ;;  %v10592_v58 = vld [vmem:[%s14410_s1 + $0x1628] ss:$16 sps:$4 sm:$0xff]  }
 0x332   : > { %7657 = vmatpush2.bf16.msra.mxu1 %v10514_v59  ;;  %7615 = vmatprep.subr.bf16.mxu0 %v10519_v61  ;;  %v10597_v59 = vld [vmem:[%s14410_s1 + $0x140c] ss:$16 sps:$4 sm:$0xff]  }
 0x333   : > { %7658 = vmatprep.subr.bf16.mxu1 %v10522_v41  ;;  %v10600_v61 = vld [vmem:[%s14410_s1 + $0x160c] ss:$16 sps:$4 sm:$0xff]   ;;  %v10595_v41 = vld [vmem:[%s14410_s1 + $0x1408] ss:$16 sps:$4 sm:$0xff]  }
 0x335   : > { %7616 = vmatpush2.bf16.msra.mxu0 %v10517_v23  ;;  %v10598_v23 = vld [vmem:[%s14410_s1 + $0x1608] ss:$16 sps:$4 sm:$0xff]  }
 0x336   : > { %7659 = vmatpush2.bf16.msra.mxu1 %v10520_v17  ;;  %7617 = vmatprep.subr.bf16.mxu0 %v10525_v22  ;;  %v10603_v17 = vld [vmem:[%s14410_s1 + $0x15ec] ss:$16 sps:$4 sm:$0xff]  }
 0x337   : > { %7660 = vmatprep.subr.bf16.mxu1 %v10528_v21  ;;  %v10606_v22 = vld [vmem:[%s14410_s1 + $0x17ec] ss:$16 sps:$4 sm:$0xff]   ;;  %v10601_v21 = vld [vmem:[%s14410_s1 + $0x15e8] ss:$16 sps:$4 sm:$0xff]  }
 0x339   : > { %7618 = vmatpush2.bf16.msra.mxu0 %v10523_v48  ;;  %v10604_v48 = vld [vmem:[%s14410_s1 + $0x17e8] ss:$16 sps:$4 sm:$0xff]  }
 0x33a   : > { %7661 = vmatpush2.bf16.msra.mxu1 %v10526_v49  ;;  %7619 = vmatprep.subr.bf16.mxu0 %v10531_v53  ;;  %v10609_v49 = vld [vmem:[%s14410_s1 + $0x15cc] ss:$16 sps:$4 sm:$0xff]  }
 0x33b   : > { %7662 = vmatprep.subr.bf16.mxu1 %v10534_v33  ;;  %v10612_v53 = vld [vmem:[%s14410_s1 + $0x17cc] ss:$16 sps:$4 sm:$0xff]   ;;  %v10607_v33 = vld [vmem:[%s14410_s1 + $0x15c8] ss:$16 sps:$4 sm:$0xff]  }
 0x33d   : > { %7620 = vmatpush2.bf16.msra.mxu0 %v10529_v3  ;;  %v10610_v3 = vld [vmem:[%s14410_s1 + $0x17c8] ss:$16 sps:$4 sm:$0xff]  }
 0x33e   : > { %7663 = vmatpush2.bf16.msra.mxu1 %v10532_v42  ;;  %7621 = vmatprep.subr.bf16.mxu0 %v10537_v6  ;;  %v10615_v42 = vld [vmem:[%s14410_s1 + $0x15ac] ss:$16 sps:$4 sm:$0xff]  }
 0x33f   : > { %7664 = vmatprep.subr.bf16.mxu1 %v10540_v14  ;;  %v10618_v6 = vld [vmem:[%s14410_s1 + $0x17ac] ss:$16 sps:$4 sm:$0xff]   ;;  %v10613_v14 = vld [vmem:[%s14410_s1 + $0x15a8] ss:$16 sps:$4 sm:$0xff]  }
 0x341   : > { %7622 = vmatpush2.bf16.msra.mxu0 %v10535_v31  ;;  %v10616_v31 = vld [vmem:[%s14410_s1 + $0x17a8] ss:$16 sps:$4 sm:$0xff]  }
 0x342   : > { %7665 = vmatpush2.bf16.msra.mxu1 %v10538_v12  ;;  %7623 = vmatprep.subr.bf16.mxu0 %v10543_v26  ;;  %v10621_v12 = vld [vmem:[%s14410_s1 + $0x158c] ss:$16 sps:$4 sm:$0xff]  }
 0x343   : > { %7666 = vmatprep.subr.bf16.mxu1 %v10546_v0  ;;  %v10624_v26 = vld [vmem:[%s14410_s1 + $0x178c] ss:$16 sps:$4 sm:$0xff]   ;;  %v10619_v0 = vld [vmem:[%s14410_s1 + $0x1588] ss:$16 sps:$4 sm:$0xff]  }
 0x345   : > { %7624 = vmatpush2.bf16.msra.mxu0 %v10541_v10  ;;  %v10622_v10 = vld [vmem:[%s14410_s1 + $0x1788] ss:$16 sps:$4 sm:$0xff]  }
 0x346   : > { %7667 = vmatpush2.bf16.msra.mxu1 %v10544_v11  ;;  %7625 = vmatprep.subr.bf16.mxu0 %v10549_v29  ;;  %v10627_v11 = vld [vmem:[%s14410_s1 + $0x156c] ss:$16 sps:$4 sm:$0xff]  }
 0x347   : > { %7668 = vmatprep.subr.bf16.mxu1 %v10552_v27  ;;  %v10630_v29 = vld [vmem:[%s14410_s1 + $0x176c] ss:$16 sps:$4 sm:$0xff]   ;;  %v10625_v27 = vld [vmem:[%s14410_s1 + $0x1568] ss:$16 sps:$4 sm:$0xff]  }
 0x349   : > { %7626 = vmatpush2.bf16.msra.mxu0 %v10547_v47  ;;  %v10628_v47 = vld [vmem:[%s14410_s1 + $0x1768] ss:$16 sps:$4 sm:$0xff]  }
 0x34a   : > { %7669 = vmatpush2.bf16.msra.mxu1 %v10550_v50  ;;  %7681 = vmatprep.subr.bf16.mxu0 %v10555_v16  ;;  %v10633_v50 = vld [vmem:[%s14410_s1 + $0x154c] ss:$16 sps:$4 sm:$0xff]  }
 0x34b   : > { %7724 = vmatprep.subr.bf16.mxu1 %v10558_v60  ;;  %v10636_v16 = vld [vmem:[%s14410_s1 + $0x174c] ss:$16 sps:$4 sm:$0xff]   ;;  %v10631_v60 = vld [vmem:[%s14410_s1 + $0x1548] ss:$16 sps:$4 sm:$0xff]  }
 0x34c   : > { %7628 = vmatmul.mubr.bf16.vlgmr.msra.gmra.mxu0 %v12002_v44  ;;  %v10570_v44 = vld [vmem:[%s14410_s1 + $0x16ac] ss:$16 sps:$4 sm:$0xff]  }
 0x34d   : > { %7671 = vmatmul.mubr.bf16.vlgmr.msra.gmra.mxu1 %v12006_v45  ;;  %7682 = vmatpush1.bf16.msra.mxu0 %v10553_v54  ;;  %v10565_v45 = vld [vmem:[%s14410_s1 + $0x14a8] ss:$16 sps:$4 sm:$0xff]  }
 0x34e   : > { %7725 = vmatpush1.bf16.msra.mxu1 %v10556_v7  ;;  %7683 = vmatprep.subr.bf16.mxu0 %v10561_v4  ;;  %v10634_v54 = vld [vmem:[%s14410_s1 + $0x1748] ss:$16 sps:$4 sm:$0xff]   ;;  %v10639_v7 = vld [vmem:[%s14410_s1 + $0x152c] ss:$16 sps:$4 sm:$0xff]  }
 0x34f   : > { %7726 = vmatprep.subr.bf16.mxu1 %v10564_v9  ;;  %7713 = vmatprep.mubr.bf16.mxu0 %v12034_v56  ;;  %v10576_v56 = vld [vmem:[%s14410_s1 + $0x168c] ss:$16 sps:$4 sm:$0xff]   ;;  %v10637_v9 = vld [vmem:[%s14410_s1 + $0x1528] ss:$16 sps:$4 sm:$0xff]  }
 0x350   : > { %7756 = vmatprep.mubr.bf16.mxu1 %v12038_v57  ;;  %v10571_v57 = vld [vmem:[%s14410_s1 + $0x1488] ss:$16 sps:$4 sm:$0xff]   ;;  %v10642_v4 = vld [vmem:[%s14410_s1 + $0x172c] ss:$16 sps:$4 sm:$0xff]  }
 0x351   : > { %7684 = vmatpush1.bf16.msra.mxu0 %v10559_v52  ;;  %v10640_v52 = vld [vmem:[%s14410_s1 + $0x1728] ss:$16 sps:$4 sm:$0xff]  }
 0x352   : > { %7727 = vmatpush1.bf16.msra.mxu1 %v10562_v38  ;;  %7685 = vmatprep.subr.bf16.mxu0 %v10567_v2  ;;  %v10645_v38 = vld [vmem:[%s14410_s1 + $0x150c] ss:$16 sps:$4 sm:$0xff]  }
 0x353   : > { %7728 = vmatprep.subr.bf16.mxu1 %v10570_v44  ;;  %v10648_v2 = vld [vmem:[%s14410_s1 + $0x170c] ss:$16 sps:$4 sm:$0xff]   ;;  %v10643_v44 = vld [vmem:[%s14410_s1 + $0x1508] ss:$16 sps:$4 sm:$0xff]  }
 0x355   : > { %7686 = vmatpush1.bf16.msra.mxu0 %v10565_v45  ;;  %v10646_v45 = vld [vmem:[%s14410_s1 + $0x1708] ss:$16 sps:$4 sm:$0xff]  }
 0x356   : > { %7729 = vmatpush1.bf16.msra.mxu1 %v10568_v46  ;;  %7687 = vmatprep.subr.bf16.mxu0 %v10573_v51  ;;  %v10651_v46 = vld [vmem:[%s14410_s1 + $0x18ec] ss:$16 sps:$4 sm:$0xff]  }
 0x357   : > { %7730 = vmatprep.subr.bf16.mxu1 %v10576_v56  ;;  %v10654_v51 = vld [vmem:[%s14410_s1 + $0x1aec] ss:$16 sps:$4 sm:$0xff]   ;;  %v10649_v56 = vld [vmem:[%s14410_s1 + $0x18e8] ss:$16 sps:$4 sm:$0xff]  }
 0x359   : > { %7688 = vmatpush1.bf16.msra.mxu0 %v10571_v57  ;;  %v10652_v57 = vld [vmem:[%s14410_s1 + $0x1ae8] ss:$16 sps:$4 sm:$0xff]  }
 0x35a   : > { %7731 = vmatpush1.bf16.msra.mxu1 %v10574_v32  ;;  %7689 = vmatprep.subr.bf16.mxu0 %v10579_v8  ;;  %v10657_v32 = vld [vmem:[%s14410_s1 + $0x18cc] ss:$16 sps:$4 sm:$0xff]  }
 0x35b   : > { %7732 = vmatprep.subr.bf16.mxu1 %v10582_v43  ;;  %v10660_v8 = vld [vmem:[%s14410_s1 + $0x1acc] ss:$16 sps:$4 sm:$0xff]   ;;  %v10655_v43 = vld [vmem:[%s14410_s1 + $0x18c8] ss:$16 sps:$4 sm:$0xff]  }
 0x35d   : > { %7690 = vmatpush1.bf16.msra.mxu0 %v10577_v63  ;;  %v10658_v63 = vld [vmem:[%s14410_s1 + $0x1ac8] ss:$16 sps:$4 sm:$0xff]  }
 0x35e   : > { %7733 = vmatpush1.bf16.msra.mxu1 %v10580_v5  ;;  %7691 = vmatprep.subr.bf16.mxu0 %v10585_v15  ;;  %v10663_v5 = vld [vmem:[%s14410_s1 + $0x18ac] ss:$16 sps:$4 sm:$0xff]   ;;  %v10664_v15 = vld [vmem:[%s14410_s1 + $0x1aa8] ss:$16 sps:$4 sm:$0xff]  }
 0x35f   : > { %7734 = vmatprep.subr.bf16.mxu1 %v10588_v28  ;;  %v10669_v28 = vld [vmem:[%s14410_s1 + $0x188c] ss:$16 sps:$4 sm:$0xff]  }
 0x361   : > { %7692 = vmatpush1.bf16.msra.mxu0 %v10583_v1  ;;  %v10670_v1 = vld [vmem:[%s14410_s1 + $0x1a88] ss:$16 sps:$4 sm:$0xff]  }
 0x362   : > { %7735 = vmatpush1.bf16.msra.mxu1 %v10586_v18  ;;  %7693 = vmatprep.subr.bf16.mxu0 %v10591_v20  ;;  %v10675_v18 = vld [vmem:[%s14410_s1 + $0x186c] ss:$16 sps:$4 sm:$0xff]  }
 0x363   : > { %7736 = vmatprep.subr.bf16.mxu1 %v10594_v19  ;;  %v10678_v20 = vld [vmem:[%s14410_s1 + $0x1a6c] ss:$16 sps:$4 sm:$0xff]   ;;  %v10673_v19 = vld [vmem:[%s14410_s1 + $0x1868] ss:$16 sps:$4 sm:$0xff]  }
 0x365   : > { %7694 = vmatpush1.bf16.msra.mxu0 %v10589_v13  ;;  %v10676_v13 = vld [vmem:[%s14410_s1 + $0x1a68] ss:$16 sps:$4 sm:$0xff]  }
 0x366   : > { %7737 = vmatpush1.bf16.msra.mxu1 %v10592_v58  ;;  %7695 = vmatprep.subr.bf16.mxu0 %v10597_v59  ;;  %v10681_v58 = vld [vmem:[%s14410_s1 + $0x184c] ss:$16 sps:$4 sm:$0xff]  }
 0x367   : > { %7738 = vmatprep.subr.bf16.mxu1 %v10600_v61  ;;  %v10684_v59 = vld [vmem:[%s14410_s1 + $0x1a4c] ss:$16 sps:$4 sm:$0xff]   ;;  %v10679_v61 = vld [vmem:[%s14410_s1 + $0x1848] ss:$16 sps:$4 sm:$0xff]  }
 0x369   : > { %7696 = vmatpush1.bf16.msra.mxu0 %v10595_v41  ;;  %v10682_v41 = vld [vmem:[%s14410_s1 + $0x1a48] ss:$16 sps:$4 sm:$0xff]  }
 0x36a   : > { %7739 = vmatpush1.bf16.msra.mxu1 %v10598_v23  ;;  %7697 = vmatprep.subr.bf16.mxu0 %v10603_v17  ;;  %v10687_v23 = vld [vmem:[%s14410_s1 + $0x182c] ss:$16 sps:$4 sm:$0xff]  }
 0x36b   : > { %7740 = vmatprep.subr.bf16.mxu1 %v10606_v22  ;;  %v10690_v17 = vld [vmem:[%s14410_s1 + $0x1a2c] ss:$16 sps:$4 sm:$0xff]   ;;  %v10685_v22 = vld [vmem:[%s14410_s1 + $0x1828] ss:$16 sps:$4 sm:$0xff]  }
 0x36d   : > { %7698 = vmatpush2.bf16.msra.mxu0 %v10601_v21  ;;  %v10688_v21 = vld [vmem:[%s14410_s1 + $0x1a28] ss:$16 sps:$4 sm:$0xff]  }
 0x36e   : > { %7741 = vmatpush2.bf16.msra.mxu1 %v10604_v48  ;;  %7699 = vmatprep.subr.bf16.mxu0 %v10609_v49  ;;  %v10693_v48 = vld [vmem:[%s14410_s1 + $0x180c] ss:$16 sps:$4 sm:$0xff]  }
 0x36f   : > { %7742 = vmatprep.subr.bf16.mxu1 %v10612_v53  ;;  %v10696_v49 = vld [vmem:[%s14410_s1 + $0x1a0c] ss:$16 sps:$4 sm:$0xff]   ;;  %v10691_v53 = vld [vmem:[%s14410_s1 + $0x1808] ss:$16 sps:$4 sm:$0xff]  }
 0x371   : > { %7700 = vmatpush2.bf16.msra.mxu0 %v10607_v33  ;;  %v10694_v33 = vld [vmem:[%s14410_s1 + $0x1a08] ss:$16 sps:$4 sm:$0xff]  }
 0x372   : > { %7743 = vmatpush2.bf16.msra.mxu1 %v10610_v3  ;;  %7701 = vmatprep.subr.bf16.mxu0 %v10615_v42  ;;  %v10699_v3 = vld [vmem:[%s14410_s1 + $0x19ec] ss:$16 sps:$4 sm:$0xff]  }
 0x373   : > { %7744 = vmatprep.subr.bf16.mxu1 %v10618_v6  ;;  %v10702_v42 = vld [vmem:[%s14410_s1 + $0x1bec] ss:$16 sps:$4 sm:$0xff]   ;;  %v10697_v6 = vld [vmem:[%s14410_s1 + $0x19e8] ss:$16 sps:$4 sm:$0xff]  }
 0x375   : > { %7702 = vmatpush2.bf16.msra.mxu0 %v10613_v14  ;;  %v10700_v14 = vld [vmem:[%s14410_s1 + $0x1be8] ss:$16 sps:$4 sm:$0xff]  }
 0x376   : > { %7745 = vmatpush2.bf16.msra.mxu1 %v10616_v31  ;;  %7703 = vmatprep.subr.bf16.mxu0 %v10621_v12  ;;  %v10705_v31 = vld [vmem:[%s14410_s1 + $0x19cc] ss:$16 sps:$4 sm:$0xff]  }
 0x377   : > { %7746 = vmatprep.subr.bf16.mxu1 %v10624_v26  ;;  %v10708_v12 = vld [vmem:[%s14410_s1 + $0x1bcc] ss:$16 sps:$4 sm:$0xff]   ;;  %v10703_v26 = vld [vmem:[%s14410_s1 + $0x19c8] ss:$16 sps:$4 sm:$0xff]  }
 0x379   : > { %7704 = vmatpush2.bf16.msra.mxu0 %v10619_v0  ;;  %v10706_v0 = vld [vmem:[%s14410_s1 + $0x1bc8] ss:$16 sps:$4 sm:$0xff]  }
 0x37a   : > { %7747 = vmatpush2.bf16.msra.mxu1 %v10622_v10  ;;  %7705 = vmatprep.subr.bf16.mxu0 %v10627_v11  ;;  %v10711_v10 = vld [vmem:[%s14410_s1 + $0x19ac] ss:$16 sps:$4 sm:$0xff]  }
 0x37b   : > { %7748 = vmatprep.subr.bf16.mxu1 %v10630_v29  ;;  %v10714_v11 = vld [vmem:[%s14410_s1 + $0x1bac] ss:$16 sps:$4 sm:$0xff]   ;;  %v10709_v29 = vld [vmem:[%s14410_s1 + $0x19a8] ss:$16 sps:$4 sm:$0xff]  }
 0x37d   : > { %7706 = vmatpush2.bf16.msra.mxu0 %v10625_v27  ;;  %v10712_v27 = vld [vmem:[%s14410_s1 + $0x1ba8] ss:$16 sps:$4 sm:$0xff]  }
 0x37e   : > { %7749 = vmatpush2.bf16.msra.mxu1 %v10628_v47  ;;  %7707 = vmatprep.subr.bf16.mxu0 %v10633_v50  ;;  %v10717_v47 = vld [vmem:[%s14410_s1 + $0x198c] ss:$16 sps:$4 sm:$0xff]  }
 0x37f   : > { %7750 = vmatprep.subr.bf16.mxu1 %v10636_v16  ;;  %v10720_v50 = vld [vmem:[%s14410_s1 + $0x1b8c] ss:$16 sps:$4 sm:$0xff]   ;;  %v10715_v16 = vld [vmem:[%s14410_s1 + $0x1988] ss:$16 sps:$4 sm:$0xff]  }
 0x381   : > { %7708 = vmatpush2.bf16.msra.mxu0 %v10631_v60  ;;  %v10718_v60 = vld [vmem:[%s14410_s1 + $0x1b88] ss:$16 sps:$4 sm:$0xff]  }
 0x382   : > { %7751 = vmatpush2.bf16.msra.mxu1 %v10634_v54  ;;  %7709 = vmatprep.subr.bf16.mxu0 %v10639_v7  ;;  %v10723_v54 = vld [vmem:[%s14410_s1 + $0x196c] ss:$16 sps:$4 sm:$0xff]  }
 0x383   : > { %7752 = vmatprep.subr.bf16.mxu1 %v10642_v4  ;;  %v10726_v7 = vld [vmem:[%s14410_s1 + $0x1b6c] ss:$16 sps:$4 sm:$0xff]   ;;  %v10721_v4 = vld [vmem:[%s14410_s1 + $0x1968] ss:$16 sps:$4 sm:$0xff]  }
 0x385   : > { %7710 = vmatpush2.bf16.msra.mxu0 %v10637_v9  ;;  %v10724_v9 = vld [vmem:[%s14410_s1 + $0x1b68] ss:$16 sps:$4 sm:$0xff]  }
 0x386   : > { %7753 = vmatpush2.bf16.msra.mxu1 %v10640_v52  ;;  %7711 = vmatprep.subr.bf16.mxu0 %v10645_v38  ;;  %v10729_v52 = vld [vmem:[%s14410_s1 + $0x194c] ss:$16 sps:$4 sm:$0xff]  }
 0x387   : > { %7754 = vmatprep.subr.bf16.mxu1 %v10648_v2  ;;  %v10732_v38 = vld [vmem:[%s14410_s1 + $0x1b4c] ss:$16 sps:$4 sm:$0xff]   ;;  %v10727_v2 = vld [vmem:[%s14410_s1 + $0x1948] ss:$16 sps:$4 sm:$0xff]  }
 0x389   : > { %7712 = vmatpush2.bf16.msra.mxu0 %v10643_v44  ;;  %v10730_v44 = vld [vmem:[%s14410_s1 + $0x1b48] ss:$16 sps:$4 sm:$0xff]  }
 0x38a   : > { %7755 = vmatpush2.bf16.msra.mxu1 %v10646_v45  ;;  %7767 = vmatprep.subr.bf16.mxu0 %v10651_v46  ;;  %v10735_v45 = vld [vmem:[%s14410_s1 + $0x192c] ss:$16 sps:$4 sm:$0xff]  }
 0x38b   : > { %7810 = vmatprep.subr.bf16.mxu1 %v10654_v51  ;;  %v10738_v46 = vld [vmem:[%s14410_s1 + $0x1b2c] ss:$16 sps:$4 sm:$0xff]   ;;  %v10733_v51 = vld [vmem:[%s14410_s1 + $0x1928] ss:$16 sps:$4 sm:$0xff]  }
 0x38c   : > { %7714 = vmatmul.mubr.bf16.vlgmr.msra.gmra.mxu0 %v12226_v24  ;;  %v10666_v24 = vld [vmem:[%s14410_s1 + $0x1aac] ss:$16 sps:$4 sm:$0xff]  }
 0x38d   : > { %7757 = vmatmul.mubr.bf16.vlgmr.msra.gmra.mxu1 %v12230_v25  ;;  %7768 = vmatpush1.bf16.msra.mxu0 %v10649_v56  ;;  %v10661_v25 = vld [vmem:[%s14410_s1 + $0x18a8] ss:$16 sps:$4 sm:$0xff]  }
 0x38e   : > { %7811 = vmatpush1.bf16.msra.mxu1 %v10652_v57  ;;  %7769 = vmatprep.subr.bf16.mxu0 %v10657_v32  ;;  %v10736_v56 = vld [vmem:[%s14410_s1 + $0x1b28] ss:$16 sps:$4 sm:$0xff]   ;;  %v10741_v57 = vld [vmem:[%s14410_s1 + $0x190c] ss:$16 sps:$4 sm:$0xff]  }
 0x38f   : > { %7812 = vmatprep.subr.bf16.mxu1 %v10660_v8  ;;  %7799 = vmatprep.mubr.bf16.mxu0 %v12258_v36  ;;  %v10672_v36 = vld [vmem:[%s14410_s1 + $0x1a8c] ss:$16 sps:$4 sm:$0xff]   ;;  %v10739_v8 = vld [vmem:[%s14410_s1 + $0x1908] ss:$16 sps:$4 sm:$0xff]  }
 0x390   : > { %7842 = vmatprep.mubr.bf16.mxu1 %v12262_v37  ;;  %v10667_v37 = vld [vmem:[%s14410_s1 + $0x1888] ss:$16 sps:$4 sm:$0xff]   ;;  %v10744_v32 = vld [vmem:[%s14410_s1 + $0x1b0c] ss:$16 sps:$4 sm:$0xff]  }
 0x391   : > { %7770 = vmatpush1.bf16.msra.mxu0 %v10655_v43  ;;  %v10742_v43 = vld [vmem:[%s14410_s1 + $0x1b08] ss:$16 sps:$4 sm:$0xff]  }
 0x392   : > { %7813 = vmatpush1.bf16.msra.mxu1 %v10658_v63  ;;  %7771 = vmatprep.subr.bf16.mxu0 %v10663_v5  ;;  %v10747_v63 = vld [vmem:[%s14410_s1 + $0x1cec] ss:$16 sps:$4 sm:$0xff]  }
 0x393   : > { %7814 = vmatprep.subr.bf16.mxu1 %v10666_v24  ;;  %v10750_v5 = vld [vmem:[%s14410_s1 + $0x1eec] ss:$16 sps:$4 sm:$0xff]   ;;  %v10745_v24 = vld [vmem:[%s14410_s1 + $0x1ce8] ss:$16 sps:$4 sm:$0xff]  }
 0x395   : > { %7772 = vmatpush1.bf16.msra.mxu0 %v10661_v25  ;;  %v10748_v25 = vld [vmem:[%s14410_s1 + $0x1ee8] ss:$16 sps:$4 sm:$0xff]  }
 0x396   : > { %7815 = vmatpush1.bf16.msra.mxu1 %v10664_v15  ;;  %7773 = vmatprep.subr.bf16.mxu0 %v10669_v28  ;;  %v10753_v15 = vld [vmem:[%s14410_s1 + $0x1ccc] ss:$16 sps:$4 sm:$0xff]  }
 0x397   : > { %7816 = vmatprep.subr.bf16.mxu1 %v10672_v36  ;;  %v10756_v28 = vld [vmem:[%s14410_s1 + $0x1ecc] ss:$16 sps:$4 sm:$0xff]   ;;  %v14424_v36 = vld [vmem:[#allocation2_spill] sm:$0xff] }
 0x399   : > { %7774 = vmatpush1.bf16.msra.mxu0 %v10667_v37  ;;  %v10751_v37 = vld [vmem:[%s14410_s1 + $0x1cc8] ss:$16 sps:$4 sm:$0xff]  }
 0x39a   : > { %7817 = vmatpush1.bf16.msra.mxu1 %v10670_v1  ;;  %7775 = vmatprep.subr.bf16.mxu0 %v10675_v18  ;;  %v10754_v1 = vld [vmem:[%s14410_s1 + $0x1ec8] ss:$16 sps:$4 sm:$0xff]   ;;  %v10759_v18 = vld [vmem:[%s14410_s1 + $0x1cac] ss:$16 sps:$4 sm:$0xff]  }
 0x39b   : > { %7818 = vmatprep.subr.bf16.mxu1 %v10678_v20  ;;  %v14425_v20 = vld [vmem:[#allocation3_spill] sm:$0xff] }
 0x39d   : > { %7776 = vmatpush1.bf16.msra.mxu0 %v10673_v19  ;;  %v14426_v19 = vld [vmem:[#allocation4_spill] sm:$0xff] }
 0x39e   : > { %7819 = vmatpush1.bf16.msra.mxu1 %v10676_v13  ;;  %7777 = vmatprep.subr.bf16.mxu0 %v10681_v58  ;;  %v10757_v13 = vld [vmem:[%s14410_s1 + $0x1ca8] ss:$16 sps:$4 sm:$0xff]  }
 0x39f   : > { %7820 = vmatprep.subr.bf16.mxu1 %v10684_v59  ;;  %v10760_v58 = vld [vmem:[%s14410_s1 + $0x1ea8] ss:$16 sps:$4 sm:$0xff]   ;;  %v10765_v59 = vld [vmem:[%s14410_s1 + $0x1c8c] ss:$16 sps:$4 sm:$0xff]  }
 0x3a1   : > { %7778 = vmatpush1.bf16.msra.mxu0 %v10679_v61  ;;  %v10768_v61 = vld [vmem:[%s14410_s1 + $0x1e8c] ss:$16 sps:$4 sm:$0xff]  }
 0x3a2   : > { %7821 = vmatpush1.bf16.msra.mxu1 %v10682_v41  ;;  %7779 = vmatprep.subr.bf16.mxu0 %v10687_v23  ;;  %v10763_v41 = vld [vmem:[%s14410_s1 + $0x1c88] ss:$16 sps:$4 sm:$0xff]  }
 0x3a3   : > { %7822 = vmatprep.subr.bf16.mxu1 %v10690_v17  ;;  %v10766_v23 = vld [vmem:[%s14410_s1 + $0x1e88] ss:$16 sps:$4 sm:$0xff]   ;;  %v10771_v17 = vld [vmem:[%s14410_s1 + $0x1c6c] ss:$16 sps:$4 sm:$0xff]  }
 0x3a5   : > { %7780 = vmatpush1.bf16.msra.mxu0 %v10685_v22  ;;  %v10774_v22 = vld [vmem:[%s14410_s1 + $0x1e6c] ss:$16 sps:$4 sm:$0xff]  }
 0x3a6   : > { %7823 = vmatpush1.bf16.msra.mxu1 %v10688_v21  ;;  %7781 = vmatprep.subr.bf16.mxu0 %v10693_v48  ;;  %v10769_v21 = vld [vmem:[%s14410_s1 + $0x1c68] ss:$16 sps:$4 sm:$0xff]  }
 0x3a7   : > { %7824 = vmatprep.subr.bf16.mxu1 %v10696_v49  ;;  %v10772_v48 = vld [vmem:[%s14410_s1 + $0x1e68] ss:$16 sps:$4 sm:$0xff]   ;;  %v10777_v49 = vld [vmem:[%s14410_s1 + $0x1c4c] ss:$16 sps:$4 sm:$0xff]  }
 0x3a9   : > { %7782 = vmatpush1.bf16.msra.mxu0 %v10691_v53  ;;  %v10780_v53 = vld [vmem:[%s14410_s1 + $0x1e4c] ss:$16 sps:$4 sm:$0xff]  }
 0x3aa   : > { %7825 = vmatpush1.bf16.msra.mxu1 %v10694_v33  ;;  %7783 = vmatprep.subr.bf16.mxu0 %v10699_v3  ;;  %v10775_v33 = vld [vmem:[%s14410_s1 + $0x1c48] ss:$16 sps:$4 sm:$0xff]  }
 0x3ab   : > { %7826 = vmatprep.subr.bf16.mxu1 %v10702_v42  ;;  %v10778_v3 = vld [vmem:[%s14410_s1 + $0x1e48] ss:$16 sps:$4 sm:$0xff]   ;;  %v10783_v42 = vld [vmem:[%s14410_s1 + $0x1c2c] ss:$16 sps:$4 sm:$0xff]  }
 0x3ad   : > { %7784 = vmatpush2.bf16.msra.mxu0 %v10697_v6  ;;  %v10786_v6 = vld [vmem:[%s14410_s1 + $0x1e2c] ss:$16 sps:$4 sm:$0xff]  }
 0x3ae   : > { %7827 = vmatpush2.bf16.msra.mxu1 %v10700_v14  ;;  %7785 = vmatprep.subr.bf16.mxu0 %v10705_v31  ;;  %v10781_v14 = vld [vmem:[%s14410_s1 + $0x1c28] ss:$16 sps:$4 sm:$0xff]  }
 0x3af   : > { %7828 = vmatprep.subr.bf16.mxu1 %v10708_v12  ;;  %v10784_v31 = vld [vmem:[%s14410_s1 + $0x1e28] ss:$16 sps:$4 sm:$0xff]   ;;  %v10789_v12 = vld [vmem:[%s14410_s1 + $0x1c0c] ss:$16 sps:$4 sm:$0xff]  }
 0x3b1   : > { %7786 = vmatpush2.bf16.msra.mxu0 %v10703_v26  ;;  %v10792_v26 = vld [vmem:[%s14410_s1 + $0x1e0c] ss:$16 sps:$4 sm:$0xff]  }
 0x3b2   : > { %7829 = vmatpush2.bf16.msra.mxu1 %v10706_v0  ;;  %7787 = vmatprep.subr.bf16.mxu0 %v10711_v10  ;;  %v10787_v0 = vld [vmem:[%s14410_s1 + $0x1c08] ss:$16 sps:$4 sm:$0xff]  }
 0x3b3   : > { %7830 = vmatprep.subr.bf16.mxu1 %v10714_v11  ;;  %v10790_v10 = vld [vmem:[%s14410_s1 + $0x1e08] ss:$16 sps:$4 sm:$0xff]   ;;  %v10795_v11 = vld [vmem:[%s14410_s1 + $0x1dec] ss:$16 sps:$4 sm:$0xff]  }
 0x3b5   : > { %7788 = vmatpush2.bf16.msra.mxu0 %v10709_v29  ;;  %v10798_v29 = vld [vmem:[%s14410_s1 + $0x1fec] ss:$16 sps:$4 sm:$0xff]  }
 0x3b6   : > { %7831 = vmatpush2.bf16.msra.mxu1 %v10712_v27  ;;  %7789 = vmatprep.subr.bf16.mxu0 %v10717_v47  ;;  %v10793_v27 = vld [vmem:[%s14410_s1 + $0x1de8] ss:$16 sps:$4 sm:$0xff]  }
 0x3b7   : > { %7832 = vmatprep.subr.bf16.mxu1 %v10720_v50  ;;  %v10796_v47 = vld [vmem:[%s14410_s1 + $0x1fe8] ss:$16 sps:$4 sm:$0xff]   ;;  %v10801_v50 = vld [vmem:[%s14410_s1 + $0x1dcc] ss:$16 sps:$4 sm:$0xff]  }
 0x3b9   : > { %7790 = vmatpush2.bf16.msra.mxu0 %v10715_v16  ;;  %v10804_v16 = vld [vmem:[%s14410_s1 + $0x1fcc] ss:$16 sps:$4 sm:$0xff]  }
 0x3ba   : > { %7833 = vmatpush2.bf16.msra.mxu1 %v10718_v60  ;;  %7791 = vmatprep.subr.bf16.mxu0 %v10723_v54  ;;  %v10799_v60 = vld [vmem:[%s14410_s1 + $0x1dc8] ss:$16 sps:$4 sm:$0xff]  }
 0x3bb   : > { %7834 = vmatprep.subr.bf16.mxu1 %v10726_v7  ;;  %v10802_v54 = vld [vmem:[%s14410_s1 + $0x1fc8] ss:$16 sps:$4 sm:$0xff]   ;;  %v10807_v7 = vld [vmem:[%s14410_s1 + $0x1dac] ss:$16 sps:$4 sm:$0xff]  }
 0x3bd   : > { %7792 = vmatpush2.bf16.msra.mxu0 %v10721_v4  ;;  %v10810_v4 = vld [vmem:[%s14410_s1 + $0x1fac] ss:$16 sps:$4 sm:$0xff]  }
 0x3be   : > { %7835 = vmatpush2.bf16.msra.mxu1 %v10724_v9  ;;  %7793 = vmatprep.subr.bf16.mxu0 %v10729_v52  ;;  %v10805_v9 = vld [vmem:[%s14410_s1 + $0x1da8] ss:$16 sps:$4 sm:$0xff]  }
 0x3bf   : > { %7836 = vmatprep.subr.bf16.mxu1 %v10732_v38  ;;  %v10808_v52 = vld [vmem:[%s14410_s1 + $0x1fa8] ss:$16 sps:$4 sm:$0xff]   ;;  %v10813_v38 = vld [vmem:[%s14410_s1 + $0x1d8c] ss:$16 sps:$4 sm:$0xff]  }
 0x3c1   : > { %7794 = vmatpush2.bf16.msra.mxu0 %v10727_v2  ;;  %v10816_v2 = vld [vmem:[%s14410_s1 + $0x1f8c] ss:$16 sps:$4 sm:$0xff]  }
 0x3c2   : > { %7837 = vmatpush2.bf16.msra.mxu1 %v10730_v44  ;;  %7795 = vmatprep.subr.bf16.mxu0 %v10735_v45  ;;  %v10811_v44 = vld [vmem:[%s14410_s1 + $0x1d88] ss:$16 sps:$4 sm:$0xff]  }
 0x3c3   : > { %7838 = vmatprep.subr.bf16.mxu1 %v10738_v46  ;;  %v10814_v45 = vld [vmem:[%s14410_s1 + $0x1f88] ss:$16 sps:$4 sm:$0xff]   ;;  %v10819_v46 = vld [vmem:[%s14410_s1 + $0x1d6c] ss:$16 sps:$4 sm:$0xff]  }
 0x3c5   : > { %7796 = vmatpush2.bf16.msra.mxu0 %v10733_v51  ;;  %v10822_v51 = vld [vmem:[%s14410_s1 + $0x1f6c] ss:$16 sps:$4 sm:$0xff]  }
 0x3c6   : > { %7839 = vmatpush2.bf16.msra.mxu1 %v10736_v56  ;;  %7797 = vmatprep.subr.bf16.mxu0 %v10741_v57  ;;  %v10817_v56 = vld [vmem:[%s14410_s1 + $0x1d68] ss:$16 sps:$4 sm:$0xff]  }
 0x3c7   : > { %7840 = vmatprep.subr.bf16.mxu1 %v10744_v32  ;;  %v10820_v57 = vld [vmem:[%s14410_s1 + $0x1f68] ss:$16 sps:$4 sm:$0xff]   ;;  %v10825_v32 = vld [vmem:[%s14410_s1 + $0x1d4c] ss:$16 sps:$4 sm:$0xff]  }
 0x3c9   : > { %7798 = vmatpush2.bf16.msra.mxu0 %v10739_v8  ;;  %v10828_v8 = vld [vmem:[%s14410_s1 + $0x1f4c] ss:$16 sps:$4 sm:$0xff]  }
 0x3ca   : > { %7841 = vmatpush2.bf16.msra.mxu1 %v10742_v43  ;;  %7853 = vmatprep.subr.bf16.mxu0 %v10747_v63  ;;  %v10823_v43 = vld [vmem:[%s14410_s1 + $0x1d48] ss:$16 sps:$4 sm:$0xff]  }
 0x3cb   : > { %7896 = vmatprep.subr.bf16.mxu1 %v10750_v5  ;;  %v10826_v63 = vld [vmem:[%s14410_s1 + $0x1f48] ss:$16 sps:$4 sm:$0xff]   ;;  %v10831_v5 = vld [vmem:[%s14410_s1 + $0x1d2c] ss:$16 sps:$4 sm:$0xff]  }
 0x3cc   : > { %7800 = vmatmul.mubr.bf16.vlgmr.msra.gmra.mxu0 %v12462_v40  ;;  %v10762_v40 = vld [vmem:[%s14410_s1 + $0x1eac] ss:$16 sps:$4 sm:$0xff]  }
 0x3cd   : > { %7843 = vmatmul.mubr.bf16.vlgmr.msra.gmra.mxu1 %v14424_v36  ;;  %7854 = vmatpush1.bf16.msra.mxu0 %v10745_v24  ;;  %v10834_v24 = vld [vmem:[%s14410_s1 + $0x1f2c] ss:$16 sps:$4 sm:$0xff]  }
 0x3ce   : > { %7897 = vmatpush1.bf16.msra.mxu1 %v10748_v25  ;;  %7855 = vmatprep.subr.bf16.mxu0 %v10753_v15  ;;  %v10829_v25 = vld [vmem:[%s14410_s1 + $0x1d28] ss:$16 sps:$4 sm:$0xff]   ;;  %v10840_v36 = vld [vmem:[%s14410_s1 + $0x1f0c] ss:$16 sps:$4 sm:$0xff]  }
 0x3cf   : > { %7898 = vmatprep.subr.bf16.mxu1 %v10756_v28  ;;  %7885 = vmatprep.mubr.bf16.mxu0 %v14425_v20  ;;  %v10832_v15 = vld [vmem:[%s14410_s1 + $0x1f28] ss:$16 sps:$4 sm:$0xff]   ;;  %v10837_v28 = vld [vmem:[%s14410_s1 + $0x1d0c] ss:$16 sps:$4 sm:$0xff]   ;;  %v7285_v20 = vpop.f32.mrf.mxu0 }
 0x3d0   : > { %7928 = vmatprep.mubr.bf16.mxu1 %v14426_v19  ;;  %v7328_v19 = vpop.f32.mrf.mxu1 }
 0x3d1   : > { %7856 = vmatpush1.bf16.msra.mxu0 %v10751_v37  ;;  %v10835_v37 = vld [vmem:[%s14410_s1 + $0x1d08] ss:$16 sps:$4 sm:$0xff]  }
 0x3d2   : > { %7899 = vmatpush1.bf16.msra.mxu1 %v10754_v1  ;;  %7857 = vmatprep.subr.bf16.mxu0 %v10759_v18  ;;  %v10838_v1 = vld [vmem:[%s14410_s1 + $0x1f08] ss:$16 sps:$4 sm:$0xff]  }
 0x3d3   : > { %7900 = vmatprep.subr.bf16.mxu1 %v10762_v40  ;;  %v14427_v18 = vld [vmem:[#allocation5_spill] sm:$0xff]  ;;  %v14428_v40 = vld [vmem:[#allocation6_spill] sm:$0xff] }
 0x3d5   : > { %7858 = vmatpush1.bf16.msra.mxu0 %v10757_v13  ;;  %v7287_v13 = vpop.f32.mrf.mxu0 }
 0x3d6   : > { %7901 = vmatpush1.bf16.msra.mxu1 %v10760_v58  ;;  %7859 = vmatprep.subr.bf16.mxu0 %v10765_v59  ;;  %v7330_v58 = vpop.f32.mrf.mxu1 }
 0x3d7   : > { %7902 = vmatprep.subr.bf16.mxu1 %v10768_v61  ;;  %v7289_v59 = vpop.f32.mrf.mxu0 }
 0x3d8   : > { %v7332_v61 = vpop.f32.mrf.mxu1 }
 0x3d9   : > { %7860 = vmatpush1.bf16.msra.mxu0 %v10763_v41  ;;  %v7291_v41 = vpop.f32.mrf.mxu0 }
 0x3da   : > { %7903 = vmatpush1.bf16.msra.mxu1 %v10766_v23  ;;  %7861 = vmatprep.subr.bf16.mxu0 %v10771_v17  ;;  %v7334_v23 = vpop.f32.mrf.mxu1 }
 0x3db   : > { %7904 = vmatprep.subr.bf16.mxu1 %v10774_v22  ;;  %v7371_v17 = vpop.f32.mrf.mxu0 }
 0x3dc   : > { %v7414_v22 = vpop.f32.mrf.mxu1 }
 0x3dd   : > { %7862 = vmatpush1.bf16.msra.mxu0 %v10769_v21  ;;  %v7373_v21 = vpop.f32.mrf.mxu0 }
 0x3de   : > { %7905 = vmatpush1.bf16.msra.mxu1 %v10772_v48  ;;  %7863 = vmatprep.subr.bf16.mxu0 %v10777_v49  ;;  %v7416_v48 = vpop.f32.mrf.mxu1 }
 0x3df   : > { %7906 = vmatprep.subr.bf16.mxu1 %v10780_v53  ;;  %v7375_v49 = vpop.f32.mrf.mxu0 }
 0x3e0   : > { %v7418_v53 = vpop.f32.mrf.mxu1 }
 0x3e1   : > { %7864 = vmatpush1.bf16.msra.mxu0 %v10775_v33  ;;  %v7377_v33 = vpop.f32.mrf.mxu0 }
 0x3e2   : > { %7907 = vmatpush1.bf16.msra.mxu1 %v10778_v3  ;;  %7865 = vmatprep.subr.bf16.mxu0 %v10783_v42  ;;  %v7420_v3 = vpop.f32.mrf.mxu1 }
 0x3e3   : > { %7908 = vmatprep.subr.bf16.mxu1 %v10786_v6  ;;  %v7457_v42 = vpop.f32.mrf.mxu0 }
 0x3e4   : > { %v7500_v6 = vpop.f32.mrf.mxu1 }
 0x3e5   : > { %7866 = vmatpush1.bf16.msra.mxu0 %v10781_v14  ;;  %v7459_v14 = vpop.f32.mrf.mxu0 }
 0x3e6   : > { %7909 = vmatpush1.bf16.msra.mxu1 %v10784_v31  ;;  %7867 = vmatprep.subr.bf16.mxu0 %v10789_v12  ;;  %v7502_v31 = vpop.f32.mrf.mxu1 }
 0x3e7   : > { %7910 = vmatprep.subr.bf16.mxu1 %v10792_v26  ;;  %v7461_v12 = vpop.f32.mrf.mxu0 }
 0x3e8   : > { %v7504_v26 = vpop.f32.mrf.mxu1 }
 0x3e9   : > { %7868 = vmatpush1.bf16.msra.mxu0 %v10787_v0  ;;  %v7463_v0 = vpop.f32.mrf.mxu0 }
 0x3ea   : > { %7911 = vmatpush1.bf16.msra.mxu1 %v10790_v10  ;;  %7869 = vmatprep.subr.bf16.mxu0 %v10795_v11  ;;  %v7506_v10 = vpop.f32.mrf.mxu1 }
 0x3eb   : > { %7912 = vmatprep.subr.bf16.mxu1 %v10798_v29  ;;  %v7543_v11 = vpop.f32.mrf.mxu0 }
 0x3ec   : > { %v7586_v29 = vpop.f32.mrf.mxu1 }
 0x3ed   : > { %7870 = vmatpush2.bf16.msra.mxu0 %v10793_v27  ;;  %v7545_v27 = vpop.f32.mrf.mxu0 }
 0x3ee   : > { %7913 = vmatpush2.bf16.msra.mxu1 %v10796_v47  ;;  %7871 = vmatprep.subr.bf16.mxu0 %v10801_v50  ;;  %v7588_v47 = vpop.f32.mrf.mxu1 }
 0x3ef   : > { %7914 = vmatprep.subr.bf16.mxu1 %v10804_v16  ;;  %v7547_v50 = vpop.f32.mrf.mxu0 }
 0x3f0   : > { %v7590_v16 = vpop.f32.mrf.mxu1 }
 0x3f1   : > { %7872 = vmatpush2.bf16.msra.mxu0 %v10799_v60  ;;  %v7549_v60 = vpop.f32.mrf.mxu0 }
 0x3f2   : > { %7915 = vmatpush2.bf16.msra.mxu1 %v10802_v54  ;;  %7873 = vmatprep.subr.bf16.mxu0 %v10807_v7  ;;  %v7592_v54 = vpop.f32.mrf.mxu1 }
 0x3f3   : > { %7916 = vmatprep.subr.bf16.mxu1 %v10810_v4 }
 0x3f5   : > { %7874 = vmatpush2.bf16.msra.mxu0 %v10805_v9 }
 0x3f6   : > { %7917 = vmatpush2.bf16.msra.mxu1 %v10808_v52  ;;  %7875 = vmatprep.subr.bf16.mxu0 %v10813_v38  ;;  %v7329_v38 = vadd.f32 %v7328_v19, %v7285_v20 }
 0x3f7   : > { %7918 = vmatprep.subr.bf16.mxu1 %v10816_v2  ;;  %v7331_v2 = vadd.f32 %v7330_v58, %v7287_v13 }
 0x3f9   : > { %7876 = vmatpush2.bf16.msra.mxu0 %v10811_v44  ;;  %v7372_v44 = vadd.f32 %v7371_v17, %v7329_v38 }
 0x3fa   : > { %7919 = vmatpush2.bf16.msra.mxu1 %v10814_v45  ;;  %7877 = vmatprep.subr.bf16.mxu0 %v10819_v46 }
 0x3fb   : > { %7920 = vmatprep.subr.bf16.mxu1 %v10822_v51  ;;  %v7333_v51 = vadd.f32 %v7332_v61, %v7289_v59 }
 0x3fd   : > { %7878 = vmatpush2.bf16.msra.mxu0 %v10817_v56  ;;  %v7374_v56 = vadd.f32 %v7373_v21, %v7331_v2 }
 0x3fe   : > { %7921 = vmatpush2.bf16.msra.mxu1 %v10820_v57  ;;  %7879 = vmatprep.subr.bf16.mxu0 %v10825_v32  ;;  %v7335_v57 = vadd.f32 %v7334_v23, %v7291_v41  ;;  %v7415_v32 = vadd.f32 %v7414_v22, %v7372_v44 }
 0x3ff   : > { %7922 = vmatprep.subr.bf16.mxu1 %v10828_v8  ;;  %v7376_v8 = vadd.f32 %v7375_v49, %v7333_v51 }
 0x401   : > { %7880 = vmatpush2.bf16.msra.mxu0 %v10823_v43 }
 0x402   : > { %7923 = vmatpush2.bf16.msra.mxu1 %v10826_v63  ;;  %7881 = vmatprep.subr.bf16.mxu0 %v10831_v5  ;;  %v7417_v5 = vadd.f32 %v7416_v48, %v7374_v56 }
 0x403   : > { %7924 = vmatprep.subr.bf16.mxu1 %v10834_v24  ;;  %v7378_v24 = vadd.f32 %v7377_v33, %v7335_v57 }
 0x405   : > { %7882 = vmatpush2.bf16.msra.mxu0 %v10829_v25  ;;  %v7458_v25 = vadd.f32 %v7457_v42, %v7415_v32 }
 0x406   : > { %7925 = vmatpush2.bf16.msra.mxu1 %v10832_v15  ;;  %7883 = vmatprep.subr.bf16.mxu0 %v10837_v28 }
 0x407   : > { %7926 = vmatprep.subr.bf16.mxu1 %v10840_v36  ;;  %v7419_v36 = vadd.f32 %v7418_v53, %v7376_v8 }
 0x409   : > { %7884 = vmatpush2.bf16.msra.mxu0 %v10835_v37  ;;  %v7460_v37 = vadd.f32 %v7459_v14, %v7417_v5 }
 0x40a   : > { %7927 = vmatpush2.bf16.msra.mxu1 %v10838_v1  ;;  %v7421_v1 = vadd.f32 %v7420_v3, %v7378_v24 }
 0x40b   : > { %v7503_v13 = vadd.f32 %v7502_v31, %v7460_v37 }
 0x40c   : > { %7886 = vmatmul.mubr.bf16.vlgmr.msra.gmra.mxu0 %v14427_v18  ;;  %v7629_v7 = vpop.f32.mrf.mxu0  ;;  %v7501_v18 = vadd.f32 %v7500_v6, %v7458_v25  ;;  %v7464_v58 = vadd.f32 %v7463_v0, %v7421_v1 }
 0x40d   : > { %7929 = vmatmul.mubr.bf16.vlgmr.msra.gmra.mxu1 %v14428_v40  ;;  %v7672_v4 = vpop.f32.mrf.mxu1  ;;  %v7462_v40 = vadd.f32 %v7461_v12, %v7419_v36  ;;  %v7546_v41 = vadd.f32 %v7545_v27, %v7503_v13 }
 0x40e   : > { %v7631_v9 = vpop.f32.mrf.mxu0  ;;  %v7544_v59 = vadd.f32 %v7543_v11, %v7501_v18  ;;  %v7507_v22 = vadd.f32 %v7506_v10, %v7464_v58 }
 0x40f   : > { %v7674_v52 = vpop.f32.mrf.mxu1  ;;  %v7505_v61 = vadd.f32 %v7504_v26, %v7462_v40  ;;  %v7589_v49 = vadd.f32 %v7588_v47, %v7546_v41 }
 0x410   : > { %v7633_v45 = vpop.f32.mrf.mxu0  ;;  %v7587_v21 = vadd.f32 %v7586_v29, %v7544_v59  ;;  %v7550_v33 = vadd.f32 %v7549_v60, %v7507_v22 }
 0x411   : > { %v7676_v46 = vpop.f32.mrf.mxu1  ;;  %v7548_v48 = vadd.f32 %v7547_v50, %v7505_v61  ;;  %v7632_v6 = vadd.f32 %v7631_v9, %v7589_v49 }
 0x412   : > { %v7635_v43 = vpop.f32.mrf.mxu0  ;;  %v7630_v42 = vadd.f32 %v7629_v7, %v7587_v21  ;;  %v7593_v2 = vadd.f32 %v7592_v54, %v7550_v33 }
 0x413   : > { %v7678_v63 = vpop.f32.mrf.mxu1  ;;  %v7591_v3 = vadd.f32 %v7590_v16, %v7548_v48  ;;  %v7675_v11 = vadd.f32 %v7674_v52, %v7632_v6 }
 0x414   : > { %v7673_v31 = vadd.f32 %v7672_v4, %v7630_v42  ;;  %v7636_v26 = vadd.f32 %v7635_v43, %v7593_v2  ;;  %v10849_v2 = vmov 1966171168  }
 0x415   : > { %v7634_v0 = vadd.f32 %v7633_v45, %v7591_v3 }
 0x416   : > { %v7679_v50 = vadd.f32 %v7678_v63, %v7636_v26 }
 0x417   : > { %v7677_v10 = vadd.f32 %v7676_v46, %v7634_v0 }
 0x44c   : > { %v7715_v15 = vpop.f32.mrf.mxu0 }
 0x44d   : > { %v7758_v28 = vpop.f32.mrf.mxu1  ;;  %v7716_v27 = vadd.f32 %v7715_v15, %v7673_v31  ;;  %v8002_v31 = vunpack.c.l.s4 %v10849_v2 }
 0x44e   : > { %v7717_v20 = vpop.f32.mrf.mxu0 }
 0x44f   : > { %v7760_v19 = vpop.f32.mrf.mxu1  ;;  %v7718_v29 = vadd.f32 %v7717_v20, %v7675_v11  ;;  %v7759_v47 = vadd.f32 %v7758_v28, %v7716_v27  ;;  %v8004_v11 = vlaneseq }
 0x450   : > { %v7719_v23 = vpop.f32.mrf.mxu0 }
 0x451   : > { %v7762_v17 = vpop.f32.mrf.mxu1  ;;  %v7720_v60 = vadd.f32 %v7719_v23, %v7677_v10  ;;  %v7761_v57 = vadd.f32 %v7760_v19, %v7718_v29  ;;  %vm8026_vm0 = vcmp.lt.s32.totalorder %v8004_v11, 512 }
 0x452   : > { %v7721_v53 = vpop.f32.mrf.mxu0 }
 0x453   : > { %v7764_v14 = vpop.f32.mrf.mxu1  ;;  %v7722_v16 = vadd.f32 %v7721_v53, %v7679_v50  ;;  %v7763_v32 = vadd.f32 %v7762_v17, %v7720_v60 }
 0x455   : > { %v7765_v45 = vadd.f32 %v7764_v14, %v7722_v16 }
 0x48c   : > { %v7801_v12 = vpop.f32.mrf.mxu0 }
 0x48d   : > { %v7844_v38 = vpop.f32.mrf.mxu1  ;;  %v7802_v9 = vadd.f32 %v7801_v12, %v7759_v47  ;;  %v8003_v47 = vunpack.c.0.s8 %v8002_v31 }
 0x48e   : > { %v7803_v44 = vpop.f32.mrf.mxu0 }
 0x48f   : > { %v7846_v51 = vpop.f32.mrf.mxu1  ;;  %v7804_v8 = vadd.f32 %v7803_v44, %v7761_v57  ;;  %v7845_v52 = vadd.f32 %v7844_v38, %v7802_v9 }
 0x490   : > { %v7805_v7 = vpop.f32.mrf.mxu0 }
 0x491   : > { %v7848_v56 = vpop.f32.mrf.mxu1  ;;  %v7806_v43 = vadd.f32 %v7805_v7, %v7763_v32  ;;  %v7847_v25 = vadd.f32 %v7846_v51, %v7804_v8  ;;  %v8005_v7 = vshrl.u32 %v8004_v11, 7 }
 0x492   : > { %v7807_v54 = vpop.f32.mrf.mxu0 }
 0x493   : > { %v7850_v4 = vpop.f32.mrf.mxu1  ;;  %v7808_v46 = vadd.f32 %v7807_v54, %v7765_v45  ;;  %v7849_v36 = vadd.f32 %v7848_v56, %v7806_v43 }
 0x495   : > { %v7851_v40 = vadd.f32 %v7850_v4, %v7808_v46  ;;  %v8006_v4 = vsub.s32 %v8003_v47, %v8005_v7 }
 0x497   : > { %v8007_v46 = vrot.slane %v7999_v35, %v8006_v4 }
 0x4cc   : > { %v7887_v5 = vpop.f32.mrf.mxu0 }
 0x4cd   : > { %v7930_v24 = vpop.f32.mrf.mxu1  ;;  %v7888_v15 = vadd.f32 %v7887_v5, %v7845_v52 }
 0x4ce   : > { %v7889_v63 = vpop.f32.mrf.mxu0 }
 0x4cf   : > { %v7932_v28 = vpop.f32.mrf.mxu1  ;;  %v7890_v37 = vadd.f32 %v7889_v63, %v7847_v25  ;;  %v7931_v20 = vadd.f32 %v7930_v24, %v7888_v15 }
 0x4d0   : > { %v7891_v1 = vpop.f32.mrf.mxu0 }
 0x4d1   : > { %v7934_v18 = vpop.f32.mrf.mxu1  ;;  %v7933_v19 = vadd.f32 %v7932_v28, %v7890_v37  ;;  %v7892_v13 = vadd.f32 %v7891_v1, %v7849_v36  ;;  %v8031_v17 = vmul.f32 %v7931_v20, %v7931_v20  ;;  %v8077_v36 = vrot.slane %v8069_v62, %v8006_v4 }
 0x4d2   : > { %v7893_v58 = vpop.f32.mrf.mxu0 }
 0x4d3   : > { %v9293_v59 = vpack.c.bf16 %v7933_v19, %v7931_v20  ;;  %v7935_v61 = vadd.f32 %v7934_v18, %v7892_v13  ;;  %v7894_v41 = vadd.f32 %v7893_v58, %v7851_v40  ;;  %v7936_v23 = vpop.f32.mrf.mxu1  ;;  %v8032_v14 = vmul.f32 %v7933_v19, %v7933_v19 }
 0x4d5   : > { %7964 = vst [vmem:[%s13432_s17 + $0x8] sm:$0xff] %v9293_v59  ;;  %v7981_v22 = vadd.f32 %v7935_v61, %v7931_v20  ;;  %v8035_v21 = vmul.f32 %v7935_v61, %v7935_v61  ;;  %v7937_v48 = vadd.f32 %v7936_v23, %v7894_v41 }
 0x4d7   : > { %v7982_v49 = vrot.slane %v7981_v22, 4  ;;  %v8051_v33 = vadd.f32 %v8035_v21, %v8031_v17  ;;  %v9295_v42 = vpack.c.bf16 %v7937_v48, %v7935_v61  ;;  %v7988_v53 = vadd.f32 %v7937_v48, %v7933_v19 }
 0x4d8   : > { %v8036_v3 = vmul.f32 %v7937_v48, %v7937_v48 }
 0x4d9   : > { %v7983_v6 = vadd.f32 %v7982_v49, %v7981_v22  ;;  %v8052_v12 = vrot.slane %v8051_v33, 4  ;;  %7966 = vst [vmem:[%s13432_s17 + $0x18] sm:$0xff] %v9295_v42  ;;  %v7989_v38 = vrot.slane %v7988_v53, 4  ;;  %s8226_s17 = sshll.u32 %s14432_s16, 2 }
 0x4da   : > { %v8058_v0 = vadd.f32 %v8036_v3, %v8032_v14  ;;  %s222_s14 = scalar_lea.vmem %s14412_s3, %s8226_s17  ;;  %s226_s18 = scalar_lea.vmem %s14413_s4, %s8226_s17 }
 0x4db   : > { %v7984_v26 = vrot.slane %v7983_v6, 2  ;;  %v8053_v27 = vadd.f32 %v8052_v12, %v8051_v33  ;;  %v7990_v44 = vadd.f32 %v7989_v38, %v7988_v53 }
 0x4dc   : > { %v8059_v51 = vrot.slane %v8058_v0, 4 }
 0x4dd   : > { %v7985_v10 = vadd.f32 %v7984_v26, %v7983_v6  ;;  %v8054_v29 = vrot.slane %v8053_v27, 2  ;;  %v7991_v50 = vrot.slane %v7990_v44, 2 }
 0x4de   : > { %v8060_v60 = vadd.f32 %v8059_v51, %v8058_v0 }
 0x4df   : > { %v7986_v56 = vrot.slane %v7985_v10, 1  ;;  %v8055_v57 = vadd.f32 %v8054_v29, %v8053_v27  ;;  %v7992_v16 = vadd.f32 %v7991_v50, %v7990_v44 }
 0x4e0   : > { %v8061_v9 = vrot.slane %v8060_v60, 2 }
 0x4e1   : > { %v7993_v32 = vrot.slane %v7992_v16, 1  ;;  %v8056_v8 = vrot.slane %v8055_v57, 1  ;;  %v7987_v45 = vadd.f32 %v7986_v56, %v7985_v10 }
 0x4e2   : > { %v8062_v54 = vadd.f32 %v8061_v9, %v8060_v60 }
 0x4e3   : > { %v7994_v52 = vadd.f32 %v7993_v32, %v7992_v16  ;;  %v8057_v24 = vadd.f32 %v8056_v8, %v8055_v57 }
 0x4e4   : > { %v8063_v43 = vrot.slane %v8062_v54, 1 }
 0x4e5   : > { %v8000_v5 = vcombine.low %v7987_v45, %v7994_v52 }
 0x4e6   : > { %v8064_v25 = vadd.f32 %v8063_v43, %v8062_v54 }
 0x4e7   : > { %v8014_v15 = vrot.slane %v8000_v5, %v8006_v4 }
 0x4e8   : > { %v8070_v63 = vcombine.low %v8057_v24, %v8064_v25 }
 0x4e9   : > { %v8015_v28 = vcombine.low %v8007_v46, %v8014_v15 }
 0x4ea   : > { %v8084_v37 = vrot.slane %v8070_v63, %v8006_v4 }
 0x4eb   : > { %v8022_v1 = vrot.slane %v8015_v28, %v8006_v4 }
 0x4ec   : > { %v8085_v18 = vcombine.low %v8077_v36, %v8084_v37 }
 0x4ed   : > { %8028 = vst.msk [vmem:[%s222_s14] sm:$0xf] %vm8026_vm0, %v8022_v1 }
 0x4ee   : > { %v8092_v30 = vrot.slane %v8085_v18, %v8006_v4 }
 0x4f0   : > { %8094 = vst.msk [vmem:[%s226_s18] sm:$0xf] %vm8026_vm0, %v8092_v30 }
 0x4f1 PF: > { %s15_s15 = sadd.s32 1, %s10847_s15  }
 0x4f2   : > { %p12_p5 = scmp.ge.s32.totalorder %s15_s15, 4  }
 0x4f4   :  { %14 = sbr.rel (!%p12_p5) target bundleno = 1 (0x1), region = 82 }

// kernel: forward_real.15
= control target key start
LH: loop header
LB: loop body
LE: loop exit
PB: predicated region body
PF: predicated region fallthrough
CT: control target
= control target key end

     0   :  { %s9720_s1 = inlined_call_operand.vmem [shape: bf16[8192,128], index: 1, kind: input, shape index: {}]   ;;  %s9721_s0 = inlined_call_operand.vmem [shape: bf16[16,8192], index: 0, kind: input, shape index: {}]   ;;  %s9722_s2 = inlined_call_operand.vmem [shape: f32[1,128], index: 2, kind: input, shape index: {}]   ;;  %s9723_s3 = inlined_call_operand.vmem [shape: f32[16,128], index: 3, kind: output, shape index: {0}]   ;;  %s9724_s4 = inlined_call_operand.vmem [shape: f32[1,1,128], index: 4, kind: output, shape index: {1}]  }
   0x1   :  { %v7169_v0 = vld [vmem:[%s9720_s1 + $0x78] sm:$0xff]   ;;  %v7173_v4 = vld [vmem:[%s9720_s1 + $0x70] sm:$0xff]   ;;  %v7177_v8 = vld [vmem:[%s9720_s1 + $0x68] sm:$0xff]  }
   0x2   :  { %v7170_v1 = vld [vmem:[%s9720_s1 + $0xf8] sm:$0xff]   ;;  %6463 = vmatprep.subr.bf16.mxu0 %v7169_v0  ;;  %v7174_v5 = vld [vmem:[%s9720_s1 + $0xf0] sm:$0xff]   ;;  %v7178_v9 = vld [vmem:[%s9720_s1 + $0xe8] sm:$0xff]  }
   0x3   :  { %v7171_v2 = vld [vmem:[%s9720_s1 + $0x38] sm:$0xff]   ;;  %6485 = vmatprep.subr.bf16.mxu1 %v7170_v1  ;;  %v7175_v6 = vld [vmem:[%s9720_s1 + $0x30] sm:$0xff]   ;;  %v7179_v10 = vld [vmem:[%s9720_s1 + $0x28] sm:$0xff]  }
   0x4   :  { %v7172_v3 = vld [vmem:[%s9720_s1 + $0xb8] sm:$0xff]   ;;  %6464 = vmatpush3.bf16.msra.mxu0 %v7171_v2  ;;  %v7176_v7 = vld [vmem:[%s9720_s1 + $0xb0] sm:$0xff]   ;;  %v7180_v11 = vld [vmem:[%s9720_s1 + $0xa8] sm:$0xff]  }
   0x5   :  { %6486 = vmatpush3.bf16.msra.mxu1 %v7172_v3  ;;  %6465 = vmatprep.subr.bf16.mxu0 %v7173_v4  ;;  %v7181_v12 = vld [vmem:[%s9720_s1 + $0x60] sm:$0xff]   ;;  %v7185_v16 = vld [vmem:[%s9720_s1 + $0x58] sm:$0xff]   ;;  %v7189_v20 = vld [vmem:[%s9720_s1 + $0x50] sm:$0xff]  }
   0x6   :  { %6487 = vmatprep.subr.bf16.mxu1 %v7174_v5  ;;  %v7182_v13 = vld [vmem:[%s9720_s1 + $0xe0] sm:$0xff]   ;;  %v7186_v17 = vld [vmem:[%s9720_s1 + $0xd8] sm:$0xff]   ;;  %v7190_v21 = vld [vmem:[%s9720_s1 + $0xd0] sm:$0xff]  }
   0x7   :  { %v7183_v14 = vld [vmem:[%s9720_s1 + $0x20] sm:$0xff]   ;;  %v7187_v18 = vld [vmem:[%s9720_s1 + $0x18] sm:$0xff]   ;;  %v7191_v22 = vld [vmem:[%s9720_s1 + $0x10] sm:$0xff]  }
   0x8   :  { %6466 = vmatpush3.bf16.msra.mxu0 %v7175_v6  ;;  %v7184_v15 = vld [vmem:[%s9720_s1 + $0xa0] sm:$0xff]   ;;  %v7188_v19 = vld [vmem:[%s9720_s1 + $0x98] sm:$0xff]   ;;  %v7192_v23 = vld [vmem:[%s9720_s1 + $0x90] sm:$0xff]  }
   0x9   :  { %6488 = vmatpush3.bf16.msra.mxu1 %v7176_v7  ;;  %6467 = vmatprep.subr.bf16.mxu0 %v7177_v8  ;;  %v7193_v24 = vld [vmem:[%s9720_s1 + $0x48] sm:$0xff]   ;;  %v7197_v28 = vld [vmem:[%s9720_s1 + $0x40] sm:$0xff]   ;;  %v7201_v40 = vld [vmem:[%s9720_s1 + $0x178] sm:$0xff]  }
   0xa   :  { %6489 = vmatprep.subr.bf16.mxu1 %v7178_v9  ;;  %v7194_v25 = vld [vmem:[%s9720_s1 + $0xc8] sm:$0xff]   ;;  %v7198_v29 = vld [vmem:[%s9720_s1 + $0xc0] sm:$0xff]   ;;  %v7202_v41 = vld [vmem:[%s9720_s1 + $0x1f8] sm:$0xff]  }
   0xb   :  { %v7195_v26 = vld [vmem:[%s9720_s1 + $0x8] sm:$0xff]   ;;  %v7199_v30 = vld [vmem:[%s9720_s1] sm:$0xff]   ;;  %v7203_v42 = vld [vmem:[%s9720_s1 + $0x138] sm:$0xff]  }
   0xc   :  { %6468 = vmatpush3.bf16.msra.mxu0 %v7179_v10  ;;  %v7196_v27 = vld [vmem:[%s9720_s1 + $0x88] sm:$0xff]   ;;  %v7200_v31 = vld [vmem:[%s9720_s1 + $0x80] sm:$0xff]   ;;  %v7204_v43 = vld [vmem:[%s9720_s1 + $0x1b8] sm:$0xff]  }
   0xd   :  { %6490 = vmatpush3.bf16.msra.mxu1 %v7180_v11  ;;  %6469 = vmatprep.subr.bf16.mxu0 %v7181_v12  ;;  %v17_v32 = vld [vmem:[%s9721_s0] sm:$0xff]  ;;  %v18_v34 = vld [vmem:[%s9721_s0 + $0x8] sm:$0xff]  ;;  %v7205_v44 = vld [vmem:[%s9720_s1 + $0x170] sm:$0xff]  }
   0xe   :  { %6491 = vmatprep.subr.bf16.mxu1 %v7182_v13  ;;  %v49_v33 = vld [vmem:[%s9721_s0 + $0x100] sm:$0xff]  ;;  %v50_v37 = vld [vmem:[%s9721_s0 + $0x108] sm:$0xff]  ;;  %v7206_v45 = vld [vmem:[%s9720_s1 + $0x1f0] sm:$0xff]  }
   0xf   :  { %v5887_v35 = vcombine.low %v17_v32, %v49_v33  ;;  %v5888_v36 = vcombine.high %v17_v32, %v49_v33  ;;  %v5889_v38 = vcombine.low %v18_v34, %v50_v37  ;;  %v5890_v39 = vcombine.high %v18_v34, %v50_v37  ;;  %v7207_v46 = vld [vmem:[%s9720_s1 + $0x130] sm:$0xff]   ;;  %v7209_v48 = vld [vmem:[%s9720_s1 + $0x168] sm:$0xff]   ;;  %v7213_v52 = vld [vmem:[%s9720_s1 + $0x160] sm:$0xff]  }
  0x10   :  { %6470 = vmatpush3.bf16.msra.mxu0 %v7183_v14  ;;  %v7208_v47 = vld [vmem:[%s9720_s1 + $0x1b0] sm:$0xff]   ;;  %v7210_v49 = vld [vmem:[%s9720_s1 + $0x1e8] sm:$0xff]   ;;  %v7214_v53 = vld [vmem:[%s9720_s1 + $0x1e0] sm:$0xff]  }
  0x11   :  { %6492 = vmatpush3.bf16.msra.mxu1 %v7184_v15  ;;  %6471 = vmatprep.subr.bf16.mxu0 %v7185_v16  ;;  %v7211_v50 = vld [vmem:[%s9720_s1 + $0x128] sm:$0xff]   ;;  %v7215_v54 = vld [vmem:[%s9720_s1 + $0x120] sm:$0xff]   ;;  %v7217_v56 = vld [vmem:[%s9720_s1 + $0x158] sm:$0xff]  }
  0x12   :  { %6493 = vmatprep.subr.bf16.mxu1 %v7186_v17  ;;  %4536 = vmatprep.mubr.bf16.mxu0 %v5888_v36  ;;  %v7212_v51 = vld [vmem:[%s9720_s1 + $0x1a8] sm:$0xff]   ;;  %v7216_v55 = vld [vmem:[%s9720_s1 + $0x1a0] sm:$0xff]   ;;  %v7218_v57 = vld [vmem:[%s9720_s1 + $0x1d8] sm:$0xff]  }
  0x13   :  { %4577 = vmatprep.mubr.bf16.mxu1 %v5890_v39  ;;  %v7219_v58 = vld [vmem:[%s9720_s1 + $0x118] sm:$0xff]   ;;  %v7221_v60 = vld [vmem:[%s9720_s1 + $0x150] sm:$0xff]   ;;  %v7225_v0 = vld [vmem:[%s9720_s1 + $0x148] sm:$0xff]  }
  0x14   :  { %6472 = vmatpush3.bf16.msra.mxu0 %v7187_v18  ;;  %v7220_v59 = vld [vmem:[%s9720_s1 + $0x198] sm:$0xff]   ;;  %v7222_v61 = vld [vmem:[%s9720_s1 + $0x1d0] sm:$0xff]   ;;  %v7226_v1 = vld [vmem:[%s9720_s1 + $0x1c8] sm:$0xff]  }
  0x15   :  { %6494 = vmatpush3.bf16.msra.mxu1 %v7188_v19  ;;  %6473 = vmatprep.subr.bf16.mxu0 %v7189_v20  ;;  %v7223_v62 = vld [vmem:[%s9720_s1 + $0x110] sm:$0xff]   ;;  %v7227_v2 = vld [vmem:[%s9720_s1 + $0x108] sm:$0xff]   ;;  %v7229_v4 = vld [vmem:[%s9720_s1 + $0x140] sm:$0xff]  }
  0x16   :  { %6495 = vmatprep.subr.bf16.mxu1 %v7190_v21  ;;  %v7224_v63 = vld [vmem:[%s9720_s1 + $0x190] sm:$0xff]   ;;  %v7228_v3 = vld [vmem:[%s9720_s1 + $0x188] sm:$0xff]   ;;  %v7230_v5 = vld [vmem:[%s9720_s1 + $0x1c0] sm:$0xff]  }
  0x17   :  { %v7231_v6 = vld [vmem:[%s9720_s1 + $0x100] sm:$0xff]   ;;  %v19_v8 = vld [vmem:[%s9721_s0 + $0x10] sm:$0xff]  ;;  %v20_v12 = vld [vmem:[%s9721_s0 + $0x18] sm:$0xff] }
  0x18   :  { %6474 = vmatpush3.bf16.msra.mxu0 %v7191_v22  ;;  %v7232_v7 = vld [vmem:[%s9720_s1 + $0x180] sm:$0xff]   ;;  %v51_v9 = vld [vmem:[%s9721_s0 + $0x110] sm:$0xff]  ;;  %v52_v13 = vld [vmem:[%s9721_s0 + $0x118] sm:$0xff] }
  0x19   :  { %6496 = vmatpush3.bf16.msra.mxu1 %v7192_v23  ;;  %6475 = vmatprep.subr.bf16.mxu0 %v7193_v24  ;;  %v5891_v10 = vcombine.low %v19_v8, %v51_v9  ;;  %v5892_v11 = vcombine.high %v19_v8, %v51_v9  ;;  %v5893_v14 = vcombine.low %v20_v12, %v52_v13  ;;  %v7233_v16 = vld [vmem:[%s9720_s1 + $0x278] sm:$0xff]   ;;  %v7237_v20 = vld [vmem:[%s9720_s1 + $0x270] sm:$0xff]   ;;  %v7241_v24 = vld [vmem:[%s9720_s1 + $0x268] sm:$0xff]  }
  0x1a   :  { %6497 = vmatprep.subr.bf16.mxu1 %v7194_v25  ;;  %v5894_v15 = vcombine.high %v20_v12, %v52_v13  ;;  %v7234_v17 = vld [vmem:[%s9720_s1 + $0x2f8] sm:$0xff]   ;;  %v7238_v21 = vld [vmem:[%s9720_s1 + $0x2f0] sm:$0xff]   ;;  %v7242_v25 = vld [vmem:[%s9720_s1 + $0x2e8] sm:$0xff]  }
  0x1b   :  { %v7235_v18 = vld [vmem:[%s9720_s1 + $0x238] sm:$0xff]   ;;  %v7239_v22 = vld [vmem:[%s9720_s1 + $0x230] sm:$0xff]  }
  0x1c   :  { %6476 = vmatpush3.bf16.msra.mxu0 %v7195_v26  ;;  %v7236_v19 = vld [vmem:[%s9720_s1 + $0x2b8] sm:$0xff]   ;;  %v7240_v23 = vld [vmem:[%s9720_s1 + $0x2b0] sm:$0xff]   ;;  %v7243_v26 = vld [vmem:[%s9720_s1 + $0x228] sm:$0xff]  }
  0x1d   :  { %6498 = vmatpush3.bf16.msra.mxu1 %v7196_v27  ;;  %6477 = vmatprep.subr.bf16.mxu0 %v7197_v28  ;;  %v7244_v27 = vld [vmem:[%s9720_s1 + $0x2a8] sm:$0xff]   ;;  %v7245_v28 = vld [vmem:[%s9720_s1 + $0x260] sm:$0xff]   ;;  %v7249_v32 = vld [vmem:[%s9720_s1 + $0x258] sm:$0xff]  }
  0x1e   :  { %6499 = vmatprep.subr.bf16.mxu1 %v7198_v29  ;;  %v7246_v29 = vld [vmem:[%s9720_s1 + $0x2e0] sm:$0xff]   ;;  %v7250_v33 = vld [vmem:[%s9720_s1 + $0x2d8] sm:$0xff]   ;;  %v7253_v36 = vld [vmem:[%s9720_s1 + $0x250] sm:$0xff]  }
  0x1f   :  { %v7251_v34 = vld [vmem:[%s9720_s1 + $0x218] sm:$0xff]   ;;  %v7254_v37 = vld [vmem:[%s9720_s1 + $0x2d0] sm:$0xff]  }
  0x20   :  { %6478 = vmatpush3.bf16.msra.mxu0 %v7199_v30  ;;  %v7247_v30 = vld [vmem:[%s9720_s1 + $0x220] sm:$0xff]   ;;  %v7256_v39 = vld [vmem:[%s9720_s1 + $0x290] sm:$0xff]   ;;  %v7281_v8 = vld [vmem:[%s9720_s1 + $0x358] sm:$0xff]  }
  0x21   :  { %6500 = vmatpush3.bf16.msra.mxu1 %v7200_v31  ;;  %6507 = vmatprep.subr.bf16.mxu0 %v7201_v40  ;;  %v7248_v31 = vld [vmem:[%s9720_s1 + $0x2a0] sm:$0xff]   ;;  %v7257_v40 = vld [vmem:[%s9720_s1 + $0x248] sm:$0xff]   ;;  %v7282_v9 = vld [vmem:[%s9720_s1 + $0x3d8] sm:$0xff]  }
  0x22   :  { %6529 = vmatprep.subr.bf16.mxu1 %v7202_v41  ;;  %v7258_v41 = vld [vmem:[%s9720_s1 + $0x2c8] sm:$0xff]   ;;  %v7285_v12 = vld [vmem:[%s9720_s1 + $0x350] sm:$0xff]  }
  0x23   :  { %4537 = vmatmul.mubr.bf16.vlgmr.msra.gmra.mxu0 %v5887_v35  ;;  %v7252_v35 = vld [vmem:[%s9720_s1 + $0x298] sm:$0xff]   ;;  %v7286_v13 = vld [vmem:[%s9720_s1 + $0x3d0] sm:$0xff]  }
  0x24   :  { %4578 = vmatmul.mubr.bf16.vlgmr.msra.gmra.mxu1 %v5889_v38  ;;  %6508 = vmatpush3.bf16.msra.mxu0 %v7203_v42  ;;  %v7255_v38 = vld [vmem:[%s9720_s1 + $0x210] sm:$0xff]   ;;  %v7259_v42 = vld [vmem:[%s9720_s1 + $0x208] sm:$0xff]  }
  0x25   :  { %6530 = vmatpush3.bf16.msra.mxu1 %v7204_v43  ;;  %6509 = vmatprep.subr.bf16.mxu0 %v7205_v44  ;;  %v7260_v43 = vld [vmem:[%s9720_s1 + $0x288] sm:$0xff]   ;;  %v7261_v44 = vld [vmem:[%s9720_s1 + $0x240] sm:$0xff]  }
  0x26   :  { %6531 = vmatprep.subr.bf16.mxu1 %v7206_v45  ;;  %4618 = vmatprep.mubr.bf16.mxu0 %v5892_v11  ;;  %v7262_v45 = vld [vmem:[%s9720_s1 + $0x2c0] sm:$0xff]   ;;  %v7284_v11 = vld [vmem:[%s9720_s1 + $0x398] sm:$0xff]  }
  0x27   :  { %4659 = vmatprep.mubr.bf16.mxu1 %v5894_v15  ;;  %v7288_v15 = vld [vmem:[%s9720_s1 + $0x390] sm:$0xff]  }
  0x28   :  { %6510 = vmatpush3.bf16.msra.mxu0 %v7207_v46  ;;  %v7263_v46 = vld [vmem:[%s9720_s1 + $0x200] sm:$0xff]  }
  0x29   :  { %6532 = vmatpush3.bf16.msra.mxu1 %v7208_v47  ;;  %6511 = vmatprep.subr.bf16.mxu0 %v7209_v48  ;;  %v7264_v47 = vld [vmem:[%s9720_s1 + $0x280] sm:$0xff]  }
  0x2a   :  { %6533 = vmatprep.subr.bf16.mxu1 %v7210_v49  ;;  %v21_v48 = vld [vmem:[%s9721_s0 + $0x20] sm:$0xff] }
  0x2b   :  { %v53_v49 = vld [vmem:[%s9721_s0 + $0x120] sm:$0xff] }
  0x2c   :  { %6512 = vmatpush3.bf16.msra.mxu0 %v7211_v50  ;;  %v22_v50 = vld [vmem:[%s9721_s0 + $0x28] sm:$0xff] }
  0x2d   :  { %6534 = vmatpush3.bf16.msra.mxu1 %v7212_v51  ;;  %6513 = vmatprep.subr.bf16.mxu0 %v7213_v52  ;;  %v54_v51 = vld [vmem:[%s9721_s0 + $0x128] sm:$0xff]  ;;  %v5895_v52 = vcombine.low %v21_v48, %v53_v49 }
  0x2e   :  { %6535 = vmatprep.subr.bf16.mxu1 %v7214_v53  ;;  %v5896_v53 = vcombine.high %v21_v48, %v53_v49  ;;  %v7313_v48 = vld [vmem:[%s9720_s1 + $0x458] sm:$0xff]  }
  0x2f   :  { %v7314_v49 = vld [vmem:[%s9720_s1 + $0x4d8] sm:$0xff]  }
  0x30   :  { %6514 = vmatpush3.bf16.msra.mxu0 %v7215_v54  ;;  %v5897_v54 = vcombine.low %v22_v50, %v54_v51 }
  0x31   :  { %6536 = vmatpush3.bf16.msra.mxu1 %v7216_v55  ;;  %6515 = vmatprep.subr.bf16.mxu0 %v7217_v56  ;;  %v5898_v55 = vcombine.high %v22_v50, %v54_v51  ;;  %v7265_v56 = vld [vmem:[%s9720_s1 + $0x378] sm:$0xff]  }
  0x32   :  { %6537 = vmatprep.subr.bf16.mxu1 %v7218_v57  ;;  %v7266_v57 = vld [vmem:[%s9720_s1 + $0x3f8] sm:$0xff]  }
  0x33   :  { %v7315_v50 = vld [vmem:[%s9720_s1 + $0x418] sm:$0xff]  }
  0x34   :  { %6516 = vmatpush3.bf16.msra.mxu0 %v7219_v58  ;;  %v7267_v58 = vld [vmem:[%s9720_s1 + $0x338] sm:$0xff]  }
  0x35   :  { %6538 = vmatpush3.bf16.msra.mxu1 %v7220_v59  ;;  %6517 = vmatprep.subr.bf16.mxu0 %v7221_v60  ;;  %v7268_v59 = vld [vmem:[%s9720_s1 + $0x3b8] sm:$0xff]   ;;  %v7269_v60 = vld [vmem:[%s9720_s1 + $0x370] sm:$0xff]  }
  0x36   :  { %6539 = vmatprep.subr.bf16.mxu1 %v7222_v61  ;;  %v7270_v61 = vld [vmem:[%s9720_s1 + $0x3f0] sm:$0xff]   ;;  %v7316_v51 = vld [vmem:[%s9720_s1 + $0x498] sm:$0xff]  }
  0x38   :  { %6518 = vmatpush3.bf16.msra.mxu0 %v7223_v62  ;;  %v7271_v62 = vld [vmem:[%s9720_s1 + $0x330] sm:$0xff]  }
  0x39   :  { %6540 = vmatpush3.bf16.msra.mxu1 %v7224_v63  ;;  %6519 = vmatprep.subr.bf16.mxu0 %v7225_v0  ;;  %v7272_v63 = vld [vmem:[%s9720_s1 + $0x3b0] sm:$0xff]   ;;  %v7273_v0 = vld [vmem:[%s9720_s1 + $0x368] sm:$0xff]  }
  0x3a   :  { %6541 = vmatprep.subr.bf16.mxu1 %v7226_v1  ;;  %v7274_v1 = vld [vmem:[%s9720_s1 + $0x3e8] sm:$0xff]  }
  0x3c   :  { %6520 = vmatpush3.bf16.msra.mxu0 %v7227_v2  ;;  %v7275_v2 = vld [vmem:[%s9720_s1 + $0x328] sm:$0xff]  }
  0x3d   :  { %6542 = vmatpush3.bf16.msra.mxu1 %v7228_v3  ;;  %6521 = vmatprep.subr.bf16.mxu0 %v7229_v4  ;;  %v7276_v3 = vld [vmem:[%s9720_s1 + $0x3a8] sm:$0xff]   ;;  %v7277_v4 = vld [vmem:[%s9720_s1 + $0x360] sm:$0xff]  }
  0x3e   :  { %6543 = vmatprep.subr.bf16.mxu1 %v7230_v5  ;;  %v7278_v5 = vld [vmem:[%s9720_s1 + $0x3e0] sm:$0xff]  }
  0x40   :  { %6522 = vmatpush3.bf16.msra.mxu0 %v7231_v6  ;;  %v7279_v6 = vld [vmem:[%s9720_s1 + $0x320] sm:$0xff]  }
  0x41   :  { %6544 = vmatpush3.bf16.msra.mxu1 %v7232_v7  ;;  %6551 = vmatprep.subr.bf16.mxu0 %v7233_v16  ;;  %v7280_v7 = vld [vmem:[%s9720_s1 + $0x3a0] sm:$0xff]   ;;  %v7289_v16 = vld [vmem:[%s9720_s1 + $0x348] sm:$0xff]  }
  0x42   :  { %6573 = vmatprep.subr.bf16.mxu1 %v7234_v17  ;;  %v7290_v17 = vld [vmem:[%s9720_s1 + $0x3c8] sm:$0xff]  }
  0x43   :  { %4619 = vmatmul.mubr.bf16.vlgmr.msra.gmra.mxu0 %v5891_v10  ;;  %v7283_v10 = vld [vmem:[%s9720_s1 + $0x318] sm:$0xff]  }
  0x44   :  { %4660 = vmatmul.mubr.bf16.vlgmr.msra.gmra.mxu1 %v5893_v14  ;;  %6552 = vmatpush3.bf16.msra.mxu0 %v7235_v18  ;;  %v7287_v14 = vld [vmem:[%s9720_s1 + $0x310] sm:$0xff]   ;;  %v7291_v18 = vld [vmem:[%s9720_s1 + $0x308] sm:$0xff]  }
  0x45   :  { %6574 = vmatpush3.bf16.msra.mxu1 %v7236_v19  ;;  %6553 = vmatprep.subr.bf16.mxu0 %v7237_v20  ;;  %v7292_v19 = vld [vmem:[%s9720_s1 + $0x388] sm:$0xff]   ;;  %v7293_v20 = vld [vmem:[%s9720_s1 + $0x340] sm:$0xff]  }
  0x46   :  { %6575 = vmatprep.subr.bf16.mxu1 %v7238_v21  ;;  %4700 = vmatprep.mubr.bf16.mxu0 %v5896_v53  ;;  %v7294_v21 = vld [vmem:[%s9720_s1 + $0x3c0] sm:$0xff]   ;;  %v7318_v53 = vld [vmem:[%s9720_s1 + $0x4d0] sm:$0xff]  }
  0x47   :  { %4741 = vmatprep.mubr.bf16.mxu1 %v5898_v55  ;;  %v7320_v55 = vld [vmem:[%s9720_s1 + $0x490] sm:$0xff]  }
  0x48   :  { %6554 = vmatpush3.bf16.msra.mxu0 %v7239_v22  ;;  %v7295_v22 = vld [vmem:[%s9720_s1 + $0x300] sm:$0xff]  }
  0x49   :  { %6576 = vmatpush3.bf16.msra.mxu1 %v7240_v23  ;;  %6555 = vmatprep.subr.bf16.mxu0 %v7241_v24  ;;  %v7296_v23 = vld [vmem:[%s9720_s1 + $0x380] sm:$0xff]   ;;  %v23_v24 = vld [vmem:[%s9721_s0 + $0x30] sm:$0xff] }
  0x4a   :  { %6577 = vmatprep.subr.bf16.mxu1 %v7242_v25  ;;  %v55_v25 = vld [vmem:[%s9721_s0 + $0x130] sm:$0xff] }
  0x4c   :  { %6556 = vmatpush3.bf16.msra.mxu0 %v7243_v26  ;;  %v24_v26 = vld [vmem:[%s9721_s0 + $0x38] sm:$0xff] }
  0x4d   :  { %6578 = vmatpush3.bf16.msra.mxu1 %v7244_v27  ;;  %6557 = vmatprep.subr.bf16.mxu0 %v7245_v28  ;;  %v5899_v27 = vcombine.low %v23_v24, %v55_v25  ;;  %v5900_v28 = vcombine.high %v23_v24, %v55_v25  ;;  %v7345_v24 = vld [vmem:[%s9720_s1 + $0x558] sm:$0xff]  }
  0x4e   :  { %6579 = vmatprep.subr.bf16.mxu1 %v7246_v29  ;;  %v56_v29 = vld [vmem:[%s9721_s0 + $0x138] sm:$0xff] }
  0x4f   :  { %v7346_v25 = vld [vmem:[%s9720_s1 + $0x5d8] sm:$0xff]  }
  0x50   :  { %6558 = vmatpush3.bf16.msra.mxu0 %v7247_v30  ;;  %v5901_v30 = vcombine.low %v24_v26, %v56_v29 }
  0x51   :  { %6580 = vmatpush3.bf16.msra.mxu1 %v7248_v31  ;;  %6559 = vmatprep.subr.bf16.mxu0 %v7249_v32  ;;  %v5902_v31 = vcombine.high %v24_v26, %v56_v29  ;;  %v7297_v32 = vld [vmem:[%s9720_s1 + $0x478] sm:$0xff]   ;;  %v7350_v29 = vld [vmem:[%s9720_s1 + $0x5d0] sm:$0xff]  }
  0x52   :  { %6581 = vmatprep.subr.bf16.mxu1 %v7250_v33  ;;  %v7298_v33 = vld [vmem:[%s9720_s1 + $0x4f8] sm:$0xff]  }
  0x53   :  { %v7347_v26 = vld [vmem:[%s9720_s1 + $0x518] sm:$0xff]  }
  0x54   :  { %6560 = vmatpush3.bf16.msra.mxu0 %v7251_v34  ;;  %v7299_v34 = vld [vmem:[%s9720_s1 + $0x438] sm:$0xff]  }
  0x55   :  { %6582 = vmatpush3.bf16.msra.mxu1 %v7252_v35  ;;  %6561 = vmatprep.subr.bf16.mxu0 %v7253_v36  ;;  %v7300_v35 = vld [vmem:[%s9720_s1 + $0x4b8] sm:$0xff]   ;;  %v7301_v36 = vld [vmem:[%s9720_s1 + $0x470] sm:$0xff]  }
  0x56   :  { %6583 = vmatprep.subr.bf16.mxu1 %v7254_v37  ;;  %v7302_v37 = vld [vmem:[%s9720_s1 + $0x4f0] sm:$0xff]  }
  0x58   :  { %6562 = vmatpush3.bf16.msra.mxu0 %v7255_v38  ;;  %v7303_v38 = vld [vmem:[%s9720_s1 + $0x430] sm:$0xff]  }
  0x59   :  { %6584 = vmatpush3.bf16.msra.mxu1 %v7256_v39  ;;  %6563 = vmatprep.subr.bf16.mxu0 %v7257_v40  ;;  %v7304_v39 = vld [vmem:[%s9720_s1 + $0x4b0] sm:$0xff]   ;;  %v7305_v40 = vld [vmem:[%s9720_s1 + $0x468] sm:$0xff]  }
  0x5a   :  { %6585 = vmatprep.subr.bf16.mxu1 %v7258_v41  ;;  %v7306_v41 = vld [vmem:[%s9720_s1 + $0x4e8] sm:$0xff]  }
  0x5c   :  { %6564 = vmatpush3.bf16.msra.mxu0 %v7259_v42  ;;  %v7307_v42 = vld [vmem:[%s9720_s1 + $0x428] sm:$0xff]  }
  0x5d   :  { %6586 = vmatpush3.bf16.msra.mxu1 %v7260_v43  ;;  %6565 = vmatprep.subr.bf16.mxu0 %v7261_v44  ;;  %v7308_v43 = vld [vmem:[%s9720_s1 + $0x4a8] sm:$0xff]   ;;  %v7309_v44 = vld [vmem:[%s9720_s1 + $0x460] sm:$0xff]  }
  0x5e   :  { %6587 = vmatprep.subr.bf16.mxu1 %v7262_v45  ;;  %v7310_v45 = vld [vmem:[%s9720_s1 + $0x4e0] sm:$0xff]  }
  0x60   :  { %6566 = vmatpush3.bf16.msra.mxu0 %v7263_v46  ;;  %v7311_v46 = vld [vmem:[%s9720_s1 + $0x420] sm:$0xff]  }
  0x61   :  { %6588 = vmatpush3.bf16.msra.mxu1 %v7264_v47  ;;  %6595 = vmatprep.subr.bf16.mxu0 %v7265_v56  ;;  %v7312_v47 = vld [vmem:[%s9720_s1 + $0x4a0] sm:$0xff]   ;;  %v7321_v56 = vld [vmem:[%s9720_s1 + $0x448] sm:$0xff]  }
  0x62   :  { %6617 = vmatprep.subr.bf16.mxu1 %v7266_v57  ;;  %v7322_v57 = vld [vmem:[%s9720_s1 + $0x4c8] sm:$0xff]  }
  0x63   :  { %4701 = vmatmul.mubr.bf16.vlgmr.msra.gmra.mxu0 %v5895_v52  ;;  %v7317_v52 = vld [vmem:[%s9720_s1 + $0x450] sm:$0xff]  }
  0x64   :  { %4742 = vmatmul.mubr.bf16.vlgmr.msra.gmra.mxu1 %v5897_v54  ;;  %6596 = vmatpush3.bf16.msra.mxu0 %v7267_v58  ;;  %v7319_v54 = vld [vmem:[%s9720_s1 + $0x410] sm:$0xff]   ;;  %v7323_v58 = vld [vmem:[%s9720_s1 + $0x408] sm:$0xff]  }
  0x65   :  { %6618 = vmatpush3.bf16.msra.mxu1 %v7268_v59  ;;  %6597 = vmatprep.subr.bf16.mxu0 %v7269_v60  ;;  %v7324_v59 = vld [vmem:[%s9720_s1 + $0x488] sm:$0xff]   ;;  %v7325_v60 = vld [vmem:[%s9720_s1 + $0x440] sm:$0xff]  }
  0x66   :  { %6619 = vmatprep.subr.bf16.mxu1 %v7270_v61  ;;  %4782 = vmatprep.mubr.bf16.mxu0 %v5900_v28  ;;  %v7326_v61 = vld [vmem:[%s9720_s1 + $0x4c0] sm:$0xff]   ;;  %v7349_v28 = vld [vmem:[%s9720_s1 + $0x550] sm:$0xff]  }
  0x67   :  { %4823 = vmatprep.mubr.bf16.mxu1 %v5902_v31  ;;  %v7352_v31 = vld [vmem:[%s9720_s1 + $0x590] sm:$0xff]  }
  0x68   :  { %6598 = vmatpush3.bf16.msra.mxu0 %v7271_v62  ;;  %v7327_v62 = vld [vmem:[%s9720_s1 + $0x400] sm:$0xff]  }
  0x69   :  { %6620 = vmatpush3.bf16.msra.mxu1 %v7272_v63  ;;  %6599 = vmatprep.subr.bf16.mxu0 %v7273_v0  ;;  %v7328_v63 = vld [vmem:[%s9720_s1 + $0x480] sm:$0xff]  }
  0x6a   :  { %6621 = vmatprep.subr.bf16.mxu1 %v7274_v1  ;;  %v25_v0 = vld [vmem:[%s9721_s0 + $0x40] sm:$0xff] }
  0x6b   :  { %v57_v1 = vld [vmem:[%s9721_s0 + $0x140] sm:$0xff] }
  0x6c   :  { %6600 = vmatpush3.bf16.msra.mxu0 %v7275_v2  ;;  %v5903_v2 = vcombine.low %v25_v0, %v57_v1 }
  0x6d   :  { %6622 = vmatpush3.bf16.msra.mxu1 %v7276_v3  ;;  %6601 = vmatprep.subr.bf16.mxu0 %v7277_v4  ;;  %v5904_v3 = vcombine.high %v25_v0, %v57_v1  ;;  %v26_v4 = vld [vmem:[%s9721_s0 + $0x48] sm:$0xff]  ;;  %v7377_v0 = vld [vmem:[%s9720_s1 + $0x658] sm:$0xff]  }
  0x6e   :  { %6623 = vmatprep.subr.bf16.mxu1 %v7278_v5  ;;  %v58_v5 = vld [vmem:[%s9721_s0 + $0x148] sm:$0xff]  ;;  %v7378_v1 = vld [vmem:[%s9720_s1 + $0x6d8] sm:$0xff]  }
  0x70   :  { %6602 = vmatpush3.bf16.msra.mxu0 %v7279_v6  ;;  %v5905_v6 = vcombine.low %v26_v4, %v58_v5 }
  0x71   :  { %6624 = vmatpush3.bf16.msra.mxu1 %v7280_v7  ;;  %6603 = vmatprep.subr.bf16.mxu0 %v7281_v8  ;;  %v5906_v7 = vcombine.high %v26_v4, %v58_v5  ;;  %v7329_v8 = vld [vmem:[%s9720_s1 + $0x578] sm:$0xff]   ;;  %v7381_v4 = vld [vmem:[%s9720_s1 + $0x650] sm:$0xff]  }
  0x72   :  { %6625 = vmatprep.subr.bf16.mxu1 %v7282_v9  ;;  %v7330_v9 = vld [vmem:[%s9720_s1 + $0x5f8] sm:$0xff]   ;;  %v7382_v5 = vld [vmem:[%s9720_s1 + $0x6d0] sm:$0xff]  }
  0x74   :  { %6604 = vmatpush3.bf16.msra.mxu0 %v7283_v10  ;;  %v7331_v10 = vld [vmem:[%s9720_s1 + $0x538] sm:$0xff]  }
  0x75   :  { %6626 = vmatpush3.bf16.msra.mxu1 %v7284_v11  ;;  %6605 = vmatprep.subr.bf16.mxu0 %v7285_v12  ;;  %v7332_v11 = vld [vmem:[%s9720_s1 + $0x5b8] sm:$0xff]   ;;  %v7333_v12 = vld [vmem:[%s9720_s1 + $0x570] sm:$0xff]  }
  0x76   :  { %6627 = vmatprep.subr.bf16.mxu1 %v7286_v13  ;;  %v7334_v13 = vld [vmem:[%s9720_s1 + $0x5f0] sm:$0xff]  }
  0x78   :  { %6606 = vmatpush3.bf16.msra.mxu0 %v7287_v14  ;;  %v7335_v14 = vld [vmem:[%s9720_s1 + $0x530] sm:$0xff]  }
  0x79   :  { %6628 = vmatpush3.bf16.msra.mxu1 %v7288_v15  ;;  %6607 = vmatprep.subr.bf16.mxu0 %v7289_v16  ;;  %v7336_v15 = vld [vmem:[%s9720_s1 + $0x5b0] sm:$0xff]   ;;  %v7337_v16 = vld [vmem:[%s9720_s1 + $0x568] sm:$0xff]  }
  0x7a   :  { %6629 = vmatprep.subr.bf16.mxu1 %v7290_v17  ;;  %v7338_v17 = vld [vmem:[%s9720_s1 + $0x5e8] sm:$0xff]  }
  0x7c   :  { %6608 = vmatpush3.bf16.msra.mxu0 %v7291_v18  ;;  %v7339_v18 = vld [vmem:[%s9720_s1 + $0x528] sm:$0xff]  }
  0x7d   :  { %6630 = vmatpush3.bf16.msra.mxu1 %v7292_v19  ;;  %6609 = vmatprep.subr.bf16.mxu0 %v7293_v20  ;;  %v7340_v19 = vld [vmem:[%s9720_s1 + $0x5a8] sm:$0xff]   ;;  %v7341_v20 = vld [vmem:[%s9720_s1 + $0x560] sm:$0xff]  }
  0x7e   :  { %6631 = vmatprep.subr.bf16.mxu1 %v7294_v21  ;;  %v7342_v21 = vld [vmem:[%s9720_s1 + $0x5e0] sm:$0xff]  }
  0x80   :  { %6610 = vmatpush3.bf16.msra.mxu0 %v7295_v22  ;;  %v7343_v22 = vld [vmem:[%s9720_s1 + $0x520] sm:$0xff]  }
  0x81   :  { %6632 = vmatpush3.bf16.msra.mxu1 %v7296_v23  ;;  %6639 = vmatprep.subr.bf16.mxu0 %v7297_v32  ;;  %v7344_v23 = vld [vmem:[%s9720_s1 + $0x5a0] sm:$0xff]   ;;  %v7353_v32 = vld [vmem:[%s9720_s1 + $0x548] sm:$0xff]  }
  0x82   :  { %6661 = vmatprep.subr.bf16.mxu1 %v7298_v33  ;;  %v7354_v33 = vld [vmem:[%s9720_s1 + $0x5c8] sm:$0xff]  }
  0x83   :  { %4783 = vmatmul.mubr.bf16.vlgmr.msra.gmra.mxu0 %v5899_v27  ;;  %v7348_v27 = vld [vmem:[%s9720_s1 + $0x598] sm:$0xff]  }
  0x84   :  { %4824 = vmatmul.mubr.bf16.vlgmr.msra.gmra.mxu1 %v5901_v30  ;;  %6640 = vmatpush3.bf16.msra.mxu0 %v7299_v34  ;;  %v7351_v30 = vld [vmem:[%s9720_s1 + $0x510] sm:$0xff]   ;;  %v7355_v34 = vld [vmem:[%s9720_s1 + $0x508] sm:$0xff]  }
  0x85   :  { %6662 = vmatpush3.bf16.msra.mxu1 %v7300_v35  ;;  %6641 = vmatprep.subr.bf16.mxu0 %v7301_v36  ;;  %v7356_v35 = vld [vmem:[%s9720_s1 + $0x588] sm:$0xff]   ;;  %v7357_v36 = vld [vmem:[%s9720_s1 + $0x540] sm:$0xff]  }
  0x86   :  { %6663 = vmatprep.subr.bf16.mxu1 %v7302_v37  ;;  %4864 = vmatprep.mubr.bf16.mxu0 %v5904_v3  ;;  %v7358_v37 = vld [vmem:[%s9720_s1 + $0x5c0] sm:$0xff]   ;;  %v7380_v3 = vld [vmem:[%s9720_s1 + $0x698] sm:$0xff]  }
  0x87   :  { %4905 = vmatprep.mubr.bf16.mxu1 %v5906_v7  ;;  %v7384_v7 = vld [vmem:[%s9720_s1 + $0x690] sm:$0xff]  }
  0x88   :  { %6642 = vmatpush3.bf16.msra.mxu0 %v7303_v38  ;;  %v7359_v38 = vld [vmem:[%s9720_s1 + $0x500] sm:$0xff]  }
  0x89   :  { %6664 = vmatpush3.bf16.msra.mxu1 %v7304_v39  ;;  %6643 = vmatprep.subr.bf16.mxu0 %v7305_v40  ;;  %v7360_v39 = vld [vmem:[%s9720_s1 + $0x580] sm:$0xff]   ;;  %v27_v40 = vld [vmem:[%s9721_s0 + $0x50] sm:$0xff] }
  0x8a   :  { %6665 = vmatprep.subr.bf16.mxu1 %v7306_v41  ;;  %v59_v41 = vld [vmem:[%s9721_s0 + $0x150] sm:$0xff] }
  0x8c   :  { %6644 = vmatpush3.bf16.msra.mxu0 %v7307_v42  ;;  %v28_v42 = vld [vmem:[%s9721_s0 + $0x58] sm:$0xff] }
  0x8d   :  { %6666 = vmatpush3.bf16.msra.mxu1 %v7308_v43  ;;  %6645 = vmatprep.subr.bf16.mxu0 %v7309_v44  ;;  %v60_v43 = vld [vmem:[%s9721_s0 + $0x158] sm:$0xff]  ;;  %v5907_v44 = vcombine.low %v27_v40, %v59_v41 }
  0x8e   :  { %6667 = vmatprep.subr.bf16.mxu1 %v7310_v45  ;;  %v5908_v45 = vcombine.high %v27_v40, %v59_v41  ;;  %v7409_v40 = vld [vmem:[%s9720_s1 + $0x758] sm:$0xff]  }
  0x8f   :  { %v7410_v41 = vld [vmem:[%s9720_s1 + $0x7d8] sm:$0xff]  }
  0x90   :  { %6646 = vmatpush3.bf16.msra.mxu0 %v7311_v46  ;;  %v5909_v46 = vcombine.low %v28_v42, %v60_v43 }
  0x91   :  { %6668 = vmatpush3.bf16.msra.mxu1 %v7312_v47  ;;  %6647 = vmatprep.subr.bf16.mxu0 %v7313_v48  ;;  %v5910_v47 = vcombine.high %v28_v42, %v60_v43  ;;  %v7361_v48 = vld [vmem:[%s9720_s1 + $0x678] sm:$0xff]  }
  0x92   :  { %6669 = vmatprep.subr.bf16.mxu1 %v7314_v49  ;;  %v7362_v49 = vld [vmem:[%s9720_s1 + $0x6f8] sm:$0xff]  }
  0x93   :  { %v7411_v42 = vld [vmem:[%s9720_s1 + $0x718] sm:$0xff]  }
  0x94   :  { %6648 = vmatpush3.bf16.msra.mxu0 %v7315_v50  ;;  %v7363_v50 = vld [vmem:[%s9720_s1 + $0x638] sm:$0xff]  }
  0x95   :  { %6670 = vmatpush3.bf16.msra.mxu1 %v7316_v51  ;;  %6649 = vmatprep.subr.bf16.mxu0 %v7317_v52  ;;  %v7364_v51 = vld [vmem:[%s9720_s1 + $0x6b8] sm:$0xff]   ;;  %v7365_v52 = vld [vmem:[%s9720_s1 + $0x670] sm:$0xff]  }
  0x96   :  { %6671 = vmatprep.subr.bf16.mxu1 %v7318_v53  ;;  %v7366_v53 = vld [vmem:[%s9720_s1 + $0x6f0] sm:$0xff]   ;;  %v7412_v43 = vld [vmem:[%s9720_s1 + $0x798] sm:$0xff]  }
  0x98   :  { %6650 = vmatpush3.bf16.msra.mxu0 %v7319_v54  ;;  %v7367_v54 = vld [vmem:[%s9720_s1 + $0x630] sm:$0xff]  }
  0x99   :  { %6672 = vmatpush3.bf16.msra.mxu1 %v7320_v55  ;;  %6651 = vmatprep.subr.bf16.mxu0 %v7321_v56  ;;  %v7368_v55 = vld [vmem:[%s9720_s1 + $0x6b0] sm:$0xff]   ;;  %v7369_v56 = vld [vmem:[%s9720_s1 + $0x668] sm:$0xff]  }
  0x9a   :  { %6673 = vmatprep.subr.bf16.mxu1 %v7322_v57  ;;  %v7370_v57 = vld [vmem:[%s9720_s1 + $0x6e8] sm:$0xff]  }
  0x9c   :  { %6652 = vmatpush3.bf16.msra.mxu0 %v7323_v58  ;;  %v7371_v58 = vld [vmem:[%s9720_s1 + $0x628] sm:$0xff]  }
  0x9d   :  { %6674 = vmatpush3.bf16.msra.mxu1 %v7324_v59  ;;  %6653 = vmatprep.subr.bf16.mxu0 %v7325_v60  ;;  %v7372_v59 = vld [vmem:[%s9720_s1 + $0x6a8] sm:$0xff]   ;;  %v7373_v60 = vld [vmem:[%s9720_s1 + $0x660] sm:$0xff]  }
  0x9e   :  { %6675 = vmatprep.subr.bf16.mxu1 %v7326_v61  ;;  %v7374_v61 = vld [vmem:[%s9720_s1 + $0x6e0] sm:$0xff]  }
  0xa0   :  { %6654 = vmatpush3.bf16.msra.mxu0 %v7327_v62  ;;  %v7375_v62 = vld [vmem:[%s9720_s1 + $0x620] sm:$0xff]  }
  0xa1   :  { %6676 = vmatpush3.bf16.msra.mxu1 %v7328_v63  ;;  %6683 = vmatprep.subr.bf16.mxu0 %v7329_v8  ;;  %v7376_v63 = vld [vmem:[%s9720_s1 + $0x6a0] sm:$0xff]   ;;  %v7385_v8 = vld [vmem:[%s9720_s1 + $0x648] sm:$0xff]  }
  0xa2   :  { %6705 = vmatprep.subr.bf16.mxu1 %v7330_v9  ;;  %v7386_v9 = vld [vmem:[%s9720_s1 + $0x6c8] sm:$0xff]  }
  0xa3   :  { %4865 = vmatmul.mubr.bf16.vlgmr.msra.gmra.mxu0 %v5903_v2  ;;  %v7379_v2 = vld [vmem:[%s9720_s1 + $0x618] sm:$0xff]  }
  0xa4   :  { %4906 = vmatmul.mubr.bf16.vlgmr.msra.gmra.mxu1 %v5905_v6  ;;  %6684 = vmatpush3.bf16.msra.mxu0 %v7331_v10  ;;  %v7383_v6 = vld [vmem:[%s9720_s1 + $0x610] sm:$0xff]   ;;  %v7387_v10 = vld [vmem:[%s9720_s1 + $0x608] sm:$0xff]  }
  0xa5   :  { %6706 = vmatpush3.bf16.msra.mxu1 %v7332_v11  ;;  %6685 = vmatprep.subr.bf16.mxu0 %v7333_v12  ;;  %v7388_v11 = vld [vmem:[%s9720_s1 + $0x688] sm:$0xff]   ;;  %v7389_v12 = vld [vmem:[%s9720_s1 + $0x640] sm:$0xff]  }
  0xa6   :  { %6707 = vmatprep.subr.bf16.mxu1 %v7334_v13  ;;  %4946 = vmatprep.mubr.bf16.mxu0 %v5908_v45  ;;  %v7390_v13 = vld [vmem:[%s9720_s1 + $0x6c0] sm:$0xff]   ;;  %v7414_v45 = vld [vmem:[%s9720_s1 + $0x7d0] sm:$0xff]  }
  0xa7   :  { %4987 = vmatprep.mubr.bf16.mxu1 %v5910_v47  ;;  %v7416_v47 = vld [vmem:[%s9720_s1 + $0x790] sm:$0xff]  }
  0xa8   :  { %6686 = vmatpush3.bf16.msra.mxu0 %v7335_v14  ;;  %v7391_v14 = vld [vmem:[%s9720_s1 + $0x600] sm:$0xff]  }
  0xa9   :  { %6708 = vmatpush3.bf16.msra.mxu1 %v7336_v15  ;;  %6687 = vmatprep.subr.bf16.mxu0 %v7337_v16  ;;  %v7392_v15 = vld [vmem:[%s9720_s1 + $0x680] sm:$0xff]  }
  0xaa   :  { %6709 = vmatprep.subr.bf16.mxu1 %v7338_v17  ;;  %v29_v16 = vld [vmem:[%s9721_s0 + $0x60] sm:$0xff] }
  0xab   :  { %v61_v17 = vld [vmem:[%s9721_s0 + $0x160] sm:$0xff] }
  0xac   :  { %6688 = vmatpush3.bf16.msra.mxu0 %v7339_v18  ;;  %v30_v18 = vld [vmem:[%s9721_s0 + $0x68] sm:$0xff] }
  0xad   :  { %6710 = vmatpush3.bf16.msra.mxu1 %v7340_v19  ;;  %6689 = vmatprep.subr.bf16.mxu0 %v7341_v20  ;;  %v5911_v19 = vcombine.low %v29_v16, %v61_v17  ;;  %v5912_v20 = vcombine.high %v29_v16, %v61_v17  ;;  %v7441_v16 = vld [vmem:[%s9720_s1 + $0x858] sm:$0xff]  }
  0xae   :  { %6711 = vmatprep.subr.bf16.mxu1 %v7342_v21  ;;  %v62_v21 = vld [vmem:[%s9721_s0 + $0x168] sm:$0xff]  ;;  %v7442_v17 = vld [vmem:[%s9720_s1 + $0x8d8] sm:$0xff]  }
  0xb0   :  { %6690 = vmatpush3.bf16.msra.mxu0 %v7343_v22  ;;  %v5913_v22 = vcombine.low %v30_v18, %v62_v21 }
  0xb1   :  { %6712 = vmatpush3.bf16.msra.mxu1 %v7344_v23  ;;  %6691 = vmatprep.subr.bf16.mxu0 %v7345_v24  ;;  %v5914_v23 = vcombine.high %v30_v18, %v62_v21  ;;  %v7393_v24 = vld [vmem:[%s9720_s1 + $0x778] sm:$0xff]   ;;  %v7446_v21 = vld [vmem:[%s9720_s1 + $0x8d0] sm:$0xff]  }
  0xb2   :  { %6713 = vmatprep.subr.bf16.mxu1 %v7346_v25  ;;  %v7394_v25 = vld [vmem:[%s9720_s1 + $0x7f8] sm:$0xff]  }
  0xb3   :  { %v7443_v18 = vld [vmem:[%s9720_s1 + $0x818] sm:$0xff]  }
  0xb4   :  { %6692 = vmatpush3.bf16.msra.mxu0 %v7347_v26  ;;  %v7395_v26 = vld [vmem:[%s9720_s1 + $0x738] sm:$0xff]  }
  0xb5   :  { %6714 = vmatpush3.bf16.msra.mxu1 %v7348_v27  ;;  %6693 = vmatprep.subr.bf16.mxu0 %v7349_v28  ;;  %v7396_v27 = vld [vmem:[%s9720_s1 + $0x7b8] sm:$0xff]   ;;  %v7397_v28 = vld [vmem:[%s9720_s1 + $0x770] sm:$0xff]  }
  0xb6   :  { %6715 = vmatprep.subr.bf16.mxu1 %v7350_v29  ;;  %v7398_v29 = vld [vmem:[%s9720_s1 + $0x7f0] sm:$0xff]  }
  0xb8   :  { %6694 = vmatpush3.bf16.msra.mxu0 %v7351_v30  ;;  %v7399_v30 = vld [vmem:[%s9720_s1 + $0x730] sm:$0xff]  }
  0xb9   :  { %6716 = vmatpush3.bf16.msra.mxu1 %v7352_v31  ;;  %6695 = vmatprep.subr.bf16.mxu0 %v7353_v32  ;;  %v7400_v31 = vld [vmem:[%s9720_s1 + $0x7b0] sm:$0xff]   ;;  %v7401_v32 = vld [vmem:[%s9720_s1 + $0x768] sm:$0xff]  }
  0xba   :  { %6717 = vmatprep.subr.bf16.mxu1 %v7354_v33  ;;  %v7402_v33 = vld [vmem:[%s9720_s1 + $0x7e8] sm:$0xff]  }
  0xbc   :  { %6696 = vmatpush3.bf16.msra.mxu0 %v7355_v34  ;;  %v7403_v34 = vld [vmem:[%s9720_s1 + $0x728] sm:$0xff]  }
  0xbd   :  { %6718 = vmatpush3.bf16.msra.mxu1 %v7356_v35  ;;  %6697 = vmatprep.subr.bf16.mxu0 %v7357_v36  ;;  %v7404_v35 = vld [vmem:[%s9720_s1 + $0x7a8] sm:$0xff]   ;;  %v7405_v36 = vld [vmem:[%s9720_s1 + $0x760] sm:$0xff]  }
  0xbe   :  { %6719 = vmatprep.subr.bf16.mxu1 %v7358_v37  ;;  %v7406_v37 = vld [vmem:[%s9720_s1 + $0x7e0] sm:$0xff]  }
  0xc0   :  { %6698 = vmatpush3.bf16.msra.mxu0 %v7359_v38  ;;  %v7407_v38 = vld [vmem:[%s9720_s1 + $0x720] sm:$0xff]  }
  0xc1   :  { %6720 = vmatpush3.bf16.msra.mxu1 %v7360_v39  ;;  %6727 = vmatprep.subr.bf16.mxu0 %v7361_v48  ;;  %v7408_v39 = vld [vmem:[%s9720_s1 + $0x7a0] sm:$0xff]   ;;  %v7417_v48 = vld [vmem:[%s9720_s1 + $0x748] sm:$0xff]  }
  0xc2   :  { %6749 = vmatprep.subr.bf16.mxu1 %v7362_v49  ;;  %v7418_v49 = vld [vmem:[%s9720_s1 + $0x7c8] sm:$0xff]  }
  0xc3   :  { %4947 = vmatmul.mubr.bf16.vlgmr.msra.gmra.mxu0 %v5907_v44  ;;  %v7413_v44 = vld [vmem:[%s9720_s1 + $0x750] sm:$0xff]  }
  0xc4   :  { %4988 = vmatmul.mubr.bf16.vlgmr.msra.gmra.mxu1 %v5909_v46  ;;  %6728 = vmatpush3.bf16.msra.mxu0 %v7363_v50  ;;  %v7415_v46 = vld [vmem:[%s9720_s1 + $0x710] sm:$0xff]   ;;  %v7419_v50 = vld [vmem:[%s9720_s1 + $0x708] sm:$0xff]  }
  0xc5   :  { %6750 = vmatpush3.bf16.msra.mxu1 %v7364_v51  ;;  %6729 = vmatprep.subr.bf16.mxu0 %v7365_v52  ;;  %v7420_v51 = vld [vmem:[%s9720_s1 + $0x788] sm:$0xff]   ;;  %v7421_v52 = vld [vmem:[%s9720_s1 + $0x740] sm:$0xff]  }
  0xc6   :  { %6751 = vmatprep.subr.bf16.mxu1 %v7366_v53  ;;  %5028 = vmatprep.mubr.bf16.mxu0 %v5912_v20  ;;  %v7422_v53 = vld [vmem:[%s9720_s1 + $0x7c0] sm:$0xff]   ;;  %v7445_v20 = vld [vmem:[%s9720_s1 + $0x850] sm:$0xff]  }
  0xc7   :  { %5069 = vmatprep.mubr.bf16.mxu1 %v5914_v23  ;;  %v7448_v23 = vld [vmem:[%s9720_s1 + $0x890] sm:$0xff]  }
  0xc8   :  { %6730 = vmatpush3.bf16.msra.mxu0 %v7367_v54  ;;  %v7423_v54 = vld [vmem:[%s9720_s1 + $0x700] sm:$0xff]  }
  0xc9   :  { %6752 = vmatpush3.bf16.msra.mxu1 %v7368_v55  ;;  %6731 = vmatprep.subr.bf16.mxu0 %v7369_v56  ;;  %v7424_v55 = vld [vmem:[%s9720_s1 + $0x780] sm:$0xff]   ;;  %v31_v56 = vld [vmem:[%s9721_s0 + $0x70] sm:$0xff] }
  0xca   :  { %6753 = vmatprep.subr.bf16.mxu1 %v7370_v57  ;;  %v63_v57 = vld [vmem:[%s9721_s0 + $0x170] sm:$0xff] }
  0xcc   :  { %6732 = vmatpush3.bf16.msra.mxu0 %v7371_v58  ;;  %v32_v58 = vld [vmem:[%s9721_s0 + $0x78] sm:$0xff] }
  0xcd   :  { %6754 = vmatpush3.bf16.msra.mxu1 %v7372_v59  ;;  %6733 = vmatprep.subr.bf16.mxu0 %v7373_v60  ;;  %v64_v59 = vld [vmem:[%s9721_s0 + $0x178] sm:$0xff]  ;;  %v5915_v60 = vcombine.low %v31_v56, %v63_v57 }
  0xce   :  { %6755 = vmatprep.subr.bf16.mxu1 %v7374_v61  ;;  %v5916_v61 = vcombine.high %v31_v56, %v63_v57  ;;  %v7473_v56 = vld [vmem:[%s9720_s1 + $0x958] sm:$0xff]  }
  0xcf   :  { %v7474_v57 = vld [vmem:[%s9720_s1 + $0x9d8] sm:$0xff]  }
  0xd0   :  { %6734 = vmatpush3.bf16.msra.mxu0 %v7375_v62  ;;  %v5917_v62 = vcombine.low %v32_v58, %v64_v59 }
  0xd1   :  { %6756 = vmatpush3.bf16.msra.mxu1 %v7376_v63  ;;  %6735 = vmatprep.subr.bf16.mxu0 %v7377_v0  ;;  %v5918_v63 = vcombine.high %v32_v58, %v64_v59  ;;  %v7425_v0 = vld [vmem:[%s9720_s1 + $0x878] sm:$0xff]  }
  0xd2   :  { %6757 = vmatprep.subr.bf16.mxu1 %v7378_v1  ;;  %v7426_v1 = vld [vmem:[%s9720_s1 + $0x8f8] sm:$0xff]  }
  0xd3   :  { %v7475_v58 = vld [vmem:[%s9720_s1 + $0x918] sm:$0xff]  }
  0xd4   :  { %6736 = vmatpush3.bf16.msra.mxu0 %v7379_v2  ;;  %v7427_v2 = vld [vmem:[%s9720_s1 + $0x838] sm:$0xff]  }
  0xd5   :  { %6758 = vmatpush3.bf16.msra.mxu1 %v7380_v3  ;;  %6737 = vmatprep.subr.bf16.mxu0 %v7381_v4  ;;  %v7428_v3 = vld [vmem:[%s9720_s1 + $0x8b8] sm:$0xff]   ;;  %v7429_v4 = vld [vmem:[%s9720_s1 + $0x870] sm:$0xff]  }
  0xd6   :  { %6759 = vmatprep.subr.bf16.mxu1 %v7382_v5  ;;  %v7430_v5 = vld [vmem:[%s9720_s1 + $0x8f0] sm:$0xff]   ;;  %v7476_v59 = vld [vmem:[%s9720_s1 + $0x998] sm:$0xff]  }
  0xd8   :  { %6738 = vmatpush3.bf16.msra.mxu0 %v7383_v6  ;;  %v7431_v6 = vld [vmem:[%s9720_s1 + $0x830] sm:$0xff]  }
  0xd9   :  { %6760 = vmatpush3.bf16.msra.mxu1 %v7384_v7  ;;  %6739 = vmatprep.subr.bf16.mxu0 %v7385_v8  ;;  %v7432_v7 = vld [vmem:[%s9720_s1 + $0x8b0] sm:$0xff]   ;;  %v7433_v8 = vld [vmem:[%s9720_s1 + $0x868] sm:$0xff]  }
  0xda   :  { %6761 = vmatprep.subr.bf16.mxu1 %v7386_v9  ;;  %v7434_v9 = vld [vmem:[%s9720_s1 + $0x8e8] sm:$0xff]  }
  0xdc   :  { %6740 = vmatpush3.bf16.msra.mxu0 %v7387_v10  ;;  %v7435_v10 = vld [vmem:[%s9720_s1 + $0x828] sm:$0xff]  }
  0xdd   :  { %6762 = vmatpush3.bf16.msra.mxu1 %v7388_v11  ;;  %6741 = vmatprep.subr.bf16.mxu0 %v7389_v12  ;;  %v7436_v11 = vld [vmem:[%s9720_s1 + $0x8a8] sm:$0xff]   ;;  %v7437_v12 = vld [vmem:[%s9720_s1 + $0x860] sm:$0xff]  }
  0xde   :  { %6763 = vmatprep.subr.bf16.mxu1 %v7390_v13  ;;  %v7438_v13 = vld [vmem:[%s9720_s1 + $0x8e0] sm:$0xff]  }
  0xe0   :  { %6742 = vmatpush3.bf16.msra.mxu0 %v7391_v14  ;;  %v7439_v14 = vld [vmem:[%s9720_s1 + $0x820] sm:$0xff]  }
  0xe1   :  { %6764 = vmatpush3.bf16.msra.mxu1 %v7392_v15  ;;  %6771 = vmatprep.subr.bf16.mxu0 %v7393_v24  ;;  %v7440_v15 = vld [vmem:[%s9720_s1 + $0x8a0] sm:$0xff]   ;;  %v7449_v24 = vld [vmem:[%s9720_s1 + $0x848] sm:$0xff]  }
  0xe2   :  { %6793 = vmatprep.subr.bf16.mxu1 %v7394_v25  ;;  %v7450_v25 = vld [vmem:[%s9720_s1 + $0x8c8] sm:$0xff]  }
  0xe3   :  { %5029 = vmatmul.mubr.bf16.vlgmr.msra.gmra.mxu0 %v5911_v19  ;;  %v7444_v19 = vld [vmem:[%s9720_s1 + $0x898] sm:$0xff]  }
  0xe4   :  { %5070 = vmatmul.mubr.bf16.vlgmr.msra.gmra.mxu1 %v5913_v22  ;;  %6772 = vmatpush3.bf16.msra.mxu0 %v7395_v26  ;;  %v7447_v22 = vld [vmem:[%s9720_s1 + $0x810] sm:$0xff]   ;;  %v7451_v26 = vld [vmem:[%s9720_s1 + $0x808] sm:$0xff]  }
  0xe5   :  { %6794 = vmatpush3.bf16.msra.mxu1 %v7396_v27  ;;  %6773 = vmatprep.subr.bf16.mxu0 %v7397_v28  ;;  %v7452_v27 = vld [vmem:[%s9720_s1 + $0x888] sm:$0xff]   ;;  %v7453_v28 = vld [vmem:[%s9720_s1 + $0x840] sm:$0xff]  }
  0xe6   :  { %6795 = vmatprep.subr.bf16.mxu1 %v7398_v29  ;;  %5110 = vmatprep.mubr.bf16.mxu0 %v5916_v61  ;;  %v7454_v29 = vld [vmem:[%s9720_s1 + $0x8c0] sm:$0xff]   ;;  %v7478_v61 = vld [vmem:[%s9720_s1 + $0x9d0] sm:$0xff]  }
  0xe7   :  { %5151 = vmatprep.mubr.bf16.mxu1 %v5918_v63  ;;  %v7480_v63 = vld [vmem:[%s9720_s1 + $0x990] sm:$0xff]  }
  0xe8   :  { %6774 = vmatpush3.bf16.msra.mxu0 %v7399_v30  ;;  %v7455_v30 = vld [vmem:[%s9720_s1 + $0x800] sm:$0xff]  }
  0xe9   :  { %6796 = vmatpush3.bf16.msra.mxu1 %v7400_v31  ;;  %6775 = vmatprep.subr.bf16.mxu0 %v7401_v32  ;;  %v7456_v31 = vld [vmem:[%s9720_s1 + $0x880] sm:$0xff]  }
  0xea   :  { %6797 = vmatprep.subr.bf16.mxu1 %v7402_v33  ;;  %v33_v32 = vld [vmem:[%s9721_s0 + $0x80] sm:$0xff] }
  0xeb   :  { %v65_v33 = vld [vmem:[%s9721_s0 + $0x180] sm:$0xff] }
  0xec   :  { %6776 = vmatpush3.bf16.msra.mxu0 %v7403_v34  ;;  %v34_v34 = vld [vmem:[%s9721_s0 + $0x88] sm:$0xff] }
  0xed   :  { %6798 = vmatpush3.bf16.msra.mxu1 %v7404_v35  ;;  %6777 = vmatprep.subr.bf16.mxu0 %v7405_v36  ;;  %v5919_v35 = vcombine.low %v33_v32, %v65_v33  ;;  %v5920_v36 = vcombine.high %v33_v32, %v65_v33  ;;  %v7505_v32 = vld [vmem:[%s9720_s1 + $0xa58] sm:$0xff]  }
  0xee   :  { %6799 = vmatprep.subr.bf16.mxu1 %v7406_v37  ;;  %v66_v37 = vld [vmem:[%s9721_s0 + $0x188] sm:$0xff]  ;;  %v7506_v33 = vld [vmem:[%s9720_s1 + $0xad8] sm:$0xff]  }
  0xf0   :  { %6778 = vmatpush3.bf16.msra.mxu0 %v7407_v38  ;;  %v5921_v38 = vcombine.low %v34_v34, %v66_v37 }
  0xf1   :  { %6800 = vmatpush3.bf16.msra.mxu1 %v7408_v39  ;;  %6779 = vmatprep.subr.bf16.mxu0 %v7409_v40  ;;  %v5922_v39 = vcombine.high %v34_v34, %v66_v37  ;;  %v7457_v40 = vld [vmem:[%s9720_s1 + $0x978] sm:$0xff]   ;;  %v7510_v37 = vld [vmem:[%s9720_s1 + $0xad0] sm:$0xff]  }
  0xf2   :  { %6801 = vmatprep.subr.bf16.mxu1 %v7410_v41  ;;  %v7458_v41 = vld [vmem:[%s9720_s1 + $0x9f8] sm:$0xff]  }
  0xf3   :  { %v7507_v34 = vld [vmem:[%s9720_s1 + $0xa18] sm:$0xff]  }
  0xf4   :  { %6780 = vmatpush3.bf16.msra.mxu0 %v7411_v42  ;;  %v7459_v42 = vld [vmem:[%s9720_s1 + $0x938] sm:$0xff]  }
  0xf5   :  { %6802 = vmatpush3.bf16.msra.mxu1 %v7412_v43  ;;  %6781 = vmatprep.subr.bf16.mxu0 %v7413_v44  ;;  %v7460_v43 = vld [vmem:[%s9720_s1 + $0x9b8] sm:$0xff]   ;;  %v7461_v44 = vld [vmem:[%s9720_s1 + $0x970] sm:$0xff]  }
  0xf6   :  { %6803 = vmatprep.subr.bf16.mxu1 %v7414_v45  ;;  %v7462_v45 = vld [vmem:[%s9720_s1 + $0x9f0] sm:$0xff]  }
  0xf8   :  { %6782 = vmatpush3.bf16.msra.mxu0 %v7415_v46  ;;  %v7463_v46 = vld [vmem:[%s9720_s1 + $0x930] sm:$0xff]  }
  0xf9   :  { %6804 = vmatpush3.bf16.msra.mxu1 %v7416_v47  ;;  %6783 = vmatprep.subr.bf16.mxu0 %v7417_v48  ;;  %v7464_v47 = vld [vmem:[%s9720_s1 + $0x9b0] sm:$0xff]   ;;  %v7465_v48 = vld [vmem:[%s9720_s1 + $0x968] sm:$0xff]  }
  0xfa   :  { %6805 = vmatprep.subr.bf16.mxu1 %v7418_v49  ;;  %v7466_v49 = vld [vmem:[%s9720_s1 + $0x9e8] sm:$0xff]  }
  0xfc   :  { %6784 = vmatpush3.bf16.msra.mxu0 %v7419_v50  ;;  %v7467_v50 = vld [vmem:[%s9720_s1 + $0x928] sm:$0xff]  }
  0xfd   :  { %6806 = vmatpush3.bf16.msra.mxu1 %v7420_v51  ;;  %6785 = vmatprep.subr.bf16.mxu0 %v7421_v52  ;;  %v7468_v51 = vld [vmem:[%s9720_s1 + $0x9a8] sm:$0xff]   ;;  %v7469_v52 = vld [vmem:[%s9720_s1 + $0x960] sm:$0xff]  }
  0xfe   :  { %6807 = vmatprep.subr.bf16.mxu1 %v7422_v53  ;;  %v7470_v53 = vld [vmem:[%s9720_s1 + $0x9e0] sm:$0xff]  }
 0x100   :  { %6786 = vmatpush3.bf16.msra.mxu0 %v7423_v54  ;;  %v7471_v54 = vld [vmem:[%s9720_s1 + $0x920] sm:$0xff]  }
 0x101   :  { %6808 = vmatpush3.bf16.msra.mxu1 %v7424_v55  ;;  %6815 = vmatprep.subr.bf16.mxu0 %v7425_v0  ;;  %v7472_v55 = vld [vmem:[%s9720_s1 + $0x9a0] sm:$0xff]   ;;  %v7481_v0 = vld [vmem:[%s9720_s1 + $0x948] sm:$0xff]  }
 0x102   :  { %6837 = vmatprep.subr.bf16.mxu1 %v7426_v1  ;;  %v7482_v1 = vld [vmem:[%s9720_s1 + $0x9c8] sm:$0xff]  }
 0x103   :  { %5111 = vmatmul.mubr.bf16.vlgmr.msra.gmra.mxu0 %v5915_v60  ;;  %v7477_v60 = vld [vmem:[%s9720_s1 + $0x950] sm:$0xff]  }
 0x104   :  { %5152 = vmatmul.mubr.bf16.vlgmr.msra.gmra.mxu1 %v5917_v62  ;;  %6816 = vmatpush3.bf16.msra.mxu0 %v7427_v2  ;;  %v7479_v62 = vld [vmem:[%s9720_s1 + $0x910] sm:$0xff]   ;;  %v7483_v2 = vld [vmem:[%s9720_s1 + $0x908] sm:$0xff]  }
 0x105   :  { %6838 = vmatpush3.bf16.msra.mxu1 %v7428_v3  ;;  %6817 = vmatprep.subr.bf16.mxu0 %v7429_v4  ;;  %v7484_v3 = vld [vmem:[%s9720_s1 + $0x988] sm:$0xff]   ;;  %v7485_v4 = vld [vmem:[%s9720_s1 + $0x940] sm:$0xff]  }
 0x106   :  { %6839 = vmatprep.subr.bf16.mxu1 %v7430_v5  ;;  %5192 = vmatprep.mubr.bf16.mxu0 %v5920_v36  ;;  %v7486_v5 = vld [vmem:[%s9720_s1 + $0x9c0] sm:$0xff]   ;;  %v7509_v36 = vld [vmem:[%s9720_s1 + $0xa50] sm:$0xff]  }
 0x107   :  { %5233 = vmatprep.mubr.bf16.mxu1 %v5922_v39  ;;  %v7512_v39 = vld [vmem:[%s9720_s1 + $0xa90] sm:$0xff]  }
 0x108   :  { %6818 = vmatpush3.bf16.msra.mxu0 %v7431_v6  ;;  %v7487_v6 = vld [vmem:[%s9720_s1 + $0x900] sm:$0xff]  }
 0x109   :  { %6840 = vmatpush3.bf16.msra.mxu1 %v7432_v7  ;;  %6819 = vmatprep.subr.bf16.mxu0 %v7433_v8  ;;  %v7488_v7 = vld [vmem:[%s9720_s1 + $0x980] sm:$0xff]   ;;  %v35_v8 = vld [vmem:[%s9721_s0 + $0x90] sm:$0xff] }
 0x10a   :  { %6841 = vmatprep.subr.bf16.mxu1 %v7434_v9  ;;  %v67_v9 = vld [vmem:[%s9721_s0 + $0x190] sm:$0xff] }
 0x10c   :  { %6820 = vmatpush3.bf16.msra.mxu0 %v7435_v10  ;;  %v5923_v10 = vcombine.low %v35_v8, %v67_v9 }
 0x10d   :  { %6842 = vmatpush3.bf16.msra.mxu1 %v7436_v11  ;;  %6821 = vmatprep.subr.bf16.mxu0 %v7437_v12  ;;  %v5924_v11 = vcombine.high %v35_v8, %v67_v9  ;;  %v36_v12 = vld [vmem:[%s9721_s0 + $0x98] sm:$0xff] }
 0x10e   :  { %6843 = vmatprep.subr.bf16.mxu1 %v7438_v13  ;;  %v68_v13 = vld [vmem:[%s9721_s0 + $0x198] sm:$0xff] }
 0x10f   :  { %v7537_v8 = vld [vmem:[%s9720_s1 + $0xb58] sm:$0xff]  }
 0x110   :  { %6822 = vmatpush3.bf16.msra.mxu0 %v7439_v14  ;;  %v5925_v14 = vcombine.low %v36_v12, %v68_v13  ;;  %v7538_v9 = vld [vmem:[%s9720_s1 + $0xbd8] sm:$0xff]  }
 0x111   :  { %6844 = vmatpush3.bf16.msra.mxu1 %v7440_v15  ;;  %6823 = vmatprep.subr.bf16.mxu0 %v7441_v16  ;;  %v5926_v15 = vcombine.high %v36_v12, %v68_v13  ;;  %v7489_v16 = vld [vmem:[%s9720_s1 + $0xa78] sm:$0xff]   ;;  %v7541_v12 = vld [vmem:[%s9720_s1 + $0xb50] sm:$0xff]  }
 0x112   :  { %6845 = vmatprep.subr.bf16.mxu1 %v7442_v17  ;;  %v7490_v17 = vld [vmem:[%s9720_s1 + $0xaf8] sm:$0xff]   ;;  %v7542_v13 = vld [vmem:[%s9720_s1 + $0xbd0] sm:$0xff]  }
 0x114   :  { %6824 = vmatpush3.bf16.msra.mxu0 %v7443_v18  ;;  %v7491_v18 = vld [vmem:[%s9720_s1 + $0xa38] sm:$0xff]  }
 0x115   :  { %6846 = vmatpush3.bf16.msra.mxu1 %v7444_v19  ;;  %6825 = vmatprep.subr.bf16.mxu0 %v7445_v20  ;;  %v7492_v19 = vld [vmem:[%s9720_s1 + $0xab8] sm:$0xff]   ;;  %v7493_v20 = vld [vmem:[%s9720_s1 + $0xa70] sm:$0xff]  }
 0x116   :  { %6847 = vmatprep.subr.bf16.mxu1 %v7446_v21  ;;  %v7494_v21 = vld [vmem:[%s9720_s1 + $0xaf0] sm:$0xff]  }
 0x118   :  { %6826 = vmatpush3.bf16.msra.mxu0 %v7447_v22  ;;  %v7495_v22 = vld [vmem:[%s9720_s1 + $0xa30] sm:$0xff]  }
 0x119   :  { %6848 = vmatpush3.bf16.msra.mxu1 %v7448_v23  ;;  %6827 = vmatprep.subr.bf16.mxu0 %v7449_v24  ;;  %v7496_v23 = vld [vmem:[%s9720_s1 + $0xab0] sm:$0xff]   ;;  %v7497_v24 = vld [vmem:[%s9720_s1 + $0xa68] sm:$0xff]  }
 0x11a   :  { %6849 = vmatprep.subr.bf16.mxu1 %v7450_v25  ;;  %v7498_v25 = vld [vmem:[%s9720_s1 + $0xae8] sm:$0xff]  }
 0x11c   :  { %6828 = vmatpush3.bf16.msra.mxu0 %v7451_v26  ;;  %v7499_v26 = vld [vmem:[%s9720_s1 + $0xa28] sm:$0xff]  }
 0x11d   :  { %6850 = vmatpush3.bf16.msra.mxu1 %v7452_v27  ;;  %6829 = vmatprep.subr.bf16.mxu0 %v7453_v28  ;;  %v7500_v27 = vld [vmem:[%s9720_s1 + $0xaa8] sm:$0xff]   ;;  %v7501_v28 = vld [vmem:[%s9720_s1 + $0xa60] sm:$0xff]  }
 0x11e   :  { %6851 = vmatprep.subr.bf16.mxu1 %v7454_v29  ;;  %v7502_v29 = vld [vmem:[%s9720_s1 + $0xae0] sm:$0xff]  }
 0x120   :  { %6830 = vmatpush3.bf16.msra.mxu0 %v7455_v30  ;;  %v7503_v30 = vld [vmem:[%s9720_s1 + $0xa20] sm:$0xff]  }
 0x121   :  { %6852 = vmatpush3.bf16.msra.mxu1 %v7456_v31  ;;  %6859 = vmatprep.subr.bf16.mxu0 %v7457_v40  ;;  %v7504_v31 = vld [vmem:[%s9720_s1 + $0xaa0] sm:$0xff]   ;;  %v7513_v40 = vld [vmem:[%s9720_s1 + $0xa48] sm:$0xff]  }
 0x122   :  { %6881 = vmatprep.subr.bf16.mxu1 %v7458_v41  ;;  %v7514_v41 = vld [vmem:[%s9720_s1 + $0xac8] sm:$0xff]  }
 0x123   :  { %5193 = vmatmul.mubr.bf16.vlgmr.msra.gmra.mxu0 %v5919_v35  ;;  %v7508_v35 = vld [vmem:[%s9720_s1 + $0xa98] sm:$0xff]  }
 0x124   :  { %5234 = vmatmul.mubr.bf16.vlgmr.msra.gmra.mxu1 %v5921_v38  ;;  %6860 = vmatpush3.bf16.msra.mxu0 %v7459_v42  ;;  %v7511_v38 = vld [vmem:[%s9720_s1 + $0xa10] sm:$0xff]   ;;  %v7515_v42 = vld [vmem:[%s9720_s1 + $0xa08] sm:$0xff]  }
 0x125   :  { %6882 = vmatpush3.bf16.msra.mxu1 %v7460_v43  ;;  %6861 = vmatprep.subr.bf16.mxu0 %v7461_v44  ;;  %v7516_v43 = vld [vmem:[%s9720_s1 + $0xa88] sm:$0xff]   ;;  %v7517_v44 = vld [vmem:[%s9720_s1 + $0xa40] sm:$0xff]  }
 0x126   :  { %6883 = vmatprep.subr.bf16.mxu1 %v7462_v45  ;;  %5274 = vmatprep.mubr.bf16.mxu0 %v5924_v11  ;;  %v7518_v45 = vld [vmem:[%s9720_s1 + $0xac0] sm:$0xff]   ;;  %v7540_v11 = vld [vmem:[%s9720_s1 + $0xb98] sm:$0xff]  }
 0x127   :  { %5315 = vmatprep.mubr.bf16.mxu1 %v5926_v15  ;;  %v7544_v15 = vld [vmem:[%s9720_s1 + $0xb90] sm:$0xff]  }
 0x128   :  { %6862 = vmatpush3.bf16.msra.mxu0 %v7463_v46  ;;  %v7519_v46 = vld [vmem:[%s9720_s1 + $0xa00] sm:$0xff]  }
 0x129   :  { %6884 = vmatpush3.bf16.msra.mxu1 %v7464_v47  ;;  %6863 = vmatprep.subr.bf16.mxu0 %v7465_v48  ;;  %v7520_v47 = vld [vmem:[%s9720_s1 + $0xa80] sm:$0xff]  }
 0x12a   :  { %6885 = vmatprep.subr.bf16.mxu1 %v7466_v49  ;;  %v37_v48 = vld [vmem:[%s9721_s0 + $0xa0] sm:$0xff] }
 0x12b   :  { %v69_v49 = vld [vmem:[%s9721_s0 + $0x1a0] sm:$0xff] }
 0x12c   :  { %6864 = vmatpush3.bf16.msra.mxu0 %v7467_v50  ;;  %v38_v50 = vld [vmem:[%s9721_s0 + $0xa8] sm:$0xff] }
 0x12d   :  { %6886 = vmatpush3.bf16.msra.mxu1 %v7468_v51  ;;  %6865 = vmatprep.subr.bf16.mxu0 %v7469_v52  ;;  %v70_v51 = vld [vmem:[%s9721_s0 + $0x1a8] sm:$0xff]  ;;  %v5927_v52 = vcombine.low %v37_v48, %v69_v49 }
 0x12e   :  { %6887 = vmatprep.subr.bf16.mxu1 %v7470_v53  ;;  %v5928_v53 = vcombine.high %v37_v48, %v69_v49  ;;  %v7569_v48 = vld [vmem:[%s9720_s1 + $0xc58] sm:$0xff]  }
 0x12f   :  { %v7570_v49 = vld [vmem:[%s9720_s1 + $0xcd8] sm:$0xff]  }
 0x130   :  { %6866 = vmatpush3.bf16.msra.mxu0 %v7471_v54  ;;  %v5929_v54 = vcombine.low %v38_v50, %v70_v51 }
 0x131   :  { %6888 = vmatpush3.bf16.msra.mxu1 %v7472_v55  ;;  %6867 = vmatprep.subr.bf16.mxu0 %v7473_v56  ;;  %v5930_v55 = vcombine.high %v38_v50, %v70_v51  ;;  %v7521_v56 = vld [vmem:[%s9720_s1 + $0xb78] sm:$0xff]  }
 0x132   :  { %6889 = vmatprep.subr.bf16.mxu1 %v7474_v57  ;;  %v7522_v57 = vld [vmem:[%s9720_s1 + $0xbf8] sm:$0xff]  }
 0x133   :  { %v7571_v50 = vld [vmem:[%s9720_s1 + $0xc18] sm:$0xff]  }
 0x134   :  { %6868 = vmatpush3.bf16.msra.mxu0 %v7475_v58  ;;  %v7523_v58 = vld [vmem:[%s9720_s1 + $0xb38] sm:$0xff]  }
 0x135   :  { %6890 = vmatpush3.bf16.msra.mxu1 %v7476_v59  ;;  %6869 = vmatprep.subr.bf16.mxu0 %v7477_v60  ;;  %v7524_v59 = vld [vmem:[%s9720_s1 + $0xbb8] sm:$0xff]   ;;  %v7525_v60 = vld [vmem:[%s9720_s1 + $0xb70] sm:$0xff]  }
 0x136   :  { %6891 = vmatprep.subr.bf16.mxu1 %v7478_v61  ;;  %v7526_v61 = vld [vmem:[%s9720_s1 + $0xbf0] sm:$0xff]   ;;  %v7572_v51 = vld [vmem:[%s9720_s1 + $0xc98] sm:$0xff]  }
 0x138   :  { %6870 = vmatpush3.bf16.msra.mxu0 %v7479_v62  ;;  %v7527_v62 = vld [vmem:[%s9720_s1 + $0xb30] sm:$0xff]  }
 0x139   :  { %6892 = vmatpush3.bf16.msra.mxu1 %v7480_v63  ;;  %6871 = vmatprep.subr.bf16.mxu0 %v7481_v0  ;;  %v7528_v63 = vld [vmem:[%s9720_s1 + $0xbb0] sm:$0xff]   ;;  %v7529_v0 = vld [vmem:[%s9720_s1 + $0xb68] sm:$0xff]  }
 0x13a   :  { %6893 = vmatprep.subr.bf16.mxu1 %v7482_v1  ;;  %v7530_v1 = vld [vmem:[%s9720_s1 + $0xbe8] sm:$0xff]  }
 0x13c   :  { %6872 = vmatpush3.bf16.msra.mxu0 %v7483_v2  ;;  %v7531_v2 = vld [vmem:[%s9720_s1 + $0xb28] sm:$0xff]  }
 0x13d   :  { %6894 = vmatpush3.bf16.msra.mxu1 %v7484_v3  ;;  %6873 = vmatprep.subr.bf16.mxu0 %v7485_v4  ;;  %v7532_v3 = vld [vmem:[%s9720_s1 + $0xba8] sm:$0xff]   ;;  %v7533_v4 = vld [vmem:[%s9720_s1 + $0xb60] sm:$0xff]  }
 0x13e   :  { %6895 = vmatprep.subr.bf16.mxu1 %v7486_v5  ;;  %v7534_v5 = vld [vmem:[%s9720_s1 + $0xbe0] sm:$0xff]  }
 0x140   :  { %6874 = vmatpush3.bf16.msra.mxu0 %v7487_v6  ;;  %v7535_v6 = vld [vmem:[%s9720_s1 + $0xb20] sm:$0xff]  }
 0x141   :  { %6896 = vmatpush3.bf16.msra.mxu1 %v7488_v7  ;;  %6903 = vmatprep.subr.bf16.mxu0 %v7489_v16  ;;  %v7536_v7 = vld [vmem:[%s9720_s1 + $0xba0] sm:$0xff]   ;;  %v7545_v16 = vld [vmem:[%s9720_s1 + $0xb48] sm:$0xff]  }
 0x142   :  { %6925 = vmatprep.subr.bf16.mxu1 %v7490_v17  ;;  %v7546_v17 = vld [vmem:[%s9720_s1 + $0xbc8] sm:$0xff]  }
 0x143   :  { %5275 = vmatmul.mubr.bf16.vlgmr.msra.gmra.mxu0 %v5923_v10  ;;  %v7539_v10 = vld [vmem:[%s9720_s1 + $0xb18] sm:$0xff]  }
 0x144   :  { %5316 = vmatmul.mubr.bf16.vlgmr.msra.gmra.mxu1 %v5925_v14  ;;  %6904 = vmatpush3.bf16.msra.mxu0 %v7491_v18  ;;  %v7543_v14 = vld [vmem:[%s9720_s1 + $0xb10] sm:$0xff]   ;;  %v7547_v18 = vld [vmem:[%s9720_s1 + $0xb08] sm:$0xff]  }
 0x145   :  { %6926 = vmatpush3.bf16.msra.mxu1 %v7492_v19  ;;  %6905 = vmatprep.subr.bf16.mxu0 %v7493_v20  ;;  %v7548_v19 = vld [vmem:[%s9720_s1 + $0xb88] sm:$0xff]   ;;  %v7549_v20 = vld [vmem:[%s9720_s1 + $0xb40] sm:$0xff]  }
 0x146   :  { %6927 = vmatprep.subr.bf16.mxu1 %v7494_v21  ;;  %5356 = vmatprep.mubr.bf16.mxu0 %v5928_v53  ;;  %v7550_v21 = vld [vmem:[%s9720_s1 + $0xbc0] sm:$0xff]   ;;  %v7574_v53 = vld [vmem:[%s9720_s1 + $0xcd0] sm:$0xff]  }
 0x147   :  { %5397 = vmatprep.mubr.bf16.mxu1 %v5930_v55  ;;  %v7576_v55 = vld [vmem:[%s9720_s1 + $0xc90] sm:$0xff]  }
 0x148   :  { %6906 = vmatpush3.bf16.msra.mxu0 %v7495_v22  ;;  %v7551_v22 = vld [vmem:[%s9720_s1 + $0xb00] sm:$0xff]  }
 0x149   :  { %6928 = vmatpush3.bf16.msra.mxu1 %v7496_v23  ;;  %6907 = vmatprep.subr.bf16.mxu0 %v7497_v24  ;;  %v7552_v23 = vld [vmem:[%s9720_s1 + $0xb80] sm:$0xff]   ;;  %v39_v24 = vld [vmem:[%s9721_s0 + $0xb0] sm:$0xff] }
 0x14a   :  { %6929 = vmatprep.subr.bf16.mxu1 %v7498_v25  ;;  %v71_v25 = vld [vmem:[%s9721_s0 + $0x1b0] sm:$0xff] }
 0x14c   :  { %6908 = vmatpush3.bf16.msra.mxu0 %v7499_v26  ;;  %v40_v26 = vld [vmem:[%s9721_s0 + $0xb8] sm:$0xff] }
 0x14d   :  { %6930 = vmatpush3.bf16.msra.mxu1 %v7500_v27  ;;  %6909 = vmatprep.subr.bf16.mxu0 %v7501_v28  ;;  %v5931_v27 = vcombine.low %v39_v24, %v71_v25  ;;  %v5932_v28 = vcombine.high %v39_v24, %v71_v25  ;;  %v7601_v24 = vld [vmem:[%s9720_s1 + $0xd58] sm:$0xff]  }
 0x14e   :  { %6931 = vmatprep.subr.bf16.mxu1 %v7502_v29  ;;  %v72_v29 = vld [vmem:[%s9721_s0 + $0x1b8] sm:$0xff] }
 0x14f   :  { %v7602_v25 = vld [vmem:[%s9720_s1 + $0xdd8] sm:$0xff]  }
 0x150   :  { %6910 = vmatpush3.bf16.msra.mxu0 %v7503_v30  ;;  %v5933_v30 = vcombine.low %v40_v26, %v72_v29 }
 0x151   :  { %6932 = vmatpush3.bf16.msra.mxu1 %v7504_v31  ;;  %6911 = vmatprep.subr.bf16.mxu0 %v7505_v32  ;;  %v5934_v31 = vcombine.high %v40_v26, %v72_v29  ;;  %v7553_v32 = vld [vmem:[%s9720_s1 + $0xc78] sm:$0xff]   ;;  %v7606_v29 = vld [vmem:[%s9720_s1 + $0xdd0] sm:$0xff]  }
 0x152   :  { %6933 = vmatprep.subr.bf16.mxu1 %v7506_v33  ;;  %v7554_v33 = vld [vmem:[%s9720_s1 + $0xcf8] sm:$0xff]  }
 0x153   :  { %v7603_v26 = vld [vmem:[%s9720_s1 + $0xd18] sm:$0xff]  }
 0x154   :  { %6912 = vmatpush3.bf16.msra.mxu0 %v7507_v34  ;;  %v7555_v34 = vld [vmem:[%s9720_s1 + $0xc38] sm:$0xff]  }
 0x155   :  { %6934 = vmatpush3.bf16.msra.mxu1 %v7508_v35  ;;  %6913 = vmatprep.subr.bf16.mxu0 %v7509_v36  ;;  %v7556_v35 = vld [vmem:[%s9720_s1 + $0xcb8] sm:$0xff]   ;;  %v7557_v36 = vld [vmem:[%s9720_s1 + $0xc70] sm:$0xff]  }
 0x156   :  { %6935 = vmatprep.subr.bf16.mxu1 %v7510_v37  ;;  %v7558_v37 = vld [vmem:[%s9720_s1 + $0xcf0] sm:$0xff]  }
 0x158   :  { %6914 = vmatpush3.bf16.msra.mxu0 %v7511_v38  ;;  %v7559_v38 = vld [vmem:[%s9720_s1 + $0xc30] sm:$0xff]  }
 0x159   :  { %6936 = vmatpush3.bf16.msra.mxu1 %v7512_v39  ;;  %6915 = vmatprep.subr.bf16.mxu0 %v7513_v40  ;;  %v7560_v39 = vld [vmem:[%s9720_s1 + $0xcb0] sm:$0xff]   ;;  %v7561_v40 = vld [vmem:[%s9720_s1 + $0xc68] sm:$0xff]  }
 0x15a   :  { %6937 = vmatprep.subr.bf16.mxu1 %v7514_v41  ;;  %v7562_v41 = vld [vmem:[%s9720_s1 + $0xce8] sm:$0xff]  }
 0x15c   :  { %6916 = vmatpush3.bf16.msra.mxu0 %v7515_v42  ;;  %v7563_v42 = vld [vmem:[%s9720_s1 + $0xc28] sm:$0xff]  }
 0x15d   :  { %6938 = vmatpush3.bf16.msra.mxu1 %v7516_v43  ;;  %6917 = vmatprep.subr.bf16.mxu0 %v7517_v44  ;;  %v7564_v43 = vld [vmem:[%s9720_s1 + $0xca8] sm:$0xff]   ;;  %v7565_v44 = vld [vmem:[%s9720_s1 + $0xc60] sm:$0xff]  }
 0x15e   :  { %6939 = vmatprep.subr.bf16.mxu1 %v7518_v45  ;;  %v7566_v45 = vld [vmem:[%s9720_s1 + $0xce0] sm:$0xff]  }
 0x160   :  { %6918 = vmatpush3.bf16.msra.mxu0 %v7519_v46  ;;  %v7567_v46 = vld [vmem:[%s9720_s1 + $0xc20] sm:$0xff]  }
 0x161   :  { %6940 = vmatpush3.bf16.msra.mxu1 %v7520_v47  ;;  %6947 = vmatprep.subr.bf16.mxu0 %v7521_v56  ;;  %v7568_v47 = vld [vmem:[%s9720_s1 + $0xca0] sm:$0xff]   ;;  %v7577_v56 = vld [vmem:[%s9720_s1 + $0xc48] sm:$0xff]  }
 0x162   :  { %6969 = vmatprep.subr.bf16.mxu1 %v7522_v57  ;;  %v7578_v57 = vld [vmem:[%s9720_s1 + $0xcc8] sm:$0xff]  }
 0x163   :  { %5357 = vmatmul.mubr.bf16.vlgmr.msra.gmra.mxu0 %v5927_v52  ;;  %v7573_v52 = vld [vmem:[%s9720_s1 + $0xc50] sm:$0xff]  }
 0x164   :  { %5398 = vmatmul.mubr.bf16.vlgmr.msra.gmra.mxu1 %v5929_v54  ;;  %6948 = vmatpush3.bf16.msra.mxu0 %v7523_v58  ;;  %v7575_v54 = vld [vmem:[%s9720_s1 + $0xc10] sm:$0xff]   ;;  %v7579_v58 = vld [vmem:[%s9720_s1 + $0xc08] sm:$0xff]  }
 0x165   :  { %6970 = vmatpush3.bf16.msra.mxu1 %v7524_v59  ;;  %6949 = vmatprep.subr.bf16.mxu0 %v7525_v60  ;;  %v7580_v59 = vld [vmem:[%s9720_s1 + $0xc88] sm:$0xff]   ;;  %v7581_v60 = vld [vmem:[%s9720_s1 + $0xc40] sm:$0xff]  }
 0x166   :  { %6971 = vmatprep.subr.bf16.mxu1 %v7526_v61  ;;  %5438 = vmatprep.mubr.bf16.mxu0 %v5932_v28  ;;  %v7582_v61 = vld [vmem:[%s9720_s1 + $0xcc0] sm:$0xff]   ;;  %v7605_v28 = vld [vmem:[%s9720_s1 + $0xd50] sm:$0xff]  }
 0x167   :  { %5479 = vmatprep.mubr.bf16.mxu1 %v5934_v31  ;;  %v7608_v31 = vld [vmem:[%s9720_s1 + $0xd90] sm:$0xff]  }
 0x168   :  { %6950 = vmatpush3.bf16.msra.mxu0 %v7527_v62  ;;  %v7583_v62 = vld [vmem:[%s9720_s1 + $0xc00] sm:$0xff]  }
 0x169   :  { %6972 = vmatpush3.bf16.msra.mxu1 %v7528_v63  ;;  %6951 = vmatprep.subr.bf16.mxu0 %v7529_v0  ;;  %v7584_v63 = vld [vmem:[%s9720_s1 + $0xc80] sm:$0xff]  }
 0x16a   :  { %6973 = vmatprep.subr.bf16.mxu1 %v7530_v1  ;;  %v41_v0 = vld [vmem:[%s9721_s0 + $0xc0] sm:$0xff] }
 0x16b   :  { %v73_v1 = vld [vmem:[%s9721_s0 + $0x1c0] sm:$0xff] }
 0x16c   :  { %6952 = vmatpush3.bf16.msra.mxu0 %v7531_v2  ;;  %v5935_v2 = vcombine.low %v41_v0, %v73_v1 }
 0x16d   :  { %6974 = vmatpush3.bf16.msra.mxu1 %v7532_v3  ;;  %6953 = vmatprep.subr.bf16.mxu0 %v7533_v4  ;;  %v5936_v3 = vcombine.high %v41_v0, %v73_v1  ;;  %v42_v4 = vld [vmem:[%s9721_s0 + $0xc8] sm:$0xff]  ;;  %v7633_v0 = vld [vmem:[%s9720_s1 + $0xe58] sm:$0xff]  }
 0x16e   :  { %6975 = vmatprep.subr.bf16.mxu1 %v7534_v5  ;;  %v74_v5 = vld [vmem:[%s9721_s0 + $0x1c8] sm:$0xff]  ;;  %v7634_v1 = vld [vmem:[%s9720_s1 + $0xed8] sm:$0xff]  }
 0x170   :  { %6954 = vmatpush3.bf16.msra.mxu0 %v7535_v6  ;;  %v5937_v6 = vcombine.low %v42_v4, %v74_v5 }
 0x171   :  { %6976 = vmatpush3.bf16.msra.mxu1 %v7536_v7  ;;  %6955 = vmatprep.subr.bf16.mxu0 %v7537_v8  ;;  %v5938_v7 = vcombine.high %v42_v4, %v74_v5  ;;  %v7585_v8 = vld [vmem:[%s9720_s1 + $0xd78] sm:$0xff]   ;;  %v7637_v4 = vld [vmem:[%s9720_s1 + $0xe50] sm:$0xff]  }
 0x172   :  { %6977 = vmatprep.subr.bf16.mxu1 %v7538_v9  ;;  %v7586_v9 = vld [vmem:[%s9720_s1 + $0xdf8] sm:$0xff]   ;;  %v7638_v5 = vld [vmem:[%s9720_s1 + $0xed0] sm:$0xff]  }
 0x174   :  { %6956 = vmatpush3.bf16.msra.mxu0 %v7539_v10  ;;  %v7587_v10 = vld [vmem:[%s9720_s1 + $0xd38] sm:$0xff]  }
 0x175   :  { %6978 = vmatpush3.bf16.msra.mxu1 %v7540_v11  ;;  %6957 = vmatprep.subr.bf16.mxu0 %v7541_v12  ;;  %v7588_v11 = vld [vmem:[%s9720_s1 + $0xdb8] sm:$0xff]   ;;  %v7589_v12 = vld [vmem:[%s9720_s1 + $0xd70] sm:$0xff]  }
 0x176   :  { %6979 = vmatprep.subr.bf16.mxu1 %v7542_v13  ;;  %v7590_v13 = vld [vmem:[%s9720_s1 + $0xdf0] sm:$0xff]  }
 0x178   :  { %6958 = vmatpush3.bf16.msra.mxu0 %v7543_v14  ;;  %v7591_v14 = vld [vmem:[%s9720_s1 + $0xd30] sm:$0xff]  }
 0x179   :  { %6980 = vmatpush3.bf16.msra.mxu1 %v7544_v15  ;;  %6959 = vmatprep.subr.bf16.mxu0 %v7545_v16  ;;  %v7592_v15 = vld [vmem:[%s9720_s1 + $0xdb0] sm:$0xff]   ;;  %v7593_v16 = vld [vmem:[%s9720_s1 + $0xd68] sm:$0xff]  }
 0x17a   :  { %6981 = vmatprep.subr.bf16.mxu1 %v7546_v17  ;;  %v7594_v17 = vld [vmem:[%s9720_s1 + $0xde8] sm:$0xff]  }
 0x17c   :  { %6960 = vmatpush3.bf16.msra.mxu0 %v7547_v18  ;;  %v7595_v18 = vld [vmem:[%s9720_s1 + $0xd28] sm:$0xff]  }
 0x17d   :  { %6982 = vmatpush3.bf16.msra.mxu1 %v7548_v19  ;;  %6961 = vmatprep.subr.bf16.mxu0 %v7549_v20  ;;  %v7596_v19 = vld [vmem:[%s9720_s1 + $0xda8] sm:$0xff]   ;;  %v7597_v20 = vld [vmem:[%s9720_s1 + $0xd60] sm:$0xff]  }
 0x17e   :  { %6983 = vmatprep.subr.bf16.mxu1 %v7550_v21  ;;  %v7598_v21 = vld [vmem:[%s9720_s1 + $0xde0] sm:$0xff]  }
 0x180   :  { %6962 = vmatpush3.bf16.msra.mxu0 %v7551_v22  ;;  %v7599_v22 = vld [vmem:[%s9720_s1 + $0xd20] sm:$0xff]  }
 0x181   :  { %6984 = vmatpush3.bf16.msra.mxu1 %v7552_v23  ;;  %6991 = vmatprep.subr.bf16.mxu0 %v7553_v32  ;;  %v7600_v23 = vld [vmem:[%s9720_s1 + $0xda0] sm:$0xff]   ;;  %v7609_v32 = vld [vmem:[%s9720_s1 + $0xd48] sm:$0xff]  }
 0x182   :  { %7013 = vmatprep.subr.bf16.mxu1 %v7554_v33  ;;  %v7610_v33 = vld [vmem:[%s9720_s1 + $0xdc8] sm:$0xff]  }
 0x183   :  { %5439 = vmatmul.mubr.bf16.vlgmr.msra.gmra.mxu0 %v5931_v27  ;;  %v7604_v27 = vld [vmem:[%s9720_s1 + $0xd98] sm:$0xff]  }
 0x184   :  { %5480 = vmatmul.mubr.bf16.vlgmr.msra.gmra.mxu1 %v5933_v30  ;;  %6992 = vmatpush3.bf16.msra.mxu0 %v7555_v34  ;;  %v7607_v30 = vld [vmem:[%s9720_s1 + $0xd10] sm:$0xff]   ;;  %v7611_v34 = vld [vmem:[%s9720_s1 + $0xd08] sm:$0xff]  }
 0x185   :  { %7014 = vmatpush3.bf16.msra.mxu1 %v7556_v35  ;;  %6993 = vmatprep.subr.bf16.mxu0 %v7557_v36  ;;  %v7612_v35 = vld [vmem:[%s9720_s1 + $0xd88] sm:$0xff]   ;;  %v7613_v36 = vld [vmem:[%s9720_s1 + $0xd40] sm:$0xff]  }
 0x186   :  { %7015 = vmatprep.subr.bf16.mxu1 %v7558_v37  ;;  %5520 = vmatprep.mubr.bf16.mxu0 %v5936_v3  ;;  %v7614_v37 = vld [vmem:[%s9720_s1 + $0xdc0] sm:$0xff]   ;;  %v7636_v3 = vld [vmem:[%s9720_s1 + $0xe98] sm:$0xff]  }
 0x187   :  { %5561 = vmatprep.mubr.bf16.mxu1 %v5938_v7  ;;  %v7640_v7 = vld [vmem:[%s9720_s1 + $0xe90] sm:$0xff]  }
 0x188   :  { %6994 = vmatpush3.bf16.msra.mxu0 %v7559_v38  ;;  %v7615_v38 = vld [vmem:[%s9720_s1 + $0xd00] sm:$0xff]  }
 0x189   :  { %7016 = vmatpush3.bf16.msra.mxu1 %v7560_v39  ;;  %6995 = vmatprep.subr.bf16.mxu0 %v7561_v40  ;;  %v7616_v39 = vld [vmem:[%s9720_s1 + $0xd80] sm:$0xff]   ;;  %v43_v40 = vld [vmem:[%s9721_s0 + $0xd0] sm:$0xff] }
 0x18a   :  { %7017 = vmatprep.subr.bf16.mxu1 %v7562_v41  ;;  %v75_v41 = vld [vmem:[%s9721_s0 + $0x1d0] sm:$0xff] }
 0x18c   :  { %6996 = vmatpush3.bf16.msra.mxu0 %v7563_v42  ;;  %v44_v42 = vld [vmem:[%s9721_s0 + $0xd8] sm:$0xff] }
 0x18d   :  { %7018 = vmatpush3.bf16.msra.mxu1 %v7564_v43  ;;  %6997 = vmatprep.subr.bf16.mxu0 %v7565_v44  ;;  %v76_v43 = vld [vmem:[%s9721_s0 + $0x1d8] sm:$0xff]  ;;  %v5939_v44 = vcombine.low %v43_v40, %v75_v41 }
 0x18e   :  { %7019 = vmatprep.subr.bf16.mxu1 %v7566_v45  ;;  %v5940_v45 = vcombine.high %v43_v40, %v75_v41  ;;  %v7664_v40 = vld [vmem:[%s9720_s1 + $0xfa0] sm:$0xff]   ;;  %v7665_v41 = vld [vmem:[%s9720_s1 + $0xf58] sm:$0xff]  }
 0x190   :  { %6998 = vmatpush3.bf16.msra.mxu0 %v7567_v46  ;;  %v5941_v46 = vcombine.low %v44_v42, %v76_v43 }
 0x191   :  { %7020 = vmatpush3.bf16.msra.mxu1 %v7568_v47  ;;  %6999 = vmatprep.subr.bf16.mxu0 %v7569_v48  ;;  %v5942_v47 = vcombine.high %v44_v42, %v76_v43  ;;  %v7617_v48 = vld [vmem:[%s9720_s1 + $0xe78] sm:$0xff]   ;;  %v9386_v43 = vpop.f32.mrf.mxu1 }
 0x192   :  { %7021 = vmatprep.subr.bf16.mxu1 %v7570_v49  ;;  %v7618_v49 = vld [vmem:[%s9720_s1 + $0xef8] sm:$0xff]  }
 0x193   :  { %v7666_v42 = vld [vmem:[%s9720_s1 + $0xfd8] sm:$0xff]  }
 0x194   :  { %7000 = vmatpush3.bf16.msra.mxu0 %v7571_v50  ;;  %v7619_v50 = vld [vmem:[%s9720_s1 + $0xe38] sm:$0xff]  }
 0x195   :  { %7022 = vmatpush3.bf16.msra.mxu1 %v7572_v51  ;;  %7001 = vmatprep.subr.bf16.mxu0 %v7573_v52  ;;  %v7620_v51 = vld [vmem:[%s9720_s1 + $0xeb8] sm:$0xff]   ;;  %v7621_v52 = vld [vmem:[%s9720_s1 + $0xe70] sm:$0xff]  }
 0x196   :  { %7023 = vmatprep.subr.bf16.mxu1 %v7574_v53  ;;  %v7622_v53 = vld [vmem:[%s9720_s1 + $0xef0] sm:$0xff]  }
 0x198   :  { %7002 = vmatpush3.bf16.msra.mxu0 %v7575_v54  ;;  %v7623_v54 = vld [vmem:[%s9720_s1 + $0xe30] sm:$0xff]  }
 0x199   :  { %7024 = vmatpush3.bf16.msra.mxu1 %v7576_v55  ;;  %7003 = vmatprep.subr.bf16.mxu0 %v7577_v56  ;;  %v7624_v55 = vld [vmem:[%s9720_s1 + $0xeb0] sm:$0xff]   ;;  %v7625_v56 = vld [vmem:[%s9720_s1 + $0xe68] sm:$0xff]  }
 0x19a   :  { %7025 = vmatprep.subr.bf16.mxu1 %v7578_v57  ;;  %v7626_v57 = vld [vmem:[%s9720_s1 + $0xee8] sm:$0xff]  }
 0x19c   :  { %7004 = vmatpush3.bf16.msra.mxu0 %v7579_v58  ;;  %v7627_v58 = vld [vmem:[%s9720_s1 + $0xe28] sm:$0xff]  }
 0x19d   :  { %7026 = vmatpush3.bf16.msra.mxu1 %v7580_v59  ;;  %7005 = vmatprep.subr.bf16.mxu0 %v7581_v60  ;;  %v7628_v59 = vld [vmem:[%s9720_s1 + $0xea8] sm:$0xff]   ;;  %v7629_v60 = vld [vmem:[%s9720_s1 + $0xe60] sm:$0xff]  }
 0x19e   :  { %7027 = vmatprep.subr.bf16.mxu1 %v7582_v61  ;;  %v7630_v61 = vld [vmem:[%s9720_s1 + $0xee0] sm:$0xff]  }
 0x1a0   :  { %7006 = vmatpush3.bf16.msra.mxu0 %v7583_v62  ;;  %v7631_v62 = vld [vmem:[%s9720_s1 + $0xe20] sm:$0xff]  }
 0x1a1   :  { %7028 = vmatpush3.bf16.msra.mxu1 %v7584_v63  ;;  %7035 = vmatprep.subr.bf16.mxu0 %v7585_v8  ;;  %v7632_v63 = vld [vmem:[%s9720_s1 + $0xea0] sm:$0xff]   ;;  %v7641_v8 = vld [vmem:[%s9720_s1 + $0xe48] sm:$0xff]  }
 0x1a2   :  { %7057 = vmatprep.subr.bf16.mxu1 %v7586_v9  ;;  %v7642_v9 = vld [vmem:[%s9720_s1 + $0xec8] sm:$0xff]  }
 0x1a3   :  { %5521 = vmatmul.mubr.bf16.vlgmr.msra.gmra.mxu0 %v5935_v2  ;;  %v7635_v2 = vld [vmem:[%s9720_s1 + $0xe18] sm:$0xff]  }
 0x1a4   :  { %5562 = vmatmul.mubr.bf16.vlgmr.msra.gmra.mxu1 %v5937_v6  ;;  %7036 = vmatpush3.bf16.msra.mxu0 %v7587_v10  ;;  %v7639_v6 = vld [vmem:[%s9720_s1 + $0xe10] sm:$0xff]   ;;  %v7643_v10 = vld [vmem:[%s9720_s1 + $0xe08] sm:$0xff]  }
 0x1a5   :  { %7058 = vmatpush3.bf16.msra.mxu1 %v7588_v11  ;;  %7037 = vmatprep.subr.bf16.mxu0 %v7589_v12  ;;  %v7644_v11 = vld [vmem:[%s9720_s1 + $0xe88] sm:$0xff]   ;;  %v7645_v12 = vld [vmem:[%s9720_s1 + $0xe40] sm:$0xff]  }
 0x1a6   :  { %7059 = vmatprep.subr.bf16.mxu1 %v7590_v13  ;;  %5602 = vmatprep.mubr.bf16.mxu0 %v5940_v45  ;;  %v7646_v13 = vld [vmem:[%s9720_s1 + $0xec0] sm:$0xff]  }
 0x1a7   :  { %5643 = vmatprep.mubr.bf16.mxu1 %v5942_v47  ;;  %v7669_v47 = vld [vmem:[%s9720_s1 + $0xf50] sm:$0xff]  }
 0x1a8   :  { %7038 = vmatpush3.bf16.msra.mxu0 %v7591_v14  ;;  %v7647_v14 = vld [vmem:[%s9720_s1 + $0xe00] sm:$0xff]  }
 0x1a9   :  { %7060 = vmatpush3.bf16.msra.mxu1 %v7592_v15  ;;  %7039 = vmatprep.subr.bf16.mxu0 %v7593_v16  ;;  %v7648_v15 = vld [vmem:[%s9720_s1 + $0xe80] sm:$0xff]  }
 0x1aa   :  { %7061 = vmatprep.subr.bf16.mxu1 %v7594_v17  ;;  %v45_v16 = vld [vmem:[%s9721_s0 + $0xe0] sm:$0xff] }
 0x1ab   :  { %v77_v17 = vld [vmem:[%s9721_s0 + $0x1e0] sm:$0xff] }
 0x1ac   :  { %7040 = vmatpush3.bf16.msra.mxu0 %v7595_v18  ;;  %v46_v18 = vld [vmem:[%s9721_s0 + $0xe8] sm:$0xff] }
 0x1ad   :  { %7062 = vmatpush3.bf16.msra.mxu1 %v7596_v19  ;;  %7041 = vmatprep.subr.bf16.mxu0 %v7597_v20  ;;  %v5943_v19 = vcombine.low %v45_v16, %v77_v17  ;;  %v5944_v20 = vcombine.high %v45_v16, %v77_v17 }
 0x1ae   :  { %7063 = vmatprep.subr.bf16.mxu1 %v7598_v21  ;;  %v78_v21 = vld [vmem:[%s9721_s0 + $0x1e8] sm:$0xff] }
 0x1b0   :  { %7042 = vmatpush3.bf16.msra.mxu0 %v7599_v22  ;;  %v5945_v22 = vcombine.low %v46_v18, %v78_v21 }
 0x1b1   :  { %7064 = vmatpush3.bf16.msra.mxu1 %v7600_v23  ;;  %7043 = vmatprep.subr.bf16.mxu0 %v7601_v24  ;;  %v5946_v23 = vcombine.high %v46_v18, %v78_v21  ;;  %v7649_v24 = vld [vmem:[%s9720_s1 + $0xf78] sm:$0xff]  }
 0x1b2   :  { %7065 = vmatprep.subr.bf16.mxu1 %v7602_v25  ;;  %v7650_v25 = vld [vmem:[%s9720_s1 + $0xff8] sm:$0xff]  }
 0x1b4   :  { %7044 = vmatpush3.bf16.msra.mxu0 %v7603_v26  ;;  %v7651_v26 = vld [vmem:[%s9720_s1 + $0xf38] sm:$0xff]  }
 0x1b5   :  { %7066 = vmatpush3.bf16.msra.mxu1 %v7604_v27  ;;  %7045 = vmatprep.subr.bf16.mxu0 %v7605_v28  ;;  %v7652_v27 = vld [vmem:[%s9720_s1 + $0xfb8] sm:$0xff]   ;;  %v7653_v28 = vld [vmem:[%s9720_s1 + $0xf70] sm:$0xff]  }
 0x1b6   :  { %7067 = vmatprep.subr.bf16.mxu1 %v7606_v29  ;;  %v7654_v29 = vld [vmem:[%s9720_s1 + $0xff0] sm:$0xff]  }
 0x1b8   :  { %7046 = vmatpush3.bf16.msra.mxu0 %v7607_v30  ;;  %v7655_v30 = vld [vmem:[%s9720_s1 + $0xf30] sm:$0xff]  }
 0x1b9   :  { %7068 = vmatpush3.bf16.msra.mxu1 %v7608_v31  ;;  %7047 = vmatprep.subr.bf16.mxu0 %v7609_v32  ;;  %v7656_v31 = vld [vmem:[%s9720_s1 + $0xfb0] sm:$0xff]   ;;  %v7657_v32 = vld [vmem:[%s9720_s1 + $0xf68] sm:$0xff]  }
 0x1ba   :  { %7069 = vmatprep.subr.bf16.mxu1 %v7610_v33  ;;  %v7658_v33 = vld [vmem:[%s9720_s1 + $0xfe8] sm:$0xff]  }
 0x1bc   :  { %7048 = vmatpush3.bf16.msra.mxu0 %v7611_v34  ;;  %v7659_v34 = vld [vmem:[%s9720_s1 + $0xf28] sm:$0xff]  }
 0x1bd   :  { %7070 = vmatpush3.bf16.msra.mxu1 %v7612_v35  ;;  %7049 = vmatprep.subr.bf16.mxu0 %v7613_v36  ;;  %v7660_v35 = vld [vmem:[%s9720_s1 + $0xfa8] sm:$0xff]   ;;  %v7661_v36 = vld [vmem:[%s9720_s1 + $0xf60] sm:$0xff]  }
 0x1be   :  { %7071 = vmatprep.subr.bf16.mxu1 %v7614_v37  ;;  %v7662_v37 = vld [vmem:[%s9720_s1 + $0xfe0] sm:$0xff]  }
 0x1c0   :  { %7050 = vmatpush3.bf16.msra.mxu0 %v7615_v38  ;;  %v7663_v38 = vld [vmem:[%s9720_s1 + $0xf20] sm:$0xff]  }
 0x1c1   :  { %7072 = vmatpush3.bf16.msra.mxu1 %v7616_v39  ;;  %7079 = vmatprep.subr.bf16.mxu0 %v7617_v48  ;;  %v9375_v39 = vpop.f32.mrf.mxu0  ;;  %v7670_v48 = vld [vmem:[%s9720_s1 + $0xfd0] sm:$0xff]  }
 0x1c2   :  { %7101 = vmatprep.subr.bf16.mxu1 %v7618_v49  ;;  %v9402_v49 = vpop.f32.mrf.mxu1 }
 0x1c3   :  { %5603 = vmatmul.mubr.bf16.vlgmr.msra.gmra.mxu0 %v5939_v44  ;;  %v7667_v44 = vld [vmem:[%s9720_s1 + $0xf18] sm:$0xff]   ;;  %v9391_v45 = vpop.f32.mrf.mxu0 }
 0x1c4   :  { %5644 = vmatmul.mubr.bf16.vlgmr.msra.gmra.mxu1 %v5941_v46  ;;  %7080 = vmatpush3.bf16.msra.mxu0 %v7619_v50  ;;  %v7668_v46 = vld [vmem:[%s9720_s1 + $0xf98] sm:$0xff]   ;;  %v7671_v50 = vld [vmem:[%s9720_s1 + $0xf10] sm:$0xff]  }
 0x1c5   :  { %7102 = vmatpush3.bf16.msra.mxu1 %v7620_v51  ;;  %7081 = vmatprep.subr.bf16.mxu0 %v7621_v52  ;;  %v9407_v51 = vpop.f32.mrf.mxu0  ;;  %v7672_v52 = vld [vmem:[%s9720_s1 + $0xf90] sm:$0xff]  }
 0x1c6   :  { %7103 = vmatprep.subr.bf16.mxu1 %v7622_v53  ;;  %5684 = vmatprep.mubr.bf16.mxu0 %v5944_v20  ;;  %v7673_v53 = vld [vmem:[%s9720_s1 + $0xf48] sm:$0xff]  }
 0x1c7   :  { %5725 = vmatprep.mubr.bf16.mxu1 %v5946_v23 }
 0x1c8   :  { %7082 = vmatpush3.bf16.msra.mxu0 %v7623_v54  ;;  %v7674_v54 = vld [vmem:[%s9720_s1 + $0xfc8] sm:$0xff]  }
 0x1c9   :  { %7104 = vmatpush3.bf16.msra.mxu1 %v7624_v55  ;;  %7083 = vmatprep.subr.bf16.mxu0 %v7625_v56  ;;  %v9418_v55 = vpop.f32.mrf.mxu1  ;;  %v7675_v56 = vld [vmem:[%s9720_s1 + $0xf08] sm:$0xff]  }
 0x1ca   :  { %7105 = vmatprep.subr.bf16.mxu1 %v7626_v57  ;;  %v9423_v57 = vpop.f32.mrf.mxu0 }
 0x1cc   :  { %7084 = vmatpush3.bf16.msra.mxu0 %v7627_v58  ;;  %v7676_v58 = vld [vmem:[%s9720_s1 + $0xf88] sm:$0xff]  }
 0x1cd   :  { %7106 = vmatpush3.bf16.msra.mxu1 %v7628_v59  ;;  %7085 = vmatprep.subr.bf16.mxu0 %v7629_v60  ;;  %v7677_v59 = vld [vmem:[%s9720_s1 + $0xf40] sm:$0xff]   ;;  %v9431_v60 = vpop.f32.mrf.mxu0 }
 0x1ce   :  { %7107 = vmatprep.subr.bf16.mxu1 %v7630_v61  ;;  %v7678_v61 = vld [vmem:[%s9720_s1 + $0xfc0] sm:$0xff]  }
 0x1d0   :  { %7086 = vmatpush3.bf16.msra.mxu0 %v7631_v62  ;;  %v9436_v62 = vpop.f32.mrf.mxu1 }
 0x1d1   :  { %7108 = vmatpush3.bf16.msra.mxu1 %v7632_v63  ;;  %7087 = vmatprep.subr.bf16.mxu0 %v7633_v0  ;;  %v7679_v63 = vld [vmem:[%s9720_s1 + $0xf00] sm:$0xff]  }
 0x1d2   :  { %7109 = vmatprep.subr.bf16.mxu1 %v7634_v1  ;;  %v7680_v0 = vld [vmem:[%s9720_s1 + $0xf80] sm:$0xff]   ;;  %v47_v1 = vld [vmem:[%s9721_s0 + $0xf0] sm:$0xff] }
 0x1d4   :  { %7088 = vmatpush3.bf16.msra.mxu0 %v7635_v2  ;;  %v79_v2 = vld [vmem:[%s9721_s0 + $0x1f0] sm:$0xff] }
 0x1d5   :  { %7110 = vmatpush3.bf16.msra.mxu1 %v7636_v3  ;;  %7089 = vmatprep.subr.bf16.mxu0 %v7637_v4  ;;  %v9450_v3 = vpop.f32.mrf.mxu1  ;;  %v5947_v4 = vcombine.low %v47_v1, %v79_v2 }
 0x1d6   :  { %7111 = vmatprep.subr.bf16.mxu1 %v7638_v5  ;;  %v5948_v5 = vcombine.high %v47_v1, %v79_v2 }
 0x1d8   :  { %7090 = vmatpush3.bf16.msra.mxu0 %v7639_v6  ;;  %v48_v6 = vld [vmem:[%s9721_s0 + $0xf8] sm:$0xff] }
 0x1d9   :  { %7112 = vmatpush3.bf16.msra.mxu1 %v7640_v7  ;;  %7091 = vmatprep.subr.bf16.mxu0 %v7641_v8  ;;  %v80_v7 = vld [vmem:[%s9721_s0 + $0x1f8] sm:$0xff]  ;;  %v9458_v8 = vpop.f32.mrf.mxu0 }
 0x1da   :  { %7113 = vmatprep.subr.bf16.mxu1 %v7642_v9  ;;  %v5949_v9 = vcombine.low %v48_v6, %v80_v7 }
 0x1dc   :  { %7092 = vmatpush3.bf16.msra.mxu0 %v7643_v10  ;;  %v5950_v10 = vcombine.high %v48_v6, %v80_v7 }
 0x1dd   :  { %7114 = vmatpush3.bf16.msra.mxu1 %v7644_v11  ;;  %7093 = vmatprep.subr.bf16.mxu0 %v7645_v12  ;;  %v9460_v11 = vpop.f32.mrf.mxu1  ;;  %v9462_v12 = vpop.f32.mrf.mxu0 }
 0x1de   :  { %7115 = vmatprep.subr.bf16.mxu1 %v7646_v13 }
 0x1df   :  { %v9464_v13 = vpop.f32.mrf.mxu1 }
 0x1e0   :  { %7094 = vmatpush3.bf16.msra.mxu0 %v7647_v14  ;;  %v9466_v14 = vpop.f32.mrf.mxu0 }
 0x1e1   :  { %7116 = vmatpush3.bf16.msra.mxu1 %v7648_v15  ;;  %7123 = vmatprep.subr.bf16.mxu0 %v7649_v24  ;;  %v9470_v16 = vpop.f32.mrf.mxu1 }
 0x1e2   :  { %7145 = vmatprep.subr.bf16.mxu1 %v7650_v25  ;;  %v9468_v15 = vpop.f32.mrf.mxu0 }
 0x1e3   :  { %5685 = vmatmul.mubr.bf16.vlgmr.msra.gmra.mxu0 %v5943_v19  ;;  %v9472_v17 = vpop.f32.mrf.mxu1 }
 0x1e4   :  { %5726 = vmatmul.mubr.bf16.vlgmr.msra.gmra.mxu1 %v5945_v22  ;;  %7124 = vmatpush3.bf16.msra.mxu0 %v7651_v26  ;;  %v9474_v18 = vpop.f32.mrf.mxu0 }
 0x1e5   :  { %7146 = vmatpush3.bf16.msra.mxu1 %v7652_v27  ;;  %7125 = vmatprep.subr.bf16.mxu0 %v7653_v28  ;;  %v9476_v19 = vpop.f32.mrf.mxu1 }
 0x1e6   :  { %7147 = vmatprep.subr.bf16.mxu1 %v7654_v29  ;;  %5766 = vmatprep.mubr.bf16.mxu0 %v5948_v5  ;;  %v9478_v20 = vpop.f32.mrf.mxu0 }
 0x1e7   :  { %5807 = vmatprep.mubr.bf16.mxu1 %v5950_v10  ;;  %v9480_v21 = vpop.f32.mrf.mxu1 }
 0x1e8   :  { %7126 = vmatpush3.bf16.msra.mxu0 %v7655_v30  ;;  %v9482_v22 = vpop.f32.mrf.mxu0 }
 0x1e9   :  { %7148 = vmatpush3.bf16.msra.mxu1 %v7656_v31  ;;  %7127 = vmatprep.subr.bf16.mxu0 %v7657_v32  ;;  %v9486_v24 = vpop.f32.mrf.mxu1 }
 0x1ea   :  { %7149 = vmatprep.subr.bf16.mxu1 %v7658_v33  ;;  %v9484_v23 = vpop.f32.mrf.mxu0 }
 0x1eb   :  { %v9488_v25 = vpop.f32.mrf.mxu1 }
 0x1ec   :  { %7128 = vmatpush3.bf16.msra.mxu0 %v7659_v34  ;;  %v9490_v26 = vpop.f32.mrf.mxu0 }
 0x1ed   :  { %7150 = vmatpush3.bf16.msra.mxu1 %v7660_v35  ;;  %7129 = vmatprep.subr.bf16.mxu0 %v7661_v36  ;;  %v9492_v27 = vpop.f32.mrf.mxu1 }
 0x1ee   :  { %7151 = vmatprep.subr.bf16.mxu1 %v7662_v37  ;;  %v9494_v28 = vpop.f32.mrf.mxu0 }
 0x1ef   :  { %v9496_v29 = vpop.f32.mrf.mxu1 }
 0x1f0   :  { %7130 = vmatpush3.bf16.msra.mxu0 %v7663_v38  ;;  %v9498_v30 = vpop.f32.mrf.mxu0 }
 0x1f1   :  { %7152 = vmatpush3.bf16.msra.mxu1 %v7664_v40  ;;  %7131 = vmatprep.subr.bf16.mxu0 %v7665_v41  ;;  %v9502_v32 = vpop.f32.mrf.mxu1 }
 0x1f2   :  { %7153 = vmatprep.subr.bf16.mxu1 %v7666_v42  ;;  %v9500_v31 = vpop.f32.mrf.mxu0 }
 0x1f3   :  { %v9504_v33 = vpop.f32.mrf.mxu1 }
 0x1f4   :  { %7132 = vmatpush3.bf16.msra.mxu0 %v7667_v44  ;;  %v9506_v34 = vpop.f32.mrf.mxu0 }
 0x1f5   :  { %7154 = vmatpush3.bf16.msra.mxu1 %v7668_v46  ;;  %7133 = vmatprep.subr.bf16.mxu0 %v7669_v47  ;;  %v9508_v35 = vpop.f32.mrf.mxu1 }
 0x1f6   :  { %7155 = vmatprep.subr.bf16.mxu1 %v7670_v48  ;;  %v9510_v36 = vpop.f32.mrf.mxu0 }
 0x1f7   :  { %v9512_v37 = vpop.f32.mrf.mxu1 }
 0x1f8   :  { %7134 = vmatpush3.bf16.msra.mxu0 %v7671_v50  ;;  %v9514_v38 = vpop.f32.mrf.mxu0 }
 0x1f9   :  { %7156 = vmatpush3.bf16.msra.mxu1 %v7672_v52  ;;  %7135 = vmatprep.subr.bf16.mxu0 %v7673_v53  ;;  %v9518_v41 = vpop.f32.mrf.mxu1 }
 0x1fa   :  { %7157 = vmatprep.subr.bf16.mxu1 %v7674_v54  ;;  %v9516_v40 = vpop.f32.mrf.mxu0 }
 0x1fb   :  { %v9520_v42 = vpop.f32.mrf.mxu1 }
 0x1fc   :  { %7136 = vmatpush3.bf16.msra.mxu0 %v7675_v56  ;;  %v9522_v44 = vpop.f32.mrf.mxu0 }
 0x1fd   :  { %7158 = vmatpush3.bf16.msra.mxu1 %v7676_v58  ;;  %7137 = vmatprep.subr.bf16.mxu0 %v7677_v59  ;;  %v9524_v46 = vpop.f32.mrf.mxu1 }
 0x1fe   :  { %7159 = vmatprep.subr.bf16.mxu1 %v7678_v61  ;;  %v9526_v47 = vpop.f32.mrf.mxu0 }
 0x1ff   :  { %v9528_v48 = vpop.f32.mrf.mxu1 }
 0x200   :  { %7138 = vmatpush3.bf16.msra.mxu0 %v7679_v63  ;;  %v9530_v50 = vpop.f32.mrf.mxu0 }
 0x201   :  { %7160 = vmatpush3.bf16.msra.mxu1 %v7680_v0  ;;  %v9534_v53 = vpop.f32.mrf.mxu1 }
 0x202   :  { %v9532_v52 = vpop.f32.mrf.mxu0 }
 0x203   :  { %5767 = vmatmul.mubr.bf16.vlgmr.msra.gmra.mxu0 %v5947_v4  ;;  %v9536_v54 = vpop.f32.mrf.mxu1 }
 0x204   :  { %5808 = vmatmul.mubr.bf16.vlgmr.msra.gmra.mxu1 %v5949_v9  ;;  %v9538_v56 = vpop.f32.mrf.mxu0 }
 0x205   :  { %v9540_v58 = vpop.f32.mrf.mxu1 }
 0x206   :  { %v9542_v59 = vpop.f32.mrf.mxu0 }
 0x207   :  { %v9544_v61 = vpop.f32.mrf.mxu1 }
 0x208   :  { %9725 = vst [vmem:[#allocation2_spill] sm:$0xff] %v9544_v61  ;;  %v9546_v63 = vpop.f32.mrf.mxu0 }
 0x209   :  { %9726 = vst [vmem:[#allocation3_spill] sm:$0xff] %v9546_v63  ;;  %v9550_v1 = vpop.f32.mrf.mxu1 }
 0x20a   :  { %v9548_v0 = vpop.f32.mrf.mxu0  ;;  %9728 = vst [vmem:[#allocation5_spill] sm:$0xff] %v9550_v1 }
 0x20b   :  { %9727 = vst [vmem:[#allocation4_spill] sm:$0xff] %v9548_v0  ;;  %v9552_v2 = vpop.f32.mrf.mxu1 }
 0x20c   :  { %9729 = vst [vmem:[#allocation6_spill] sm:$0xff] %v9552_v2  ;;  %v9554_v4 = vpop.f32.mrf.mxu0 }
 0x20d   :  { %v9556_v5 = vpop.f32.mrf.mxu1 }
 0x20e   :  { %9730 = vst [vmem:[#allocation7_spill] sm:$0xff] %v9556_v5  ;;  %v9558_v6 = vpop.f32.mrf.mxu0  ;;  %v6481_v5 = vadd.f32 %v9391_v45, %v9375_v39  ;;  %v6525_v39 = vadd.f32 %v9458_v8, %v9431_v60  ;;  %v6569_v8 = vadd.f32 %v9474_v18, %v9468_v15  ;;  %v6613_v15 = vadd.f32 %v9490_v26, %v9484_v23 }
 0x20f   :  { %9731 = vst [vmem:[#allocation8_spill] sm:$0xff] %v9558_v6  ;;  %v9560_v7 = vpop.f32.mrf.mxu1  ;;  %v6657_v23 = vadd.f32 %v9506_v34, %v9500_v31  ;;  %v6701_v34 = vadd.f32 %v9522_v44, %v9516_v40  ;;  %v6745_v44 = vadd.f32 %v9538_v56, %v9532_v52 }
 0x210   :  { %9732 = vst [vmem:[#allocation9_spill] sm:$0xff] %v9560_v7  ;;  %v9562_v9 = vpop.f32.mrf.mxu0  ;;  %v5886_v7 = vld [vmem:[%s9722_s2] ss:$0 sm:$0xff] }
 0x211   :  { %9733 = vst [vmem:[#allocation10_spill] sm:$0xff] %v9562_v9  ;;  %v9566_v61 = vpop.f32.mrf.mxu1 }
 0x212   :  { %v9564_v10 = vpop.f32.mrf.mxu0  ;;  %9735 = vst [vmem:[#allocation12_spill] sm:$0xff] %v9566_v61 }
 0x213   :  { %9734 = vst [vmem:[#allocation11_spill] sm:$0xff] %v9564_v10  ;;  %v9568_v63 = vpop.f32.mrf.mxu1 }
 0x214   :  { %9736 = vst [vmem:[#allocation13_spill] sm:$0xff] %v9568_v63  ;;  %v9570_v0 = vpop.f32.mrf.mxu0  ;;  %v4539_v63 = vadd.f32 %v6481_v5, %v5886_v7  ;;  %v6506_v5 = vadd.f32 %v9436_v62, %v9418_v55  ;;  %v6550_v62 = vadd.f32 %v9470_v16, %v9464_v13  ;;  %v6594_v16 = vadd.f32 %v9486_v24, %v9480_v21 }
 0x215   :  { %9737 = vst [vmem:[#allocation14_spill] sm:$0xff] %v9570_v0  ;;  %v9572_v1 = vpop.f32.mrf.mxu1  ;;  %v6503_v0 = vadd.f32 %v9402_v49, %v9386_v43  ;;  %v6547_v43 = vadd.f32 %v9460_v11, %v9450_v3  ;;  %v6528_v49 = vadd.f32 %v9466_v14, %v9462_v12  ;;  %v6591_v11 = vadd.f32 %v9476_v19, %v9472_v17 }
 0x216   :  { %9738 = vst [vmem:[#allocation15_spill] sm:$0xff] %v9572_v1  ;;  %v9574_v2 = vpop.f32.mrf.mxu0  ;;  %v6572_v12 = vadd.f32 %v9482_v22, %v9478_v20  ;;  %v6635_v19 = vadd.f32 %v9492_v27, %v9488_v25  ;;  %v6616_v20 = vadd.f32 %v9498_v30, %v9494_v28  ;;  %v6638_v21 = vadd.f32 %v9502_v32, %v9496_v29 }
 0x217   :  { %9739 = vst [vmem:[#allocation16_spill] sm:$0xff] %v9574_v2  ;;  %v9578_v6 = vpop.f32.mrf.mxu1  ;;  %v6484_v2 = vadd.f32 %v9423_v57, %v9407_v51  ;;  %v4580_v9 = vadd.f32 %v6503_v0, %v4539_v63  ;;  %v6679_v25 = vadd.f32 %v9508_v35, %v9504_v33  ;;  %v6660_v27 = vadd.f32 %v9514_v38, %v9510_v36 }
 0x218   :  { %9740 = vst [vmem:[#allocation17_spill] sm:$0xff] %v9578_v6  ;;  %v9583_v10 = vpop.f32.mrf.mxu0  ;;  %v6682_v32 = vadd.f32 %v9518_v41, %v9512_v37  ;;  %v6723_v35 = vadd.f32 %v9524_v46, %v9520_v42  ;;  %v6704_v36 = vadd.f32 %v9530_v50, %v9526_v47  ;;  %v6726_v37 = vadd.f32 %v9534_v53, %v9528_v48  ;;  %v9743_v46 = vld [vmem:[#allocation3_spill] sm:$0xff]  ;;  %v9747_v53 = vld [vmem:[#allocation6_spill] sm:$0xff] }
 0x219   :  { %9741 = vst [vmem:[#allocation18_spill] sm:$0xff] %v9583_v10  ;;  %v9591_v1 = vpop.f32.mrf.mxu1  ;;  %v4542_v10 = vadd.f32 %v6484_v2, %v5886_v7  ;;  %v6767_v42 = vadd.f32 %v9540_v58, %v9536_v54  ;;  %v6748_v47 = vadd.f32 %v9743_v46, %v9542_v59  ;;  %v9749_v54 = vld [vmem:[#allocation8_spill] sm:$0xff]  ;;  %v9750_v58 = vld [vmem:[#allocation10_spill] sm:$0xff] }
 0x21a   :  { %v9585_v61 = vpop.f32.mrf.mxu0 }
 0x21b   :  { %9742 = vst [vmem:[#allocation19_spill] sm:$0xff] %v9585_v61  ;;  %v9595_v45 = vpop.f32.mrf.mxu1  ;;  %v4621_v61 = vadd.f32 %v6525_v39, %v4580_v9  ;;  %v4583_v60 = vadd.f32 %v6506_v5, %v4542_v10 }
 0x21c   :  { %v9597_v6 = vpop.f32.mrf.mxu0 }
 0x21d   :  { %v9605_v51 = vpop.f32.mrf.mxu1  ;;  %v4662_v63 = vadd.f32 %v6547_v43, %v4621_v61  ;;  %v4624_v0 = vadd.f32 %v6528_v49, %v4583_v60 }
 0x21e   :  { %v9607_v57 = vpop.f32.mrf.mxu0 }
 0x21f   :  { %v9611_v2 = vpop.f32.mrf.mxu1  ;;  %v4703_v3 = vadd.f32 %v6569_v8, %v4662_v63  ;;  %v4665_v7 = vadd.f32 %v6550_v62, %v4624_v0 }
 0x220   :  { %v9613_v55 = vpop.f32.mrf.mxu0 }
 0x221   :  { %v9625_v18 = vpop.f32.mrf.mxu1  ;;  %v4744_v61 = vadd.f32 %v6591_v11, %v4703_v3  ;;  %v4706_v9 = vadd.f32 %v6572_v12, %v4665_v7  ;;  %v9744_v12 = vld [vmem:[#allocation4_spill] sm:$0xff] }
 0x222   :  { %v6789_v7 = vadd.f32 %v9554_v4, %v9744_v12 }
 0x223   :  { %v9621_v14 = vpop.f32.mrf.mxu0  ;;  %v4785_v17 = vadd.f32 %v6613_v15, %v4744_v61  ;;  %v4747_v22 = vadd.f32 %v6594_v16, %v4706_v9  ;;  %v9745_v16 = vld [vmem:[#allocation2_spill] sm:$0xff] }
 0x224   :  { %v9627_v10 = vpop.f32.mrf.mxu1 }
 0x225   :  { %v9629_v13 = vpop.f32.mrf.mxu0  ;;  %v4826_v5 = vadd.f32 %v6635_v19, %v4785_v17  ;;  %v4788_v43 = vadd.f32 %v6616_v20, %v4747_v22  ;;  %v9746_v17 = vld [vmem:[#allocation5_spill] sm:$0xff]  ;;  %v9748_v20 = vld [vmem:[#allocation7_spill] sm:$0xff] }
 0x226   :  { %v9639_v26 = vpop.f32.mrf.mxu1  ;;  %v6770_v19 = vadd.f32 %v9746_v17, %v9745_v16  ;;  %v6811_v22 = vadd.f32 %v9748_v20, %v9747_v53  ;;  %v6899_v17 = vadd.f32 %v9605_v51, %v9595_v45  ;;  %v6921_v20 = vadd.f32 %v9629_v13, %v9621_v14 }
 0x227   :  { %v9641_v39 = vpop.f32.mrf.mxu0  ;;  %v4867_v24 = vadd.f32 %v6657_v23, %v4826_v5  ;;  %v4829_v31 = vadd.f32 %v6638_v21, %v4788_v43  ;;  %v6792_v23 = vadd.f32 %v9750_v58, %v9749_v54  ;;  %v9751_v43 = vld [vmem:[#allocation11_spill] sm:$0xff]  ;;  %v9752_v21 = vld [vmem:[#allocation14_spill] sm:$0xff]  ;;  %v6943_v45 = vadd.f32 %v9639_v26, %v9627_v10 }
 0x228   :  { %v9649_v28 = vpop.f32.mrf.mxu1  ;;  %v6833_v4 = vadd.f32 %v9752_v21, %v9751_v43 }
 0x229   :  { %v9651_v30 = vpop.f32.mrf.mxu0  ;;  %v4908_v60 = vadd.f32 %v6679_v25, %v4867_v24  ;;  %v4870_v8 = vadd.f32 %v6660_v27, %v4829_v31 }
 0x22a   :  { %v9657_v29 = vpop.f32.mrf.mxu1  ;;  %v6924_v51 = vadd.f32 %v9651_v30, %v9641_v39 }
 0x22b   :  { %v4949_v33 = vadd.f32 %v6701_v34, %v4908_v60  ;;  %v4911_v40 = vadd.f32 %v6682_v32, %v4870_v8  ;;  %v9753_v34 = vld [vmem:[#allocation9_spill] sm:$0xff]  ;;  %v9754_v60 = vld [vmem:[#allocation12_spill] sm:$0xff] }
 0x22c   :  { %v6814_v8 = vadd.f32 %v9754_v60, %v9753_v34 }
 0x22d   :  { %v4990_v0 = vadd.f32 %v6723_v35, %v4949_v33  ;;  %v4952_v62 = vadd.f32 %v6704_v36, %v4911_v40  ;;  %v9755_v33 = vld [vmem:[#allocation13_spill] sm:$0xff]  ;;  %v9756_v35 = vld [vmem:[#allocation15_spill] sm:$0xff]  ;;  %v9757_v40 = vld [vmem:[#allocation16_spill] sm:$0xff] }
 0x22e   :  { %v6855_v36 = vadd.f32 %v9756_v35, %v9755_v33 }
 0x22f   :  { %v5031_v41 = vadd.f32 %v6745_v44, %v4990_v0  ;;  %v4993_v50 = vadd.f32 %v6726_v37, %v4952_v62  ;;  %v9758_v44 = vld [vmem:[#allocation18_spill] sm:$0xff] }
 0x230   :  { %v6836_v0 = vadd.f32 %v9758_v44, %v9757_v40 }
 0x231   :  { %v5072_v56 = vadd.f32 %v6767_v42, %v5031_v41  ;;  %v5034_v61 = vadd.f32 %v6748_v47, %v4993_v50  ;;  %v9759_v42 = vld [vmem:[#allocation19_spill] sm:$0xff] }
 0x232   :  { %v6877_v46 = vadd.f32 %v9597_v6, %v9759_v42 }
 0x233   :  { %v5113_v48 = vadd.f32 %v6789_v7, %v5072_v56  ;;  %v5075_v5 = vadd.f32 %v6770_v19, %v5034_v61  ;;  %v9760_v56 = vld [vmem:[#allocation17_spill] sm:$0xff]  ;;  %v6880_v19 = vadd.f32 %v9613_v55, %v9607_v57 }
 0x234   :  { %v6858_v61 = vadd.f32 %v9591_v1, %v9760_v56  ;;  %v6902_v1 = vadd.f32 %v9625_v18, %v9611_v2 }
 0x235   :  { %v5154_v27 = vadd.f32 %v6811_v22, %v5113_v48  ;;  %v5116_v31 = vadd.f32 %v6792_v23, %v5075_v5 }
 0x237   :  { %v5195_v32 = vadd.f32 %v6833_v4, %v5154_v27  ;;  %v5157_v41 = vadd.f32 %v6814_v8, %v5116_v31  ;;  %v6946_v4 = vadd.f32 %v9657_v29, %v9649_v28 }
 0x239   :  { %v5236_v47 = vadd.f32 %v6855_v36, %v5195_v32  ;;  %v5198_v50 = vadd.f32 %v6836_v0, %v5157_v41 }
 0x23b   :  { %v5277_v16 = vadd.f32 %v6877_v46, %v5236_v47  ;;  %v5239_v53 = vadd.f32 %v6858_v61, %v5198_v50 }
 0x23d   :  { %v5318_v22 = vadd.f32 %v6899_v17, %v5277_v16  ;;  %v5280_v54 = vadd.f32 %v6880_v19, %v5239_v53 }
 0x23f   :  { %v5359_v5 = vadd.f32 %v6921_v20, %v5318_v22  ;;  %v5321_v57 = vadd.f32 %v6902_v1, %v5280_v54 }
 0x241   :  { %v5400_v13 = vadd.f32 %v6943_v45, %v5359_v5  ;;  %v5362_v21 = vadd.f32 %v6924_v51, %v5321_v57 }
 0x243   :  { %v9655_v49 = vpop.f32.mrf.mxu0  ;;  %v5403_v10 = vadd.f32 %v6946_v4, %v5362_v21 }
 0x244   :  { %v9665_v38 = vpop.f32.mrf.mxu1 }
 0x245   :  { %v6964_v63 = vpop.f32.mrf.mxu0 }
 0x246   :  { %v6986_v3 = vpop.f32.mrf.mxu1  ;;  %v6965_v55 = vadd.f32 %v6964_v63, %v9655_v49 }
 0x247   :  { %v6966_v11 = vpop.f32.mrf.mxu0  ;;  %v6987_v2 = vadd.f32 %v6986_v3, %v9665_v38 }
 0x248   :  { %v6988_v15 = vpop.f32.mrf.mxu1  ;;  %v5441_v27 = vadd.f32 %v6965_v55, %v5400_v13 }
 0x249   :  { %v6967_v52 = vpop.f32.mrf.mxu0 }
 0x24a   :  { %v6989_v59 = vpop.f32.mrf.mxu1  ;;  %v6968_v18 = vadd.f32 %v6967_v52, %v6966_v11  ;;  %v5482_v39 = vadd.f32 %v6987_v2, %v5441_v27  ;;  %v5825_v2 = vlaneseq }
 0x24b   :  { %v6990_v49 = vadd.f32 %v6989_v59, %v6988_v15 }
 0x24c   :  { %v5444_v30 = vadd.f32 %v6968_v18, %v5403_v10  ;;  %v5826_v10 = vand.u32 127, %v5825_v2 }
 0x24e   :  { %v5485_v40 = vadd.f32 %v6990_v49, %v5444_v30  ;;  %vm5829_vm1 = vcmp.lt.s32.totalorder %v5826_v10, 1 }
 0x263   :  { %v7007_v9 = vpop.f32.mrf.mxu0 }
 0x264   :  { %v7029_v24 = vpop.f32.mrf.mxu1 }
 0x265   :  { %v7008_v25 = vpop.f32.mrf.mxu0 }
 0x266   :  { %v7030_v62 = vpop.f32.mrf.mxu1  ;;  %v7009_v26 = vadd.f32 %v7008_v25, %v7007_v9 }
 0x267   :  { %v7010_v37 = vpop.f32.mrf.mxu0  ;;  %v7031_v32 = vadd.f32 %v7030_v62, %v7029_v24 }
 0x268   :  { %v7032_v12 = vpop.f32.mrf.mxu1  ;;  %v5523_v63 = vadd.f32 %v7009_v26, %v5482_v39 }
 0x269   :  { %v7011_v7 = vpop.f32.mrf.mxu0 }
 0x26a   :  { %v7033_v6 = vpop.f32.mrf.mxu1  ;;  %v7012_v33 = vadd.f32 %v7011_v7, %v7010_v37  ;;  %v5564_v29 = vadd.f32 %v7031_v32, %v5523_v63 }
 0x26b   :  { %v7034_v11 = vadd.f32 %v7033_v6, %v7032_v12 }
 0x26c   :  { %v5526_v44 = vadd.f32 %v7012_v33, %v5485_v40 }
 0x26e   :  { %v5567_v25 = vadd.f32 %v7034_v11, %v5526_v44 }
 0x283   :  { %v7051_v48 = vpop.f32.mrf.mxu0 }
 0x284   :  { %v7073_v58 = vpop.f32.mrf.mxu1 }
 0x285   :  { %v7052_v23 = vpop.f32.mrf.mxu0 }
 0x286   :  { %v7074_v43 = vpop.f32.mrf.mxu1  ;;  %v7053_v28 = vadd.f32 %v7052_v23, %v7051_v48 }
 0x287   :  { %v7054_v14 = vpop.f32.mrf.mxu0  ;;  %v7075_v0 = vadd.f32 %v7074_v43, %v7073_v58 }
 0x288   :  { %v7076_v31 = vpop.f32.mrf.mxu1  ;;  %v5605_v52 = vadd.f32 %v7053_v28, %v5564_v29 }
 0x289   :  { %v7055_v34 = vpop.f32.mrf.mxu0 }
 0x28a   :  { %v7077_v8 = vpop.f32.mrf.mxu1  ;;  %v7056_v9 = vadd.f32 %v7055_v34, %v7054_v14  ;;  %v5646_v15 = vadd.f32 %v7075_v0, %v5605_v52 }
 0x28b   :  { %v7078_v24 = vadd.f32 %v7077_v8, %v7076_v31 }
 0x28c   :  { %v5608_v59 = vadd.f32 %v7056_v9, %v5567_v25 }
 0x28e   :  { %v5649_v56 = vadd.f32 %v7078_v24, %v5608_v59 }
 0x2a3   :  { %v7095_v60 = vpop.f32.mrf.mxu0 }
 0x2a4   :  { %v7117_v35 = vpop.f32.mrf.mxu1 }
 0x2a5   :  { %v7096_v36 = vpop.f32.mrf.mxu0 }
 0x2a6   :  { %v7118_v38 = vpop.f32.mrf.mxu1  ;;  %v7097_v41 = vadd.f32 %v7096_v36, %v7095_v60 }
 0x2a7   :  { %v7098_v3 = vpop.f32.mrf.mxu0  ;;  %v7119_v37 = vadd.f32 %v7118_v38, %v7117_v35 }
 0x2a8   :  { %v7120_v42 = vpop.f32.mrf.mxu1  ;;  %v5687_v62 = vadd.f32 %v7097_v41, %v5646_v15 }
 0x2a9   :  { %v7099_v46 = vpop.f32.mrf.mxu0 }
 0x2aa   :  { %v7100_v47 = vadd.f32 %v7099_v46, %v7098_v3  ;;  %v7121_v50 = vpop.f32.mrf.mxu1  ;;  %v5728_v17 = vadd.f32 %v7119_v37, %v5687_v62 }
 0x2ab   :  { %v7122_v20 = vadd.f32 %v7121_v50, %v7120_v42 }
 0x2ac   :  { %v5690_v12 = vadd.f32 %v7100_v47, %v5649_v56 }
 0x2ae   :  { %v5731_v23 = vadd.f32 %v7122_v20, %v5690_v12 }
 0x2c3   :  { %v7139_v7 = vpop.f32.mrf.mxu0 }
 0x2c4   :  { %v7161_v61 = vpop.f32.mrf.mxu1 }
 0x2c5   :  { %v7140_v16 = vpop.f32.mrf.mxu0 }
 0x2c6   :  { %v7141_v19 = vadd.f32 %v7140_v16, %v7139_v7  ;;  %v7162_v48 = vpop.f32.mrf.mxu1 }
 0x2c7   :  { %v7142_v53 = vpop.f32.mrf.mxu0  ;;  %v7163_v22 = vadd.f32 %v7162_v48, %v7161_v61 }
 0x2c8   :  { %v5769_v6 = vadd.f32 %v7141_v19, %v5728_v17  ;;  %v7164_v54 = vpop.f32.mrf.mxu1 }
 0x2c9   :  { %v7143_v58 = vpop.f32.mrf.mxu0 }
 0x2ca   :  { %v5810_v1 = vadd.f32 %v7163_v22, %v5769_v6  ;;  %v7144_v5 = vadd.f32 %v7143_v58, %v7142_v53  ;;  %v7165_v45 = vpop.f32.mrf.mxu1 }
 0x2cb   :  { %v7166_v55 = vadd.f32 %v7165_v45, %v7164_v54 }
 0x2cc   :  { %v5836_v51 = vand.u32 2147483647, %v5810_v1  ;;  %v5772_v57 = vadd.f32 %v7144_v5, %v5731_v23  ;;  %5816 = vst [vmem:[%s9723_s3] sm:$0xff] %v5810_v1  ;;  %v5832_v31 = vmax.f32 %v5810_v1, 0.0 }
 0x2ce   :  { %v5838_v43 = vsub.f32 0.0, %v5836_v51  ;;  %v5813_v14 = vadd.f32 %v7166_v55, %v5772_v57  ;;  %v5834_v30 = vsub.f32 %v5832_v31, %v5810_v1 }
 0x2d0   :  { %v5840_v13 = vmul.f32 1.442695, %v5838_v43  ;;  %5817 = vst [vmem:[%s9723_s3 + $0x8] sm:$0xff] %v5813_v14 }
 0x2d2   :  { %7681 = vpow2.f32 %v5840_v13 }
 0x2df   :  { %v7682_v21 = vpop.eup %7681 }
 0x2e0   :  { %v5844_v4 = vadd.f32 1.0, %v7682_v21  ;;  %v5847_v27 = vmul.f32 -0.5, %v7682_v21  ;;  %v5850_v34 = vand.u32 2147483647, %v7682_v21 }
 0x2e2   :  { %7683 = vlog2.f32 %v5844_v4  ;;  %v5848_v18 = vadd.f32 1.0, %v5847_v27  ;;  %vm5851_vm0 = vcmp.lt.f32.partialorder %v5850_v34, 0.0004427343 }
 0x2e4   :  { %v5849_v39 = vmul.f32 %v7682_v21, %v5848_v18 }
 0x2ef   :  { %v7684_v26 = vpop.eup %7683 }
 0x2f0   :  { %v5846_v60 = vmul.f32 0.6931472, %v7684_v26 }
 0x2f2   :  { %v5852_v8 = vsel %vm5851_vm0, %v5849_v39, %v5846_v60 }
 0x2f3   :  { %v5862_v49 = vadd.f32 %v5852_v8, %v5834_v30 }
 0x2f5   :  { %v5864_v63 = vsel %vm5829_vm1, %v5862_v49, 0.0 }
 0x2f6   :  { %5867 = vadd.xlane.f32.xlu0 %v5864_v63 }
 0x37f   :  { %v5868_v32 = vpop.xlane.xlu0 %5867 }
 0x380   :  { %v5869_v33 = vrot.slane %v5868_v32, 4 }
 0x382   :  { %v5870_v35 = vadd.f32 %v5869_v33, %v5868_v32 }
 0x384   :  { %v5871_v36 = vrot.slane %v5870_v35, 2 }
 0x386   :  { %v5872_v40 = vadd.f32 %v5871_v36, %v5870_v35 }
 0x388   :  { %v5873_v28 = vrot.slane %v5872_v40, 1 }
 0x38a   :  { %v5874_v29 = vadd.f32 %v5873_v28, %v5872_v40 }
 0x38c   :  { %7167 = vpush %v5874_v29 }
 0x3bd   :  { %s7168_s3 = spop %7167 }
 0x3be   :  { %v5876_v44 = vstv %s7168_s3 }
 0x3bf   :  { %5877 = vst [vmem:[%s9724_s4] sm:$0x1] %v5876_v44 }

</bundles_post_ra>
